<compile_context>
chip_gen: v5e
topology: v5e:2x2
jax: 0.10.0
libtpu: 0.0.40
codegen_flags: <defaults>
</compile_context>

<pallas_src>
import functools

import jax
import jax.numpy as jnp
from jax import lax
from jax.experimental import pallas as pl
from jax.experimental.pallas import tpu as pltpu

LRELU_SLOPE = 0.1

DEFAULT_MAX_TILE = 1024              # (TILE, C<=512) blocks stay well inside v7x's 64 MiB VMEM
VMEM_LIMIT_BYTES = 32 * 1024 * 1024  # explicit scoped-VMEM budget, safe on v5e/v6e/v7x


def _cdiv(a, b):
    return -(-a // b)


def _pick_tile(t_out, t_in, max_tile):
    """Pick a T tile size. Block dims are either 8-aligned or equal to the full dim."""
    if t_out <= max_tile and (t_out == t_in or (t_out % 8 == 0 and t_out <= t_in)):
        return t_out
    tile = min(max_tile, (min(t_out, t_in) // 8) * 8)
    assert tile >= 8, "sequence too short for the tiled conv path"
    return tile


# ----------------------------------------------------------------------------
# Fused Pallas conv1d kernel:
#   optional input leaky-relu + dilated conv (im2col, single MXU matmul)
#   + bias + optional residual + optional scale + optional tanh.
# Halo comes from prev/cur/next tiles of the same array; out-of-range rows
# (left/right zero padding and ragged tile tails) are masked to zero in-kernel.
# ----------------------------------------------------------------------------
def _conv1d_kernel(*refs, K, dilation, TILE, Tin, pad_l, halo_l, halo_r,
                   lrelu_slope, scale, out_act, has_prev, has_next, has_res):
    it = iter(refs)
    xprev_ref = next(it) if has_prev else None
    xcur_ref = next(it)
    xnext_ref = next(it) if has_next else None
    w_ref = next(it)
    b_ref = next(it)
    res_ref = next(it) if has_res else None
    o_ref = next(it)

    j = pl.program_id(1)

    parts = []
    if has_prev:
        parts.append(xprev_ref[0][TILE - halo_l:, :])
    parts.append(xcur_ref[0])
    if has_next:
        parts.append(xnext_ref[0][:halo_r, :])
    xp = parts[0] if len(parts) == 1 else jnp.concatenate(parts, axis=0)

    # Global row indices of the assembled window; rows outside [0, Tin) are the
    # conv zero-padding (and ragged-tile garbage) -> mask to exact zeros.
    win = TILE + halo_l + halo_r                      # = TILE + dilation*(K-1)
    g = (j * TILE - pad_l) + lax.broadcasted_iota(jnp.int32, (win, 1), 0)
    xp = jnp.where((g >= 0) & (g < Tin), xp, 0)

    if lrelu_slope:                                   # leaky_relu(0) == 0 -> exact
        xp = jnp.where(xp >= 0, xp, lrelu_slope * xp)

    # im2col: one (TILE, K*Cin) @ (K*Cin, Cout) MXU matmul, f32 accumulation.
    cols = [xp[k * dilation:k * dilation + TILE, :] for k in range(K)]
    xcat = cols[0] if K == 1 else jnp.concatenate(cols, axis=1)
    acc = jnp.dot(xcat, w_ref[...], preferred_element_type=jnp.float32)

    acc = acc + b_ref[...]                            # (1, Cout) f32 broadcast
    if has_res:
        acc = acc + res_ref[0].astype(jnp.float32)    # fused residual add
    if scale != 1.0:
        acc = acc * scale                             # fused /num_kernels
    if out_act == "tanh":
        acc = jnp.tanh(acc)
    o_ref[0] = acc.astype(o_ref.dtype)


def conv1d_pallas(x, w, b, *, dilation=1, pad_l=None, pad_r=None,
                  lrelu_slope=0.0, residual=None, scale=1.0, out_act="none",
                  max_tile=DEFAULT_MAX_TILE):
    """x: (B, T, Cin), w: (K, Cin, Cout), b: (Cout,).  Returns (B, Tout, Cout)."""
    B, T, Cin = x.shape
    K, _, Cout = w.shape
    halo = dilation * (K - 1)
    if pad_l is None:
        pad_l = halo // 2            # "same" padding (odd K)
    if pad_r is None:
        pad_r = halo - pad_l
    Tout = T + pad_l + pad_r - halo

    TILE = _pick_tile(Tout, T, max_tile)
    NT = _cdiv(Tout, TILE)
    NTin = _cdiv(T, TILE)
    halo_l = pad_l                   # rows needed from the previous tile
    halo_r = halo - pad_l            # rows needed from the next tile
    assert 0 <= halo_l <= TILE and 0 <= halo_r <= TILE, (halo_l, halo_r, TILE)

    w_flat = w.reshape(K * Cin, Cout).astype(x.dtype)     # (K*Cin, Cout), bf16 at MXU
    b2 = b.reshape(1, Cout).astype(jnp.float32)

    has_prev = halo_l > 0
    has_next = halo_r > 0
    has_res = residual is not None

    def x_spec(imap):
        return pl.BlockSpec((1, TILE, Cin), imap)

    in_specs, operands = [], []
    if has_prev:
        in_specs.append(x_spec(lambda bi, j: (bi, jnp.clip(j - 1, 0, NTin - 1), 0)))
        operands.append(x)
    in_specs.append(x_spec(lambda bi, j: (bi, jnp.minimum(j, NTin - 1), 0)))
    operands.append(x)
    if has_next:
        in_specs.append(x_spec(lambda bi, j: (bi, jnp.minimum(j + 1, NTin - 1), 0)))
        operands.append(x)
    in_specs.append(pl.BlockSpec((K * Cin, Cout), lambda bi, j: (0, 0)))
    operands.append(w_flat)
    in_specs.append(pl.BlockSpec((1, Cout), lambda bi, j: (0, 0)))
    operands.append(b2)
    if has_res:
        assert residual.shape == (B, Tout, Cout)
        in_specs.append(pl.BlockSpec((1, TILE, Cout), lambda bi, j: (bi, j, 0)))
        operands.append(residual)

    kern = functools.partial(
        _conv1d_kernel, K=K, dilation=dilation, TILE=TILE, Tin=T, pad_l=pad_l,
        halo_l=halo_l, halo_r=halo_r, lrelu_slope=lrelu_slope, scale=scale,
        out_act=out_act, has_prev=has_prev, has_next=has_next, has_res=has_res)

    return pl.pallas_call(
        kern,
        out_shape=jax.ShapeDtypeStruct((B, Tout, Cout), x.dtype),
        grid=(B, NT),
        in_specs=in_specs,
        out_specs=pl.BlockSpec((1, TILE, Cout), lambda bi, j: (bi, j, 0)),
        compiler_params=pltpu.CompilerParams(
            dimension_semantics=("parallel", "parallel"),
            vmem_limit_bytes=VMEM_LIMIT_BYTES),
    )(*operands)


def conv_transpose1d_pallas(x, w, b, *, stride, padding, lrelu_slope=0.0):
    """ConvTranspose1d.  x: (B, T, Cin), w: (Cin, Cout, K) (PyTorch layout).

    Zero-insertion + equivalent flipped conv through the tiled fused kernel.
    leaky_relu(0)==0 so the fused input activation stays exact after zero-insertion.
    """
    B, T, Cin = x.shape
    _, Cout, K = w.shape
    assert K - 1 - padding >= 0
    Tz = (T - 1) * stride + 1
    xz = jnp.zeros((B, Tz, Cin), x.dtype).at[:, ::stride, :].set(x)
    w_conv = jnp.transpose(jnp.flip(w, axis=2), (2, 0, 1))    # (K, Cin, Cout)
    return conv1d_pallas(xz, w_conv, b, dilation=1,
                         pad_l=K - 1 - padding, pad_r=K - 1 - padding,
                         lrelu_slope=lrelu_slope)


# ----------------------------------------------------------------------------
# Generator network, written once and applied with either the Pallas conv
# backend or the pure-lax reference backend (identical op/fusion structure, so
# the reference independently validates the Pallas kernel mechanics).
# The per-branch scale = 1/num_kernels fused into the last conv of each branch
# is mathematically identical to torch's `xs / self.num_kernels`.
# ----------------------------------------------------------------------------
def _apply_generator(conv_fn, convt_fn, params, x, h):
    x = conv_fn(x, params["conv_pre"]["w"], params["conv_pre"]["b"])
    num_k = len(h["resblock_kernel_sizes"])
    for i, (u, k) in enumerate(zip(h["upsample_rates"], h["upsample_kernel_sizes"])):
        up = params["ups"][i]
        # F.leaky_relu before the upsample is fused into the transposed conv.
        x = convt_fn(x, up["w"], up["b"], stride=u, padding=(k - u + 1) // 2,
                     lrelu_slope=LRELU_SLOPE)
        xs = None
        for j in range(num_k):
            rb = params["resblocks"][i * num_k + j]
            dils = h["resblock_dilation_sizes"][j]
            y = x
            if h["resblock"] == "1":
                for idx, d in enumerate(dils):
                    s = 1.0 / num_k if idx == len(dils) - 1 else 1.0
                    yt = conv_fn(y, rb["convs1"][idx]["w"], rb["convs1"][idx]["b"],
                                 dilation=int(d), lrelu_slope=LRELU_SLOPE)
                    y = conv_fn(yt, rb["convs2"][idx]["w"], rb["convs2"][idx]["b"],
                                dilation=1, lrelu_slope=LRELU_SLOPE,
                                residual=y, scale=s)
            else:
                for idx, d in enumerate(dils):
                    s = 1.0 / num_k if idx == len(dils) - 1 else 1.0
                    y = conv_fn(y, rb["convs"][idx]["w"], rb["convs"][idx]["b"],
                                dilation=int(d), lrelu_slope=LRELU_SLOPE,
                                residual=y, scale=s)
            xs = y if xs is None else xs + y
        x = xs
    # final F.leaky_relu (default slope 0.01) + conv_post + tanh, fused in kernel.
    x = conv_fn(x, params["conv_post"]["w"], params["conv_post"]["b"],
                lrelu_slope=0.01, out_act="tanh")
    return x


def generator_forward(params, x, h, act_dtype=jnp.bfloat16):
    """x: (B, inter_channels, T) (PyTorch NCL).  Returns (B, 1, T * prod(rates))."""
    x = jnp.transpose(x, (0, 2, 1)).astype(act_dtype)         # -> (B, T, C)
    y = _apply_generator(conv1d_pallas, conv_transpose1d_pallas, params, x, h)
    return jnp.transpose(y, (0, 2, 1))                        # -> (B, 1, Tout)


# ----------------------------------------------------------------------------
# Pure-JAX reference backend (lax.conv_general_dilated), mirroring the same
# fusion structure, for correctness checking.
# ----------------------------------------------------------------------------
def _ref_conv1d_fused(x, w_kio, b, *, dilation=1, pad_l=None, pad_r=None,
                      lrelu_slope=0.0, residual=None, scale=1.0, out_act="none"):
    K = w_kio.shape[0]
    halo = dilation * (K - 1)
    if pad_l is None:
        pad_l = halo // 2
    if pad_r is None:
        pad_r = halo - pad_l
    if lrelu_slope:
        x = jnp.where(x >= 0, x, lrelu_slope * x)
    lhs = jnp.transpose(x, (0, 2, 1))                         # NCW
    rhs = jnp.transpose(w_kio, (2, 1, 0)).astype(x.dtype)     # OIK
    y = lax.conv_general_dilated(lhs, rhs, window_strides=(1,),
                                 padding=[(pad_l, pad_r)],
                                 rhs_dilation=(dilation,),
                                 dimension_numbers=("NCH", "OIH", "NCH"),
                                 preferred_element_type=jnp.float32)
    y = jnp.transpose(y, (0, 2, 1)) + b.astype(jnp.float32)[None, None, :]
    if residual is not None:
        y = y + residual.astype(jnp.float32)
    if scale != 1.0:
        y = y * scale
    if out_act == "tanh":
        y = jnp.tanh(y)
    return y.astype(x.dtype)


def _ref_conv_transpose1d_fused(x, w_iok, b, *, stride, padding, lrelu_slope=0.0):
    if lrelu_slope:
        x = jnp.where(x >= 0, x, lrelu_slope * x)
    K = w_iok.shape[2]
    lhs = jnp.transpose(x, (0, 2, 1))
    w_eq = jnp.transpose(jnp.flip(w_iok, axis=2), (1, 0, 2)).astype(x.dtype)  # (Cout, Cin, K)
    y = lax.conv_general_dilated(lhs, w_eq, window_strides=(1,),
                                 padding=[(K - 1 - padding, K - 1 - padding)],
                                 lhs_dilation=(stride,),
                                 dimension_numbers=("NCH", "OIH", "NCH"),
                                 preferred_element_type=jnp.float32)
    y = jnp.transpose(y, (0, 2, 1)) + b.astype(jnp.float32)[None, None, :]
    return y.astype(x.dtype)


def generator_forward_ref(params, x, h, act_dtype=jnp.bfloat16):
    x = jnp.transpose(x, (0, 2, 1)).astype(act_dtype)
    y = _apply_generator(_ref_conv1d_fused, _ref_conv_transpose1d_fused, params, x, h)
    return jnp.transpose(y, (0, 2, 1))


# ----------------------------------------------------------------------------
# Deterministic synthetic parameters (normal(0, 0.01) like init_weights;
# weight_norm folded into plain weights).
# ----------------------------------------------------------------------------
def _normal(key, shape, std=0.01):
    return std * jax.random.normal(key, shape, dtype=jnp.float32)


def make_params(key, h):
    params = {}
    keys = iter(jax.random.split(key, 1024))
    up_init = h["upsample_initial_channel"]
    inter = h["inter_channels"]

    params["conv_pre"] = {"w": _normal(next(keys), (7, inter, up_init)),
                          "b": _normal(next(keys), (up_init,))}
    params["ups"] = []
    params["resblocks"] = []
    ch = up_init
    for i, (u, k) in enumerate(zip(h["upsample_rates"], h["upsample_kernel_sizes"])):
        cin = up_init // (2 ** i)
        ch = up_init // (2 ** (i + 1))
        params["ups"].append({"w": _normal(next(keys), (cin, ch, k)),   # (Cin, Cout, K)
                              "b": _normal(next(keys), (ch,))})
        for ks, dil in zip(h["resblock_kernel_sizes"], h["resblock_dilation_sizes"]):
            if h["resblock"] == "1":
                rb = {"convs1": [{"w": _normal(next(keys), (ks, ch, ch)),
                                  "b": _normal(next(keys), (ch,))} for _ in dil],
                      "convs2": [{"w": _normal(next(keys), (ks, ch, ch)),
                                  "b": _normal(next(keys), (ch,))} for _ in dil]}
            else:
                rb = {"convs": [{"w": _normal(next(keys), (ks, ch, ch)),
                                 "b": _normal(next(keys), (ch,))} for _ in dil]}
            params["resblocks"].append(rb)
    params["conv_post"] = {"w": _normal(next(keys), (7, ch, 1)),
                           "b": _normal(next(keys), (1,))}
    return params


# ----------------------------------------------------------------------------
if __name__ == "__main__":
    h = {
        "inter_channels": 8,
        "upsample_initial_channel": 32,
        "upsample_rates": [2, 2],
        "upsample_kernel_sizes": [4, 4],
        "resblock": "1",
        "resblock_kernel_sizes": [3],
        "resblock_dilation_sizes": [[1, 3, 5]],
        "use_vq": False,
    }
    B, T = 2, 16

    root = jax.random.PRNGKey(0)
    k_params, k_x = jax.random.split(root)
    params = make_params(k_params, h)
    x = jax.random.normal(k_x, (B, h["inter_channels"], T), dtype=jnp.float32)

    upp = 1
    for u in h["upsample_rates"]:
        upp *= u

    # Production path: bf16 activations between layers, f32 accumulation.
    fwd16 = jax.jit(functools.partial(generator_forward, h=h, act_dtype=jnp.bfloat16))
    out16 = jax.block_until_ready(fwd16(params, x))
    assert out16.shape == (B, 1, T * upp), out16.shape

    ref16 = jax.block_until_ready(generator_forward_ref(params, x, h, jnp.bfloat16))
    a16 = out16.astype(jnp.float32)
    r16 = ref16.astype(jnp.float32)
    assert jnp.allclose(a16, r16, rtol=1e-1, atol=1e-7), \
        float(jnp.max(jnp.abs(a16 - r16)))

    # Tight f32 check of the Pallas mechanics (tiling / halo / masking / fusion).
    out32 = jax.block_until_ready(generator_forward(params, x, h, act_dtype=jnp.float32))
    ref32 = jax.block_until_ready(generator_forward_ref(params, x, h, jnp.float32))
    assert out32.shape == (B, 1, T * upp), out32.shape
    assert jnp.allclose(out32, ref32, rtol=5e-2, atol=1e-8), \
        float(jnp.max(jnp.abs(out32 - ref32)))

    print("KERNEL_OK")
</pallas_src>

<mosaic_0001>
module attributes {stable_mosaic.version = 11 : i64} {
  func.func @_conv1d_kernel(%arg0: i32, %arg1: i32, %arg2: memref<1x16x8xbf16, #tpu.memory_space<vmem>>, %arg3: memref<1x16x8xbf16, #tpu.memory_space<vmem>>, %arg4: memref<1x16x8xbf16, #tpu.memory_space<vmem>>, %arg5: memref<56x32xbf16, #tpu.memory_space<vmem>>, %arg6: memref<1x32xf32, #tpu.memory_space<vmem>>, %arg7: memref<1x16x32xbf16, #tpu.memory_space<vmem>>) attributes {dimension_semantics = [#tpu.dimension_semantics<parallel>, #tpu.dimension_semantics<parallel>], iteration_bounds = array<i64: 2, 1>, scalar_prefetch = 0 : i64, scratch_operands = 0 : i64, tpu.core_type = #tpu.core_type<tc>, window_params = [{transform_indices = @transform_0, window_bounds = array<i64: 1, 16, 8>}, {transform_indices = @transform_1, window_bounds = array<i64: 1, 16, 8>}, {transform_indices = @transform_2, window_bounds = array<i64: 1, 16, 8>}, {pipeline_mode = #tpu.pipeline_mode<synchronous>, transform_indices = @transform_3, window_bounds = array<i64: 56, 32>}, {pipeline_mode = #tpu.pipeline_mode<synchronous>, transform_indices = @transform_4, window_bounds = array<i64: 1, 32>}, {transform_indices = @transform_5, window_bounds = array<i64: 1, 16, 32>}]} {
    %c0 = arith.constant 0 : index
    %c0_0 = arith.constant 0 : index
    %c0_1 = arith.constant 0 : index
    %0 = vector.load %arg2[%c0, %c0_0, %c0_1] : memref<1x16x8xbf16, #tpu.memory_space<vmem>>, vector<1x16x8xbf16>
    %1 = vector.shape_cast %0 : vector<1x16x8xbf16> to vector<16x8xbf16>
    %2 = vector.extract_strided_slice %1 {offsets = [13, 0], sizes = [3, 8], strides = [1, 1]} : vector<16x8xbf16> to vector<3x8xbf16>
    %c0_2 = arith.constant 0 : index
    %c0_3 = arith.constant 0 : index
    %c0_4 = arith.constant 0 : index
    %3 = vector.load %arg3[%c0_2, %c0_3, %c0_4] : memref<1x16x8xbf16, #tpu.memory_space<vmem>>, vector<1x16x8xbf16>
    %4 = vector.shape_cast %3 : vector<1x16x8xbf16> to vector<16x8xbf16>
    %c0_5 = arith.constant 0 : index
    %c0_6 = arith.constant 0 : index
    %c0_7 = arith.constant 0 : index
    %5 = vector.load %arg4[%c0_5, %c0_6, %c0_7] : memref<1x16x8xbf16, #tpu.memory_space<vmem>>, vector<1x16x8xbf16>
    %6 = vector.shape_cast %5 : vector<1x16x8xbf16> to vector<16x8xbf16>
    %7 = vector.extract_strided_slice %6 {offsets = [0, 0], sizes = [3, 8], strides = [1, 1]} : vector<16x8xbf16> to vector<3x8xbf16>
    %8 = tpu.concatenate %2, %4, %7 in 0 : vector<3x8xbf16>, vector<16x8xbf16>, vector<3x8xbf16> -> vector<22x8xbf16>
    %c16_i32 = arith.constant 16 : i32
    %9 = arith.muli %arg1, %c16_i32 : i32
    %c3_i32 = arith.constant 3 : i32
    %10 = arith.subi %9, %c3_i32 : i32
    %11 = tpu.iota {dimensions = array<i32: 0>} : vector<22x1xi32>
    %12 = vector.broadcast %10 : i32 to vector<22x1xi32>
    %13 = arith.addi %12, %11 : vector<22x1xi32>
    %c0_i32 = arith.constant 0 : i32
    %14 = vector.broadcast %c0_i32 : i32 to vector<22x1xi32>
    %15 = arith.cmpi sge, %13, %14 : vector<22x1xi32>
    %c16_i32_8 = arith.constant 16 : i32
    %16 = vector.broadcast %c16_i32_8 : i32 to vector<22x1xi32>
    %17 = arith.cmpi slt, %13, %16 : vector<22x1xi32>
    %18 = arith.andi %15, %17 : vector<22x1xi1>
    %c0_i32_9 = arith.constant 0 : i32
    %19 = arith.sitofp %c0_i32_9 : i32 to bf16
    %20 = vector.shape_cast %18 : vector<22x1xi1> to vector<22x1xi1>
    %21 = vector.broadcast %20 : vector<22x1xi1> to vector<22x8xi1>
    %22 = vector.broadcast %19 : bf16 to vector<22x8xbf16>
    %23 = arith.select %21, %8, %22 : vector<22x8xi1>, vector<22x8xbf16>
    %24 = vector.extract_strided_slice %23 {offsets = [0, 0], sizes = [16, 8], strides = [1, 1]} : vector<22x8xbf16> to vector<16x8xbf16>
    %25 = vector.extract_strided_slice %23 {offsets = [1, 0], sizes = [16, 8], strides = [1, 1]} : vector<22x8xbf16> to vector<16x8xbf16>
    %26 = vector.extract_strided_slice %23 {offsets = [2, 0], sizes = [16, 8], strides = [1, 1]} : vector<22x8xbf16> to vector<16x8xbf16>
    %27 = vector.extract_strided_slice %23 {offsets = [3, 0], sizes = [16, 8], strides = [1, 1]} : vector<22x8xbf16> to vector<16x8xbf16>
    %28 = vector.extract_strided_slice %23 {offsets = [4, 0], sizes = [16, 8], strides = [1, 1]} : vector<22x8xbf16> to vector<16x8xbf16>
    %29 = vector.extract_strided_slice %23 {offsets = [5, 0], sizes = [16, 8], strides = [1, 1]} : vector<22x8xbf16> to vector<16x8xbf16>
    %30 = vector.extract_strided_slice %23 {offsets = [6, 0], sizes = [16, 8], strides = [1, 1]} : vector<22x8xbf16> to vector<16x8xbf16>
    %31 = tpu.concatenate %24, %25, %26, %27, %28, %29, %30 in 1 : vector<16x8xbf16>, vector<16x8xbf16>, vector<16x8xbf16>, vector<16x8xbf16>, vector<16x8xbf16>, vector<16x8xbf16>, vector<16x8xbf16> -> vector<16x56xbf16>
    %c0_10 = arith.constant 0 : index
    %c0_11 = arith.constant 0 : index
    %32 = vector.load %arg5[%c0_10, %c0_11] : memref<56x32xbf16, #tpu.memory_space<vmem>>, vector<56x32xbf16>
    %cst = arith.constant dense<0.000000e+00> : vector<16x32xf32>
    %33 = tpu.matmul %31, %32, %cst {dimension_numbers = #tpu.dot_dimension_numbers<[1], [0], [0], [1], [0, 0, 1, 1], [], []>} : vector<16x56xbf16>, vector<56x32xbf16>, vector<16x32xf32> -> vector<16x32xf32>
    %c0_12 = arith.constant 0 : index
    %c0_13 = arith.constant 0 : index
    %34 = vector.load %arg6[%c0_12, %c0_13] : memref<1x32xf32, #tpu.memory_space<vmem>>, vector<1x32xf32>
    %35 = vector.broadcast %34 : vector<1x32xf32> to vector<16x32xf32>
    %36 = arith.addf %33, %35 : vector<16x32xf32>
    %37 = arith.truncf %36 : vector<16x32xf32> to vector<16x32xbf16>
    %c0_14 = arith.constant 0 : index
    %c0_15 = arith.constant 0 : index
    %c0_16 = arith.constant 0 : index
    %38 = vector.load %arg7[%c0_14, %c0_15, %c0_16] : memref<1x16x32xbf16, #tpu.memory_space<vmem>>, vector<1x16x32xbf16>
    %39 = vector.shape_cast %38 : vector<1x16x32xbf16> to vector<16x32xbf16>
    %40 = vector.shape_cast %37 : vector<16x32xbf16> to vector<1x16x32xbf16>
    tpu.vector_store %arg7[%c0_14, %c0_15, %c0_16], %40 {strides = array<i32>} : memref<1x16x32xbf16, #tpu.memory_space<vmem>>, vector<1x16x32xbf16>,
    return
  }
  func.func @transform_0(%arg0: i32, %arg1: i32) -> (i32, i32, i32) {
    %c1_i32 = arith.constant 1 : i32
    %0 = arith.subi %arg1, %c1_i32 : i32
    %c0_i32 = arith.constant 0 : i32
    %c0_i32_0 = arith.constant 0 : i32
    %1 = arith.maxsi %c0_i32, %0 : i32
    %2 = arith.minsi %c0_i32_0, %1 : i32
    %c0_i32_1 = arith.constant 0 : i32
    %c0_i32_2 = arith.constant 0 : i32
    return %arg0, %2, %c0_i32_1 : i32, i32, i32
  }
  func.func @transform_1(%arg0: i32, %arg1: i32) -> (i32, i32, i32) {
    %c0_i32 = arith.constant 0 : i32
    %0 = arith.minsi %arg1, %c0_i32 : i32
    %c0_i32_0 = arith.constant 0 : i32
    %c0_i32_1 = arith.constant 0 : i32
    return %arg0, %0, %c0_i32_0 : i32, i32, i32
  }
  func.func @transform_2(%arg0: i32, %arg1: i32) -> (i32, i32, i32) {
    %c1_i32 = arith.constant 1 : i32
    %0 = arith.addi %arg1, %c1_i32 : i32
    %c0_i32 = arith.constant 0 : i32
    %1 = arith.minsi %0, %c0_i32 : i32
    %c0_i32_0 = arith.constant 0 : i32
    %c0_i32_1 = arith.constant 0 : i32
    return %arg0, %1, %c0_i32_0 : i32, i32, i32
  }
  func.func @transform_3(%arg0: i32, %arg1: i32) -> (i32, i32) {
    %c0_i32 = arith.constant 0 : i32
    %c0_i32_0 = arith.constant 0 : i32
    %c0_i32_1 = arith.constant 0 : i32
    return %c0_i32, %c0_i32_0 : i32, i32
  }
  func.func @transform_4(%arg0: i32, %arg1: i32) -> (i32, i32) {
    %c0_i32 = arith.constant 0 : i32
    %c0_i32_0 = arith.constant 0 : i32
    %c0_i32_1 = arith.constant 0 : i32
    return %c0_i32, %c0_i32_0 : i32, i32
  }
  func.func @transform_5(%arg0: i32, %arg1: i32) -> (i32, i32, i32) {
    %c0_i32 = arith.constant 0 : i32
    %c0_i32_0 = arith.constant 0 : i32
    return %arg0, %arg1, %c0_i32 : i32, i32, i32
  }
}

module attributes {stable_mosaic.version = 11 : i64} {
  func.func @_conv1d_kernel(%arg0: i32, %arg1: i32, %arg2: memref<1x24x32xbf16, #tpu.memory_space<vmem>>, %arg3: memref<1x24x32xbf16, #tpu.memory_space<vmem>>, %arg4: memref<1x24x32xbf16, #tpu.memory_space<vmem>>, %arg5: memref<128x16xbf16, #tpu.memory_space<vmem>>, %arg6: memref<1x16xf32, #tpu.memory_space<vmem>>, %arg7: memref<1x24x16xbf16, #tpu.memory_space<vmem>>) attributes {dimension_semantics = [#tpu.dimension_semantics<parallel>, #tpu.dimension_semantics<parallel>], iteration_bounds = array<i64: 2, 2>, scalar_prefetch = 0 : i64, scratch_operands = 0 : i64, tpu.core_type = #tpu.core_type<tc>, window_params = [{transform_indices = @transform_0, window_bounds = array<i64: 1, 24, 32>}, {transform_indices = @transform_1, window_bounds = array<i64: 1, 24, 32>}, {transform_indices = @transform_2, window_bounds = array<i64: 1, 24, 32>}, {pipeline_mode = #tpu.pipeline_mode<synchronous>, transform_indices = @transform_3, window_bounds = array<i64: 128, 16>}, {pipeline_mode = #tpu.pipeline_mode<synchronous>, transform_indices = @transform_4, window_bounds = array<i64: 1, 16>}, {transform_indices = @transform_5, window_bounds = array<i64: 1, 24, 16>}]} {
    %c0 = arith.constant 0 : index
    %c0_0 = arith.constant 0 : index
    %c0_1 = arith.constant 0 : index
    %0 = vector.load %arg2[%c0, %c0_0, %c0_1] : memref<1x24x32xbf16, #tpu.memory_space<vmem>>, vector<1x24x32xbf16>
    %1 = vector.shape_cast %0 : vector<1x24x32xbf16> to vector<24x32xbf16>
    %2 = vector.extract_strided_slice %1 {offsets = [22, 0], sizes = [2, 32], strides = [1, 1]} : vector<24x32xbf16> to vector<2x32xbf16>
    %c0_2 = arith.constant 0 : index
    %c0_3 = arith.constant 0 : index
    %c0_4 = arith.constant 0 : index
    %3 = vector.load %arg3[%c0_2, %c0_3, %c0_4] : memref<1x24x32xbf16, #tpu.memory_space<vmem>>, vector<1x24x32xbf16>
    %4 = vector.shape_cast %3 : vector<1x24x32xbf16> to vector<24x32xbf16>
    %c0_5 = arith.constant 0 : index
    %c0_6 = arith.constant 0 : index
    %c0_7 = arith.constant 0 : index
    %5 = vector.load %arg4[%c0_5, %c0_6, %c0_7] : memref<1x24x32xbf16, #tpu.memory_space<vmem>>, vector<1x24x32xbf16>
    %6 = vector.shape_cast %5 : vector<1x24x32xbf16> to vector<24x32xbf16>
    %7 = vector.extract_strided_slice %6 {offsets = [0, 0], sizes = [1, 32], strides = [1, 1]} : vector<24x32xbf16> to vector<1x32xbf16>
    %8 = tpu.concatenate %2, %4, %7 in 0 : vector<2x32xbf16>, vector<24x32xbf16>, vector<1x32xbf16> -> vector<27x32xbf16>
    %c24_i32 = arith.constant 24 : i32
    %9 = arith.muli %arg1, %c24_i32 : i32
    %c2_i32 = arith.constant 2 : i32
    %10 = arith.subi %9, %c2_i32 : i32
    %11 = tpu.iota {dimensions = array<i32: 0>} : vector<27x1xi32>
    %12 = vector.broadcast %10 : i32 to vector<27x1xi32>
    %13 = arith.addi %12, %11 : vector<27x1xi32>
    %c0_i32 = arith.constant 0 : i32
    %14 = vector.broadcast %c0_i32 : i32 to vector<27x1xi32>
    %15 = arith.cmpi sge, %13, %14 : vector<27x1xi32>
    %c31_i32 = arith.constant 31 : i32
    %16 = vector.broadcast %c31_i32 : i32 to vector<27x1xi32>
    %17 = arith.cmpi slt, %13, %16 : vector<27x1xi32>
    %18 = arith.andi %15, %17 : vector<27x1xi1>
    %c0_i32_8 = arith.constant 0 : i32
    %19 = arith.sitofp %c0_i32_8 : i32 to bf16
    %20 = vector.shape_cast %18 : vector<27x1xi1> to vector<27x1xi1>
    %21 = vector.broadcast %20 : vector<27x1xi1> to vector<27x32xi1>
    %22 = vector.broadcast %19 : bf16 to vector<27x32xbf16>
    %23 = arith.select %21, %8, %22 : vector<27x32xi1>, vector<27x32xbf16>
    %cst = arith.constant 0.000000e+00 : bf16
    %24 = vector.broadcast %cst : bf16 to vector<27x32xbf16>
    %25 = arith.cmpf oge, %23, %24 : vector<27x32xbf16>
    %cst_9 = arith.constant 1.000980e-01 : bf16
    %26 = vector.broadcast %cst_9 : bf16 to vector<27x32xbf16>
    %27 = arith.mulf %26, %23 : vector<27x32xbf16>
    %28 = arith.select %25, %23, %27 : vector<27x32xi1>, vector<27x32xbf16>
    %29 = vector.extract_strided_slice %28 {offsets = [0, 0], sizes = [24, 32], strides = [1, 1]} : vector<27x32xbf16> to vector<24x32xbf16>
    %30 = vector.extract_strided_slice %28 {offsets = [1, 0], sizes = [24, 32], strides = [1, 1]} : vector<27x32xbf16> to vector<24x32xbf16>
    %31 = vector.extract_strided_slice %28 {offsets = [2, 0], sizes = [24, 32], strides = [1, 1]} : vector<27x32xbf16> to vector<24x32xbf16>
    %32 = vector.extract_strided_slice %28 {offsets = [3, 0], sizes = [24, 32], strides = [1, 1]} : vector<27x32xbf16> to vector<24x32xbf16>
    %33 = tpu.concatenate %29, %30, %31, %32 in 1 : vector<24x32xbf16>, vector<24x32xbf16>, vector<24x32xbf16>, vector<24x32xbf16> -> vector<24x128xbf16>
    %c0_10 = arith.constant 0 : index
    %c0_11 = arith.constant 0 : index
    %34 = vector.load %arg5[%c0_10, %c0_11] : memref<128x16xbf16, #tpu.memory_space<vmem>>, vector<128x16xbf16>
    %cst_12 = arith.constant dense<0.000000e+00> : vector<24x16xf32>
    %35 = tpu.matmul %33, %34, %cst_12 {dimension_numbers = #tpu.dot_dimension_numbers<[1], [0], [0], [1], [0, 0, 1, 1], [], []>} : vector<24x128xbf16>, vector<128x16xbf16>, vector<24x16xf32> -> vector<24x16xf32>
    %c0_13 = arith.constant 0 : index
    %c0_14 = arith.constant 0 : index
    %36 = vector.load %arg6[%c0_13, %c0_14] : memref<1x16xf32, #tpu.memory_space<vmem>>, vector<1x16xf32>
    %37 = vector.broadcast %36 : vector<1x16xf32> to vector<24x16xf32>
    %38 = arith.addf %35, %37 : vector<24x16xf32>
    %39 = arith.truncf %38 : vector<24x16xf32> to vector<24x16xbf16>
    %c0_15 = arith.constant 0 : index
    %c0_16 = arith.constant 0 : index
    %c0_17 = arith.constant 0 : index
    %40 = vector.load %arg7[%c0_15, %c0_16, %c0_17] : memref<1x24x16xbf16, #tpu.memory_space<vmem>>, vector<1x24x16xbf16>
    %41 = vector.shape_cast %40 : vector<1x24x16xbf16> to vector<24x16xbf16>
    %42 = vector.shape_cast %39 : vector<24x16xbf16> to vector<1x24x16xbf16>
    tpu.vector_store %arg7[%c0_15, %c0_16, %c0_17], %42 {strides = array<i32>} : memref<1x24x16xbf16, #tpu.memory_space<vmem>>, vector<1x24x16xbf16>,
    return
  }
  func.func @transform_0(%arg0: i32, %arg1: i32) -> (i32, i32, i32) {
    %c1_i32 = arith.constant 1 : i32
    %0 = arith.subi %arg1, %c1_i32 : i32
    %c0_i32 = arith.constant 0 : i32
    %c1_i32_0 = arith.constant 1 : i32
    %1 = arith.maxsi %c0_i32, %0 : i32
    %2 = arith.minsi %c1_i32_0, %1 : i32
    %c0_i32_1 = arith.constant 0 : i32
    %c0_i32_2 = arith.constant 0 : i32
    return %arg0, %2, %c0_i32_1 : i32, i32, i32
  }
  func.func @transform_1(%arg0: i32, %arg1: i32) -> (i32, i32, i32) {
    %c1_i32 = arith.constant 1 : i32
    %0 = arith.minsi %arg1, %c1_i32 : i32
    %c0_i32 = arith.constant 0 : i32
    %c0_i32_0 = arith.constant 0 : i32
    return %arg0, %0, %c0_i32 : i32, i32, i32
  }
  func.func @transform_2(%arg0: i32, %arg1: i32) -> (i32, i32, i32) {
    %c1_i32 = arith.constant 1 : i32
    %0 = arith.addi %arg1, %c1_i32 : i32
    %c1_i32_0 = arith.constant 1 : i32
    %1 = arith.minsi %0, %c1_i32_0 : i32
    %c0_i32 = arith.constant 0 : i32
    %c0_i32_1 = arith.constant 0 : i32
    return %arg0, %1, %c0_i32 : i32, i32, i32
  }
  func.func @transform_3(%arg0: i32, %arg1: i32) -> (i32, i32) {
    %c0_i32 = arith.constant 0 : i32
    %c0_i32_0 = arith.constant 0 : i32
    %c0_i32_1 = arith.constant 0 : i32
    return %c0_i32, %c0_i32_0 : i32, i32
  }
  func.func @transform_4(%arg0: i32, %arg1: i32) -> (i32, i32) {
    %c0_i32 = arith.constant 0 : i32
    %c0_i32_0 = arith.constant 0 : i32
    %c0_i32_1 = arith.constant 0 : i32
    return %c0_i32, %c0_i32_0 : i32, i32
  }
  func.func @transform_5(%arg0: i32, %arg1: i32) -> (i32, i32, i32) {
    %c0_i32 = arith.constant 0 : i32
    %c0_i32_0 = arith.constant 0 : i32
    return %arg0, %arg1, %c0_i32 : i32, i32, i32
  }
}

module attributes {stable_mosaic.version = 11 : i64} {
  func.func @_conv1d_kernel(%arg0: i32, %arg1: i32, %arg2: memref<1x32x16xbf16, #tpu.memory_space<vmem>>, %arg3: memref<1x32x16xbf16, #tpu.memory_space<vmem>>, %arg4: memref<1x32x16xbf16, #tpu.memory_space<vmem>>, %arg5: memref<48x16xbf16, #tpu.memory_space<vmem>>, %arg6: memref<1x16xf32, #tpu.memory_space<vmem>>, %arg7: memref<1x32x16xbf16, #tpu.memory_space<vmem>>) attributes {dimension_semantics = [#tpu.dimension_semantics<parallel>, #tpu.dimension_semantics<parallel>], iteration_bounds = array<i64: 2, 1>, scalar_prefetch = 0 : i64, scratch_operands = 0 : i64, tpu.core_type = #tpu.core_type<tc>, window_params = [{transform_indices = @transform_0, window_bounds = array<i64: 1, 32, 16>}, {transform_indices = @transform_1, window_bounds = array<i64: 1, 32, 16>}, {transform_indices = @transform_2, window_bounds = array<i64: 1, 32, 16>}, {pipeline_mode = #tpu.pipeline_mode<synchronous>, transform_indices = @transform_3, window_bounds = array<i64: 48, 16>}, {pipeline_mode = #tpu.pipeline_mode<synchronous>, transform_indices = @transform_4, window_bounds = array<i64: 1, 16>}, {transform_indices = @transform_5, window_bounds = array<i64: 1, 32, 16>}]} {
    %c0 = arith.constant 0 : index
    %c0_0 = arith.constant 0 : index
    %c0_1 = arith.constant 0 : index
    %0 = vector.load %arg2[%c0, %c0_0, %c0_1] : memref<1x32x16xbf16, #tpu.memory_space<vmem>>, vector<1x32x16xbf16>
    %1 = vector.shape_cast %0 : vector<1x32x16xbf16> to vector<32x16xbf16>
    %2 = vector.extract_strided_slice %1 {offsets = [31, 0], sizes = [1, 16], strides = [1, 1]} : vector<32x16xbf16> to vector<1x16xbf16>
    %c0_2 = arith.constant 0 : index
    %c0_3 = arith.constant 0 : index
    %c0_4 = arith.constant 0 : index
    %3 = vector.load %arg3[%c0_2, %c0_3, %c0_4] : memref<1x32x16xbf16, #tpu.memory_space<vmem>>, vector<1x32x16xbf16>
    %4 = vector.shape_cast %3 : vector<1x32x16xbf16> to vector<32x16xbf16>
    %c0_5 = arith.constant 0 : index
    %c0_6 = arith.constant 0 : index
    %c0_7 = arith.constant 0 : index
    %5 = vector.load %arg4[%c0_5, %c0_6, %c0_7] : memref<1x32x16xbf16, #tpu.memory_space<vmem>>, vector<1x32x16xbf16>
    %6 = vector.shape_cast %5 : vector<1x32x16xbf16> to vector<32x16xbf16>
    %7 = vector.extract_strided_slice %6 {offsets = [0, 0], sizes = [1, 16], strides = [1, 1]} : vector<32x16xbf16> to vector<1x16xbf16>
    %8 = tpu.concatenate %2, %4, %7 in 0 : vector<1x16xbf16>, vector<32x16xbf16>, vector<1x16xbf16> -> vector<34x16xbf16>
    %c32_i32 = arith.constant 32 : i32
    %9 = arith.muli %arg1, %c32_i32 : i32
    %c1_i32 = arith.constant 1 : i32
    %10 = arith.subi %9, %c1_i32 : i32
    %11 = tpu.iota {dimensions = array<i32: 0>} : vector<34x1xi32>
    %12 = vector.broadcast %10 : i32 to vector<34x1xi32>
    %13 = arith.addi %12, %11 : vector<34x1xi32>
    %c0_i32 = arith.constant 0 : i32
    %14 = vector.broadcast %c0_i32 : i32 to vector<34x1xi32>
    %15 = arith.cmpi sge, %13, %14 : vector<34x1xi32>
    %c32_i32_8 = arith.constant 32 : i32
    %16 = vector.broadcast %c32_i32_8 : i32 to vector<34x1xi32>
    %17 = arith.cmpi slt, %13, %16 : vector<34x1xi32>
    %18 = arith.andi %15, %17 : vector<34x1xi1>
    %c0_i32_9 = arith.constant 0 : i32
    %19 = arith.sitofp %c0_i32_9 : i32 to bf16
    %20 = vector.shape_cast %18 : vector<34x1xi1> to vector<34x1xi1>
    %21 = vector.broadcast %20 : vector<34x1xi1> to vector<34x16xi1>
    %22 = vector.broadcast %19 : bf16 to vector<34x16xbf16>
    %23 = arith.select %21, %8, %22 : vector<34x16xi1>, vector<34x16xbf16>
    %cst = arith.constant 0.000000e+00 : bf16
    %24 = vector.broadcast %cst : bf16 to vector<34x16xbf16>
    %25 = arith.cmpf oge, %23, %24 : vector<34x16xbf16>
    %cst_10 = arith.constant 1.000980e-01 : bf16
    %26 = vector.broadcast %cst_10 : bf16 to vector<34x16xbf16>
    %27 = arith.mulf %26, %23 : vector<34x16xbf16>
    %28 = arith.select %25, %23, %27 : vector<34x16xi1>, vector<34x16xbf16>
    %29 = vector.extract_strided_slice %28 {offsets = [0, 0], sizes = [32, 16], strides = [1, 1]} : vector<34x16xbf16> to vector<32x16xbf16>
    %30 = vector.extract_strided_slice %28 {offsets = [1, 0], sizes = [32, 16], strides = [1, 1]} : vector<34x16xbf16> to vector<32x16xbf16>
    %31 = vector.extract_strided_slice %28 {offsets = [2, 0], sizes = [32, 16], strides = [1, 1]} : vector<34x16xbf16> to vector<32x16xbf16>
    %32 = tpu.concatenate %29, %30, %31 in 1 : vector<32x16xbf16>, vector<32x16xbf16>, vector<32x16xbf16> -> vector<32x48xbf16>
    %c0_11 = arith.constant 0 : index
    %c0_12 = arith.constant 0 : index
    %33 = vector.load %arg5[%c0_11, %c0_12] : memref<48x16xbf16, #tpu.memory_space<vmem>>, vector<48x16xbf16>
    %cst_13 = arith.constant dense<0.000000e+00> : vector<32x16xf32>
    %34 = tpu.matmul %32, %33, %cst_13 {dimension_numbers = #tpu.dot_dimension_numbers<[1], [0], [0], [1], [0, 0, 1, 1], [], []>} : vector<32x48xbf16>, vector<48x16xbf16>, vector<32x16xf32> -> vector<32x16xf32>
    %c0_14 = arith.constant 0 : index
    %c0_15 = arith.constant 0 : index
    %35 = vector.load %arg6[%c0_14, %c0_15] : memref<1x16xf32, #tpu.memory_space<vmem>>, vector<1x16xf32>
    %36 = vector.broadcast %35 : vector<1x16xf32> to vector<32x16xf32>
    %37 = arith.addf %34, %36 : vector<32x16xf32>
    %38 = arith.truncf %37 : vector<32x16xf32> to vector<32x16xbf16>
    %c0_16 = arith.constant 0 : index
    %c0_17 = arith.constant 0 : index
    %c0_18 = arith.constant 0 : index
    %39 = vector.load %arg7[%c0_16, %c0_17, %c0_18] : memref<1x32x16xbf16, #tpu.memory_space<vmem>>, vector<1x32x16xbf16>
    %40 = vector.shape_cast %39 : vector<1x32x16xbf16> to vector<32x16xbf16>
    %41 = vector.shape_cast %38 : vector<32x16xbf16> to vector<1x32x16xbf16>
    tpu.vector_store %arg7[%c0_16, %c0_17, %c0_18], %41 {strides = array<i32>} : memref<1x32x16xbf16, #tpu.memory_space<vmem>>, vector<1x32x16xbf16>,
    return
  }
  func.func @transform_0(%arg0: i32, %arg1: i32) -> (i32, i32, i32) {
    %c1_i32 = arith.constant 1 : i32
    %0 = arith.subi %arg1, %c1_i32 : i32
    %c0_i32 = arith.constant 0 : i32
    %c0_i32_0 = arith.constant 0 : i32
    %1 = arith.maxsi %c0_i32, %0 : i32
    %2 = arith.minsi %c0_i32_0, %1 : i32
    %c0_i32_1 = arith.constant 0 : i32
    %c0_i32_2 = arith.constant 0 : i32
    return %arg0, %2, %c0_i32_1 : i32, i32, i32
  }
  func.func @transform_1(%arg0: i32, %arg1: i32) -> (i32, i32, i32) {
    %c0_i32 = arith.constant 0 : i32
    %0 = arith.minsi %arg1, %c0_i32 : i32
    %c0_i32_0 = arith.constant 0 : i32
    %c0_i32_1 = arith.constant 0 : i32
    return %arg0, %0, %c0_i32_0 : i32, i32, i32
  }
  func.func @transform_2(%arg0: i32, %arg1: i32) -> (i32, i32, i32) {
    %c1_i32 = arith.constant 1 : i32
    %0 = arith.addi %arg1, %c1_i32 : i32
    %c0_i32 = arith.constant 0 : i32
    %1 = arith.minsi %0, %c0_i32 : i32
    %c0_i32_0 = arith.constant 0 : i32
    %c0_i32_1 = arith.constant 0 : i32
    return %arg0, %1, %c0_i32_0 : i32, i32, i32
  }
  func.func @transform_3(%arg0: i32, %arg1: i32) -> (i32, i32) {
    %c0_i32 = arith.constant 0 : i32
    %c0_i32_0 = arith.constant 0 : i32
    %c0_i32_1 = arith.constant 0 : i32
    return %c0_i32, %c0_i32_0 : i32, i32
  }
  func.func @transform_4(%arg0: i32, %arg1: i32) -> (i32, i32) {
    %c0_i32 = arith.constant 0 : i32
    %c0_i32_0 = arith.constant 0 : i32
    %c0_i32_1 = arith.constant 0 : i32
    return %c0_i32, %c0_i32_0 : i32, i32
  }
  func.func @transform_5(%arg0: i32, %arg1: i32) -> (i32, i32, i32) {
    %c0_i32 = arith.constant 0 : i32
    %c0_i32_0 = arith.constant 0 : i32
    return %arg0, %arg1, %c0_i32 : i32, i32, i32
  }
}

module attributes {stable_mosaic.version = 11 : i64} {
  func.func @_conv1d_kernel(%arg0: i32, %arg1: i32, %arg2: memref<1x32x16xbf16, #tpu.memory_space<vmem>>, %arg3: memref<1x32x16xbf16, #tpu.memory_space<vmem>>, %arg4: memref<1x32x16xbf16, #tpu.memory_space<vmem>>, %arg5: memref<48x16xbf16, #tpu.memory_space<vmem>>, %arg6: memref<1x16xf32, #tpu.memory_space<vmem>>, %arg7: memref<1x32x16xbf16, #tpu.memory_space<vmem>>) attributes {dimension_semantics = [#tpu.dimension_semantics<parallel>, #tpu.dimension_semantics<parallel>], iteration_bounds = array<i64: 2, 1>, scalar_prefetch = 0 : i64, scratch_operands = 0 : i64, tpu.core_type = #tpu.core_type<tc>, window_params = [{transform_indices = @transform_0, window_bounds = array<i64: 1, 32, 16>}, {transform_indices = @transform_1, window_bounds = array<i64: 1, 32, 16>}, {transform_indices = @transform_2, window_bounds = array<i64: 1, 32, 16>}, {pipeline_mode = #tpu.pipeline_mode<synchronous>, transform_indices = @transform_3, window_bounds = array<i64: 48, 16>}, {pipeline_mode = #tpu.pipeline_mode<synchronous>, transform_indices = @transform_4, window_bounds = array<i64: 1, 16>}, {transform_indices = @transform_5, window_bounds = array<i64: 1, 32, 16>}]} {
    %c0 = arith.constant 0 : index
    %c0_0 = arith.constant 0 : index
    %c0_1 = arith.constant 0 : index
    %0 = vector.load %arg2[%c0, %c0_0, %c0_1] : memref<1x32x16xbf16, #tpu.memory_space<vmem>>, vector<1x32x16xbf16>
    %1 = vector.shape_cast %0 : vector<1x32x16xbf16> to vector<32x16xbf16>
    %2 = vector.extract_strided_slice %1 {offsets = [29, 0], sizes = [3, 16], strides = [1, 1]} : vector<32x16xbf16> to vector<3x16xbf16>
    %c0_2 = arith.constant 0 : index
    %c0_3 = arith.constant 0 : index
    %c0_4 = arith.constant 0 : index
    %3 = vector.load %arg3[%c0_2, %c0_3, %c0_4] : memref<1x32x16xbf16, #tpu.memory_space<vmem>>, vector<1x32x16xbf16>
    %4 = vector.shape_cast %3 : vector<1x32x16xbf16> to vector<32x16xbf16>
    %c0_5 = arith.constant 0 : index
    %c0_6 = arith.constant 0 : index
    %c0_7 = arith.constant 0 : index
    %5 = vector.load %arg4[%c0_5, %c0_6, %c0_7] : memref<1x32x16xbf16, #tpu.memory_space<vmem>>, vector<1x32x16xbf16>
    %6 = vector.shape_cast %5 : vector<1x32x16xbf16> to vector<32x16xbf16>
    %7 = vector.extract_strided_slice %6 {offsets = [0, 0], sizes = [3, 16], strides = [1, 1]} : vector<32x16xbf16> to vector<3x16xbf16>
    %8 = tpu.concatenate %2, %4, %7 in 0 : vector<3x16xbf16>, vector<32x16xbf16>, vector<3x16xbf16> -> vector<38x16xbf16>
    %c32_i32 = arith.constant 32 : i32
    %9 = arith.muli %arg1, %c32_i32 : i32
    %c3_i32 = arith.constant 3 : i32
    %10 = arith.subi %9, %c3_i32 : i32
    %11 = tpu.iota {dimensions = array<i32: 0>} : vector<38x1xi32>
    %12 = vector.broadcast %10 : i32 to vector<38x1xi32>
    %13 = arith.addi %12, %11 : vector<38x1xi32>
    %c0_i32 = arith.constant 0 : i32
    %14 = vector.broadcast %c0_i32 : i32 to vector<38x1xi32>
    %15 = arith.cmpi sge, %13, %14 : vector<38x1xi32>
    %c32_i32_8 = arith.constant 32 : i32
    %16 = vector.broadcast %c32_i32_8 : i32 to vector<38x1xi32>
    %17 = arith.cmpi slt, %13, %16 : vector<38x1xi32>
    %18 = arith.andi %15, %17 : vector<38x1xi1>
    %c0_i32_9 = arith.constant 0 : i32
    %19 = arith.sitofp %c0_i32_9 : i32 to bf16
    %20 = vector.shape_cast %18 : vector<38x1xi1> to vector<38x1xi1>
    %21 = vector.broadcast %20 : vector<38x1xi1> to vector<38x16xi1>
    %22 = vector.broadcast %19 : bf16 to vector<38x16xbf16>
    %23 = arith.select %21, %8, %22 : vector<38x16xi1>, vector<38x16xbf16>
    %cst = arith.constant 0.000000e+00 : bf16
    %24 = vector.broadcast %cst : bf16 to vector<38x16xbf16>
    %25 = arith.cmpf oge, %23, %24 : vector<38x16xbf16>
    %cst_10 = arith.constant 1.000980e-01 : bf16
    %26 = vector.broadcast %cst_10 : bf16 to vector<38x16xbf16>
    %27 = arith.mulf %26, %23 : vector<38x16xbf16>
    %28 = arith.select %25, %23, %27 : vector<38x16xi1>, vector<38x16xbf16>
    %29 = vector.extract_strided_slice %28 {offsets = [0, 0], sizes = [32, 16], strides = [1, 1]} : vector<38x16xbf16> to vector<32x16xbf16>
    %30 = vector.extract_strided_slice %28 {offsets = [3, 0], sizes = [32, 16], strides = [1, 1]} : vector<38x16xbf16> to vector<32x16xbf16>
    %31 = vector.extract_strided_slice %28 {offsets = [6, 0], sizes = [32, 16], strides = [1, 1]} : vector<38x16xbf16> to vector<32x16xbf16>
    %32 = tpu.concatenate %29, %30, %31 in 1 : vector<32x16xbf16>, vector<32x16xbf16>, vector<32x16xbf16> -> vector<32x48xbf16>
    %c0_11 = arith.constant 0 : index
    %c0_12 = arith.constant 0 : index
    %33 = vector.load %arg5[%c0_11, %c0_12] : memref<48x16xbf16, #tpu.memory_space<vmem>>, vector<48x16xbf16>
    %cst_13 = arith.constant dense<0.000000e+00> : vector<32x16xf32>
    %34 = tpu.matmul %32, %33, %cst_13 {dimension_numbers = #tpu.dot_dimension_numbers<[1], [0], [0], [1], [0, 0, 1, 1], [], []>} : vector<32x48xbf16>, vector<48x16xbf16>, vector<32x16xf32> -> vector<32x16xf32>
    %c0_14 = arith.constant 0 : index
    %c0_15 = arith.constant 0 : index
    %35 = vector.load %arg6[%c0_14, %c0_15] : memref<1x16xf32, #tpu.memory_space<vmem>>, vector<1x16xf32>
    %36 = vector.broadcast %35 : vector<1x16xf32> to vector<32x16xf32>
    %37 = arith.addf %34, %36 : vector<32x16xf32>
    %38 = arith.truncf %37 : vector<32x16xf32> to vector<32x16xbf16>
    %c0_16 = arith.constant 0 : index
    %c0_17 = arith.constant 0 : index
    %c0_18 = arith.constant 0 : index
    %39 = vector.load %arg7[%c0_16, %c0_17, %c0_18] : memref<1x32x16xbf16, #tpu.memory_space<vmem>>, vector<1x32x16xbf16>
    %40 = vector.shape_cast %39 : vector<1x32x16xbf16> to vector<32x16xbf16>
    %41 = vector.shape_cast %38 : vector<32x16xbf16> to vector<1x32x16xbf16>
    tpu.vector_store %arg7[%c0_16, %c0_17, %c0_18], %41 {strides = array<i32>} : memref<1x32x16xbf16, #tpu.memory_space<vmem>>, vector<1x32x16xbf16>,
    return
  }
  func.func @transform_0(%arg0: i32, %arg1: i32) -> (i32, i32, i32) {
    %c1_i32 = arith.constant 1 : i32
    %0 = arith.subi %arg1, %c1_i32 : i32
    %c0_i32 = arith.constant 0 : i32
    %c0_i32_0 = arith.constant 0 : i32
    %1 = arith.maxsi %c0_i32, %0 : i32
    %2 = arith.minsi %c0_i32_0, %1 : i32
    %c0_i32_1 = arith.constant 0 : i32
    %c0_i32_2 = arith.constant 0 : i32
    return %arg0, %2, %c0_i32_1 : i32, i32, i32
  }
  func.func @transform_1(%arg0: i32, %arg1: i32) -> (i32, i32, i32) {
    %c0_i32 = arith.constant 0 : i32
    %0 = arith.minsi %arg1, %c0_i32 : i32
    %c0_i32_0 = arith.constant 0 : i32
    %c0_i32_1 = arith.constant 0 : i32
    return %arg0, %0, %c0_i32_0 : i32, i32, i32
  }
  func.func @transform_2(%arg0: i32, %arg1: i32) -> (i32, i32, i32) {
    %c1_i32 = arith.constant 1 : i32
    %0 = arith.addi %arg1, %c1_i32 : i32
    %c0_i32 = arith.constant 0 : i32
    %1 = arith.minsi %0, %c0_i32 : i32
    %c0_i32_0 = arith.constant 0 : i32
    %c0_i32_1 = arith.constant 0 : i32
    return %arg0, %1, %c0_i32_0 : i32, i32, i32
  }
  func.func @transform_3(%arg0: i32, %arg1: i32) -> (i32, i32) {
    %c0_i32 = arith.constant 0 : i32
    %c0_i32_0 = arith.constant 0 : i32
    %c0_i32_1 = arith.constant 0 : i32
    return %c0_i32, %c0_i32_0 : i32, i32
  }
  func.func @transform_4(%arg0: i32, %arg1: i32) -> (i32, i32) {
    %c0_i32 = arith.constant 0 : i32
    %c0_i32_0 = arith.constant 0 : i32
    %c0_i32_1 = arith.constant 0 : i32
    return %c0_i32, %c0_i32_0 : i32, i32
  }
  func.func @transform_5(%arg0: i32, %arg1: i32) -> (i32, i32, i32) {
    %c0_i32 = arith.constant 0 : i32
    %c0_i32_0 = arith.constant 0 : i32
    return %arg0, %arg1, %c0_i32 : i32, i32, i32
  }
}

module attributes {stable_mosaic.version = 11 : i64} {
  func.func @_conv1d_kernel(%arg0: i32, %arg1: i32, %arg2: memref<1x32x16xbf16, #tpu.memory_space<vmem>>, %arg3: memref<1x32x16xbf16, #tpu.memory_space<vmem>>, %arg4: memref<1x32x16xbf16, #tpu.memory_space<vmem>>, %arg5: memref<48x16xbf16, #tpu.memory_space<vmem>>, %arg6: memref<1x16xf32, #tpu.memory_space<vmem>>, %arg7: memref<1x32x16xbf16, #tpu.memory_space<vmem>>, %arg8: memref<1x32x16xbf16, #tpu.memory_space<vmem>>) attributes {dimension_semantics = [#tpu.dimension_semantics<parallel>, #tpu.dimension_semantics<parallel>], iteration_bounds = array<i64: 2, 1>, scalar_prefetch = 0 : i64, scratch_operands = 0 : i64, tpu.core_type = #tpu.core_type<tc>, window_params = [{transform_indices = @transform_0, window_bounds = array<i64: 1, 32, 16>}, {transform_indices = @transform_1, window_bounds = array<i64: 1, 32, 16>}, {transform_indices = @transform_2, window_bounds = array<i64: 1, 32, 16>}, {pipeline_mode = #tpu.pipeline_mode<synchronous>, transform_indices = @transform_3, window_bounds = array<i64: 48, 16>}, {pipeline_mode = #tpu.pipeline_mode<synchronous>, transform_indices = @transform_4, window_bounds = array<i64: 1, 16>}, {transform_indices = @transform_5, window_bounds = array<i64: 1, 32, 16>}, {transform_indices = @transform_6, window_bounds = array<i64: 1, 32, 16>}]} {
    %c0 = arith.constant 0 : index
    %c0_0 = arith.constant 0 : index
    %c0_1 = arith.constant 0 : index
    %0 = vector.load %arg2[%c0, %c0_0, %c0_1] : memref<1x32x16xbf16, #tpu.memory_space<vmem>>, vector<1x32x16xbf16>
    %1 = vector.shape_cast %0 : vector<1x32x16xbf16> to vector<32x16xbf16>
    %2 = vector.extract_strided_slice %1 {offsets = [31, 0], sizes = [1, 16], strides = [1, 1]} : vector<32x16xbf16> to vector<1x16xbf16>
    %c0_2 = arith.constant 0 : index
    %c0_3 = arith.constant 0 : index
    %c0_4 = arith.constant 0 : index
    %3 = vector.load %arg3[%c0_2, %c0_3, %c0_4] : memref<1x32x16xbf16, #tpu.memory_space<vmem>>, vector<1x32x16xbf16>
    %4 = vector.shape_cast %3 : vector<1x32x16xbf16> to vector<32x16xbf16>
    %c0_5 = arith.constant 0 : index
    %c0_6 = arith.constant 0 : index
    %c0_7 = arith.constant 0 : index
    %5 = vector.load %arg4[%c0_5, %c0_6, %c0_7] : memref<1x32x16xbf16, #tpu.memory_space<vmem>>, vector<1x32x16xbf16>
    %6 = vector.shape_cast %5 : vector<1x32x16xbf16> to vector<32x16xbf16>
    %7 = vector.extract_strided_slice %6 {offsets = [0, 0], sizes = [1, 16], strides = [1, 1]} : vector<32x16xbf16> to vector<1x16xbf16>
    %8 = tpu.concatenate %2, %4, %7 in 0 : vector<1x16xbf16>, vector<32x16xbf16>, vector<1x16xbf16> -> vector<34x16xbf16>
    %c32_i32 = arith.constant 32 : i32
    %9 = arith.muli %arg1, %c32_i32 : i32
    %c1_i32 = arith.constant 1 : i32
    %10 = arith.subi %9, %c1_i32 : i32
    %11 = tpu.iota {dimensions = array<i32: 0>} : vector<34x1xi32>
    %12 = vector.broadcast %10 : i32 to vector<34x1xi32>
    %13 = arith.addi %12, %11 : vector<34x1xi32>
    %c0_i32 = arith.constant 0 : i32
    %14 = vector.broadcast %c0_i32 : i32 to vector<34x1xi32>
    %15 = arith.cmpi sge, %13, %14 : vector<34x1xi32>
    %c32_i32_8 = arith.constant 32 : i32
    %16 = vector.broadcast %c32_i32_8 : i32 to vector<34x1xi32>
    %17 = arith.cmpi slt, %13, %16 : vector<34x1xi32>
    %18 = arith.andi %15, %17 : vector<34x1xi1>
    %c0_i32_9 = arith.constant 0 : i32
    %19 = arith.sitofp %c0_i32_9 : i32 to bf16
    %20 = vector.shape_cast %18 : vector<34x1xi1> to vector<34x1xi1>
    %21 = vector.broadcast %20 : vector<34x1xi1> to vector<34x16xi1>
    %22 = vector.broadcast %19 : bf16 to vector<34x16xbf16>
    %23 = arith.select %21, %8, %22 : vector<34x16xi1>, vector<34x16xbf16>
    %cst = arith.constant 0.000000e+00 : bf16
    %24 = vector.broadcast %cst : bf16 to vector<34x16xbf16>
    %25 = arith.cmpf oge, %23, %24 : vector<34x16xbf16>
    %cst_10 = arith.constant 1.000980e-01 : bf16
    %26 = vector.broadcast %cst_10 : bf16 to vector<34x16xbf16>
    %27 = arith.mulf %26, %23 : vector<34x16xbf16>
    %28 = arith.select %25, %23, %27 : vector<34x16xi1>, vector<34x16xbf16>
    %29 = vector.extract_strided_slice %28 {offsets = [0, 0], sizes = [32, 16], strides = [1, 1]} : vector<34x16xbf16> to vector<32x16xbf16>
    %30 = vector.extract_strided_slice %28 {offsets = [1, 0], sizes = [32, 16], strides = [1, 1]} : vector<34x16xbf16> to vector<32x16xbf16>
    %31 = vector.extract_strided_slice %28 {offsets = [2, 0], sizes = [32, 16], strides = [1, 1]} : vector<34x16xbf16> to vector<32x16xbf16>
    %32 = tpu.concatenate %29, %30, %31 in 1 : vector<32x16xbf16>, vector<32x16xbf16>, vector<32x16xbf16> -> vector<32x48xbf16>
    %c0_11 = arith.constant 0 : index
    %c0_12 = arith.constant 0 : index
    %33 = vector.load %arg5[%c0_11, %c0_12] : memref<48x16xbf16, #tpu.memory_space<vmem>>, vector<48x16xbf16>
    %cst_13 = arith.constant dense<0.000000e+00> : vector<32x16xf32>
    %34 = tpu.matmul %32, %33, %cst_13 {dimension_numbers = #tpu.dot_dimension_numbers<[1], [0], [0], [1], [0, 0, 1, 1], [], []>} : vector<32x48xbf16>, vector<48x16xbf16>, vector<32x16xf32> -> vector<32x16xf32>
    %c0_14 = arith.constant 0 : index
    %c0_15 = arith.constant 0 : index
    %35 = vector.load %arg6[%c0_14, %c0_15] : memref<1x16xf32, #tpu.memory_space<vmem>>, vector<1x16xf32>
    %36 = vector.broadcast %35 : vector<1x16xf32> to vector<32x16xf32>
    %37 = arith.addf %34, %36 : vector<32x16xf32>
    %c0_16 = arith.constant 0 : index
    %c0_17 = arith.constant 0 : index
    %c0_18 = arith.constant 0 : index
    %38 = vector.load %arg7[%c0_16, %c0_17, %c0_18] : memref<1x32x16xbf16, #tpu.memory_space<vmem>>, vector<1x32x16xbf16>
    %39 = vector.shape_cast %38 : vector<1x32x16xbf16> to vector<32x16xbf16>
    %40 = arith.extf %39 : vector<32x16xbf16> to vector<32x16xf32>
    %41 = arith.addf %37, %40 : vector<32x16xf32>
    %42 = arith.truncf %41 : vector<32x16xf32> to vector<32x16xbf16>
    %c0_19 = arith.constant 0 : index
    %c0_20 = arith.constant 0 : index
    %c0_21 = arith.constant 0 : index
    %43 = vector.load %arg8[%c0_19, %c0_20, %c0_21] : memref<1x32x16xbf16, #tpu.memory_space<vmem>>, vector<1x32x16xbf16>
    %44 = vector.shape_cast %43 : vector<1x32x16xbf16> to vector<32x16xbf16>
    %45 = vector.shape_cast %42 : vector<32x16xbf16> to vector<1x32x16xbf16>
    tpu.vector_store %arg8[%c0_19, %c0_20, %c0_21], %45 {strides = array<i32>} : memref<1x32x16xbf16, #tpu.memory_space<vmem>>, vector<1x32x16xbf16>,
    return
  }
  func.func @transform_0(%arg0: i32, %arg1: i32) -> (i32, i32, i32) {
    %c1_i32 = arith.constant 1 : i32
    %0 = arith.subi %arg1, %c1_i32 : i32
    %c0_i32 = arith.constant 0 : i32
    %c0_i32_0 = arith.constant 0 : i32
    %1 = arith.maxsi %c0_i32, %0 : i32
    %2 = arith.minsi %c0_i32_0, %1 : i32
    %c0_i32_1 = arith.constant 0 : i32
    %c0_i32_2 = arith.constant 0 : i32
    return %arg0, %2, %c0_i32_1 : i32, i32, i32
  }
  func.func @transform_1(%arg0: i32, %arg1: i32) -> (i32, i32, i32) {
    %c0_i32 = arith.constant 0 : i32
    %0 = arith.minsi %arg1, %c0_i32 : i32
    %c0_i32_0 = arith.constant 0 : i32
    %c0_i32_1 = arith.constant 0 : i32
    return %arg0, %0, %c0_i32_0 : i32, i32, i32
  }
  func.func @transform_2(%arg0: i32, %arg1: i32) -> (i32, i32, i32) {
    %c1_i32 = arith.constant 1 : i32
    %0 = arith.addi %arg1, %c1_i32 : i32
    %c0_i32 = arith.constant 0 : i32
    %1 = arith.minsi %0, %c0_i32 : i32
    %c0_i32_0 = arith.constant 0 : i32
    %c0_i32_1 = arith.constant 0 : i32
    return %arg0, %1, %c0_i32_0 : i32, i32, i32
  }
  func.func @transform_3(%arg0: i32, %arg1: i32) -> (i32, i32) {
    %c0_i32 = arith.constant 0 : i32
    %c0_i32_0 = arith.constant 0 : i32
    %c0_i32_1 = arith.constant 0 : i32
    return %c0_i32, %c0_i32_0 : i32, i32
  }
  func.func @transform_4(%arg0: i32, %arg1: i32) -> (i32, i32) {
    %c0_i32 = arith.constant 0 : i32
    %c0_i32_0 = arith.constant 0 : i32
    %c0_i32_1 = arith.constant 0 : i32
    return %c0_i32, %c0_i32_0 : i32, i32
  }
  func.func @transform_5(%arg0: i32, %arg1: i32) -> (i32, i32, i32) {
    %c0_i32 = arith.constant 0 : i32
    %c0_i32_0 = arith.constant 0 : i32
    return %arg0, %arg1, %c0_i32 : i32, i32, i32
  }
  func.func @transform_6(%arg0: i32, %arg1: i32) -> (i32, i32, i32) {
    %c0_i32 = arith.constant 0 : i32
    %c0_i32_0 = arith.constant 0 : i32
    return %arg0, %arg1, %c0_i32 : i32, i32, i32
  }
}

module attributes {stable_mosaic.version = 11 : i64} {
  func.func @_conv1d_kernel(%arg0: i32, %arg1: i32, %arg2: memref<1x32x16xbf16, #tpu.memory_space<vmem>>, %arg3: memref<1x32x16xbf16, #tpu.memory_space<vmem>>, %arg4: memref<1x32x16xbf16, #tpu.memory_space<vmem>>, %arg5: memref<48x16xbf16, #tpu.memory_space<vmem>>, %arg6: memref<1x16xf32, #tpu.memory_space<vmem>>, %arg7: memref<1x32x16xbf16, #tpu.memory_space<vmem>>) attributes {dimension_semantics = [#tpu.dimension_semantics<parallel>, #tpu.dimension_semantics<parallel>], iteration_bounds = array<i64: 2, 1>, scalar_prefetch = 0 : i64, scratch_operands = 0 : i64, tpu.core_type = #tpu.core_type<tc>, window_params = [{transform_indices = @transform_0, window_bounds = array<i64: 1, 32, 16>}, {transform_indices = @transform_1, window_bounds = array<i64: 1, 32, 16>}, {transform_indices = @transform_2, window_bounds = array<i64: 1, 32, 16>}, {pipeline_mode = #tpu.pipeline_mode<synchronous>, transform_indices = @transform_3, window_bounds = array<i64: 48, 16>}, {pipeline_mode = #tpu.pipeline_mode<synchronous>, transform_indices = @transform_4, window_bounds = array<i64: 1, 16>}, {transform_indices = @transform_5, window_bounds = array<i64: 1, 32, 16>}]} {
    %c0 = arith.constant 0 : index
    %c0_0 = arith.constant 0 : index
    %c0_1 = arith.constant 0 : index
    %0 = vector.load %arg2[%c0, %c0_0, %c0_1] : memref<1x32x16xbf16, #tpu.memory_space<vmem>>, vector<1x32x16xbf16>
    %1 = vector.shape_cast %0 : vector<1x32x16xbf16> to vector<32x16xbf16>
    %2 = vector.extract_strided_slice %1 {offsets = [27, 0], sizes = [5, 16], strides = [1, 1]} : vector<32x16xbf16> to vector<5x16xbf16>
    %c0_2 = arith.constant 0 : index
    %c0_3 = arith.constant 0 : index
    %c0_4 = arith.constant 0 : index
    %3 = vector.load %arg3[%c0_2, %c0_3, %c0_4] : memref<1x32x16xbf16, #tpu.memory_space<vmem>>, vector<1x32x16xbf16>
    %4 = vector.shape_cast %3 : vector<1x32x16xbf16> to vector<32x16xbf16>
    %c0_5 = arith.constant 0 : index
    %c0_6 = arith.constant 0 : index
    %c0_7 = arith.constant 0 : index
    %5 = vector.load %arg4[%c0_5, %c0_6, %c0_7] : memref<1x32x16xbf16, #tpu.memory_space<vmem>>, vector<1x32x16xbf16>
    %6 = vector.shape_cast %5 : vector<1x32x16xbf16> to vector<32x16xbf16>
    %7 = vector.extract_strided_slice %6 {offsets = [0, 0], sizes = [5, 16], strides = [1, 1]} : vector<32x16xbf16> to vector<5x16xbf16>
    %8 = tpu.concatenate %2, %4, %7 in 0 : vector<5x16xbf16>, vector<32x16xbf16>, vector<5x16xbf16> -> vector<42x16xbf16>
    %c32_i32 = arith.constant 32 : i32
    %9 = arith.muli %arg1, %c32_i32 : i32
    %c5_i32 = arith.constant 5 : i32
    %10 = arith.subi %9, %c5_i32 : i32
    %11 = tpu.iota {dimensions = array<i32: 0>} : vector<42x1xi32>
    %12 = vector.broadcast %10 : i32 to vector<42x1xi32>
    %13 = arith.addi %12, %11 : vector<42x1xi32>
    %c0_i32 = arith.constant 0 : i32
    %14 = vector.broadcast %c0_i32 : i32 to vector<42x1xi32>
    %15 = arith.cmpi sge, %13, %14 : vector<42x1xi32>
    %c32_i32_8 = arith.constant 32 : i32
    %16 = vector.broadcast %c32_i32_8 : i32 to vector<42x1xi32>
    %17 = arith.cmpi slt, %13, %16 : vector<42x1xi32>
    %18 = arith.andi %15, %17 : vector<42x1xi1>
    %c0_i32_9 = arith.constant 0 : i32
    %19 = arith.sitofp %c0_i32_9 : i32 to bf16
    %20 = vector.shape_cast %18 : vector<42x1xi1> to vector<42x1xi1>
    %21 = vector.broadcast %20 : vector<42x1xi1> to vector<42x16xi1>
    %22 = vector.broadcast %19 : bf16 to vector<42x16xbf16>
    %23 = arith.select %21, %8, %22 : vector<42x16xi1>, vector<42x16xbf16>
    %cst = arith.constant 0.000000e+00 : bf16
    %24 = vector.broadcast %cst : bf16 to vector<42x16xbf16>
    %25 = arith.cmpf oge, %23, %24 : vector<42x16xbf16>
    %cst_10 = arith.constant 1.000980e-01 : bf16
    %26 = vector.broadcast %cst_10 : bf16 to vector<42x16xbf16>
    %27 = arith.mulf %26, %23 : vector<42x16xbf16>
    %28 = arith.select %25, %23, %27 : vector<42x16xi1>, vector<42x16xbf16>
    %29 = vector.extract_strided_slice %28 {offsets = [0, 0], sizes = [32, 16], strides = [1, 1]} : vector<42x16xbf16> to vector<32x16xbf16>
    %30 = vector.extract_strided_slice %28 {offsets = [5, 0], sizes = [32, 16], strides = [1, 1]} : vector<42x16xbf16> to vector<32x16xbf16>
    %31 = vector.extract_strided_slice %28 {offsets = [10, 0], sizes = [32, 16], strides = [1, 1]} : vector<42x16xbf16> to vector<32x16xbf16>
    %32 = tpu.concatenate %29, %30, %31 in 1 : vector<32x16xbf16>, vector<32x16xbf16>, vector<32x16xbf16> -> vector<32x48xbf16>
    %c0_11 = arith.constant 0 : index
    %c0_12 = arith.constant 0 : index
    %33 = vector.load %arg5[%c0_11, %c0_12] : memref<48x16xbf16, #tpu.memory_space<vmem>>, vector<48x16xbf16>
    %cst_13 = arith.constant dense<0.000000e+00> : vector<32x16xf32>
    %34 = tpu.matmul %32, %33, %cst_13 {dimension_numbers = #tpu.dot_dimension_numbers<[1], [0], [0], [1], [0, 0, 1, 1], [], []>} : vector<32x48xbf16>, vector<48x16xbf16>, vector<32x16xf32> -> vector<32x16xf32>
    %c0_14 = arith.constant 0 : index
    %c0_15 = arith.constant 0 : index
    %35 = vector.load %arg6[%c0_14, %c0_15] : memref<1x16xf32, #tpu.memory_space<vmem>>, vector<1x16xf32>
    %36 = vector.broadcast %35 : vector<1x16xf32> to vector<32x16xf32>
    %37 = arith.addf %34, %36 : vector<32x16xf32>
    %38 = arith.truncf %37 : vector<32x16xf32> to vector<32x16xbf16>
    %c0_16 = arith.constant 0 : index
    %c0_17 = arith.constant 0 : index
    %c0_18 = arith.constant 0 : index
    %39 = vector.load %arg7[%c0_16, %c0_17, %c0_18] : memref<1x32x16xbf16, #tpu.memory_space<vmem>>, vector<1x32x16xbf16>
    %40 = vector.shape_cast %39 : vector<1x32x16xbf16> to vector<32x16xbf16>
    %41 = vector.shape_cast %38 : vector<32x16xbf16> to vector<1x32x16xbf16>
    tpu.vector_store %arg7[%c0_16, %c0_17, %c0_18], %41 {strides = array<i32>} : memref<1x32x16xbf16, #tpu.memory_space<vmem>>, vector<1x32x16xbf16>,
    return
  }
  func.func @transform_0(%arg0: i32, %arg1: i32) -> (i32, i32, i32) {
    %c1_i32 = arith.constant 1 : i32
    %0 = arith.subi %arg1, %c1_i32 : i32
    %c0_i32 = arith.constant 0 : i32
    %c0_i32_0 = arith.constant 0 : i32
    %1 = arith.maxsi %c0_i32, %0 : i32
    %2 = arith.minsi %c0_i32_0, %1 : i32
    %c0_i32_1 = arith.constant 0 : i32
    %c0_i32_2 = arith.constant 0 : i32
    return %arg0, %2, %c0_i32_1 : i32, i32, i32
  }
  func.func @transform_1(%arg0: i32, %arg1: i32) -> (i32, i32, i32) {
    %c0_i32 = arith.constant 0 : i32
    %0 = arith.minsi %arg1, %c0_i32 : i32
    %c0_i32_0 = arith.constant 0 : i32
    %c0_i32_1 = arith.constant 0 : i32
    return %arg0, %0, %c0_i32_0 : i32, i32, i32
  }
  func.func @transform_2(%arg0: i32, %arg1: i32) -> (i32, i32, i32) {
    %c1_i32 = arith.constant 1 : i32
    %0 = arith.addi %arg1, %c1_i32 : i32
    %c0_i32 = arith.constant 0 : i32
    %1 = arith.minsi %0, %c0_i32 : i32
    %c0_i32_0 = arith.constant 0 : i32
    %c0_i32_1 = arith.constant 0 : i32
    return %arg0, %1, %c0_i32_0 : i32, i32, i32
  }
  func.func @transform_3(%arg0: i32, %arg1: i32) -> (i32, i32) {
    %c0_i32 = arith.constant 0 : i32
    %c0_i32_0 = arith.constant 0 : i32
    %c0_i32_1 = arith.constant 0 : i32
    return %c0_i32, %c0_i32_0 : i32, i32
  }
  func.func @transform_4(%arg0: i32, %arg1: i32) -> (i32, i32) {
    %c0_i32 = arith.constant 0 : i32
    %c0_i32_0 = arith.constant 0 : i32
    %c0_i32_1 = arith.constant 0 : i32
    return %c0_i32, %c0_i32_0 : i32, i32
  }
  func.func @transform_5(%arg0: i32, %arg1: i32) -> (i32, i32, i32) {
    %c0_i32 = arith.constant 0 : i32
    %c0_i32_0 = arith.constant 0 : i32
    return %arg0, %arg1, %c0_i32 : i32, i32, i32
  }
}

module attributes {stable_mosaic.version = 11 : i64} {
  func.func @_conv1d_kernel(%arg0: i32, %arg1: i32, %arg2: memref<1x64x8xbf16, #tpu.memory_space<vmem>>, %arg3: memref<1x64x8xbf16, #tpu.memory_space<vmem>>, %arg4: memref<1x64x8xbf16, #tpu.memory_space<vmem>>, %arg5: memref<24x8xbf16, #tpu.memory_space<vmem>>, %arg6: memref<1x8xf32, #tpu.memory_space<vmem>>, %arg7: memref<1x64x8xbf16, #tpu.memory_space<vmem>>) attributes {dimension_semantics = [#tpu.dimension_semantics<parallel>, #tpu.dimension_semantics<parallel>], iteration_bounds = array<i64: 2, 1>, scalar_prefetch = 0 : i64, scratch_operands = 0 : i64, tpu.core_type = #tpu.core_type<tc>, window_params = [{transform_indices = @transform_0, window_bounds = array<i64: 1, 64, 8>}, {transform_indices = @transform_1, window_bounds = array<i64: 1, 64, 8>}, {transform_indices = @transform_2, window_bounds = array<i64: 1, 64, 8>}, {pipeline_mode = #tpu.pipeline_mode<synchronous>, transform_indices = @transform_3, window_bounds = array<i64: 24, 8>}, {pipeline_mode = #tpu.pipeline_mode<synchronous>, transform_indices = @transform_4, window_bounds = array<i64: 1, 8>}, {transform_indices = @transform_5, window_bounds = array<i64: 1, 64, 8>}]} {
    %c0 = arith.constant 0 : index
    %c0_0 = arith.constant 0 : index
    %c0_1 = arith.constant 0 : index
    %0 = vector.load %arg2[%c0, %c0_0, %c0_1] : memref<1x64x8xbf16, #tpu.memory_space<vmem>>, vector<1x64x8xbf16>
    %1 = vector.shape_cast %0 : vector<1x64x8xbf16> to vector<64x8xbf16>
    %2 = vector.extract_strided_slice %1 {offsets = [63, 0], sizes = [1, 8], strides = [1, 1]} : vector<64x8xbf16> to vector<1x8xbf16>
    %c0_2 = arith.constant 0 : index
    %c0_3 = arith.constant 0 : index
    %c0_4 = arith.constant 0 : index
    %3 = vector.load %arg3[%c0_2, %c0_3, %c0_4] : memref<1x64x8xbf16, #tpu.memory_space<vmem>>, vector<1x64x8xbf16>
    %4 = vector.shape_cast %3 : vector<1x64x8xbf16> to vector<64x8xbf16>
    %c0_5 = arith.constant 0 : index
    %c0_6 = arith.constant 0 : index
    %c0_7 = arith.constant 0 : index
    %5 = vector.load %arg4[%c0_5, %c0_6, %c0_7] : memref<1x64x8xbf16, #tpu.memory_space<vmem>>, vector<1x64x8xbf16>
    %6 = vector.shape_cast %5 : vector<1x64x8xbf16> to vector<64x8xbf16>
    %7 = vector.extract_strided_slice %6 {offsets = [0, 0], sizes = [1, 8], strides = [1, 1]} : vector<64x8xbf16> to vector<1x8xbf16>
    %8 = tpu.concatenate %2, %4, %7 in 0 : vector<1x8xbf16>, vector<64x8xbf16>, vector<1x8xbf16> -> vector<66x8xbf16>
    %c64_i32 = arith.constant 64 : i32
    %9 = arith.muli %arg1, %c64_i32 : i32
    %c1_i32 = arith.constant 1 : i32
    %10 = arith.subi %9, %c1_i32 : i32
    %11 = tpu.iota {dimensions = array<i32: 0>} : vector<66x1xi32>
    %12 = vector.broadcast %10 : i32 to vector<66x1xi32>
    %13 = arith.addi %12, %11 : vector<66x1xi32>
    %c0_i32 = arith.constant 0 : i32
    %14 = vector.broadcast %c0_i32 : i32 to vector<66x1xi32>
    %15 = arith.cmpi sge, %13, %14 : vector<66x1xi32>
    %c64_i32_8 = arith.constant 64 : i32
    %16 = vector.broadcast %c64_i32_8 : i32 to vector<66x1xi32>
    %17 = arith.cmpi slt, %13, %16 : vector<66x1xi32>
    %18 = arith.andi %15, %17 : vector<66x1xi1>
    %c0_i32_9 = arith.constant 0 : i32
    %19 = arith.sitofp %c0_i32_9 : i32 to bf16
    %20 = vector.shape_cast %18 : vector<66x1xi1> to vector<66x1xi1>
    %21 = vector.broadcast %20 : vector<66x1xi1> to vector<66x8xi1>
    %22 = vector.broadcast %19 : bf16 to vector<66x8xbf16>
    %23 = arith.select %21, %8, %22 : vector<66x8xi1>, vector<66x8xbf16>
    %cst = arith.constant 0.000000e+00 : bf16
    %24 = vector.broadcast %cst : bf16 to vector<66x8xbf16>
    %25 = arith.cmpf oge, %23, %24 : vector<66x8xbf16>
    %cst_10 = arith.constant 1.000980e-01 : bf16
    %26 = vector.broadcast %cst_10 : bf16 to vector<66x8xbf16>
    %27 = arith.mulf %26, %23 : vector<66x8xbf16>
    %28 = arith.select %25, %23, %27 : vector<66x8xi1>, vector<66x8xbf16>
    %29 = vector.extract_strided_slice %28 {offsets = [0, 0], sizes = [64, 8], strides = [1, 1]} : vector<66x8xbf16> to vector<64x8xbf16>
    %30 = vector.extract_strided_slice %28 {offsets = [1, 0], sizes = [64, 8], strides = [1, 1]} : vector<66x8xbf16> to vector<64x8xbf16>
    %31 = vector.extract_strided_slice %28 {offsets = [2, 0], sizes = [64, 8], strides = [1, 1]} : vector<66x8xbf16> to vector<64x8xbf16>
    %32 = tpu.concatenate %29, %30, %31 in 1 : vector<64x8xbf16>, vector<64x8xbf16>, vector<64x8xbf16> -> vector<64x24xbf16>
    %c0_11 = arith.constant 0 : index
    %c0_12 = arith.constant 0 : index
    %33 = vector.load %arg5[%c0_11, %c0_12] : memref<24x8xbf16, #tpu.memory_space<vmem>>, vector<24x8xbf16>
    %cst_13 = arith.constant dense<0.000000e+00> : vector<64x8xf32>
    %34 = tpu.matmul %32, %33, %cst_13 {dimension_numbers = #tpu.dot_dimension_numbers<[1], [0], [0], [1], [0, 0, 1, 1], [], []>} : vector<64x24xbf16>, vector<24x8xbf16>, vector<64x8xf32> -> vector<64x8xf32>
    %c0_14 = arith.constant 0 : index
    %c0_15 = arith.constant 0 : index
    %35 = vector.load %arg6[%c0_14, %c0_15] : memref<1x8xf32, #tpu.memory_space<vmem>>, vector<1x8xf32>
    %36 = vector.broadcast %35 : vector<1x8xf32> to vector<64x8xf32>
    %37 = arith.addf %34, %36 : vector<64x8xf32>
    %38 = arith.truncf %37 : vector<64x8xf32> to vector<64x8xbf16>
    %c0_16 = arith.constant 0 : index
    %c0_17 = arith.constant 0 : index
    %c0_18 = arith.constant 0 : index
    %39 = vector.load %arg7[%c0_16, %c0_17, %c0_18] : memref<1x64x8xbf16, #tpu.memory_space<vmem>>, vector<1x64x8xbf16>
    %40 = vector.shape_cast %39 : vector<1x64x8xbf16> to vector<64x8xbf16>
    %41 = vector.shape_cast %38 : vector<64x8xbf16> to vector<1x64x8xbf16>
    tpu.vector_store %arg7[%c0_16, %c0_17, %c0_18], %41 {strides = array<i32>} : memref<1x64x8xbf16, #tpu.memory_space<vmem>>, vector<1x64x8xbf16>,
    return
  }
  func.func @transform_0(%arg0: i32, %arg1: i32) -> (i32, i32, i32) {
    %c1_i32 = arith.constant 1 : i32
    %0 = arith.subi %arg1, %c1_i32 : i32
    %c0_i32 = arith.constant 0 : i32
    %c0_i32_0 = arith.constant 0 : i32
    %1 = arith.maxsi %c0_i32, %0 : i32
    %2 = arith.minsi %c0_i32_0, %1 : i32
    %c0_i32_1 = arith.constant 0 : i32
    %c0_i32_2 = arith.constant 0 : i32
    return %arg0, %2, %c0_i32_1 : i32, i32, i32
  }
  func.func @transform_1(%arg0: i32, %arg1: i32) -> (i32, i32, i32) {
    %c0_i32 = arith.constant 0 : i32
    %0 = arith.minsi %arg1, %c0_i32 : i32
    %c0_i32_0 = arith.constant 0 : i32
    %c0_i32_1 = arith.constant 0 : i32
    return %arg0, %0, %c0_i32_0 : i32, i32, i32
  }
  func.func @transform_2(%arg0: i32, %arg1: i32) -> (i32, i32, i32) {
    %c1_i32 = arith.constant 1 : i32
    %0 = arith.addi %arg1, %c1_i32 : i32
    %c0_i32 = arith.constant 0 : i32
    %1 = arith.minsi %0, %c0_i32 : i32
    %c0_i32_0 = arith.constant 0 : i32
    %c0_i32_1 = arith.constant 0 : i32
    return %arg0, %1, %c0_i32_0 : i32, i32, i32
  }
  func.func @transform_3(%arg0: i32, %arg1: i32) -> (i32, i32) {
    %c0_i32 = arith.constant 0 : i32
    %c0_i32_0 = arith.constant 0 : i32
    %c0_i32_1 = arith.constant 0 : i32
    return %c0_i32, %c0_i32_0 : i32, i32
  }
  func.func @transform_4(%arg0: i32, %arg1: i32) -> (i32, i32) {
    %c0_i32 = arith.constant 0 : i32
    %c0_i32_0 = arith.constant 0 : i32
    %c0_i32_1 = arith.constant 0 : i32
    return %c0_i32, %c0_i32_0 : i32, i32
  }
  func.func @transform_5(%arg0: i32, %arg1: i32) -> (i32, i32, i32) {
    %c0_i32 = arith.constant 0 : i32
    %c0_i32_0 = arith.constant 0 : i32
    return %arg0, %arg1, %c0_i32 : i32, i32, i32
  }
}

module attributes {stable_mosaic.version = 11 : i64} {
  func.func @_conv1d_kernel(%arg0: i32, %arg1: i32, %arg2: memref<1x56x16xbf16, #tpu.memory_space<vmem>>, %arg3: memref<1x56x16xbf16, #tpu.memory_space<vmem>>, %arg4: memref<1x56x16xbf16, #tpu.memory_space<vmem>>, %arg5: memref<64x8xbf16, #tpu.memory_space<vmem>>, %arg6: memref<1x8xf32, #tpu.memory_space<vmem>>, %arg7: memref<1x56x8xbf16, #tpu.memory_space<vmem>>) attributes {dimension_semantics = [#tpu.dimension_semantics<parallel>, #tpu.dimension_semantics<parallel>], iteration_bounds = array<i64: 2, 2>, scalar_prefetch = 0 : i64, scratch_operands = 0 : i64, tpu.core_type = #tpu.core_type<tc>, window_params = [{transform_indices = @transform_0, window_bounds = array<i64: 1, 56, 16>}, {transform_indices = @transform_1, window_bounds = array<i64: 1, 56, 16>}, {transform_indices = @transform_2, window_bounds = array<i64: 1, 56, 16>}, {pipeline_mode = #tpu.pipeline_mode<synchronous>, transform_indices = @transform_3, window_bounds = array<i64: 64, 8>}, {pipeline_mode = #tpu.pipeline_mode<synchronous>, transform_indices = @transform_4, window_bounds = array<i64: 1, 8>}, {transform_indices = @transform_5, window_bounds = array<i64: 1, 56, 8>}]} {
    %c0 = arith.constant 0 : index
    %c0_0 = arith.constant 0 : index
    %c0_1 = arith.constant 0 : index
    %0 = vector.load %arg2[%c0, %c0_0, %c0_1] : memref<1x56x16xbf16, #tpu.memory_space<vmem>>, vector<1x56x16xbf16>
    %1 = vector.shape_cast %0 : vector<1x56x16xbf16> to vector<56x16xbf16>
    %2 = vector.extract_strided_slice %1 {offsets = [54, 0], sizes = [2, 16], strides = [1, 1]} : vector<56x16xbf16> to vector<2x16xbf16>
    %c0_2 = arith.constant 0 : index
    %c0_3 = arith.constant 0 : index
    %c0_4 = arith.constant 0 : index
    %3 = vector.load %arg3[%c0_2, %c0_3, %c0_4] : memref<1x56x16xbf16, #tpu.memory_space<vmem>>, vector<1x56x16xbf16>
    %4 = vector.shape_cast %3 : vector<1x56x16xbf16> to vector<56x16xbf16>
    %c0_5 = arith.constant 0 : index
    %c0_6 = arith.constant 0 : index
    %c0_7 = arith.constant 0 : index
    %5 = vector.load %arg4[%c0_5, %c0_6, %c0_7] : memref<1x56x16xbf16, #tpu.memory_space<vmem>>, vector<1x56x16xbf16>
    %6 = vector.shape_cast %5 : vector<1x56x16xbf16> to vector<56x16xbf16>
    %7 = vector.extract_strided_slice %6 {offsets = [0, 0], sizes = [1, 16], strides = [1, 1]} : vector<56x16xbf16> to vector<1x16xbf16>
    %8 = tpu.concatenate %2, %4, %7 in 0 : vector<2x16xbf16>, vector<56x16xbf16>, vector<1x16xbf16> -> vector<59x16xbf16>
    %c56_i32 = arith.constant 56 : i32
    %9 = arith.muli %arg1, %c56_i32 : i32
    %c2_i32 = arith.constant 2 : i32
    %10 = arith.subi %9, %c2_i32 : i32
    %11 = tpu.iota {dimensions = array<i32: 0>} : vector<59x1xi32>
    %12 = vector.broadcast %10 : i32 to vector<59x1xi32>
    %13 = arith.addi %12, %11 : vector<59x1xi32>
    %c0_i32 = arith.constant 0 : i32
    %14 = vector.broadcast %c0_i32 : i32 to vector<59x1xi32>
    %15 = arith.cmpi sge, %13, %14 : vector<59x1xi32>
    %c63_i32 = arith.constant 63 : i32
    %16 = vector.broadcast %c63_i32 : i32 to vector<59x1xi32>
    %17 = arith.cmpi slt, %13, %16 : vector<59x1xi32>
    %18 = arith.andi %15, %17 : vector<59x1xi1>
    %c0_i32_8 = arith.constant 0 : i32
    %19 = arith.sitofp %c0_i32_8 : i32 to bf16
    %20 = vector.shape_cast %18 : vector<59x1xi1> to vector<59x1xi1>
    %21 = vector.broadcast %20 : vector<59x1xi1> to vector<59x16xi1>
    %22 = vector.broadcast %19 : bf16 to vector<59x16xbf16>
    %23 = arith.select %21, %8, %22 : vector<59x16xi1>, vector<59x16xbf16>
    %cst = arith.constant 0.000000e+00 : bf16
    %24 = vector.broadcast %cst : bf16 to vector<59x16xbf16>
    %25 = arith.cmpf oge, %23, %24 : vector<59x16xbf16>
    %cst_9 = arith.constant 1.000980e-01 : bf16
    %26 = vector.broadcast %cst_9 : bf16 to vector<59x16xbf16>
    %27 = arith.mulf %26, %23 : vector<59x16xbf16>
    %28 = arith.select %25, %23, %27 : vector<59x16xi1>, vector<59x16xbf16>
    %29 = vector.extract_strided_slice %28 {offsets = [0, 0], sizes = [56, 16], strides = [1, 1]} : vector<59x16xbf16> to vector<56x16xbf16>
    %30 = vector.extract_strided_slice %28 {offsets = [1, 0], sizes = [56, 16], strides = [1, 1]} : vector<59x16xbf16> to vector<56x16xbf16>
    %31 = vector.extract_strided_slice %28 {offsets = [2, 0], sizes = [56, 16], strides = [1, 1]} : vector<59x16xbf16> to vector<56x16xbf16>
    %32 = vector.extract_strided_slice %28 {offsets = [3, 0], sizes = [56, 16], strides = [1, 1]} : vector<59x16xbf16> to vector<56x16xbf16>
    %33 = tpu.concatenate %29, %30, %31, %32 in 1 : vector<56x16xbf16>, vector<56x16xbf16>, vector<56x16xbf16>, vector<56x16xbf16> -> vector<56x64xbf16>
    %c0_10 = arith.constant 0 : index
    %c0_11 = arith.constant 0 : index
    %34 = vector.load %arg5[%c0_10, %c0_11] : memref<64x8xbf16, #tpu.memory_space<vmem>>, vector<64x8xbf16>
    %cst_12 = arith.constant dense<0.000000e+00> : vector<56x8xf32>
    %35 = tpu.matmul %33, %34, %cst_12 {dimension_numbers = #tpu.dot_dimension_numbers<[1], [0], [0], [1], [0, 0, 1, 1], [], []>} : vector<56x64xbf16>, vector<64x8xbf16>, vector<56x8xf32> -> vector<56x8xf32>
    %c0_13 = arith.constant 0 : index
    %c0_14 = arith.constant 0 : index
    %36 = vector.load %arg6[%c0_13, %c0_14] : memref<1x8xf32, #tpu.memory_space<vmem>>, vector<1x8xf32>
    %37 = vector.broadcast %36 : vector<1x8xf32> to vector<56x8xf32>
    %38 = arith.addf %35, %37 : vector<56x8xf32>
    %39 = arith.truncf %38 : vector<56x8xf32> to vector<56x8xbf16>
    %c0_15 = arith.constant 0 : index
    %c0_16 = arith.constant 0 : index
    %c0_17 = arith.constant 0 : index
    %40 = vector.load %arg7[%c0_15, %c0_16, %c0_17] : memref<1x56x8xbf16, #tpu.memory_space<vmem>>, vector<1x56x8xbf16>
    %41 = vector.shape_cast %40 : vector<1x56x8xbf16> to vector<56x8xbf16>
    %42 = vector.shape_cast %39 : vector<56x8xbf16> to vector<1x56x8xbf16>
    tpu.vector_store %arg7[%c0_15, %c0_16, %c0_17], %42 {strides = array<i32>} : memref<1x56x8xbf16, #tpu.memory_space<vmem>>, vector<1x56x8xbf16>,
    return
  }
  func.func @transform_0(%arg0: i32, %arg1: i32) -> (i32, i32, i32) {
    %c1_i32 = arith.constant 1 : i32
    %0 = arith.subi %arg1, %c1_i32 : i32
    %c0_i32 = arith.constant 0 : i32
    %c1_i32_0 = arith.constant 1 : i32
    %1 = arith.maxsi %c0_i32, %0 : i32
    %2 = arith.minsi %c1_i32_0, %1 : i32
    %c0_i32_1 = arith.constant 0 : i32
    %c0_i32_2 = arith.constant 0 : i32
    return %arg0, %2, %c0_i32_1 : i32, i32, i32
  }
  func.func @transform_1(%arg0: i32, %arg1: i32) -> (i32, i32, i32) {
    %c1_i32 = arith.constant 1 : i32
    %0 = arith.minsi %arg1, %c1_i32 : i32
    %c0_i32 = arith.constant 0 : i32
    %c0_i32_0 = arith.constant 0 : i32
    return %arg0, %0, %c0_i32 : i32, i32, i32
  }
  func.func @transform_2(%arg0: i32, %arg1: i32) -> (i32, i32, i32) {
    %c1_i32 = arith.constant 1 : i32
    %0 = arith.addi %arg1, %c1_i32 : i32
    %c1_i32_0 = arith.constant 1 : i32
    %1 = arith.minsi %0, %c1_i32_0 : i32
    %c0_i32 = arith.constant 0 : i32
    %c0_i32_1 = arith.constant 0 : i32
    return %arg0, %1, %c0_i32 : i32, i32, i32
  }
  func.func @transform_3(%arg0: i32, %arg1: i32) -> (i32, i32) {
    %c0_i32 = arith.constant 0 : i32
    %c0_i32_0 = arith.constant 0 : i32
    %c0_i32_1 = arith.constant 0 : i32
    return %c0_i32, %c0_i32_0 : i32, i32
  }
  func.func @transform_4(%arg0: i32, %arg1: i32) -> (i32, i32) {
    %c0_i32 = arith.constant 0 : i32
    %c0_i32_0 = arith.constant 0 : i32
    %c0_i32_1 = arith.constant 0 : i32
    return %c0_i32, %c0_i32_0 : i32, i32
  }
  func.func @transform_5(%arg0: i32, %arg1: i32) -> (i32, i32, i32) {
    %c0_i32 = arith.constant 0 : i32
    %c0_i32_0 = arith.constant 0 : i32
    return %arg0, %arg1, %c0_i32 : i32, i32, i32
  }
}

module attributes {stable_mosaic.version = 11 : i64} {
  func.func @_conv1d_kernel(%arg0: i32, %arg1: i32, %arg2: memref<1x64x8xbf16, #tpu.memory_space<vmem>>, %arg3: memref<1x64x8xbf16, #tpu.memory_space<vmem>>, %arg4: memref<1x64x8xbf16, #tpu.memory_space<vmem>>, %arg5: memref<24x8xbf16, #tpu.memory_space<vmem>>, %arg6: memref<1x8xf32, #tpu.memory_space<vmem>>, %arg7: memref<1x64x8xbf16, #tpu.memory_space<vmem>>, %arg8: memref<1x64x8xbf16, #tpu.memory_space<vmem>>) attributes {dimension_semantics = [#tpu.dimension_semantics<parallel>, #tpu.dimension_semantics<parallel>], iteration_bounds = array<i64: 2, 1>, scalar_prefetch = 0 : i64, scratch_operands = 0 : i64, tpu.core_type = #tpu.core_type<tc>, window_params = [{transform_indices = @transform_0, window_bounds = array<i64: 1, 64, 8>}, {transform_indices = @transform_1, window_bounds = array<i64: 1, 64, 8>}, {transform_indices = @transform_2, window_bounds = array<i64: 1, 64, 8>}, {pipeline_mode = #tpu.pipeline_mode<synchronous>, transform_indices = @transform_3, window_bounds = array<i64: 24, 8>}, {pipeline_mode = #tpu.pipeline_mode<synchronous>, transform_indices = @transform_4, window_bounds = array<i64: 1, 8>}, {transform_indices = @transform_5, window_bounds = array<i64: 1, 64, 8>}, {transform_indices = @transform_6, window_bounds = array<i64: 1, 64, 8>}]} {
    %c0 = arith.constant 0 : index
    %c0_0 = arith.constant 0 : index
    %c0_1 = arith.constant 0 : index
    %0 = vector.load %arg2[%c0, %c0_0, %c0_1] : memref<1x64x8xbf16, #tpu.memory_space<vmem>>, vector<1x64x8xbf16>
    %1 = vector.shape_cast %0 : vector<1x64x8xbf16> to vector<64x8xbf16>
    %2 = vector.extract_strided_slice %1 {offsets = [63, 0], sizes = [1, 8], strides = [1, 1]} : vector<64x8xbf16> to vector<1x8xbf16>
    %c0_2 = arith.constant 0 : index
    %c0_3 = arith.constant 0 : index
    %c0_4 = arith.constant 0 : index
    %3 = vector.load %arg3[%c0_2, %c0_3, %c0_4] : memref<1x64x8xbf16, #tpu.memory_space<vmem>>, vector<1x64x8xbf16>
    %4 = vector.shape_cast %3 : vector<1x64x8xbf16> to vector<64x8xbf16>
    %c0_5 = arith.constant 0 : index
    %c0_6 = arith.constant 0 : index
    %c0_7 = arith.constant 0 : index
    %5 = vector.load %arg4[%c0_5, %c0_6, %c0_7] : memref<1x64x8xbf16, #tpu.memory_space<vmem>>, vector<1x64x8xbf16>
    %6 = vector.shape_cast %5 : vector<1x64x8xbf16> to vector<64x8xbf16>
    %7 = vector.extract_strided_slice %6 {offsets = [0, 0], sizes = [1, 8], strides = [1, 1]} : vector<64x8xbf16> to vector<1x8xbf16>
    %8 = tpu.concatenate %2, %4, %7 in 0 : vector<1x8xbf16>, vector<64x8xbf16>, vector<1x8xbf16> -> vector<66x8xbf16>
    %c64_i32 = arith.constant 64 : i32
    %9 = arith.muli %arg1, %c64_i32 : i32
    %c1_i32 = arith.constant 1 : i32
    %10 = arith.subi %9, %c1_i32 : i32
    %11 = tpu.iota {dimensions = array<i32: 0>} : vector<66x1xi32>
    %12 = vector.broadcast %10 : i32 to vector<66x1xi32>
    %13 = arith.addi %12, %11 : vector<66x1xi32>
    %c0_i32 = arith.constant 0 : i32
    %14 = vector.broadcast %c0_i32 : i32 to vector<66x1xi32>
    %15 = arith.cmpi sge, %13, %14 : vector<66x1xi32>
    %c64_i32_8 = arith.constant 64 : i32
    %16 = vector.broadcast %c64_i32_8 : i32 to vector<66x1xi32>
    %17 = arith.cmpi slt, %13, %16 : vector<66x1xi32>
    %18 = arith.andi %15, %17 : vector<66x1xi1>
    %c0_i32_9 = arith.constant 0 : i32
    %19 = arith.sitofp %c0_i32_9 : i32 to bf16
    %20 = vector.shape_cast %18 : vector<66x1xi1> to vector<66x1xi1>
    %21 = vector.broadcast %20 : vector<66x1xi1> to vector<66x8xi1>
    %22 = vector.broadcast %19 : bf16 to vector<66x8xbf16>
    %23 = arith.select %21, %8, %22 : vector<66x8xi1>, vector<66x8xbf16>
    %cst = arith.constant 0.000000e+00 : bf16
    %24 = vector.broadcast %cst : bf16 to vector<66x8xbf16>
    %25 = arith.cmpf oge, %23, %24 : vector<66x8xbf16>
    %cst_10 = arith.constant 1.000980e-01 : bf16
    %26 = vector.broadcast %cst_10 : bf16 to vector<66x8xbf16>
    %27 = arith.mulf %26, %23 : vector<66x8xbf16>
    %28 = arith.select %25, %23, %27 : vector<66x8xi1>, vector<66x8xbf16>
    %29 = vector.extract_strided_slice %28 {offsets = [0, 0], sizes = [64, 8], strides = [1, 1]} : vector<66x8xbf16> to vector<64x8xbf16>
    %30 = vector.extract_strided_slice %28 {offsets = [1, 0], sizes = [64, 8], strides = [1, 1]} : vector<66x8xbf16> to vector<64x8xbf16>
    %31 = vector.extract_strided_slice %28 {offsets = [2, 0], sizes = [64, 8], strides = [1, 1]} : vector<66x8xbf16> to vector<64x8xbf16>
    %32 = tpu.concatenate %29, %30, %31 in 1 : vector<64x8xbf16>, vector<64x8xbf16>, vector<64x8xbf16> -> vector<64x24xbf16>
    %c0_11 = arith.constant 0 : index
    %c0_12 = arith.constant 0 : index
    %33 = vector.load %arg5[%c0_11, %c0_12] : memref<24x8xbf16, #tpu.memory_space<vmem>>, vector<24x8xbf16>
    %cst_13 = arith.constant dense<0.000000e+00> : vector<64x8xf32>
    %34 = tpu.matmul %32, %33, %cst_13 {dimension_numbers = #tpu.dot_dimension_numbers<[1], [0], [0], [1], [0, 0, 1, 1], [], []>} : vector<64x24xbf16>, vector<24x8xbf16>, vector<64x8xf32> -> vector<64x8xf32>
    %c0_14 = arith.constant 0 : index
    %c0_15 = arith.constant 0 : index
    %35 = vector.load %arg6[%c0_14, %c0_15] : memref<1x8xf32, #tpu.memory_space<vmem>>, vector<1x8xf32>
    %36 = vector.broadcast %35 : vector<1x8xf32> to vector<64x8xf32>
    %37 = arith.addf %34, %36 : vector<64x8xf32>
    %c0_16 = arith.constant 0 : index
    %c0_17 = arith.constant 0 : index
    %c0_18 = arith.constant 0 : index
    %38 = vector.load %arg7[%c0_16, %c0_17, %c0_18] : memref<1x64x8xbf16, #tpu.memory_space<vmem>>, vector<1x64x8xbf16>
    %39 = vector.shape_cast %38 : vector<1x64x8xbf16> to vector<64x8xbf16>
    %40 = arith.extf %39 : vector<64x8xbf16> to vector<64x8xf32>
    %41 = arith.addf %37, %40 : vector<64x8xf32>
    %42 = arith.truncf %41 : vector<64x8xf32> to vector<64x8xbf16>
    %c0_19 = arith.constant 0 : index
    %c0_20 = arith.constant 0 : index
    %c0_21 = arith.constant 0 : index
    %43 = vector.load %arg8[%c0_19, %c0_20, %c0_21] : memref<1x64x8xbf16, #tpu.memory_space<vmem>>, vector<1x64x8xbf16>
    %44 = vector.shape_cast %43 : vector<1x64x8xbf16> to vector<64x8xbf16>
    %45 = vector.shape_cast %42 : vector<64x8xbf16> to vector<1x64x8xbf16>
    tpu.vector_store %arg8[%c0_19, %c0_20, %c0_21], %45 {strides = array<i32>} : memref<1x64x8xbf16, #tpu.memory_space<vmem>>, vector<1x64x8xbf16>,
    return
  }
  func.func @transform_0(%arg0: i32, %arg1: i32) -> (i32, i32, i32) {
    %c1_i32 = arith.constant 1 : i32
    %0 = arith.subi %arg1, %c1_i32 : i32
    %c0_i32 = arith.constant 0 : i32
    %c0_i32_0 = arith.constant 0 : i32
    %1 = arith.maxsi %c0_i32, %0 : i32
    %2 = arith.minsi %c0_i32_0, %1 : i32
    %c0_i32_1 = arith.constant 0 : i32
    %c0_i32_2 = arith.constant 0 : i32
    return %arg0, %2, %c0_i32_1 : i32, i32, i32
  }
  func.func @transform_1(%arg0: i32, %arg1: i32) -> (i32, i32, i32) {
    %c0_i32 = arith.constant 0 : i32
    %0 = arith.minsi %arg1, %c0_i32 : i32
    %c0_i32_0 = arith.constant 0 : i32
    %c0_i32_1 = arith.constant 0 : i32
    return %arg0, %0, %c0_i32_0 : i32, i32, i32
  }
  func.func @transform_2(%arg0: i32, %arg1: i32) -> (i32, i32, i32) {
    %c1_i32 = arith.constant 1 : i32
    %0 = arith.addi %arg1, %c1_i32 : i32
    %c0_i32 = arith.constant 0 : i32
    %1 = arith.minsi %0, %c0_i32 : i32
    %c0_i32_0 = arith.constant 0 : i32
    %c0_i32_1 = arith.constant 0 : i32
    return %arg0, %1, %c0_i32_0 : i32, i32, i32
  }
  func.func @transform_3(%arg0: i32, %arg1: i32) -> (i32, i32) {
    %c0_i32 = arith.constant 0 : i32
    %c0_i32_0 = arith.constant 0 : i32
    %c0_i32_1 = arith.constant 0 : i32
    return %c0_i32, %c0_i32_0 : i32, i32
  }
  func.func @transform_4(%arg0: i32, %arg1: i32) -> (i32, i32) {
    %c0_i32 = arith.constant 0 : i32
    %c0_i32_0 = arith.constant 0 : i32
    %c0_i32_1 = arith.constant 0 : i32
    return %c0_i32, %c0_i32_0 : i32, i32
  }
  func.func @transform_5(%arg0: i32, %arg1: i32) -> (i32, i32, i32) {
    %c0_i32 = arith.constant 0 : i32
    %c0_i32_0 = arith.constant 0 : i32
    return %arg0, %arg1, %c0_i32 : i32, i32, i32
  }
  func.func @transform_6(%arg0: i32, %arg1: i32) -> (i32, i32, i32) {
    %c0_i32 = arith.constant 0 : i32
    %c0_i32_0 = arith.constant 0 : i32
    return %arg0, %arg1, %c0_i32 : i32, i32, i32
  }
}

module attributes {stable_mosaic.version = 11 : i64} {
  func.func @_conv1d_kernel(%arg0: i32, %arg1: i32, %arg2: memref<1x64x8xbf16, #tpu.memory_space<vmem>>, %arg3: memref<1x64x8xbf16, #tpu.memory_space<vmem>>, %arg4: memref<1x64x8xbf16, #tpu.memory_space<vmem>>, %arg5: memref<24x8xbf16, #tpu.memory_space<vmem>>, %arg6: memref<1x8xf32, #tpu.memory_space<vmem>>, %arg7: memref<1x64x8xbf16, #tpu.memory_space<vmem>>) attributes {dimension_semantics = [#tpu.dimension_semantics<parallel>, #tpu.dimension_semantics<parallel>], iteration_bounds = array<i64: 2, 1>, scalar_prefetch = 0 : i64, scratch_operands = 0 : i64, tpu.core_type = #tpu.core_type<tc>, window_params = [{transform_indices = @transform_0, window_bounds = array<i64: 1, 64, 8>}, {transform_indices = @transform_1, window_bounds = array<i64: 1, 64, 8>}, {transform_indices = @transform_2, window_bounds = array<i64: 1, 64, 8>}, {pipeline_mode = #tpu.pipeline_mode<synchronous>, transform_indices = @transform_3, window_bounds = array<i64: 24, 8>}, {pipeline_mode = #tpu.pipeline_mode<synchronous>, transform_indices = @transform_4, window_bounds = array<i64: 1, 8>}, {transform_indices = @transform_5, window_bounds = array<i64: 1, 64, 8>}]} {
    %c0 = arith.constant 0 : index
    %c0_0 = arith.constant 0 : index
    %c0_1 = arith.constant 0 : index
    %0 = vector.load %arg2[%c0, %c0_0, %c0_1] : memref<1x64x8xbf16, #tpu.memory_space<vmem>>, vector<1x64x8xbf16>
    %1 = vector.shape_cast %0 : vector<1x64x8xbf16> to vector<64x8xbf16>
    %2 = vector.extract_strided_slice %1 {offsets = [61, 0], sizes = [3, 8], strides = [1, 1]} : vector<64x8xbf16> to vector<3x8xbf16>
    %c0_2 = arith.constant 0 : index
    %c0_3 = arith.constant 0 : index
    %c0_4 = arith.constant 0 : index
    %3 = vector.load %arg3[%c0_2, %c0_3, %c0_4] : memref<1x64x8xbf16, #tpu.memory_space<vmem>>, vector<1x64x8xbf16>
    %4 = vector.shape_cast %3 : vector<1x64x8xbf16> to vector<64x8xbf16>
    %c0_5 = arith.constant 0 : index
    %c0_6 = arith.constant 0 : index
    %c0_7 = arith.constant 0 : index
    %5 = vector.load %arg4[%c0_5, %c0_6, %c0_7] : memref<1x64x8xbf16, #tpu.memory_space<vmem>>, vector<1x64x8xbf16>
    %6 = vector.shape_cast %5 : vector<1x64x8xbf16> to vector<64x8xbf16>
    %7 = vector.extract_strided_slice %6 {offsets = [0, 0], sizes = [3, 8], strides = [1, 1]} : vector<64x8xbf16> to vector<3x8xbf16>
    %8 = tpu.concatenate %2, %4, %7 in 0 : vector<3x8xbf16>, vector<64x8xbf16>, vector<3x8xbf16> -> vector<70x8xbf16>
    %c64_i32 = arith.constant 64 : i32
    %9 = arith.muli %arg1, %c64_i32 : i32
    %c3_i32 = arith.constant 3 : i32
    %10 = arith.subi %9, %c3_i32 : i32
    %11 = tpu.iota {dimensions = array<i32: 0>} : vector<70x1xi32>
    %12 = vector.broadcast %10 : i32 to vector<70x1xi32>
    %13 = arith.addi %12, %11 : vector<70x1xi32>
    %c0_i32 = arith.constant 0 : i32
    %14 = vector.broadcast %c0_i32 : i32 to vector<70x1xi32>
    %15 = arith.cmpi sge, %13, %14 : vector<70x1xi32>
    %c64_i32_8 = arith.constant 64 : i32
    %16 = vector.broadcast %c64_i32_8 : i32 to vector<70x1xi32>
    %17 = arith.cmpi slt, %13, %16 : vector<70x1xi32>
    %18 = arith.andi %15, %17 : vector<70x1xi1>
    %c0_i32_9 = arith.constant 0 : i32
    %19 = arith.sitofp %c0_i32_9 : i32 to bf16
    %20 = vector.shape_cast %18 : vector<70x1xi1> to vector<70x1xi1>
    %21 = vector.broadcast %20 : vector<70x1xi1> to vector<70x8xi1>
    %22 = vector.broadcast %19 : bf16 to vector<70x8xbf16>
    %23 = arith.select %21, %8, %22 : vector<70x8xi1>, vector<70x8xbf16>
    %cst = arith.constant 0.000000e+00 : bf16
    %24 = vector.broadcast %cst : bf16 to vector<70x8xbf16>
    %25 = arith.cmpf oge, %23, %24 : vector<70x8xbf16>
    %cst_10 = arith.constant 1.000980e-01 : bf16
    %26 = vector.broadcast %cst_10 : bf16 to vector<70x8xbf16>
    %27 = arith.mulf %26, %23 : vector<70x8xbf16>
    %28 = arith.select %25, %23, %27 : vector<70x8xi1>, vector<70x8xbf16>
    %29 = vector.extract_strided_slice %28 {offsets = [0, 0], sizes = [64, 8], strides = [1, 1]} : vector<70x8xbf16> to vector<64x8xbf16>
    %30 = vector.extract_strided_slice %28 {offsets = [3, 0], sizes = [64, 8], strides = [1, 1]} : vector<70x8xbf16> to vector<64x8xbf16>
    %31 = vector.extract_strided_slice %28 {offsets = [6, 0], sizes = [64, 8], strides = [1, 1]} : vector<70x8xbf16> to vector<64x8xbf16>
    %32 = tpu.concatenate %29, %30, %31 in 1 : vector<64x8xbf16>, vector<64x8xbf16>, vector<64x8xbf16> -> vector<64x24xbf16>
    %c0_11 = arith.constant 0 : index
    %c0_12 = arith.constant 0 : index
    %33 = vector.load %arg5[%c0_11, %c0_12] : memref<24x8xbf16, #tpu.memory_space<vmem>>, vector<24x8xbf16>
    %cst_13 = arith.constant dense<0.000000e+00> : vector<64x8xf32>
    %34 = tpu.matmul %32, %33, %cst_13 {dimension_numbers = #tpu.dot_dimension_numbers<[1], [0], [0], [1], [0, 0, 1, 1], [], []>} : vector<64x24xbf16>, vector<24x8xbf16>, vector<64x8xf32> -> vector<64x8xf32>
    %c0_14 = arith.constant 0 : index
    %c0_15 = arith.constant 0 : index
    %35 = vector.load %arg6[%c0_14, %c0_15] : memref<1x8xf32, #tpu.memory_space<vmem>>, vector<1x8xf32>
    %36 = vector.broadcast %35 : vector<1x8xf32> to vector<64x8xf32>
    %37 = arith.addf %34, %36 : vector<64x8xf32>
    %38 = arith.truncf %37 : vector<64x8xf32> to vector<64x8xbf16>
    %c0_16 = arith.constant 0 : index
    %c0_17 = arith.constant 0 : index
    %c0_18 = arith.constant 0 : index
    %39 = vector.load %arg7[%c0_16, %c0_17, %c0_18] : memref<1x64x8xbf16, #tpu.memory_space<vmem>>, vector<1x64x8xbf16>
    %40 = vector.shape_cast %39 : vector<1x64x8xbf16> to vector<64x8xbf16>
    %41 = vector.shape_cast %38 : vector<64x8xbf16> to vector<1x64x8xbf16>
    tpu.vector_store %arg7[%c0_16, %c0_17, %c0_18], %41 {strides = array<i32>} : memref<1x64x8xbf16, #tpu.memory_space<vmem>>, vector<1x64x8xbf16>,
    return
  }
  func.func @transform_0(%arg0: i32, %arg1: i32) -> (i32, i32, i32) {
    %c1_i32 = arith.constant 1 : i32
    %0 = arith.subi %arg1, %c1_i32 : i32
    %c0_i32 = arith.constant 0 : i32
    %c0_i32_0 = arith.constant 0 : i32
    %1 = arith.maxsi %c0_i32, %0 : i32
    %2 = arith.minsi %c0_i32_0, %1 : i32
    %c0_i32_1 = arith.constant 0 : i32
    %c0_i32_2 = arith.constant 0 : i32
    return %arg0, %2, %c0_i32_1 : i32, i32, i32
  }
  func.func @transform_1(%arg0: i32, %arg1: i32) -> (i32, i32, i32) {
    %c0_i32 = arith.constant 0 : i32
    %0 = arith.minsi %arg1, %c0_i32 : i32
    %c0_i32_0 = arith.constant 0 : i32
    %c0_i32_1 = arith.constant 0 : i32
    return %arg0, %0, %c0_i32_0 : i32, i32, i32
  }
  func.func @transform_2(%arg0: i32, %arg1: i32) -> (i32, i32, i32) {
    %c1_i32 = arith.constant 1 : i32
    %0 = arith.addi %arg1, %c1_i32 : i32
    %c0_i32 = arith.constant 0 : i32
    %1 = arith.minsi %0, %c0_i32 : i32
    %c0_i32_0 = arith.constant 0 : i32
    %c0_i32_1 = arith.constant 0 : i32
    return %arg0, %1, %c0_i32_0 : i32, i32, i32
  }
  func.func @transform_3(%arg0: i32, %arg1: i32) -> (i32, i32) {
    %c0_i32 = arith.constant 0 : i32
    %c0_i32_0 = arith.constant 0 : i32
    %c0_i32_1 = arith.constant 0 : i32
    return %c0_i32, %c0_i32_0 : i32, i32
  }
  func.func @transform_4(%arg0: i32, %arg1: i32) -> (i32, i32) {
    %c0_i32 = arith.constant 0 : i32
    %c0_i32_0 = arith.constant 0 : i32
    %c0_i32_1 = arith.constant 0 : i32
    return %c0_i32, %c0_i32_0 : i32, i32
  }
  func.func @transform_5(%arg0: i32, %arg1: i32) -> (i32, i32, i32) {
    %c0_i32 = arith.constant 0 : i32
    %c0_i32_0 = arith.constant 0 : i32
    return %arg0, %arg1, %c0_i32 : i32, i32, i32
  }
}

module attributes {stable_mosaic.version = 11 : i64} {
  func.func @_conv1d_kernel(%arg0: i32, %arg1: i32, %arg2: memref<1x64x8xbf16, #tpu.memory_space<vmem>>, %arg3: memref<1x64x8xbf16, #tpu.memory_space<vmem>>, %arg4: memref<1x64x8xbf16, #tpu.memory_space<vmem>>, %arg5: memref<24x8xbf16, #tpu.memory_space<vmem>>, %arg6: memref<1x8xf32, #tpu.memory_space<vmem>>, %arg7: memref<1x64x8xbf16, #tpu.memory_space<vmem>>) attributes {dimension_semantics = [#tpu.dimension_semantics<parallel>, #tpu.dimension_semantics<parallel>], iteration_bounds = array<i64: 2, 1>, scalar_prefetch = 0 : i64, scratch_operands = 0 : i64, tpu.core_type = #tpu.core_type<tc>, window_params = [{transform_indices = @transform_0, window_bounds = array<i64: 1, 64, 8>}, {transform_indices = @transform_1, window_bounds = array<i64: 1, 64, 8>}, {transform_indices = @transform_2, window_bounds = array<i64: 1, 64, 8>}, {pipeline_mode = #tpu.pipeline_mode<synchronous>, transform_indices = @transform_3, window_bounds = array<i64: 24, 8>}, {pipeline_mode = #tpu.pipeline_mode<synchronous>, transform_indices = @transform_4, window_bounds = array<i64: 1, 8>}, {transform_indices = @transform_5, window_bounds = array<i64: 1, 64, 8>}]} {
    %c0 = arith.constant 0 : index
    %c0_0 = arith.constant 0 : index
    %c0_1 = arith.constant 0 : index
    %0 = vector.load %arg2[%c0, %c0_0, %c0_1] : memref<1x64x8xbf16, #tpu.memory_space<vmem>>, vector<1x64x8xbf16>
    %1 = vector.shape_cast %0 : vector<1x64x8xbf16> to vector<64x8xbf16>
    %2 = vector.extract_strided_slice %1 {offsets = [59, 0], sizes = [5, 8], strides = [1, 1]} : vector<64x8xbf16> to vector<5x8xbf16>
    %c0_2 = arith.constant 0 : index
    %c0_3 = arith.constant 0 : index
    %c0_4 = arith.constant 0 : index
    %3 = vector.load %arg3[%c0_2, %c0_3, %c0_4] : memref<1x64x8xbf16, #tpu.memory_space<vmem>>, vector<1x64x8xbf16>
    %4 = vector.shape_cast %3 : vector<1x64x8xbf16> to vector<64x8xbf16>
    %c0_5 = arith.constant 0 : index
    %c0_6 = arith.constant 0 : index
    %c0_7 = arith.constant 0 : index
    %5 = vector.load %arg4[%c0_5, %c0_6, %c0_7] : memref<1x64x8xbf16, #tpu.memory_space<vmem>>, vector<1x64x8xbf16>
    %6 = vector.shape_cast %5 : vector<1x64x8xbf16> to vector<64x8xbf16>
    %7 = vector.extract_strided_slice %6 {offsets = [0, 0], sizes = [5, 8], strides = [1, 1]} : vector<64x8xbf16> to vector<5x8xbf16>
    %8 = tpu.concatenate %2, %4, %7 in 0 : vector<5x8xbf16>, vector<64x8xbf16>, vector<5x8xbf16> -> vector<74x8xbf16>
    %c64_i32 = arith.constant 64 : i32
    %9 = arith.muli %arg1, %c64_i32 : i32
    %c5_i32 = arith.constant 5 : i32
    %10 = arith.subi %9, %c5_i32 : i32
    %11 = tpu.iota {dimensions = array<i32: 0>} : vector<74x1xi32>
    %12 = vector.broadcast %10 : i32 to vector<74x1xi32>
    %13 = arith.addi %12, %11 : vector<74x1xi32>
    %c0_i32 = arith.constant 0 : i32
    %14 = vector.broadcast %c0_i32 : i32 to vector<74x1xi32>
    %15 = arith.cmpi sge, %13, %14 : vector<74x1xi32>
    %c64_i32_8 = arith.constant 64 : i32
    %16 = vector.broadcast %c64_i32_8 : i32 to vector<74x1xi32>
    %17 = arith.cmpi slt, %13, %16 : vector<74x1xi32>
    %18 = arith.andi %15, %17 : vector<74x1xi1>
    %c0_i32_9 = arith.constant 0 : i32
    %19 = arith.sitofp %c0_i32_9 : i32 to bf16
    %20 = vector.shape_cast %18 : vector<74x1xi1> to vector<74x1xi1>
    %21 = vector.broadcast %20 : vector<74x1xi1> to vector<74x8xi1>
    %22 = vector.broadcast %19 : bf16 to vector<74x8xbf16>
    %23 = arith.select %21, %8, %22 : vector<74x8xi1>, vector<74x8xbf16>
    %cst = arith.constant 0.000000e+00 : bf16
    %24 = vector.broadcast %cst : bf16 to vector<74x8xbf16>
    %25 = arith.cmpf oge, %23, %24 : vector<74x8xbf16>
    %cst_10 = arith.constant 1.000980e-01 : bf16
    %26 = vector.broadcast %cst_10 : bf16 to vector<74x8xbf16>
    %27 = arith.mulf %26, %23 : vector<74x8xbf16>
    %28 = arith.select %25, %23, %27 : vector<74x8xi1>, vector<74x8xbf16>
    %29 = vector.extract_strided_slice %28 {offsets = [0, 0], sizes = [64, 8], strides = [1, 1]} : vector<74x8xbf16> to vector<64x8xbf16>
    %30 = vector.extract_strided_slice %28 {offsets = [5, 0], sizes = [64, 8], strides = [1, 1]} : vector<74x8xbf16> to vector<64x8xbf16>
    %31 = vector.extract_strided_slice %28 {offsets = [10, 0], sizes = [64, 8], strides = [1, 1]} : vector<74x8xbf16> to vector<64x8xbf16>
    %32 = tpu.concatenate %29, %30, %31 in 1 : vector<64x8xbf16>, vector<64x8xbf16>, vector<64x8xbf16> -> vector<64x24xbf16>
    %c0_11 = arith.constant 0 : index
    %c0_12 = arith.constant 0 : index
    %33 = vector.load %arg5[%c0_11, %c0_12] : memref<24x8xbf16, #tpu.memory_space<vmem>>, vector<24x8xbf16>
    %cst_13 = arith.constant dense<0.000000e+00> : vector<64x8xf32>
    %34 = tpu.matmul %32, %33, %cst_13 {dimension_numbers = #tpu.dot_dimension_numbers<[1], [0], [0], [1], [0, 0, 1, 1], [], []>} : vector<64x24xbf16>, vector<24x8xbf16>, vector<64x8xf32> -> vector<64x8xf32>
    %c0_14 = arith.constant 0 : index
    %c0_15 = arith.constant 0 : index
    %35 = vector.load %arg6[%c0_14, %c0_15] : memref<1x8xf32, #tpu.memory_space<vmem>>, vector<1x8xf32>
    %36 = vector.broadcast %35 : vector<1x8xf32> to vector<64x8xf32>
    %37 = arith.addf %34, %36 : vector<64x8xf32>
    %38 = arith.truncf %37 : vector<64x8xf32> to vector<64x8xbf16>
    %c0_16 = arith.constant 0 : index
    %c0_17 = arith.constant 0 : index
    %c0_18 = arith.constant 0 : index
    %39 = vector.load %arg7[%c0_16, %c0_17, %c0_18] : memref<1x64x8xbf16, #tpu.memory_space<vmem>>, vector<1x64x8xbf16>
    %40 = vector.shape_cast %39 : vector<1x64x8xbf16> to vector<64x8xbf16>
    %41 = vector.shape_cast %38 : vector<64x8xbf16> to vector<1x64x8xbf16>
    tpu.vector_store %arg7[%c0_16, %c0_17, %c0_18], %41 {strides = array<i32>} : memref<1x64x8xbf16, #tpu.memory_space<vmem>>, vector<1x64x8xbf16>,
    return
  }
  func.func @transform_0(%arg0: i32, %arg1: i32) -> (i32, i32, i32) {
    %c1_i32 = arith.constant 1 : i32
    %0 = arith.subi %arg1, %c1_i32 : i32
    %c0_i32 = arith.constant 0 : i32
    %c0_i32_0 = arith.constant 0 : i32
    %1 = arith.maxsi %c0_i32, %0 : i32
    %2 = arith.minsi %c0_i32_0, %1 : i32
    %c0_i32_1 = arith.constant 0 : i32
    %c0_i32_2 = arith.constant 0 : i32
    return %arg0, %2, %c0_i32_1 : i32, i32, i32
  }
  func.func @transform_1(%arg0: i32, %arg1: i32) -> (i32, i32, i32) {
    %c0_i32 = arith.constant 0 : i32
    %0 = arith.minsi %arg1, %c0_i32 : i32
    %c0_i32_0 = arith.constant 0 : i32
    %c0_i32_1 = arith.constant 0 : i32
    return %arg0, %0, %c0_i32_0 : i32, i32, i32
  }
  func.func @transform_2(%arg0: i32, %arg1: i32) -> (i32, i32, i32) {
    %c1_i32 = arith.constant 1 : i32
    %0 = arith.addi %arg1, %c1_i32 : i32
    %c0_i32 = arith.constant 0 : i32
    %1 = arith.minsi %0, %c0_i32 : i32
    %c0_i32_0 = arith.constant 0 : i32
    %c0_i32_1 = arith.constant 0 : i32
    return %arg0, %1, %c0_i32_0 : i32, i32, i32
  }
  func.func @transform_3(%arg0: i32, %arg1: i32) -> (i32, i32) {
    %c0_i32 = arith.constant 0 : i32
    %c0_i32_0 = arith.constant 0 : i32
    %c0_i32_1 = arith.constant 0 : i32
    return %c0_i32, %c0_i32_0 : i32, i32
  }
  func.func @transform_4(%arg0: i32, %arg1: i32) -> (i32, i32) {
    %c0_i32 = arith.constant 0 : i32
    %c0_i32_0 = arith.constant 0 : i32
    %c0_i32_1 = arith.constant 0 : i32
    return %c0_i32, %c0_i32_0 : i32, i32
  }
  func.func @transform_5(%arg0: i32, %arg1: i32) -> (i32, i32, i32) {
    %c0_i32 = arith.constant 0 : i32
    %c0_i32_0 = arith.constant 0 : i32
    return %arg0, %arg1, %c0_i32 : i32, i32, i32
  }
}

module attributes {stable_mosaic.version = 11 : i64} {
  func.func @_conv1d_kernel(%arg0: i32, %arg1: i32, %arg2: memref<1x64x8xbf16, #tpu.memory_space<vmem>>, %arg3: memref<1x64x8xbf16, #tpu.memory_space<vmem>>, %arg4: memref<1x64x8xbf16, #tpu.memory_space<vmem>>, %arg5: memref<56x1xbf16, #tpu.memory_space<vmem>>, %arg6: memref<1x1xf32, #tpu.memory_space<vmem>>, %arg7: memref<1x64x1xbf16, #tpu.memory_space<vmem>>) attributes {dimension_semantics = [#tpu.dimension_semantics<parallel>, #tpu.dimension_semantics<parallel>], iteration_bounds = array<i64: 2, 1>, scalar_prefetch = 0 : i64, scratch_operands = 0 : i64, tpu.core_type = #tpu.core_type<tc>, window_params = [{transform_indices = @transform_0, window_bounds = array<i64: 1, 64, 8>}, {transform_indices = @transform_1, window_bounds = array<i64: 1, 64, 8>}, {transform_indices = @transform_2, window_bounds = array<i64: 1, 64, 8>}, {pipeline_mode = #tpu.pipeline_mode<synchronous>, transform_indices = @transform_3, window_bounds = array<i64: 56, 1>}, {pipeline_mode = #tpu.pipeline_mode<synchronous>, transform_indices = @transform_4, window_bounds = array<i64: 1, 1>}, {transform_indices = @transform_5, window_bounds = array<i64: 1, 64, 1>}]} {
    %c0 = arith.constant 0 : index
    %c0_0 = arith.constant 0 : index
    %c0_1 = arith.constant 0 : index
    %0 = vector.load %arg2[%c0, %c0_0, %c0_1] : memref<1x64x8xbf16, #tpu.memory_space<vmem>>, vector<1x64x8xbf16>
    %1 = vector.shape_cast %0 : vector<1x64x8xbf16> to vector<64x8xbf16>
    %2 = vector.extract_strided_slice %1 {offsets = [61, 0], sizes = [3, 8], strides = [1, 1]} : vector<64x8xbf16> to vector<3x8xbf16>
    %c0_2 = arith.constant 0 : index
    %c0_3 = arith.constant 0 : index
    %c0_4 = arith.constant 0 : index
    %3 = vector.load %arg3[%c0_2, %c0_3, %c0_4] : memref<1x64x8xbf16, #tpu.memory_space<vmem>>, vector<1x64x8xbf16>
    %4 = vector.shape_cast %3 : vector<1x64x8xbf16> to vector<64x8xbf16>
    %c0_5 = arith.constant 0 : index
    %c0_6 = arith.constant 0 : index
    %c0_7 = arith.constant 0 : index
    %5 = vector.load %arg4[%c0_5, %c0_6, %c0_7] : memref<1x64x8xbf16, #tpu.memory_space<vmem>>, vector<1x64x8xbf16>
    %6 = vector.shape_cast %5 : vector<1x64x8xbf16> to vector<64x8xbf16>
    %7 = vector.extract_strided_slice %6 {offsets = [0, 0], sizes = [3, 8], strides = [1, 1]} : vector<64x8xbf16> to vector<3x8xbf16>
    %8 = tpu.concatenate %2, %4, %7 in 0 : vector<3x8xbf16>, vector<64x8xbf16>, vector<3x8xbf16> -> vector<70x8xbf16>
    %c64_i32 = arith.constant 64 : i32
    %9 = arith.muli %arg1, %c64_i32 : i32
    %c3_i32 = arith.constant 3 : i32
    %10 = arith.subi %9, %c3_i32 : i32
    %11 = tpu.iota {dimensions = array<i32: 0>} : vector<70x1xi32>
    %12 = vector.broadcast %10 : i32 to vector<70x1xi32>
    %13 = arith.addi %12, %11 : vector<70x1xi32>
    %c0_i32 = arith.constant 0 : i32
    %14 = vector.broadcast %c0_i32 : i32 to vector<70x1xi32>
    %15 = arith.cmpi sge, %13, %14 : vector<70x1xi32>
    %c64_i32_8 = arith.constant 64 : i32
    %16 = vector.broadcast %c64_i32_8 : i32 to vector<70x1xi32>
    %17 = arith.cmpi slt, %13, %16 : vector<70x1xi32>
    %18 = arith.andi %15, %17 : vector<70x1xi1>
    %c0_i32_9 = arith.constant 0 : i32
    %19 = arith.sitofp %c0_i32_9 : i32 to bf16
    %20 = vector.shape_cast %18 : vector<70x1xi1> to vector<70x1xi1>
    %21 = vector.broadcast %20 : vector<70x1xi1> to vector<70x8xi1>
    %22 = vector.broadcast %19 : bf16 to vector<70x8xbf16>
    %23 = arith.select %21, %8, %22 : vector<70x8xi1>, vector<70x8xbf16>
    %cst = arith.constant 0.000000e+00 : bf16
    %24 = vector.broadcast %cst : bf16 to vector<70x8xbf16>
    %25 = arith.cmpf oge, %23, %24 : vector<70x8xbf16>
    %cst_10 = arith.constant 1.000980e-02 : bf16
    %26 = vector.broadcast %cst_10 : bf16 to vector<70x8xbf16>
    %27 = arith.mulf %26, %23 : vector<70x8xbf16>
    %28 = arith.select %25, %23, %27 : vector<70x8xi1>, vector<70x8xbf16>
    %29 = vector.extract_strided_slice %28 {offsets = [0, 0], sizes = [64, 8], strides = [1, 1]} : vector<70x8xbf16> to vector<64x8xbf16>
    %30 = vector.extract_strided_slice %28 {offsets = [1, 0], sizes = [64, 8], strides = [1, 1]} : vector<70x8xbf16> to vector<64x8xbf16>
    %31 = vector.extract_strided_slice %28 {offsets = [2, 0], sizes = [64, 8], strides = [1, 1]} : vector<70x8xbf16> to vector<64x8xbf16>
    %32 = vector.extract_strided_slice %28 {offsets = [3, 0], sizes = [64, 8], strides = [1, 1]} : vector<70x8xbf16> to vector<64x8xbf16>
    %33 = vector.extract_strided_slice %28 {offsets = [4, 0], sizes = [64, 8], strides = [1, 1]} : vector<70x8xbf16> to vector<64x8xbf16>
    %34 = vector.extract_strided_slice %28 {offsets = [5, 0], sizes = [64, 8], strides = [1, 1]} : vector<70x8xbf16> to vector<64x8xbf16>
    %35 = vector.extract_strided_slice %28 {offsets = [6, 0], sizes = [64, 8], strides = [1, 1]} : vector<70x8xbf16> to vector<64x8xbf16>
    %36 = tpu.concatenate %29, %30, %31, %32, %33, %34, %35 in 1 : vector<64x8xbf16>, vector<64x8xbf16>, vector<64x8xbf16>, vector<64x8xbf16>, vector<64x8xbf16>, vector<64x8xbf16>, vector<64x8xbf16> -> vector<64x56xbf16>
    %c0_11 = arith.constant 0 : index
    %c0_12 = arith.constant 0 : index
    %37 = vector.load %arg5[%c0_11, %c0_12] : memref<56x1xbf16, #tpu.memory_space<vmem>>, vector<56x1xbf16>
    %cst_13 = arith.constant dense<0.000000e+00> : vector<64x1xf32>
    %38 = tpu.matmul %36, %37, %cst_13 {dimension_numbers = #tpu.dot_dimension_numbers<[1], [0], [0], [1], [0, 0, 1, 1], [], []>} : vector<64x56xbf16>, vector<56x1xbf16>, vector<64x1xf32> -> vector<64x1xf32>
    %c0_14 = arith.constant 0 : index
    %c0_15 = arith.constant 0 : index
    %39 = vector.load %arg6[%c0_14, %c0_15] : memref<1x1xf32, #tpu.memory_space<vmem>>, vector<1x1xf32>
    %40 = vector.broadcast %39 : vector<1x1xf32> to vector<64x1xf32>
    %41 = arith.addf %38, %40 : vector<64x1xf32>
    %42 = math.tanh %41 : vector<64x1xf32>
    %43 = arith.truncf %42 : vector<64x1xf32> to vector<64x1xbf16>
    %c0_16 = arith.constant 0 : index
    %c0_17 = arith.constant 0 : index
    %c0_18 = arith.constant 0 : index
    %44 = vector.load %arg7[%c0_16, %c0_17, %c0_18] : memref<1x64x1xbf16, #tpu.memory_space<vmem>>, vector<1x64x1xbf16>
    %45 = vector.shape_cast %44 : vector<1x64x1xbf16> to vector<64x1xbf16>
    %46 = vector.shape_cast %43 : vector<64x1xbf16> to vector<1x64x1xbf16>
    tpu.vector_store %arg7[%c0_16, %c0_17, %c0_18], %46 {strides = array<i32>} : memref<1x64x1xbf16, #tpu.memory_space<vmem>>, vector<1x64x1xbf16>,
    return
  }
  func.func @transform_0(%arg0: i32, %arg1: i32) -> (i32, i32, i32) {
    %c1_i32 = arith.constant 1 : i32
    %0 = arith.subi %arg1, %c1_i32 : i32
    %c0_i32 = arith.constant 0 : i32
    %c0_i32_0 = arith.constant 0 : i32
    %1 = arith.maxsi %c0_i32, %0 : i32
    %2 = arith.minsi %c0_i32_0, %1 : i32
    %c0_i32_1 = arith.constant 0 : i32
    %c0_i32_2 = arith.constant 0 : i32
    return %arg0, %2, %c0_i32_1 : i32, i32, i32
  }
  func.func @transform_1(%arg0: i32, %arg1: i32) -> (i32, i32, i32) {
    %c0_i32 = arith.constant 0 : i32
    %0 = arith.minsi %arg1, %c0_i32 : i32
    %c0_i32_0 = arith.constant 0 : i32
    %c0_i32_1 = arith.constant 0 : i32
    return %arg0, %0, %c0_i32_0 : i32, i32, i32
  }
  func.func @transform_2(%arg0: i32, %arg1: i32) -> (i32, i32, i32) {
    %c1_i32 = arith.constant 1 : i32
    %0 = arith.addi %arg1, %c1_i32 : i32
    %c0_i32 = arith.constant 0 : i32
    %1 = arith.minsi %0, %c0_i32 : i32
    %c0_i32_0 = arith.constant 0 : i32
    %c0_i32_1 = arith.constant 0 : i32
    return %arg0, %1, %c0_i32_0 : i32, i32, i32
  }
  func.func @transform_3(%arg0: i32, %arg1: i32) -> (i32, i32) {
    %c0_i32 = arith.constant 0 : i32
    %c0_i32_0 = arith.constant 0 : i32
    %c0_i32_1 = arith.constant 0 : i32
    return %c0_i32, %c0_i32_0 : i32, i32
  }
  func.func @transform_4(%arg0: i32, %arg1: i32) -> (i32, i32) {
    %c0_i32 = arith.constant 0 : i32
    %c0_i32_0 = arith.constant 0 : i32
    %c0_i32_1 = arith.constant 0 : i32
    return %c0_i32, %c0_i32_0 : i32, i32
  }
  func.func @transform_5(%arg0: i32, %arg1: i32) -> (i32, i32, i32) {
    %c0_i32 = arith.constant 0 : i32
    %c0_i32_0 = arith.constant 0 : i32
    return %arg0, %arg1, %c0_i32 : i32, i32, i32
  }
}

</mosaic_0001>

<bundles_post_ra>
// kernel: generator_forward.16
= control target key start
LH: loop header
LB: loop body
LE: loop exit
PB: predicated region body
PF: predicated region fallthrough
CT: control target
= control target key end

     0   :  { %s903_s18 = smov 0   ;;  %s905_s19 = smov 0   ;;  %s975_s0 = inlined_call_operand.vmem [shape: bf16[2,16,8], index: 0, kind: input, shape index: {}, may-alias: {0,1,2}]   ;;  %s976_s1 = inlined_call_operand.vmem [shape: bf16[2,16,8], index: 1, kind: input, shape index: {}, may-alias: {0,1,2}]   ;;  %s977_s2 = inlined_call_operand.vmem [shape: bf16[2,16,8], index: 2, kind: input, shape index: {}, may-alias: {0,1,2}]   ;;  %s978_s3 = inlined_call_operand.vmem [shape: bf16[56,32], index: 3, kind: input, shape index: {}]   ;;  %s979_s4 = inlined_call_operand.vmem [shape: f32[1,32], index: 4, kind: input, shape index: {}]   ;;  %s980_s5 = inlined_call_operand.vmem [shape: bf16[2,16,32], index: 5, kind: output, shape index: {}]  }
   0x1   :  { %s907_s20 = smov 0  }
   0x2 LB: > { %s27_s21 = sadd.s32 1, %s859_s19  ;;  %p768_p0 = scmp.ge.s32.totalorder %s863_s20, 1  ;;  %s863_s20 = sphi %s907_s20, %s15_s20   ;;  %s859_s19 = sphi %s905_s19, %s982_s19   ;;  %s855_s18 = sphi %s903_s18, %s981_s18  }
   0x3   : > { %p29_p1 = scmp.ge.s32.totalorder %s27_s21, 2  ;;  %p282_p2 = scmp.lt.s32.totalorder %s863_s20, 3 }
   0x5   : > { %s984_s21 = smov (%p29_p1, %s27_s21), 0  ;;  %p283_p3 = pnand %p768_p0, %p282_p2 }
   0x6   : > { %p352_p4 = scmp.lt.s32.totalorder (!%p283_p3), %s855_s18, 1  ;;  %s867_s9 = smov (!%p283_p3), 8  }
   0x7   : > { %286 = sbr.rel (%p283_p3) target bundleno = 303 (0x12f), region = 40  ;;  %s868_s10 = smov (!%p283_p3), 24  }
   0x8   : > { %s869_s11 = smov (!%p283_p3), 40   ;;  %s870_s12 = smov (!%p283_p3), 16  }
   0x9   : > { %s871_s13 = smov (!%p283_p3), 32   ;;  %s872_s14 = smov (!%p283_p3), 48  }
   0xc   : > { %v458_v0 = vlaneseq  ;;  %s986_s18 = smov (!%p352_p4, %s855_s18), 1  ;;  %vm865_vm0 = vmmov 1   ;;  %v866_v2 = vmov 0   ;;  %vm451_vm2 = vcmask 1041408   ;;  %v589_v8 = vld [vmem:[%s978_s3 + $0x18] sm:$0xf] }
   0xd   : > { %vm482_vm1 = vmpackc.low %vm865_vm0, %vm865_vm0  ;;  %s921_s22 = sshll.u32 %s986_s18, 3  ;;  %v495_v7 = vunpack.c.h.b16 %v866_v2  ;;  %v607_v13 = vunpack.c.l.b16 %v589_v8  ;;  %vm452_vm4 = vsmask.f32 1280  ;;  %v494_v16 = vunpack.c.l.b16 %v866_v2 }
   0xe   : > { %v459_v1 = vshrl.u32 %v458_v0, 7  ;;  %v485_v3 = vsel %vm482_vm1, 65537, %v866_v2  ;;  %s359_s25 = scalar_lea.vmem %s975_s0, %s921_s22  ;;  %s376_s28 = scalar_lea.vmem %s976_s1, %s921_s22  ;;  %vm618_vm6 = vcmask 1043456   ;;  %vm453_vm10 = vmand %vm451_vm2, %vm452_vm4  ;;  %vm508_vm0 = vsmask.f32 7424 }
   0xf   : > { %v488_v6 = vunpack.c.l.b16 %v485_v3  ;;  %s391_s8 = scalar_lea.vmem %s977_s2, %s921_s22  ;;  %v409_v9 = vld [vmem:[%s359_s25 + $0x4] sm:$0xf]  ;;  %v611_v22 = vpack.c.b16 %v607_v13, %v607_v13  ;;  %vm531_vm1 = vsmask.f32 6400  ;;  %vm549_vm2 = vsmask.f32 5376  ;;  %s404_s29 = scalar_lea.vmem %s980_s5, %s921_s22 }
  0x10   : > { %v461_v4 = vadd.s32 16, %v459_v1  ;;  %v463_v5 = vadd.s32 4294967293, %v459_v1  ;;  %v804_v10 = vld [vmem:[%s376_s28] sm:$0xff]  ;;  %v414_v15 = vunpack.c.l.b16 %v409_v9  ;;  %vm543_vm4 = vcmask 1045504  }
  0x11   : > { %v782_v12 = vunpack.i.l.s16 %v488_v6  ;;  %v412_v14 = vld [vmem:[%s391_s8] sm:$0xf]  ;;  %v431_v17 = vshrl.u32 %v804_v10, 16  ;;  %v434_v18 = vshll.u32 %v804_v10, 16  ;;  %v620_v34 = vsel %vm618_vm6, %v611_v22, 0 }
  0x12   : > { %v465_v11 = vadd.s32 4294967293, %v461_v4  ;;  %vm466_vm3 = vcmp.ge.s32.totalorder %v463_v5, 0  ;;  %v440_v19 = vunpack.c.l.b16 %v412_v14  ;;  %v415_v20 = vpack.c.b16 %v414_v15, %v414_v15  ;;  %626 = vmatpush.bf16.msra.mxu0 %v620_v34  ;;  %v807_v14 = vld [vmem:[%s978_s3 + $0x10] sm:$0xff]  ;;  %v806_v15 = vld [vmem:[%s978_s3 + $0x8] sm:$0xff] }
  0x13   : > { %vm481_vm5 = vmpackc.low %vm466_vm3, %vm466_vm3  ;;  %vm497_vm9 = vcmp.ne.s32.totalorder %v782_v12, %v495_v7  ;;  %v433_v23 = vrot.slane %v431_v17, 6  ;;  %v436_v24 = vrot.slane %v434_v18, 7  ;;  %vm525_vm3 = vcmask 1046528  }
  0x14   : > { %vm471_vm7 = vcmp.lt.s32.totalorder %v465_v11, 16  ;;  %v484_v21 = vsel %vm481_vm5, 65537, %v866_v2  ;;  %v441_v25 = vpack.c.b16 %v440_v19, %v440_v19  ;;  %v417_v27 = vshrl.u32 %v415_v20, 16 }
  0x15   : > { %vm483_vm8 = vmpackc.low %vm471_vm7, %vm471_vm7  ;;  %v420_v28 = vshll.u32 %v415_v20, 16  ;;  %v487_v29 = vunpack.c.l.b16 %v484_v21  ;;  %v437_v31 = vor.u32 %v436_v24, %v433_v23  ;;  %vm559_vm5 = vcmask 1044480  }
  0x16   : > { %v486_v26 = vsel %vm483_vm8, 65537, %v866_v2  ;;  %v443_v32 = vshrl.u32 %v441_v25, 16  ;;  %v446_v33 = vshll.u32 %v441_v25, 16  ;;  %v419_v35 = vrot.slane %v417_v27, 2  ;;  %627 = vmatpush.bf16.msra.mxu0 %v807_v14 }
  0x17   : > { %v489_v30 = vunpack.c.l.b16 %v486_v26  ;;  %v422_v36 = vrot.slane %v420_v28, 3  ;;  %v781_v37 = vunpack.i.l.s16 %v487_v29  ;;  %vm565_vm6 = vcmask 64512   ;;  %v840_v29 = vld [vmem:[%s979_s4] ss:$0 sm:$0xff] }
  0x18   : > { %v445_v39 = vrot.slane %v443_v32, 6  ;;  %v448_v40 = vrot.slane %v446_v33, 7  ;;  %vm568_vm7 = vcmask 130048   ;;  %vm571_vm8 = vcmask 195584  }
  0x19   : > { %v783_v38 = vunpack.i.l.s16 %v489_v30  ;;  %v423_v41 = vor.u32 %v422_v36, %v419_v35  ;;  %vm496_vm11 = vcmp.ne.s32.totalorder %v781_v37, %v494_v16 }
  0x1a   : > { %v449_v42 = vor.u32 %v448_v40, %v445_v39  ;;  %vm498_vm14 = vmpackc.low %vm497_vm9, %vm496_vm11  ;;  %628 = vmatpush.bf16.msra.mxu0 %v806_v15  ;;  %vm574_vm9 = vcmask 261120   ;;  %vm580_vm11 = vcmask 392192  }
  0x1b   : > { %vm503_vm12 = vcmp.ne.s32.totalorder %v783_v38, %v494_v16  ;;  %vm504_vm13 = vcmp.ne.s32.totalorder %v783_v38, %v495_v7  ;;  %v454_v43 = vsel %vm453_vm10, %v423_v41, %v437_v31  ;;  %v805_v16 = vld [vmem:[%s978_s3] sm:$0xff] }
  0x1c   : > { %vm505_vm15 = vmpackc.low %vm504_vm13, %vm503_vm12  ;;  %v455_v44 = vsel %vm453_vm10, %v437_v31, %v449_v42  ;;  %v942_v45 = vsel %vm498_vm14, %v454_v43, 0  ;;  %vm577_vm10 = vcmask 326656   ;;  %vm615_vm12 = vcmask 457728  }
  0x1d   : > { %v507_v46 = vsel %vm505_vm15, %v455_v44, 0  ;;  %v510_v47 = vshrl.u32 %v942_v45, 16  ;;  %v512_v48 = vshll.u32 %v942_v45, 16  ;;  %v526_v4 = vrot.slane %v942_v45, 1 }
  0x1e   : > { %v517_v49 = vshll.u32 %v507_v46, 16  ;;  %v535_v50 = vshrl.u32 %v507_v46, 16  ;;  %v527_v5 = vrot.slane %v507_v46, 1  ;;  %v544_v6 = vrot.slane %v942_v45, 2  ;;  %629 = vmatpush.bf16.msra.mxu0 %v805_v16 }
  0x1f   : > { %v514_v51 = vrot.slane %v512_v48, 1  ;;  %v532_v52 = vrot.slane %v510_v47, 1  ;;  %v533_v53 = vrot.slane %v512_v48, 2  ;;  %v550_v59 = vrot.slane %v510_v47, 2 }
  0x20   : > { %v519_v54 = vrot.slane %v517_v49, 1  ;;  %v537_v55 = vrot.slane %v535_v50, 1  ;;  %v538_v56 = vrot.slane %v517_v49, 2  ;;  %v551_v61 = vrot.slane %v512_v48, 3 }
  0x21   : > { %v515_v57 = vor.u32 %v514_v51, %v510_v47  ;;  %v534_v58 = vor.u32 %v533_v53, %v532_v52  ;;  %v553_v62 = vrot.slane %v535_v50, 2  ;;  %v554_v63 = vrot.slane %v517_v49, 3 }
  0x22   : > { %v539_v60 = vor.u32 %v538_v56, %v537_v55  ;;  %v552_v2 = vor.u32 %v551_v61, %v550_v59  ;;  %v545_v7 = vrot.slane %v507_v46, 2  ;;  %v560_v9 = vrot.slane %v942_v45, 3 }
  0x23   : > { %v520_v0 = vsel %vm508_vm0, %v515_v57, %v519_v54  ;;  %v555_v3 = vor.u32 %v554_v63, %v553_v62  ;;  %v561_v10 = vrot.slane %v507_v46, 3  ;;  %v528_v11 = vsel %vm525_vm3, %v526_v4, %v527_v5 }
  0x24   : > { %521 = vrot.lane.b32.xlu0 %v520_v0, %s867_s9  ;;  %v540_v1 = vsel %vm531_vm1, %v534_v58, %v539_v60  ;;  %v546_v12 = vsel %vm543_vm4, %v544_v6, %v545_v7  ;;  %vm638_vm13 = vcmask 257024  }
  0x25   : > { %541 = vrot.lane.b32.xlu1 %v540_v1, %s868_s10  ;;  %v556_v8 = vsel %vm549_vm2, %v552_v2, %v555_v3  ;;  %v562_v13 = vsel %vm559_vm5, %v560_v9, %v561_v10 }
  0x26   : > { %557 = vrot.lane.b32.xlu2 %v556_v8, %s869_s11 }
  0x2c   : > { %529 = vrot.lane.b32.xlu0 %v528_v11, %s870_s12 }
  0x2d   : > { %547 = vrot.lane.b32.xlu1 %v546_v12, %s871_s13 }
  0x2e   : > { %563 = vrot.lane.b32.xlu2 %v562_v13, %s872_s14 }
  0x80   : > { %v558_v18 = vpop.permute.xlu2 %557 }
  0x88   : > { %v564_v25 = vpop.permute.xlu2 %563 }
  0x96   : > { %v522_v17 = vpop.permute.xlu0 %521 }
  0x97   : > { %v542_v19 = vpop.permute.xlu1 %541  ;;  %v567_v20 = vsel %vm565_vm6, %v942_v45, %v522_v17 }
  0x9e   : > { %v530_v21 = vpop.permute.xlu0 %529 }
  0x9f   : > { %v570_v22 = vsel %vm568_vm7, %v567_v20, %v530_v21  ;;  %v548_v23 = vpop.permute.xlu1 %547 }
  0xa0   : > { %v573_v24 = vsel %vm571_vm8, %v570_v22, %v542_v19 }
  0xa1   : > { %v576_v26 = vsel %vm574_vm9, %v573_v24, %v548_v23 }
  0xa2   : > { %v579_v27 = vsel %vm577_vm10, %v576_v26, %v558_v18 }
  0xa3   : > { %v582_v28 = vsel %vm580_vm11, %v579_v27, %v564_v25 }
  0xa4   : > { %797 = vmatmul.msk.bf16.vlgmr.msra.gmra.mxu0 %vm615_vm12, %v582_v28 }
 0x121   : > { %v631_v30 = vpop.f32.mrf.mxu0 }
 0x122   : > { %v632_v31 = vadd.f32 %v840_v29, %v631_v30 }
 0x124   : > { %v636_v32 = vpack.c.bf16 %v632_v31, %v632_v31 }
 0x126   : > { %639 = vst.msk [vmem:[%s404_s29] sm:$0xf] %vm638_vm13, %v636_v32 }
 0x129   : > { %v633_v33 = vpop.f32.mrf.mxu0 }
 0x12a   : > { %v634_v34 = vadd.f32 %v840_v29, %v633_v33 }
 0x12c   : > { %v637_v35 = vpack.c.bf16 %v634_v34, %v634_v34 }
 0x12e   : > { %640 = vst.msk [vmem:[%s404_s29 + $0x4] sm:$0xf] %vm638_vm13, %v637_v35 }
 0x12f PF: > { %s15_s20 = sadd.s32 1, %s863_s20   ;;  %s981_s18 = smov %s859_s19 }
 0x130   : > { %p12_p5 = scmp.ge.s32.totalorder %s15_s20, 4   ;;  %s982_s19 = smov %s984_s21 }
 0x132   :  { %14 = sbr.rel (!%p12_p5) target bundleno = 2 (0x2), region = 76 }

// kernel: generator_forward.18
= control target key start
LH: loop header
LB: loop body
LE: loop exit
PB: predicated region body
PF: predicated region fallthrough
CT: control target
= control target key end

     0   :  { %s960_s18 = smov 0   ;;  %s962_s19 = smov 0   ;;  %s1077_s0 = inlined_call_operand.vmem [shape: bf16[2,32,16], index: 0, kind: input, shape index: {}, may-alias: {0,1,2}]   ;;  %s1078_s1 = inlined_call_operand.vmem [shape: bf16[2,32,16], index: 1, kind: input, shape index: {}, may-alias: {0,1,2}]   ;;  %s1079_s2 = inlined_call_operand.vmem [shape: bf16[2,32,16], index: 2, kind: input, shape index: {}, may-alias: {0,1,2}]   ;;  %s1080_s3 = inlined_call_operand.vmem [shape: bf16[48,16], index: 3, kind: input, shape index: {}]   ;;  %s1081_s4 = inlined_call_operand.vmem [shape: f32[1,16], index: 4, kind: input, shape index: {}]   ;;  %s1082_s5 = inlined_call_operand.vmem [shape: bf16[2,32,16], index: 5, kind: output, shape index: {}]  }
   0x1   :  { %s964_s20 = smov 0  }
   0x2 LB: > { %s27_s21 = sadd.s32 1, %s920_s19  ;;  %p822_p0 = scmp.ge.s32.totalorder %s924_s20, 1  ;;  %s924_s20 = sphi %s964_s20, %s15_s20   ;;  %s920_s19 = sphi %s962_s19, %s1098_s19   ;;  %s916_s18 = sphi %s960_s18, %s1097_s18  }
   0x3   : > { %p29_p1 = scmp.ge.s32.totalorder %s27_s21, 2  ;;  %p282_p2 = scmp.lt.s32.totalorder %s924_s20, 3 }
   0x5   : > { %s1100_s21 = smov (%p29_p1, %s27_s21), 0  ;;  %p283_p3 = pnand %p822_p0, %p282_p2 }
   0x6   : > { %p352_p4 = scmp.lt.s32.totalorder (!%p283_p3), %s916_s18, 1  ;;  %s928_s13 = smov (!%p283_p3), 32  }
   0x7   : > { %286 = sbr.rel (%p283_p3) target bundleno = 310 (0x136), region = 40  ;;  %s929_s14 = smov (!%p283_p3), 16  }
   0xc   : > { %v465_v0 = vlaneseq  ;;  %s1102_s18 = smov (!%p352_p4, %s916_s18), 1  ;;  %vm926_vm0 = vmmov 1   ;;  %v927_v2 = vmov 0   ;;  %vm433_vm2 = vsmask.f32 256  ;;  %v869_v29 = vld [vmem:[%s1080_s3 + $0x10] sm:$0xff] }
   0xd   : > { %vm503_vm1 = vmpackc.low %vm926_vm0, %vm926_vm0  ;;  %s978_s22 = sshll.u32 %s1102_s18, 4  ;;  %v988_v7 = vunpack.c.h.b16 %v927_v2  ;;  %vm459_vm4 = vcmask 1040384   ;;  %v522_v13 = vunpack.c.l.b16 %v927_v2  ;;  %672 = vmatpush.bf16.msra.mxu0 %v869_v29  ;;  %v868_v36 = vld [vmem:[%s1080_s3 + $0x8] sm:$0xff]  ;;  %870 = vmatpush.bf16.msra.mxu1 %v869_v29  ;;  %v867_v48 = vld [vmem:[%s1080_s3] sm:$0xff] }
   0xe   : > { %v466_v1 = vshrl.u32 %v465_v0, 7  ;;  %v508_v3 = vsel %vm503_vm1, 65537, %v927_v2  ;;  %s359_s25 = scalar_lea.vmem %s1077_s0, %s978_s22  ;;  %s376_s28 = scalar_lea.vmem %s1078_s1, %s978_s22  ;;  %vm997_vm8 = vmand %vm459_vm4, %vm433_vm2 }
   0xf   : > { %v513_v5 = vunpack.c.l.b16 %v508_v3  ;;  %v409_v8 = vld [vmem:[%s359_s25 + $0xc] sm:$0xf]  ;;  %v865_v9 = vld [vmem:[%s376_s28] sm:$0xff]  ;;  %s391_s6 = scalar_lea.vmem %s1079_s2, %s978_s22  ;;  %s404_s23 = scalar_lea.vmem %s1082_s5, %s978_s22 }
  0x10   : > { %v472_v4 = vadd.s32 4294967295, %v466_v1  ;;  %v470_v6 = vadd.s32 32, %v466_v1  ;;  %v866_v10 = vld [vmem:[%s376_s28 + $0x8] sm:$0xff]  ;;  %v416_v12 = vunpack.c.l.b16 %v409_v8  ;;  %v414_v14 = vld [vmem:[%s391_s6] sm:$0xf]  ;;  %v435_v16 = vshrl.u32 %v865_v9, 16 }
  0x11   : > { %v840_v11 = vunpack.i.l.s16 %v513_v5  ;;  %v438_v17 = vshll.u32 %v865_v9, 16  ;;  %v442_v18 = vshrl.u32 %v866_v10, 16  ;;  %v445_v19 = vshll.u32 %v866_v10, 16  ;;  %673 = vmatpush.bf16.msra.mxu0 %v868_v36  ;;  %871 = vmatpush.bf16.msra.mxu1 %v868_v36 }
  0x12   : > { %vm477_vm3 = vcmp.ge.s32.totalorder %v472_v4, 0  ;;  %v476_v15 = vadd.s32 4294967295, %v470_v6  ;;  %v417_v20 = vpack.c.b16 %v416_v12, %v416_v12  ;;  %v437_v22 = vrot.slane %v435_v16, 7 }
  0x13   : > { %vm502_vm5 = vmpackc.low %vm477_vm3, %vm477_vm3  ;;  %vm525_vm6 = vcmp.ne.s32.totalorder %v840_v11, %v988_v7  ;;  %vm531_vm7 = vcmp.ne.s32.totalorder %v840_v11, %v522_v13  ;;  %v444_v23 = vrot.slane %v442_v18, 7  ;;  %v453_v26 = vunpack.c.l.b16 %v414_v14 }
  0x14   : > { %v507_v21 = vsel %vm502_vm5, 65537, %v927_v2  ;;  %v419_v27 = vshrl.u32 %v417_v20, 16  ;;  %vm1003_vm9 = vmpackc.low %vm525_vm6, %vm531_vm7  ;;  %vm486_vm10 = vcmp.lt.s32.totalorder %v476_v15, 32  ;;  %v440_v30 = vor.u32 %v438_v17, %v437_v22 }
  0x15   : > { %v512_v25 = vunpack.c.l.b16 %v507_v21  ;;  %v447_v31 = vor.u32 %v445_v19, %v444_v23  ;;  %v454_v33 = vpack.c.b16 %v453_v26, %v453_v26  ;;  %vm506_vm11 = vmpackc.low %vm486_vm10, %vm486_vm10  ;;  %674 = vmatpush.bf16.msra.mxu0 %v867_v48  ;;  %872 = vmatpush.bf16.msra.mxu1 %v867_v48  ;;  %vm614_vm7 = vcmask 1046528  }
  0x16   : > { %v421_v34 = vrot.slane %v419_v27, 3  ;;  %v511_v35 = vsel %vm506_vm11, 65537, %v927_v2  ;;  %vm586_vm10 = vsmask.f32 7424  ;;  %vm624_vm11 = vcmask 130048  }
  0x17   : > { %v839_v32 = vunpack.i.l.s16 %v512_v25  ;;  %v448_v37 = vsel %vm433_vm2, %v437_v22, %v447_v31  ;;  %v456_v38 = vshll.u32 %v454_v33, 16  ;;  %v516_v39 = vunpack.c.l.b16 %v511_v35 }
  0x18   : > { %v461_v40 = vsel %vm997_vm8, %v421_v34, %v440_v30  ;;  %v542_v41 = vsel %vm1003_vm9, %v448_v37, 0 }
  0x19   : > { %vm524_vm12 = vcmp.ne.s32.totalorder %v839_v32, %v522_v13  ;;  %v546_v43 = vunpack.c.l.bf16 %v542_v41  ;;  %v547_v44 = vunpack.c.h.bf16 %v542_v41  ;;  %v843_v47 = vunpack.i.l.s16 %v516_v39  ;;  %v901_v39 = vld [vmem:[%s1081_s4] ss:$0 sm:$0xff] }
  0x1a   : > { %vm526_vm13 = vmpackc.low %vm525_vm6, %vm524_vm12  ;;  %v462_v51 = vsel %vm997_vm8, %v444_v23, %v456_v38  ;;  %vm629_vm12 = vcmask 261120  }
  0x1b   : > { %v541_v42 = vsel %vm526_vm13, %v461_v40, 0  ;;  %v556_v49 = vmul.f32 0.100097656, %v546_v43  ;;  %v557_v50 = vmul.f32 0.100097656, %v547_v44  ;;  %vm1025_vm14 = vcmp.ge.f32.partialorder %v546_v43, 0.0 }
  0x1c   : > { %v544_v45 = vunpack.c.l.bf16 %v541_v42  ;;  %v545_v46 = vunpack.c.h.bf16 %v541_v42  ;;  %vm1029_vm15 = vcmp.ge.f32.partialorder %v547_v44, 0.0  ;;  %vm538_vm0 = vcmp.ne.s32.totalorder %v843_v47, %v522_v13 }
  0x1d   : > { %v561_v56 = vpack.c.bf16 %v556_v49, %v556_v49  ;;  %v562_v57 = vpack.c.bf16 %v557_v50, %v557_v50  ;;  %vm539_vm1 = vcmp.ne.s32.totalorder %v843_v47, %v988_v7  ;;  %vm565_vm5 = vmpackc.low %vm1029_vm15, %vm1025_vm14  ;;  %vm662_vm13 = vcmask 392192  }
  0x1e   : > { %v554_v54 = vmul.f32 0.100097656, %v544_v45  ;;  %v555_v55 = vmul.f32 0.100097656, %v545_v46  ;;  %vm1034_vm2 = vcmp.ge.f32.partialorder %v544_v45, 0.0  ;;  %vm1038_vm3 = vcmp.ge.f32.partialorder %v545_v46, 0.0  ;;  %vm540_vm4 = vmpackc.low %vm539_vm1, %vm538_vm0 }
  0x1f   : > { %v574_v62 = vunpack.c.l.b16 %v561_v56  ;;  %v575_v63 = vunpack.c.l.b16 %v562_v57  ;;  %v543_v0 = vsel %vm540_vm4, %v462_v51, 0  ;;  %vm564_vm6 = vmpackc.low %vm1038_vm3, %vm1034_vm2  ;;  %vm690_vm14 = vcmask 125952  }
  0x20   : > { %v559_v60 = vpack.c.bf16 %v554_v54, %v554_v54  ;;  %v560_v61 = vpack.c.bf16 %v555_v55, %v555_v55  ;;  %v548_v3 = vunpack.c.l.bf16 %v543_v0 }
  0x21   : > { %v578_v4 = vpack.c.b16 %v575_v63, %v574_v62 }
  0x22   : > { %v572_v1 = vunpack.c.l.b16 %v559_v60  ;;  %v573_v2 = vunpack.c.l.b16 %v560_v61  ;;  %v558_v6 = vmul.f32 0.100097656, %v548_v3  ;;  %vm1050_vm8 = vcmp.ge.f32.partialorder %v548_v3, 0.0 }
  0x23   : > { %v584_v7 = vsel %vm565_vm5, %v542_v41, %v578_v4  ;;  %vm566_vm9 = vmpackc.low %vm1050_vm8, %vm1050_vm8 }
  0x24   : > { %v577_v5 = vpack.c.b16 %v573_v2, %v572_v1  ;;  %v595_v10 = vshll.u32 %v584_v7, 16  ;;  %v616_v11 = vrot.slane %v584_v7, 1  ;;  %v563_v12 = vpack.c.bf16 %v558_v6, %v558_v6 }
  0x25   : > { %v599_v22 = vshrl.u32 %v584_v7, 16 }
  0x26   : > { %v583_v9 = vsel %vm564_vm6, %v541_v42, %v577_v5  ;;  %v576_v16 = vunpack.c.l.b16 %v563_v12  ;;  %v597_v18 = vrot.slane %v595_v10, 1 }
  0x27   : > { %v588_v13 = vshrl.u32 %v583_v9, 16  ;;  %v590_v14 = vshll.u32 %v583_v9, 16  ;;  %v615_v15 = vrot.slane %v583_v9, 1 }
  0x28   : > { %v579_v20 = vpack.c.b16 %v576_v16, %v576_v16  ;;  %v601_v27 = vor.u32 %v599_v22, %v597_v18 }
  0x29   : > { %v592_v17 = vrot.slane %v590_v14, 1  ;;  %v617_v19 = vsel %vm614_vm7, %v615_v15, %v616_v11 }
  0x2a   : > { %620 = vrot.lane.b32.xlu1 %v617_v19, %s928_s13  ;;  %v585_v23 = vsel %vm566_vm9, %v543_v0, %v579_v20 }
  0x2b   : > { %v593_v21 = vor.u32 %v592_v17, %v588_v13  ;;  %v603_v25 = vshll.u32 %v585_v23, 16  ;;  %v618_v26 = vrot.slane %v585_v23, 1 }
  0x2d   : > { %v598_v24 = vsel %vm586_vm10, %v593_v21, %v597_v18  ;;  %v605_v28 = vrot.slane %v603_v25, 1  ;;  %v619_v29 = vsel %vm614_vm7, %v616_v11, %v618_v26 }
  0x2e   : > { %607 = vrot.lane.b32.xlu0 %v598_v24, %s929_s14 }
  0x2f   : > { %v606_v30 = vsel %vm586_vm10, %v601_v27, %v605_v28 }
  0x32   : > { %622 = vrot.lane.b32.xlu1 %v619_v29, %s928_s13 }
  0x36   : > { %609 = vrot.lane.b32.xlu0 %v606_v30, %s929_s14 }
  0x9c   : > { %v621_v31 = vpop.permute.xlu1 %620 }
  0xa0   : > { %v608_v32 = vpop.permute.xlu0 %607 }
  0xa1   : > { %v626_v33 = vsel %vm624_vm11, %v583_v9, %v608_v32 }
  0xa2   : > { %v631_v34 = vsel %vm629_vm12, %v626_v33, %v621_v31 }
  0xa3   : > { %857 = vmatmul.msk.bf16.vlgmr.msra.gmra.mxu0 %vm662_vm13, %v631_v34 }
  0xa4   : > { %v623_v35 = vpop.permute.xlu1 %622 }
  0xa8   : > { %v610_v36 = vpop.permute.xlu0 %609 }
  0xa9   : > { %v628_v37 = vsel %vm624_vm11, %v584_v7, %v610_v36 }
  0xaa   : > { %v633_v38 = vsel %vm629_vm12, %v628_v37, %v623_v35 }
  0xab   : > { %858 = vmatmul.msk.bf16.vlgmr.msra.gmra.mxu1 %vm662_vm13, %v633_v38 }
 0x120   : > { %v676_v40 = vpop.f32.mrf.mxu0 }
 0x121   : > { %v677_v41 = vadd.f32 %v901_v39, %v676_v40 }
 0x123   : > { %v686_v42 = vpack.c.bf16 %v677_v41, %v677_v41 }
 0x125   : > { %691 = vst.msk [vmem:[%s404_s23] sm:$0xf] %vm690_vm14, %v686_v42 }
 0x128   : > { %v678_v43 = vpop.f32.mrf.mxu0  ;;  %v681_v44 = vpop.f32.mrf.mxu1 }
 0x129   : > { %v679_v45 = vadd.f32 %v901_v39, %v678_v43  ;;  %v682_v46 = vadd.f32 %v901_v39, %v681_v44 }
 0x12b   : > { %v687_v47 = vpack.c.bf16 %v679_v45, %v679_v45  ;;  %v688_v48 = vpack.c.bf16 %v682_v46, %v682_v46 }
 0x12d   : > { %692 = vst.msk [vmem:[%s404_s23 + $0x4] sm:$0xf] %vm690_vm14, %v687_v47 }
 0x12e   : > { %693 = vst.msk [vmem:[%s404_s23 + $0x8] sm:$0xf] %vm690_vm14, %v688_v48 }
 0x130   : > { %v683_v49 = vpop.f32.mrf.mxu1 }
 0x131   : > { %v684_v50 = vadd.f32 %v901_v39, %v683_v49 }
 0x133   : > { %v689_v51 = vpack.c.bf16 %v684_v50, %v684_v50 }
 0x135   : > { %694 = vst.msk [vmem:[%s404_s23 + $0xc] sm:$0xf] %vm690_vm14, %v689_v51 }
 0x136 PF: > { %s15_s20 = sadd.s32 1, %s924_s20   ;;  %s1097_s18 = smov %s920_s19 }
 0x137   : > { %p12_p5 = scmp.ge.s32.totalorder %s15_s20, 4   ;;  %s1098_s19 = smov %s1100_s21 }
 0x139   :  { %14 = sbr.rel (!%p12_p5) target bundleno = 2 (0x2), region = 76 }

// kernel: generator_forward.17
= control target key start
LH: loop header
LB: loop body
LE: loop exit
PB: predicated region body
PF: predicated region fallthrough
CT: control target
= control target key end

     0   :  { %s1417_s18 = smov 0   ;;  %s1419_s19 = smov 0   ;;  %s1634_s0 = inlined_call_operand.vmem [shape: bf16[2,31,32], index: 0, kind: input, shape index: {}, may-alias: {0,1,2}]   ;;  %s1635_s1 = inlined_call_operand.vmem [shape: bf16[2,31,32], index: 1, kind: input, shape index: {}, may-alias: {0,1,2}]   ;;  %s1636_s2 = inlined_call_operand.vmem [shape: bf16[2,31,32], index: 2, kind: input, shape index: {}, may-alias: {0,1,2}]   ;;  %s1637_s3 = inlined_call_operand.vmem [shape: bf16[128,16], index: 3, kind: input, shape index: {}]   ;;  %s1638_s4 = inlined_call_operand.vmem [shape: f32[1,16], index: 4, kind: input, shape index: {}]   ;;  %s1639_s5 = inlined_call_operand.vmem [shape: bf16[2,32,16], index: 5, kind: output, shape index: {}]  }
   0x1   :  { %s1421_s20 = smov 0   ;;  %s1423_s21 = smov 0  }
   0x2   :  { %s1425_s22 = smov 0   ;;  %s1427_s23 = smov 0  }
   0x3   :  { %s1429_s24 = smov 0  }
   0x4 LB: > { %1643 = sst [smem:[#allocation3_spill]] %s1345_s23  ;;  %s24_s25 = sadd.s32 1, %s1341_s22  ;;  %s1349_s24 = sphi %s1429_s24, %s15_s24   ;;  %s1345_s23 = sphi %s1427_s23, %s1664_s23   ;;  %s1341_s22 = sphi %s1425_s22, %s1668_s22   ;;  %s1337_s21 = sphi %s1423_s21, %s1662_s21   ;;  %s1333_s20 = sphi %s1421_s20, %s1667_s20   ;;  %s1329_s19 = sphi %s1419_s19, %s1666_s19   ;;  %s1325_s18 = sphi %s1417_s18, %s1665_s18  }
   0x5   : > { %p25_p0 = scmp.ge.s32.totalorder %s24_s25, 2  ;;  %s27_s26 = sadd.s32 1, %s1345_s23 }
   0x6   : > { %s1024_s27 = sadd.s32 4294967295, %s1349_s24   ;;  %p192_p1 = scmp.ne.s32.totalorder %s1329_s19, %s1325_s18 }
   0x7   : > { %s1670_s25 = smov (%p25_p0, %s24_s25), 0  ;;  %s1672_s26 = smov (!%p25_p0, %s27_s26), %s1345_s23 }
   0x8   : > { %1644 = sst [smem:[#allocation4_spill]] %s1670_s25  ;;  %s178_s28 = ssub.s32 %s1341_s22, %s1670_s25 }
   0x9   : > { %p193_p2 = scmp.eq.s32.totalorder %s1024_s27, 3  ;;  %p29_p3 = scmp.ge.s32.totalorder %s1672_s26, 2 }
   0xa   : > { %p1040_p4 = scmp.ge.s32.totalorder %s1349_s24, 1  ;;  %p306_p6 = scmp.lt.s32.totalorder %s1349_s24, 5 }
   0xb   : > { %p1463_p5 = por %p193_p2, %p192_p1  ;;  %s1674_s26 = smov (%p29_p3, %s1672_s26), 0 }
   0xc   : > { %1646 = sst [smem:[#allocation5_spill]] %s1674_s26  ;;  %p307_p7 = pnand %p1040_p4, %p306_p6 }
   0xd   : > { %s177_s30 = ssub.s32 %s1345_s23, %s1674_s26  ;;  %s182_s7 = sadd.s32 1, %s1329_s19 }
   0xe   : > { %s179_s6 = sor.u32 %s178_s28, %s177_s30  ;;  %310 = sbr.rel (%p307_p7) target bundleno = 384 (0x180), region = 40 }
   0xf   : > { %p180_p8 = scmp.eq.s32.totalorder %s179_s6, 0  ;;  %s1041_s9 = sadd.s32 (!%p307_p7), 4294967295, %s1333_s20 }
  0x10   : > { %p387_p9 = scmp.lt.s32.totalorder (!%p307_p7), %s1337_s21, 1  ;;  %p378_p10 = scmp.gt.s32.totalorder (!%p307_p7), %s1041_s9, 0 }
  0x11   : > { %s1474_s8 = scalar_select %p180_p8, %s1329_s19, %s182_s7  }
  0x12   : > { %p1042_p11 = scmp.lt.s32.totalorder (!%p307_p7), %s1041_s9, 1  ;;  %p405_p12 = scmp.lt.s32.totalorder (!%p307_p7), %s1333_s20, 1 }
  0x13   : > { %s388_s10 = scalar_select %p387_p9, %s1337_s21, 1  ;;  %v496_v0 = vlaneseq  ;;  %v1383_v20 = vmov 0   ;;  %vm476_vm15 = vcmask 1040384   ;;  %v1121_v42 = vld [vmem:[%s1637_s3 + $0x38] sm:$0xff]  ;;  %v1120_v48 = vld [vmem:[%s1637_s3 + $0x30] sm:$0xff]  ;;  %v1119_v56 = vld [vmem:[%s1637_s3 + $0x28] sm:$0xff] }
  0x14   : > { %s1676_s9 = smov (!%p378_p10, %s1041_s9), 0  ;;  %s427_s13 = sadd.s32 1, %s1333_s20  ;;  %v542_v22 = vunpack.c.l.b16 %v1383_v20  ;;  %v543_v29 = vunpack.c.h.b16 %v1383_v20  ;;  %715 = vmatpush.bf16.msra.mxu0 %v1121_v42  ;;  %1122 = vmatpush.bf16.msra.mxu1 %v1121_v42 }
  0x15   : > { %s1678_s9 = smov (!%p1042_p11, %s1676_s9), 1  ;;  %v497_v1 = vshrl.u32 %v496_v0, 7  ;;  %s1482_s14 = sshll.u32 %s388_s10, 2 }
  0x16   : > { %s406_s11 = scalar_select %p405_p12, %s1333_s20, 1 }
  0x17   : > { %s382_s12 = smul.u32 3, %s1678_s9  ;;  %p1485_p1 = scmp.lt.s32.totalorder %s427_s13, 1  ;;  %v498_v2 = vadd.s32 8, %v497_v1  ;;  %v499_v3 = vadd.s32 16, %v497_v1  ;;  %v500_v4 = vadd.s32 24, %v497_v1 }
  0x18   : > { %s407_s15 = smul.u32 3, %s406_s11  ;;  %716 = vmatpush.bf16.msra.mxu0 %v1120_v48  ;;  %1123 = vmatpush.bf16.msra.mxu1 %v1120_v48  ;;  %s1386_s26 = smov 96  }
  0x19   : > { %p389_p13 = scmp.lt.s32.totalorder %s382_s12, 3  ;;  %s494_s16 = smul.u32 24, %s1333_s20 }
  0x1a   : > { %p414_p0 = scmp.lt.s32.totalorder %s407_s15, 3  ;;  %s1684_s13 = smov (!%p1485_p1, %s427_s13), 1 }
  0x1b   : > { %s1680_s12 = smov (!%p389_p13, %s382_s12), 3  ;;  %s1057_s28 = sadd.s32 4294967294, %s494_s16 }
  0x1c   : > { %s1682_s15 = smov (!%p414_p0, %s407_s15), 3  ;;  %s392_s27 = sadd.s32 %s1482_s14, %s1680_s12  ;;  %v501_v5 = vstv %s1057_s28  ;;  %717 = vmatpush.bf16.msra.mxu0 %v1119_v56  ;;  %1124 = vmatpush.bf16.msra.mxu1 %v1119_v56 }
  0x1d   : > { %s1048_s30 = sshll.u32 %s392_s27, 2  ;;  %s417_s6 = sadd.s32 %s1482_s14, %s1682_s15  ;;  %v502_v6 = vadd.s32 %v501_v5, %v497_v1  ;;  %v503_v7 = vadd.s32 %v501_v5, %v498_v2  ;;  %v504_v8 = vadd.s32 %v501_v5, %v499_v3  ;;  %v505_v9 = vadd.s32 %v501_v5, %v500_v4  ;;  %v1118_v4 = vld [vmem:[%s1637_s3 + $0x20] sm:$0xff] }
  0x1e   : > { %s394_s10 = scalar_lea.vmem %s1634_s0, %s1048_s30  ;;  %s1050_s11 = sshll.u32 %s417_s6, 2 }
  0x1f   : > { %s419_s23 = scalar_lea.vmem %s1635_s1, %s1050_s11  ;;  %v459_v10 = vld [vmem:[%s394_s10 + $0x8] sm:$0xf]  ;;  %vm506_vm0 = vcmp.ge.s32.totalorder %v502_v6, 0  ;;  %vm507_vm1 = vcmp.ge.s32.totalorder %v503_v7, 0  ;;  %vm508_vm2 = vcmp.ge.s32.totalorder %v504_v8, 0  ;;  %vm510_vm3 = vcmp.lt.s32.totalorder %v502_v6, 31 }
  0x20   : > { %v462_v11 = vld [vmem:[%s419_s23 + $0x8] sm:$0xf]  ;;  %v465_v12 = vunpack.c.l.b16 %v459_v10  ;;  %s430_s12 = smul.u32 3, %s1684_s13  ;;  %vm509_vm4 = vcmp.ge.s32.totalorder %v505_v9, 0  ;;  %vm511_vm5 = vcmp.lt.s32.totalorder %v503_v7, 31  ;;  %vm512_vm6 = vcmp.lt.s32.totalorder %v504_v8, 31  ;;  %vm514_vm7 = vmand %vm506_vm0, %vm510_vm3  ;;  %718 = vmatpush.bf16.msra.mxu0 %v1118_v4  ;;  %1125 = vmatpush.bf16.msra.mxu1 %v1118_v4 }
  0x21   : > { %v473_v13 = vunpack.c.l.b16 %v462_v11  ;;  %vm513_vm8 = vcmp.lt.s32.totalorder %v505_v9, 31  ;;  %vm1499_vm9 = vmand %vm507_vm1, %vm511_vm5  ;;  %v1113_v15 = vld [vmem:[%s419_s23] sm:$0xff]  ;;  %vm489_vm5 = vcmask 1044480   ;;  %s374_s17 = sand.u32 1, %s1325_s18   ;;  %s747_s18 = smul.u32 (%p1463_p5), 3, %s1333_s20 }
  0x22   : > { %p437_p2 = scmp.lt.s32.totalorder %s430_s12, 3  ;;  %v466_v16 = vpack.c.b16 %v465_v12, %v465_v12  ;;  %vm1503_vm10 = vmand %vm508_vm2, %vm512_vm6  ;;  %v477_v24 = vrot.slane %v1113_v15, 7  ;;  %v1117_v12 = vld [vmem:[%s1637_s3 + $0x18] sm:$0xff]  ;;  %s1130_s30 = smul.u32 12, %s374_s17 }
  0x23   : > { %vm1507_vm11 = vmand %vm509_vm4, %vm513_vm8  ;;  %v475_v19 = vpack.c.b16 %v473_v13, %v473_v13  ;;  %s1096_s7 = sshll.u32 (%p1463_p5), %s1337_s21, 2  ;;  %s748_s9 = ssub.s32 (%p1463_p5), 4, %s747_s18 }
  0x24   : > { %s1686_s12 = smov (!%p437_p2, %s430_s12), 3  ;;  %vm526_vm12 = vmpackc.low %vm514_vm7, %vm514_vm7  ;;  %v467_v23 = vrot.slane %v466_v16, 3  ;;  %719 = vmatpush.bf16.msra.mxu0 %v1117_v12  ;;  %1126 = vmatpush.bf16.msra.mxu1 %v1117_v12  ;;  %s1578_s6 = scalar_lea.vmem [#allocation2], %s1130_s30  }
  0x25   : > { %vm527_vm13 = vmpackc.low %vm1499_vm9, %vm1499_vm9  ;;  %v530_v21 = vsel %vm526_vm12, 65537, %v1383_v20  ;;  %s440_s23 = sadd.s32 %s1482_s14, %s1686_s12  ;;  %v478_v34 = vrot.slane %v475_v19, 7  ;;  %s754_s10 = sadd.s32 (%p1463_p5), %s1096_s7, %s747_s18 }
  0x26   : > { %vm528_vm14 = vmpackc.low %vm1503_vm10, %vm1503_vm10  ;;  %v531_v25 = vsel %vm527_vm13, 65537, %v1383_v20  ;;  %v534_v26 = vunpack.c.l.b16 %v530_v21  ;;  %s1052_s25 = sshll.u32 %s440_s23, 2  ;;  %v487_v38 = vsel %vm476_vm15, %v467_v23, %v477_v24  ;;  %v1116_v21 = vld [vmem:[%s1637_s3 + $0x10] sm:$0xff]  ;;  %s1384_s23 = smov 64  }
  0x27   : > { %vm529_vm0 = vmpackc.low %vm1507_vm11, %vm1507_vm11  ;;  %v532_v27 = vsel %vm528_vm14, 65537, %v1383_v20  ;;  %v535_v28 = vunpack.c.l.b16 %v531_v25  ;;  %s442_s14 = scalar_lea.vmem %s1636_s2, %s1052_s25  ;;  %v479_v43 = vsel %vm476_vm15, %v477_v24, %v478_v34  ;;  %vm588_vm14 = vsmask.f32 7424  ;;  %s1385_s25 = smov 32  }
  0x28   : > { %v533_v30 = vsel %vm529_vm0, 65537, %v1383_v20  ;;  %v536_v31 = vunpack.c.l.b16 %v532_v27  ;;  %v1058_v32 = vunpack.i.l.s16 %v534_v26  ;;  %v463_v33 = vld [vmem:[%s442_s14] sm:$0xf]  ;;  %vm618_vm15 = vsmask.f32 6400  ;;  %720 = vmatpush.bf16.msra.mxu0 %v1116_v21  ;;  %1127 = vmatpush.bf16.msra.mxu1 %v1116_v21  ;;  %p749_p3 = scmp.lt.s32.totalorder (%p1463_p5), %s748_s9, 3 }
  0x29   : > { %v537_v35 = vunpack.c.l.b16 %v533_v30  ;;  %v1059_v36 = vunpack.i.l.s16 %v535_v28  ;;  %v481_v37 = vunpack.c.l.b16 %v463_v33  ;;  %vm610_vm0 = vcmask 1046528   ;;  %v1114_v33 = vld [vmem:[%s1637_s3] sm:$0xff]  ;;  %s1097_s11 = sshll.u32 (%p1463_p5), %s754_s10, 2 }
  0x2a   : > { %vm544_vm1 = vcmp.ne.s32.totalorder %v1058_v32, %v542_v22  ;;  %v1060_v39 = vunpack.i.l.s16 %v536_v31  ;;  %v1115_v32 = vld [vmem:[%s1637_s3 + $0x8] sm:$0xff] }
  0x2b   : > { %vm545_vm2 = vcmp.ne.s32.totalorder %v1059_v36, %v543_v29  ;;  %v1061_v40 = vunpack.i.l.s16 %v537_v35  ;;  %v482_v41 = vpack.c.b16 %v481_v37, %v481_v37 }
  0x2c   : > { %vm546_vm3 = vmpackc.low %vm545_vm2, %vm544_vm1  ;;  %vm551_vm4 = vcmp.ne.s32.totalorder %v1060_v39, %v542_v22  ;;  %721 = vmatpush.bf16.msra.mxu0 %v1115_v32  ;;  %1128 = vmatpush.bf16.msra.mxu1 %v1115_v32  ;;  %vm630_vm1 = vcmask 261120   ;;  %vm635_vm2 = vcmask 523264  }
  0x2d   : > { %vm552_vm6 = vcmp.ne.s32.totalorder %v1061_v40, %v543_v29  ;;  %v554_v44 = vsel %vm546_vm3, %v487_v38, 0  ;;  %v483_v45 = vrot.slane %v482_v41, 3  ;;  %vm640_vm3 = vcmask 785408  }
  0x2e   : > { %vm553_vm7 = vmpackc.low %vm552_vm6, %vm551_vm4  ;;  %v556_v46 = vunpack.c.l.bf16 %v554_v44  ;;  %v557_v47 = vunpack.c.h.bf16 %v554_v44  ;;  %vm736_vm4 = vcmask 125952  }
  0x2f   : > { %v492_v49 = vsel %vm489_vm5, %v479_v43, %v483_v45 }
  0x30   : > { %v564_v50 = vmul.f32 0.100097656, %v556_v46  ;;  %v555_v51 = vsel %vm553_vm7, %v492_v49, 0  ;;  %v565_v52 = vmul.f32 0.100097656, %v557_v47  ;;  %vm1535_vm8 = vcmp.ge.f32.partialorder %v556_v46, 0.0  ;;  %722 = vmatpush.bf16.msra.mxu0 %v1114_v33  ;;  %1129 = vmatpush.bf16.msra.mxu1 %v1114_v33  ;;  %v1256_v46 = vld [vmem:[%s1638_s4] ss:$0 sm:$0xff] }
  0x31   : > { %v558_v53 = vunpack.c.l.bf16 %v555_v51  ;;  %v559_v54 = vunpack.c.h.bf16 %v555_v51  ;;  %vm1539_vm9 = vcmp.ge.f32.partialorder %v557_v47, 0.0 }
  0x32   : > { %v568_v55 = vpack.c.bf16 %v564_v50, %v564_v50  ;;  %v569_v59 = vpack.c.bf16 %v565_v52, %v565_v52  ;;  %vm572_vm12 = vmpackc.low %vm1539_vm9, %vm1535_vm8 }
  0x33   : > { %v566_v60 = vmul.f32 0.100097656, %v558_v53  ;;  %v567_v61 = vmul.f32 0.100097656, %v559_v54  ;;  %vm1543_vm10 = vcmp.ge.f32.partialorder %v558_v53, 0.0  ;;  %vm1547_vm11 = vcmp.ge.f32.partialorder %v559_v54, 0.0 }
  0x34   : > { %v578_v62 = vunpack.c.l.b16 %v568_v55  ;;  %v579_v63 = vunpack.c.l.b16 %v569_v59  ;;  %vm573_vm13 = vmpackc.low %vm1547_vm11, %vm1543_vm10 }
  0x35   : > { %v570_v2 = vpack.c.bf16 %v566_v60, %v566_v60  ;;  %v571_v3 = vpack.c.bf16 %v567_v61, %v567_v61 }
  0x36   : > { %v582_v5 = vpack.c.b16 %v579_v63, %v578_v62 }
  0x37   : > { %v580_v6 = vunpack.c.l.b16 %v570_v2  ;;  %v581_v7 = vunpack.c.l.b16 %v571_v3 }
  0x38   : > { %v586_v8 = vsel %vm572_vm12, %v554_v44, %v582_v5 }
  0x39   : > { %v583_v9 = vpack.c.b16 %v581_v7, %v580_v6  ;;  %v590_v10 = vshrl.u32 %v586_v8, 16  ;;  %v592_v11 = vshll.u32 %v586_v8, 16  ;;  %v611_v29 = vrot.slane %v586_v8, 1 }
  0x3b   : > { %v587_v13 = vsel %vm573_vm13, %v555_v51, %v583_v9  ;;  %v619_v14 = vrot.slane %v590_v10, 1  ;;  %v620_v15 = vrot.slane %v592_v11, 2  ;;  %v594_v16 = vrot.slane %v592_v11, 1 }
  0x3c   : > { %v597_v17 = vshll.u32 %v587_v13, 16  ;;  %v601_v18 = vshrl.u32 %v587_v13, 16  ;;  %v612_v19 = vrot.slane %v587_v13, 1 }
  0x3d   : > { %v595_v20 = vor.u32 %v594_v16, %v590_v10  ;;  %v621_v22 = vor.u32 %v620_v15, %v619_v14 }
  0x3e   : > { %v622_v23 = vrot.slane %v601_v18, 1  ;;  %v623_v24 = vrot.slane %v597_v17, 2  ;;  %v599_v25 = vrot.slane %v597_v17, 1  ;;  %616 = vrot.lane.b32.xlu2 %v612_v19, %s1384_s23  ;;  %v613_v30 = vsel %vm610_vm0, %v611_v29, %v612_v19 }
  0x40   : > { %v624_v26 = vor.u32 %v623_v24, %v622_v23  ;;  %v600_v27 = vsel %vm588_vm14, %v595_v20, %v599_v25  ;;  %v603_v31 = vor.u32 %v601_v18, %v599_v25 }
  0x41   : > { %604 = vrot.lane.b32.xlu0 %v600_v27, %s1385_s25 }
  0x42   : > { %v625_v28 = vsel %vm618_vm15, %v621_v22, %v624_v26 }
  0x43   : > { %626 = vrot.lane.b32.xlu1 %v625_v28, %s1386_s26 }
  0x46   : > { %628 = vrot.lane.b32.xlu2 %v624_v26, %s1386_s26 }
  0x49   : > { %614 = vrot.lane.b32.xlu0 %v613_v30, %s1384_s23 }
  0x4b   : > { %606 = vrot.lane.b32.xlu1 %v603_v31, %s1385_s25  ;;  %s1590_s25 = scalar_lea.vmem (%p1463_p5), %s1639_s5, %s1097_s11  }
  0x98   : > { %v617_v35 = vpop.permute.xlu2 %616 }
  0xa0   : > { %v629_v41 = vpop.permute.xlu2 %628 }
  0xb3   : > { %v605_v34 = vpop.permute.xlu0 %604 }
  0xb4   : > { %v632_v37 = vsel %vm630_vm1, %v586_v8, %v605_v34 }
  0xb5   : > { %v627_v36 = vpop.permute.xlu1 %626 }
  0xbb   : > { %v615_v38 = vpop.permute.xlu0 %614 }
  0xbc   : > { %v637_v39 = vsel %vm635_vm2, %v632_v37, %v615_v38 }
  0xbd   : > { %v607_v40 = vpop.permute.xlu1 %606  ;;  %v642_v42 = vsel %vm640_vm3, %v637_v39, %v627_v36 }
  0xbe   : > { %v634_v43 = vsel %vm630_vm1, %v587_v13, %v607_v40  ;;  %723 = vmatmul.bf16.vlgmr.msra.gmra.mxu0 %v642_v42 }
  0xbf   : > { %v639_v44 = vsel %vm635_vm2, %v634_v43, %v617_v35 }
  0xc0   : > { %v645_v45 = vsel %vm640_vm3, %v639_v44, %v629_v41 }
  0xc1   : > { %728 = vmatmul.bf16.vlgmr.msra.gmra.mxu1 %v645_v45 }
 0x13b   : > { %v724_v47 = vpop.f32.mrf.mxu0 }
 0x13c   : > { %v725_v48 = vadd.f32 %v1256_v46, %v724_v47 }
 0x13e   : > { %v733_v49 = vpack.c.bf16 %v725_v48, %v725_v48  ;;  %v729_v50 = vpop.f32.mrf.mxu1 }
 0x13f   : > { %v730_v51 = vadd.f32 %v1256_v46, %v729_v50 }
 0x140   : > { %737 = vst.msk [vmem:[%s1578_s6] sm:$0xf] %vm736_vm4, %v733_v49 }
 0x141   : > { %v735_v52 = vpack.c.bf16 %v730_v51, %v730_v51 }
 0x143   : > { %739 = vst.msk [vmem:[%s1578_s6 + $0x8] sm:$0xf] %vm736_vm4, %v735_v52  ;;  %v726_v53 = vpop.f32.mrf.mxu0 }
 0x144   : > { %v727_v54 = vadd.f32 %v1256_v46, %v726_v53  ;;  %746 = sbr.rel (!%p1463_p5) target bundleno = 384 (0x180), region = 44 }
 0x146   : > { %v734_v55 = vpack.c.bf16 %v727_v54, %v727_v54  ;;  %v731_v56 = vpop.f32.mrf.mxu1 }
 0x148   : > { %738 = vst.msk [vmem:[%s1578_s6 + $0x4] sm:$0xf] %vm736_vm4, %v734_v55 }
 0x149   : > { %s1688_s9 = smov (!%p749_p3, %s748_s9), 3 }
 0x14a   : > { %s1094_s26 = sshll.u32 %s1688_s9, 2 }
 0x14b   : > { %p1098_p4 = scmp.eq.s32.totalorder %s1094_s26, 0 }
 0x14c   : > { %1257 = sdivrem.u32 (!%p1098_p4), %s1688_s9, 3 }
 0x14d   : > { %759 = sbr.rel (%p1098_p4) target bundleno = 384 (0x180), region = 48 }
 0x155   : > { %s1596_s29 = spop.drf %1257 }
 0x156   : > { %s1259_s20 = spop.drf %1257  ;;  %p1099_p5 = scmp.le.s32.totalorder %s1596_s29, 0 }
 0x157   : > { %s1351_s21 = smov (!%p1099_p5), %s1590_s25   ;;  %s1355_s13 = smov (!%p1099_p5), %s1578_s6  }
 0x158   : > { %957 = sbr.rel (%p1099_p5) target bundleno = 358 (0x166), region = 126  ;;  %s1359_s14 = smov (!%p1099_p5), 0  }
 0x159   : > { %s1363_s15 = smov (!%p1099_p5), 0  }
 0x15d LB: >> { %v777_v57 = vld [vmem:[%s1357_s13] sm:$0xf]  ;;  %v779_v58 = vld [vmem:[%s1357_s13 + $0x4] sm:$0xf]  ;;  %v781_v59 = vld [vmem:[%s1357_s13 + $0x8] sm:$0xf]  ;;  %s1365_s15 = sphi %s1363_s15, %s771_s15   ;;  %s1361_s14 = sphi %s1359_s14, %s1360_s14   ;;  %s1357_s13 = sphi %s1355_s13, %s788_s13   ;;  %s1353_s21 = sphi %s1351_s21, %s789_s21  }
 0x15e   : >> { %778 = vst [vmem:[%s1353_s21] sm:$0xf] %v777_v57  ;;  %s783_s16 = sadd.s32 1, %s1361_s14  ;;  %s771_s15 = sadd.s32 1, %s1365_s15  }
 0x15f   : >> { %780 = vst [vmem:[%s1353_s21 + $0x4] sm:$0xf] %v779_v58  ;;  %p784_p6 = scmp.ge.s32.totalorder %s783_s16, %s1596_s29  ;;  %p770_p7 = scmp.ge.s32.totalorder %s771_s15, %s1596_s29 }
 0x160   : >> { %782 = vst [vmem:[%s1353_s21 + $0x8] sm:$0xf] %v781_v59 }
 0x161   : >> { %s1690_s16 = smov (%p784_p6, %s783_s16), 0  ;;  %773 = sbr.rel (!%p770_p7) target bundleno = 349 (0x15d), region = 132 }
 0x162   : >> { %s786_s17 = smul.u32 12, %s1690_s16  ;;  %s1360_s14 = smov %s1690_s16  }
 0x164   : >> { %s788_s13 = scalar_lea.vmem %s1578_s6, %s786_s17 [#allocation2]   ;;  %s789_s21 = scalar_lea.vmem %s1590_s25, %s786_s17  }
 0x166 PF: > { %1260 = sdivrem.u32 %s1688_s9, 3 }
 0x167   : > { %s1100_s27 = smul.u32 12, %s1596_s29 }
 0x169   : > { %s1608_s28 = scalar_lea.vmem %s1578_s6, %s1100_s27 [#allocation2]   ;;  %s796_s30 = scalar_lea.vmem %s1590_s25, %s1100_s27  }
 0x16f   : > { %s1261_s18 = spop.drf %1260 }
 0x170   : > { %s1262_s7 = spop.drf %1260 }
 0x171   : > { %p1102_p8 = scmp.le.s32.totalorder %s1262_s7, 0 }
 0x172   : > { %s1367_s10 = smov (!%p1102_p8), %s796_s30   ;;  %s1371_s11 = smov (!%p1102_p8), %s1608_s28  }
 0x173   : > { %971 = sbr.rel (%p1102_p8) target bundleno = 384 (0x180), region = 137  ;;  %s1375_s12 = smov (!%p1102_p8), 0  }
 0x174   : > { %s1379_s23 = smov (!%p1102_p8), 0  }
 0x178 LB: >> { %v806_v60 = vld [vmem:[%s1373_s11] sm:$0xf]  ;;  %s808_s6 = sadd.s32 1, %s1377_s12  ;;  %s800_s23 = sadd.s32 1, %s1381_s23   ;;  %s1381_s23 = sphi %s1379_s23, %s800_s23   ;;  %s1377_s12 = sphi %s1375_s12, %s1376_s12   ;;  %s1373_s11 = sphi %s1371_s11, %s813_s11   ;;  %s1369_s10 = sphi %s1367_s10, %s814_s10  }
 0x179   : >> { %807 = vst [vmem:[%s1369_s10] sm:$0xf] %v806_v60  ;;  %p809_p9 = scmp.ge.s32.totalorder %s808_s6, %s1262_s7  ;;  %p799_p10 = scmp.ge.s32.totalorder %s800_s23, %s1262_s7 }
 0x17b   : >> { %s1692_s6 = smov (%p809_p9, %s808_s6), 0  ;;  %802 = sbr.rel (!%p799_p10) target bundleno = 376 (0x178), region = 143 }
 0x17c   : >> { %s1103_s9 = sshll.u32 %s1692_s6, 2  ;;  %s1376_s12 = smov %s1692_s6  }
 0x17d   : >> { %s813_s11 = scalar_lea.vmem %s1608_s28, %s1103_s9 [#allocation2]   ;;  %s814_s10 = scalar_lea.vmem %s796_s30, %s1103_s9  }
 0x180 PF: > { %s15_s24 = sadd.s32 1, %s1349_s24   ;;  %s1662_s21 = sld [smem:[#allocation3_spill]] }
 0x181   : > { %p12_p11 = scmp.ge.s32.totalorder %s15_s24, 6   ;;  %s1663_s25 = sld [smem:[#allocation4_spill]] }
 0x182   : > { %s1664_s23 = sld [smem:[#allocation5_spill]]  ;;  %s1665_s18 = smov %s1329_s19 }
 0x183   : > { %s1666_s19 = smov %s1474_s8  ;;  %s1667_s20 = smov %s1341_s22 }
 0x184   :  { %14 = sbr.rel (!%p12_p11) target bundleno = 4 (0x4), region = 154 }
 0x187   : > { %s1668_s22 = smov %s1663_s25 }

// kernel: generator_forward.19
= control target key start
LH: loop header
LB: loop body
LE: loop exit
PB: predicated region body
PF: predicated region fallthrough
CT: control target
= control target key end

     0   :  { %s1070_s21 = smov 0   ;;  %s1072_s22 = smov 0   ;;  %s1195_s0 = inlined_call_operand.vmem [shape: bf16[2,32,16], index: 0, kind: input, shape index: {}, may-alias: {0,1,2}]   ;;  %s1196_s1 = inlined_call_operand.vmem [shape: bf16[2,32,16], index: 1, kind: input, shape index: {}, may-alias: {0,1,2}]   ;;  %s1197_s2 = inlined_call_operand.vmem [shape: bf16[2,32,16], index: 2, kind: input, shape index: {}, may-alias: {0,1,2}]   ;;  %s1198_s3 = inlined_call_operand.vmem [shape: bf16[48,16], index: 3, kind: input, shape index: {}]   ;;  %s1199_s4 = inlined_call_operand.vmem [shape: f32[1,16], index: 4, kind: input, shape index: {}]   ;;  %s1200_s5 = inlined_call_operand.vmem [shape: bf16[2,32,16], index: 5, kind: input, shape index: {}]   ;;  %s1201_s6 = inlined_call_operand.vmem [shape: bf16[2,32,16], index: 6, kind: output, shape index: {}]  }
   0x1   :  { %s1074_s23 = smov 0  }
   0x2 LB: > { %s28_s24 = sadd.s32 1, %s1025_s22  ;;  %p915_p0 = scmp.ge.s32.totalorder %s1029_s23, 1  ;;  %s1029_s23 = sphi %s1074_s23, %s16_s23   ;;  %s1025_s22 = sphi %s1072_s22, %s1217_s22   ;;  %s1021_s21 = sphi %s1070_s21, %s1216_s21  }
   0x3   : > { %p30_p1 = scmp.ge.s32.totalorder %s28_s24, 2  ;;  %p324_p2 = scmp.lt.s32.totalorder %s1029_s23, 3 }
   0x5   : > { %s1219_s24 = smov (%p30_p1, %s28_s24), 0  ;;  %p325_p3 = pnand %p915_p0, %p324_p2 }
   0x6   : > { %p405_p4 = scmp.lt.s32.totalorder (!%p325_p3), %s1021_s21, 1  ;;  %s1033_s17 = smov (!%p325_p3), 32  }
   0x7   : > { %328 = sbr.rel (%p325_p3) target bundleno = 312 (0x138), region = 44  ;;  %s1034_s18 = smov (!%p325_p3), 16  }
   0xc   : > { %v528_v0 = vlaneseq  ;;  %s1221_s21 = smov (!%p405_p4, %s1021_s21), 1  ;;  %vm1031_vm0 = vmmov 1   ;;  %v1032_v2 = vmov 0   ;;  %vm496_vm2 = vsmask.f32 256  ;;  %v965_v29 = vld [vmem:[%s1198_s3 + $0x10] sm:$0xff] }
   0xd   : > { %vm566_vm1 = vmpackc.low %vm1031_vm0, %vm1031_vm0  ;;  %s1088_s25 = sshll.u32 %s1221_s21, 4  ;;  %v1098_v7 = vunpack.c.h.b16 %v1032_v2  ;;  %vm522_vm4 = vcmask 1040384   ;;  %v585_v13 = vunpack.c.l.b16 %v1032_v2  ;;  %735 = vmatpush.bf16.msra.mxu0 %v965_v29  ;;  %v964_v36 = vld [vmem:[%s1198_s3 + $0x8] sm:$0xff]  ;;  %975 = vmatpush.bf16.msra.mxu1 %v965_v29  ;;  %v963_v48 = vld [vmem:[%s1198_s3] sm:$0xff] }
   0xe   : > { %v529_v1 = vshrl.u32 %v528_v0, 7  ;;  %v571_v3 = vsel %vm566_vm1, 65537, %v1032_v2  ;;  %s412_s28 = scalar_lea.vmem %s1195_s0, %s1088_s25  ;;  %s429_s7 = scalar_lea.vmem %s1196_s1, %s1088_s25  ;;  %vm1107_vm8 = vmand %vm522_vm4, %vm496_vm2 }
   0xf   : > { %v576_v5 = vunpack.c.l.b16 %v571_v3  ;;  %v472_v8 = vld [vmem:[%s412_s28 + $0xc] sm:$0xf]  ;;  %v961_v9 = vld [vmem:[%s429_s7] sm:$0xff]  ;;  %s444_s10 = scalar_lea.vmem %s1197_s2, %s1088_s25  ;;  %s457_s21 = scalar_lea.vmem %s1200_s5, %s1088_s25 }
  0x10   : > { %v535_v4 = vadd.s32 4294967295, %v529_v1  ;;  %v533_v6 = vadd.s32 32, %v529_v1  ;;  %v962_v10 = vld [vmem:[%s429_s7 + $0x8] sm:$0xff]  ;;  %v479_v12 = vunpack.c.l.b16 %v472_v8  ;;  %v477_v14 = vld [vmem:[%s444_s10] sm:$0xf]  ;;  %v498_v16 = vshrl.u32 %v961_v9, 16  ;;  %s467_s30 = scalar_lea.vmem %s1201_s6, %s1088_s25 }
  0x11   : > { %v935_v11 = vunpack.i.l.s16 %v576_v5  ;;  %v501_v17 = vshll.u32 %v961_v9, 16  ;;  %v505_v18 = vshrl.u32 %v962_v10, 16  ;;  %v508_v19 = vshll.u32 %v962_v10, 16  ;;  %736 = vmatpush.bf16.msra.mxu0 %v964_v36  ;;  %976 = vmatpush.bf16.msra.mxu1 %v964_v36 }
  0x12   : > { %vm540_vm3 = vcmp.ge.s32.totalorder %v535_v4, 0  ;;  %v539_v15 = vadd.s32 4294967295, %v533_v6  ;;  %v480_v20 = vpack.c.b16 %v479_v12, %v479_v12  ;;  %v500_v22 = vrot.slane %v498_v16, 7 }
  0x13   : > { %vm565_vm5 = vmpackc.low %vm540_vm3, %vm540_vm3  ;;  %vm588_vm6 = vcmp.ne.s32.totalorder %v935_v11, %v1098_v7  ;;  %vm594_vm7 = vcmp.ne.s32.totalorder %v935_v11, %v585_v13  ;;  %v507_v23 = vrot.slane %v505_v18, 7  ;;  %v516_v26 = vunpack.c.l.b16 %v477_v14 }
  0x14   : > { %v570_v21 = vsel %vm565_vm5, 65537, %v1032_v2  ;;  %v482_v27 = vshrl.u32 %v480_v20, 16  ;;  %vm1113_vm9 = vmpackc.low %vm588_vm6, %vm594_vm7  ;;  %vm549_vm10 = vcmp.lt.s32.totalorder %v539_v15, 32  ;;  %v503_v30 = vor.u32 %v501_v17, %v500_v22 }
  0x15   : > { %v575_v25 = vunpack.c.l.b16 %v570_v21  ;;  %v510_v31 = vor.u32 %v508_v19, %v507_v23  ;;  %v517_v33 = vpack.c.b16 %v516_v26, %v516_v26  ;;  %vm569_vm11 = vmpackc.low %vm549_vm10, %vm549_vm10  ;;  %737 = vmatpush.bf16.msra.mxu0 %v963_v48  ;;  %977 = vmatpush.bf16.msra.mxu1 %v963_v48  ;;  %vm677_vm7 = vcmask 1046528  }
  0x16   : > { %v484_v34 = vrot.slane %v482_v27, 3  ;;  %v574_v35 = vsel %vm569_vm11, 65537, %v1032_v2  ;;  %vm649_vm10 = vsmask.f32 7424  ;;  %vm687_vm11 = vcmask 130048  }
  0x17   : > { %v934_v32 = vunpack.i.l.s16 %v575_v25  ;;  %v511_v37 = vsel %vm496_vm2, %v500_v22, %v510_v31  ;;  %v519_v38 = vshll.u32 %v517_v33, 16  ;;  %v579_v39 = vunpack.c.l.b16 %v574_v35 }
  0x18   : > { %v524_v40 = vsel %vm1107_vm8, %v484_v34, %v503_v30  ;;  %v605_v41 = vsel %vm1113_vm9, %v511_v37, 0 }
  0x19   : > { %vm587_vm12 = vcmp.ne.s32.totalorder %v934_v32, %v585_v13  ;;  %v609_v43 = vunpack.c.l.bf16 %v605_v41  ;;  %v610_v44 = vunpack.c.h.bf16 %v605_v41  ;;  %v938_v47 = vunpack.i.l.s16 %v579_v39  ;;  %v967_v39 = vld [vmem:[%s457_s21] sm:$0xff]  }
  0x1a   : > { %vm589_vm13 = vmpackc.low %vm588_vm6, %vm587_vm12  ;;  %v525_v51 = vsel %vm1107_vm8, %v507_v23, %v519_v38  ;;  %vm692_vm12 = vcmask 261120  }
  0x1b   : > { %v604_v42 = vsel %vm589_vm13, %v524_v40, 0  ;;  %v619_v49 = vmul.f32 0.100097656, %v609_v43  ;;  %v620_v50 = vmul.f32 0.100097656, %v610_v44  ;;  %vm1135_vm14 = vcmp.ge.f32.partialorder %v609_v43, 0.0  ;;  %v1006_v40 = vld [vmem:[%s1199_s4] ss:$0 sm:$0xff] }
  0x1c   : > { %v607_v45 = vunpack.c.l.bf16 %v604_v42  ;;  %v608_v46 = vunpack.c.h.bf16 %v604_v42  ;;  %vm1139_vm15 = vcmp.ge.f32.partialorder %v610_v44, 0.0  ;;  %vm601_vm0 = vcmp.ne.s32.totalorder %v938_v47, %v585_v13 }
  0x1d   : > { %v624_v56 = vpack.c.bf16 %v619_v49, %v619_v49  ;;  %v625_v57 = vpack.c.bf16 %v620_v50, %v620_v50  ;;  %vm602_vm1 = vcmp.ne.s32.totalorder %v938_v47, %v1098_v7  ;;  %vm628_vm5 = vmpackc.low %vm1139_vm15, %vm1135_vm14  ;;  %vm725_vm13 = vcmask 392192  }
  0x1e   : > { %v617_v54 = vmul.f32 0.100097656, %v607_v45  ;;  %v618_v55 = vmul.f32 0.100097656, %v608_v46  ;;  %vm1144_vm2 = vcmp.ge.f32.partialorder %v607_v45, 0.0  ;;  %vm1148_vm3 = vcmp.ge.f32.partialorder %v608_v46, 0.0  ;;  %vm603_vm4 = vmpackc.low %vm602_vm1, %vm601_vm0  ;;  %v974_v45 = vld [vmem:[%s457_s21 + $0x8] sm:$0xff]  }
  0x1f   : > { %v637_v62 = vunpack.c.l.b16 %v624_v56  ;;  %v638_v63 = vunpack.c.l.b16 %v625_v57  ;;  %v606_v0 = vsel %vm603_vm4, %v525_v51, 0  ;;  %vm627_vm6 = vmpackc.low %vm1148_vm3, %vm1144_vm2  ;;  %vm765_vm14 = vcmask 125952  }
  0x20   : > { %v622_v60 = vpack.c.bf16 %v617_v54, %v617_v54  ;;  %v623_v61 = vpack.c.bf16 %v618_v55, %v618_v55  ;;  %v611_v3 = vunpack.c.l.bf16 %v606_v0  ;;  %v969_v47 = vunpack.c.h.bf16 %v967_v39 }
  0x21   : > { %v641_v4 = vpack.c.b16 %v638_v63, %v637_v62  ;;  %v972_v48 = vunpack.c.l.bf16 %v974_v45  ;;  %v973_v57 = vunpack.c.h.bf16 %v974_v45 }
  0x22   : > { %v635_v1 = vunpack.c.l.b16 %v622_v60  ;;  %v636_v2 = vunpack.c.l.b16 %v623_v61  ;;  %v621_v6 = vmul.f32 0.100097656, %v611_v3  ;;  %vm1160_vm8 = vcmp.ge.f32.partialorder %v611_v3, 0.0 }
  0x23   : > { %v647_v7 = vsel %vm628_vm5, %v605_v41, %v641_v4  ;;  %vm629_vm9 = vmpackc.low %vm1160_vm8, %vm1160_vm8  ;;  %v968_v41 = vunpack.c.l.bf16 %v967_v39 }
  0x24   : > { %v640_v5 = vpack.c.b16 %v636_v2, %v635_v1  ;;  %v658_v10 = vshll.u32 %v647_v7, 16  ;;  %v679_v11 = vrot.slane %v647_v7, 1  ;;  %v626_v12 = vpack.c.bf16 %v621_v6, %v621_v6 }
  0x25   : > { %v662_v22 = vshrl.u32 %v647_v7, 16 }
  0x26   : > { %v646_v9 = vsel %vm627_vm6, %v604_v42, %v640_v5  ;;  %v639_v16 = vunpack.c.l.b16 %v626_v12  ;;  %v660_v18 = vrot.slane %v658_v10, 1 }
  0x27   : > { %v651_v13 = vshrl.u32 %v646_v9, 16  ;;  %v653_v14 = vshll.u32 %v646_v9, 16  ;;  %v678_v15 = vrot.slane %v646_v9, 1 }
  0x28   : > { %v642_v20 = vpack.c.b16 %v639_v16, %v639_v16  ;;  %v664_v27 = vor.u32 %v662_v22, %v660_v18 }
  0x29   : > { %v655_v17 = vrot.slane %v653_v14, 1  ;;  %v680_v19 = vsel %vm677_vm7, %v678_v15, %v679_v11 }
  0x2a   : > { %683 = vrot.lane.b32.xlu1 %v680_v19, %s1033_s17  ;;  %v648_v23 = vsel %vm629_vm9, %v606_v0, %v642_v20 }
  0x2b   : > { %v656_v21 = vor.u32 %v655_v17, %v651_v13  ;;  %v666_v25 = vshll.u32 %v648_v23, 16  ;;  %v681_v26 = vrot.slane %v648_v23, 1 }
  0x2d   : > { %v661_v24 = vsel %vm649_vm10, %v656_v21, %v660_v18  ;;  %v668_v28 = vrot.slane %v666_v25, 1  ;;  %v682_v29 = vsel %vm677_vm7, %v679_v11, %v681_v26 }
  0x2e   : > { %670 = vrot.lane.b32.xlu0 %v661_v24, %s1034_s18 }
  0x2f   : > { %v669_v30 = vsel %vm649_vm10, %v664_v27, %v668_v28 }
  0x32   : > { %685 = vrot.lane.b32.xlu1 %v682_v29, %s1033_s17 }
  0x36   : > { %672 = vrot.lane.b32.xlu0 %v669_v30, %s1034_s18 }
  0x9c   : > { %v684_v31 = vpop.permute.xlu1 %683 }
  0xa0   : > { %v671_v32 = vpop.permute.xlu0 %670 }
  0xa1   : > { %v689_v33 = vsel %vm687_vm11, %v646_v9, %v671_v32 }
  0xa2   : > { %v694_v34 = vsel %vm692_vm12, %v689_v33, %v684_v31 }
  0xa3   : > { %952 = vmatmul.msk.bf16.vlgmr.msra.gmra.mxu0 %vm725_vm13, %v694_v34 }
  0xa4   : > { %v686_v35 = vpop.permute.xlu1 %685 }
  0xa8   : > { %v673_v36 = vpop.permute.xlu0 %672 }
  0xa9   : > { %v691_v37 = vsel %vm687_vm11, %v647_v7, %v673_v36 }
  0xaa   : > { %v696_v38 = vsel %vm692_vm12, %v691_v37, %v686_v35 }
  0xab   : > { %953 = vmatmul.msk.bf16.vlgmr.msra.gmra.mxu1 %vm725_vm13, %v696_v38 }
 0x120   : > { %v739_v42 = vpop.f32.mrf.mxu0 }
 0x121   : > { %v740_v43 = vadd.f32 %v1006_v40, %v739_v42 }
 0x123   : > { %v757_v44 = vadd.f32 %v968_v41, %v740_v43 }
 0x125   : > { %v761_v46 = vpack.c.bf16 %v757_v44, %v757_v44 }
 0x127   : > { %766 = vst.msk [vmem:[%s467_s30] sm:$0xf] %vm765_vm14, %v761_v46 }
 0x128   : > { %v741_v49 = vpop.f32.mrf.mxu0  ;;  %v744_v50 = vpop.f32.mrf.mxu1 }
 0x129   : > { %v742_v51 = vadd.f32 %v1006_v40, %v741_v49  ;;  %v745_v52 = vadd.f32 %v1006_v40, %v744_v50 }
 0x12b   : > { %v758_v53 = vadd.f32 %v969_v47, %v742_v51  ;;  %v759_v54 = vadd.f32 %v972_v48, %v745_v52 }
 0x12d   : > { %v762_v55 = vpack.c.bf16 %v758_v53, %v758_v53  ;;  %v763_v56 = vpack.c.bf16 %v759_v54, %v759_v54 }
 0x12f   : > { %767 = vst.msk [vmem:[%s467_s30 + $0x4] sm:$0xf] %vm765_vm14, %v762_v55 }
 0x130   : > { %768 = vst.msk [vmem:[%s467_s30 + $0x8] sm:$0xf] %vm765_vm14, %v763_v56  ;;  %v746_v58 = vpop.f32.mrf.mxu1 }
 0x131   : > { %v747_v59 = vadd.f32 %v1006_v40, %v746_v58 }
 0x133   : > { %v760_v60 = vadd.f32 %v973_v57, %v747_v59 }
 0x135   : > { %v764_v61 = vpack.c.bf16 %v760_v60, %v760_v60 }
 0x137   : > { %769 = vst.msk [vmem:[%s467_s30 + $0xc] sm:$0xf] %vm765_vm14, %v764_v61 }
 0x138 PF: > { %s16_s23 = sadd.s32 1, %s1029_s23   ;;  %s1216_s21 = smov %s1025_s22 }
 0x139   : > { %p13_p5 = scmp.ge.s32.totalorder %s16_s23, 4   ;;  %s1217_s22 = smov %s1219_s24 }
 0x13b   :  { %15 = sbr.rel (!%p13_p5) target bundleno = 2 (0x2), region = 83 }

// kernel: generator_forward.20
= control target key start
LH: loop header
LB: loop body
LE: loop exit
PB: predicated region body
PF: predicated region fallthrough
CT: control target
= control target key end

     0   :  { %s977_s18 = smov 0   ;;  %s979_s19 = smov 0   ;;  %s1093_s0 = inlined_call_operand.vmem [shape: bf16[2,32,16], index: 0, kind: input, shape index: {}, may-alias: {0,1,2}]   ;;  %s1094_s1 = inlined_call_operand.vmem [shape: bf16[2,32,16], index: 1, kind: input, shape index: {}, may-alias: {0,1,2}]   ;;  %s1095_s2 = inlined_call_operand.vmem [shape: bf16[2,32,16], index: 2, kind: input, shape index: {}, may-alias: {0,1,2}]   ;;  %s1096_s3 = inlined_call_operand.vmem [shape: bf16[48,16], index: 3, kind: input, shape index: {}]   ;;  %s1097_s4 = inlined_call_operand.vmem [shape: f32[1,16], index: 4, kind: input, shape index: {}]   ;;  %s1098_s5 = inlined_call_operand.vmem [shape: bf16[2,32,16], index: 5, kind: output, shape index: {}]  }
   0x1   :  { %s981_s20 = smov 0  }
   0x2 LB: > { %s27_s21 = sadd.s32 1, %s937_s19  ;;  %p839_p0 = scmp.ge.s32.totalorder %s941_s20, 1  ;;  %s941_s20 = sphi %s981_s20, %s15_s20   ;;  %s937_s19 = sphi %s979_s19, %s1112_s19   ;;  %s933_s18 = sphi %s977_s18, %s1111_s18  }
   0x3   : > { %p29_p1 = scmp.ge.s32.totalorder %s27_s21, 2  ;;  %p282_p2 = scmp.lt.s32.totalorder %s941_s20, 3 }
   0x5   : > { %s1114_s21 = smov (%p29_p1, %s27_s21), 0  ;;  %p283_p3 = pnand %p839_p0, %p282_p2 }
   0x6   : > { %p352_p4 = scmp.lt.s32.totalorder (!%p283_p3), %s933_s18, 1  ;;  %s945_s13 = smov (!%p283_p3), 32  }
   0x7   : > { %286 = sbr.rel (%p283_p3) target bundleno = 310 (0x136), region = 40  ;;  %s946_s14 = smov (!%p283_p3), 16  }
   0xc   : > { %v476_v0 = vlaneseq  ;;  %s1116_s18 = smov (!%p352_p4, %s933_s18), 1  ;;  %vm943_vm0 = vmmov 1   ;;  %v944_v2 = vmov 0   ;;  %vm437_vm3 = vsmask.f32 1280  ;;  %v886_v36 = vld [vmem:[%s1096_s3 + $0x10] sm:$0xff] }
   0xd   : > { %vm514_vm1 = vmpackc.low %vm943_vm0, %vm943_vm0  ;;  %s995_s22 = sshll.u32 %s1116_s18, 4  ;;  %v1005_v7 = vunpack.c.l.b16 %v944_v2  ;;  %v1007_v8 = vunpack.c.h.b16 %v944_v2  ;;  %vm470_vm4 = vcmask 1041408   ;;  %689 = vmatpush.bf16.msra.mxu0 %v886_v36  ;;  %v885_v43 = vld [vmem:[%s1096_s3 + $0x8] sm:$0xff]  ;;  %887 = vmatpush.bf16.msra.mxu1 %v886_v36  ;;  %v884_v56 = vld [vmem:[%s1096_s3] sm:$0xff] }
   0xe   : > { %v477_v1 = vshrl.u32 %v476_v0, 7  ;;  %v519_v3 = vsel %vm514_vm1, 65537, %v944_v2  ;;  %s359_s25 = scalar_lea.vmem %s1093_s0, %s995_s22  ;;  %s376_s28 = scalar_lea.vmem %s1094_s1, %s995_s22  ;;  %vm1023_vm11 = vmand %vm470_vm4, %vm437_vm3 }
   0xf   : > { %v524_v5 = vunpack.c.l.b16 %v519_v3  ;;  %v409_v9 = vld [vmem:[%s359_s25 + $0xc] sm:$0xf]  ;;  %v882_v10 = vld [vmem:[%s376_s28] sm:$0xff]  ;;  %s391_s6 = scalar_lea.vmem %s1095_s2, %s995_s22  ;;  %s404_s23 = scalar_lea.vmem %s1098_s5, %s995_s22 }
  0x10   : > { %v483_v4 = vadd.s32 4294967293, %v477_v1  ;;  %v481_v6 = vadd.s32 32, %v477_v1  ;;  %v883_v11 = vld [vmem:[%s376_s28 + $0x8] sm:$0xff]  ;;  %v416_v13 = vunpack.c.l.b16 %v409_v9  ;;  %v439_v15 = vshrl.u32 %v882_v10, 16  ;;  %v414_v19 = vld [vmem:[%s391_s6] sm:$0xf] }
  0x11   : > { %v857_v12 = vunpack.i.l.s16 %v524_v5  ;;  %v442_v16 = vshll.u32 %v882_v10, 16  ;;  %v447_v17 = vshrl.u32 %v883_v11, 16  ;;  %v450_v18 = vshll.u32 %v883_v11, 16  ;;  %690 = vmatpush.bf16.msra.mxu0 %v885_v43  ;;  %888 = vmatpush.bf16.msra.mxu1 %v885_v43 }
  0x12   : > { %vm488_vm2 = vcmp.ge.s32.totalorder %v483_v4, 0  ;;  %v487_v14 = vadd.s32 4294967293, %v481_v6  ;;  %v417_v20 = vpack.c.b16 %v416_v13, %v416_v13  ;;  %v441_v22 = vrot.slane %v439_v15, 6 }
  0x13   : > { %vm513_vm5 = vmpackc.low %vm488_vm2, %vm488_vm2  ;;  %vm536_vm6 = vcmp.ne.s32.totalorder %v857_v12, %v1007_v8  ;;  %vm542_vm7 = vcmp.ne.s32.totalorder %v857_v12, %v1005_v7  ;;  %v444_v23 = vrot.slane %v442_v16, 7  ;;  %v449_v24 = vrot.slane %v447_v17, 6 }
  0x14   : > { %v518_v21 = vsel %vm513_vm5, 65537, %v944_v2  ;;  %v452_v25 = vrot.slane %v450_v18, 7  ;;  %v419_v26 = vshrl.u32 %v417_v20, 16  ;;  %v422_v27 = vshll.u32 %v417_v20, 16  ;;  %vm544_vm8 = vmpackc.low %vm536_vm6, %vm542_vm7 }
  0x15   : > { %v523_v28 = vunpack.c.l.b16 %v518_v21  ;;  %v459_v29 = vunpack.c.l.b16 %v414_v19  ;;  %v445_v30 = vor.u32 %v444_v23, %v441_v22  ;;  %vm497_vm9 = vcmp.lt.s32.totalorder %v487_v14, 32  ;;  %691 = vmatpush.bf16.msra.mxu0 %v884_v56  ;;  %889 = vmatpush.bf16.msra.mxu1 %v884_v56 }
  0x16   : > { %v453_v31 = vor.u32 %v452_v25, %v449_v24  ;;  %v421_v32 = vrot.slane %v419_v26, 2  ;;  %v424_v33 = vrot.slane %v422_v27, 3  ;;  %vm517_vm10 = vmpackc.low %vm497_vm9, %vm497_vm9  ;;  %vm631_vm7 = vcmask 1044480  }
  0x17   : > { %v856_v34 = vunpack.i.l.s16 %v523_v28  ;;  %v460_v35 = vpack.c.b16 %v459_v29, %v459_v29  ;;  %v522_v39 = vsel %vm517_vm10, 65537, %v944_v2  ;;  %vm597_vm9 = vsmask.f32 6400 }
  0x18   : > { %v454_v37 = vsel %vm437_vm3, %v445_v30, %v453_v31  ;;  %v425_v40 = vor.u32 %v424_v33, %v421_v32  ;;  %v527_v47 = vunpack.c.l.b16 %v522_v39 }
  0x19   : > { %vm535_vm12 = vcmp.ne.s32.totalorder %v856_v34, %v1005_v7  ;;  %v553_v41 = vsel %vm544_vm8, %v454_v37, 0  ;;  %v462_v42 = vshrl.u32 %v460_v35, 16  ;;  %v465_v46 = vshll.u32 %v460_v35, 16 }
  0x1a   : > { %vm537_vm13 = vmpackc.low %vm536_vm6, %vm535_vm12  ;;  %v557_v44 = vunpack.c.l.bf16 %v553_v41  ;;  %v558_v45 = vunpack.c.h.bf16 %v553_v41  ;;  %v472_v48 = vsel %vm1023_vm11, %v425_v40, %v445_v30  ;;  %v860_v59 = vunpack.i.l.s16 %v527_v47 }
  0x1b   : > { %v552_v49 = vsel %vm537_vm13, %v472_v48, 0  ;;  %v464_v51 = vrot.slane %v462_v42, 6  ;;  %v467_v55 = vrot.slane %v465_v46, 7  ;;  %vm646_vm12 = vcmask 261120  }
  0x1c   : > { %v567_v50 = vmul.f32 0.100097656, %v557_v44  ;;  %v555_v52 = vunpack.c.l.bf16 %v552_v49  ;;  %v556_v53 = vunpack.c.h.bf16 %v552_v49  ;;  %v568_v54 = vmul.f32 0.100097656, %v558_v45 }
  0x1d   : > { %vm1038_vm14 = vcmp.ge.f32.partialorder %v557_v44, 0.0  ;;  %vm1046_vm0 = vcmp.ge.f32.partialorder %v558_v45, 0.0  ;;  %v468_v2 = vor.u32 %v467_v55, %v464_v51  ;;  %vm549_vm1 = vcmp.ne.s32.totalorder %v860_v59, %v1005_v7 }
  0x1e   : > { %v572_v58 = vpack.c.bf16 %v567_v50, %v567_v50  ;;  %vm1042_vm15 = vcmp.ge.f32.partialorder %v555_v52, 0.0  ;;  %v565_v62 = vmul.f32 0.100097656, %v555_v52  ;;  %v566_v63 = vmul.f32 0.100097656, %v556_v53  ;;  %vm576_vm5 = vmpackc.low %vm1046_vm0, %vm1038_vm14  ;;  %v918_v52 = vld [vmem:[%s1097_s4] ss:$0 sm:$0xff] }
  0x1f   : > { %v573_v0 = vpack.c.bf16 %v568_v54, %v568_v54  ;;  %vm1051_vm2 = vcmp.ge.f32.partialorder %v556_v53, 0.0  ;;  %vm550_vm3 = vcmp.ne.s32.totalorder %v860_v59, %v1007_v8  ;;  %v473_v9 = vsel %vm1023_vm11, %v453_v31, %v468_v2 }
  0x20   : > { %v585_v1 = vunpack.c.l.b16 %v572_v58  ;;  %v570_v4 = vpack.c.bf16 %v565_v62, %v565_v62  ;;  %v571_v5 = vpack.c.bf16 %v566_v63, %v566_v63  ;;  %vm551_vm4 = vmpackc.low %vm550_vm3, %vm549_vm1  ;;  %vm641_vm11 = vcmask 130048  }
  0x21   : > { %v586_v6 = vunpack.c.l.b16 %v573_v0  ;;  %v554_v11 = vsel %vm551_vm4, %v473_v9, 0  ;;  %vm575_vm6 = vmpackc.low %vm1051_vm2, %vm1042_vm15  ;;  %vm679_vm13 = vcmask 392192   ;;  %vm707_vm14 = vcmask 125952  }
  0x22   : > { %v583_v7 = vunpack.c.l.b16 %v570_v4  ;;  %v584_v10 = vunpack.c.l.b16 %v571_v5  ;;  %v559_v12 = vunpack.c.l.bf16 %v554_v11 }
  0x23   : > { %v589_v8 = vpack.c.b16 %v586_v6, %v585_v1 }
  0x24   : > { %v588_v13 = vpack.c.b16 %v584_v10, %v583_v7  ;;  %vm1066_vm8 = vcmp.ge.f32.partialorder %v559_v12, 0.0  ;;  %v569_v16 = vmul.f32 0.100097656, %v559_v12 }
  0x25   : > { %v595_v14 = vsel %vm576_vm5, %v553_v41, %v589_v8  ;;  %vm577_vm10 = vmpackc.low %vm1066_vm8, %vm1066_vm8 }
  0x26   : > { %v594_v17 = vsel %vm575_vm6, %v552_v49, %v588_v13  ;;  %v607_v18 = vshrl.u32 %v595_v14, 16  ;;  %v610_v19 = vshll.u32 %v595_v14, 16  ;;  %v633_v20 = vrot.slane %v595_v14, 3 }
  0x27   : > { %v599_v21 = vshrl.u32 %v594_v17, 16  ;;  %v602_v22 = vshll.u32 %v594_v17, 16  ;;  %v632_v23 = vrot.slane %v594_v17, 3  ;;  %v574_v24 = vpack.c.bf16 %v569_v16, %v569_v16 }
  0x28   : > { %v609_v25 = vrot.slane %v607_v18, 1  ;;  %v612_v26 = vrot.slane %v610_v19, 2 }
  0x29   : > { %v601_v27 = vrot.slane %v599_v21, 1  ;;  %v604_v28 = vrot.slane %v602_v22, 2  ;;  %v634_v29 = vsel %vm631_vm7, %v632_v23, %v633_v20  ;;  %v587_v30 = vunpack.c.l.b16 %v574_v24 }
  0x2a   : > { %v613_v31 = vor.u32 %v612_v26, %v609_v25  ;;  %637 = vrot.lane.b32.xlu1 %v634_v29, %s945_s13 }
  0x2b   : > { %v605_v32 = vor.u32 %v604_v28, %v601_v27  ;;  %v590_v33 = vpack.c.b16 %v587_v30, %v587_v30 }
  0x2d   : > { %v614_v34 = vsel %vm597_vm9, %v605_v32, %v613_v31  ;;  %v596_v35 = vsel %vm577_vm10, %v554_v11, %v590_v33 }
  0x2e   : > { %624 = vrot.lane.b32.xlu0 %v614_v34, %s946_s14  ;;  %v616_v36 = vshrl.u32 %v596_v35, 16  ;;  %v619_v37 = vshll.u32 %v596_v35, 16  ;;  %v635_v38 = vrot.slane %v596_v35, 3 }
  0x30   : > { %v618_v39 = vrot.slane %v616_v36, 1  ;;  %v621_v40 = vrot.slane %v619_v37, 2  ;;  %v636_v41 = vsel %vm631_vm7, %v633_v20, %v635_v38 }
  0x32   : > { %v622_v42 = vor.u32 %v621_v40, %v618_v39  ;;  %639 = vrot.lane.b32.xlu1 %v636_v41, %s945_s13 }
  0x34   : > { %v623_v43 = vsel %vm597_vm9, %v613_v31, %v622_v42 }
  0x36   : > { %626 = vrot.lane.b32.xlu0 %v623_v43, %s946_s14 }
  0x9c   : > { %v638_v44 = vpop.permute.xlu1 %637 }
  0xa0   : > { %v625_v45 = vpop.permute.xlu0 %624 }
  0xa1   : > { %v643_v46 = vsel %vm641_vm11, %v594_v17, %v625_v45 }
  0xa2   : > { %v648_v47 = vsel %vm646_vm12, %v643_v46, %v638_v44 }
  0xa3   : > { %874 = vmatmul.msk.bf16.vlgmr.msra.gmra.mxu0 %vm679_vm13, %v648_v47 }
  0xa4   : > { %v640_v48 = vpop.permute.xlu1 %639 }
  0xa8   : > { %v627_v49 = vpop.permute.xlu0 %626 }
  0xa9   : > { %v645_v50 = vsel %vm641_vm11, %v595_v14, %v627_v49 }
  0xaa   : > { %v650_v51 = vsel %vm646_vm12, %v645_v50, %v640_v48 }
  0xab   : > { %875 = vmatmul.msk.bf16.vlgmr.msra.gmra.mxu1 %vm679_vm13, %v650_v51 }
 0x120   : > { %v693_v53 = vpop.f32.mrf.mxu0 }
 0x121   : > { %v694_v54 = vadd.f32 %v918_v52, %v693_v53 }
 0x123   : > { %v703_v55 = vpack.c.bf16 %v694_v54, %v694_v54 }
 0x125   : > { %708 = vst.msk [vmem:[%s404_s23] sm:$0xf] %vm707_vm14, %v703_v55 }
 0x128   : > { %v695_v56 = vpop.f32.mrf.mxu0  ;;  %v698_v57 = vpop.f32.mrf.mxu1 }
 0x129   : > { %v696_v58 = vadd.f32 %v918_v52, %v695_v56  ;;  %v699_v59 = vadd.f32 %v918_v52, %v698_v57 }
 0x12b   : > { %v704_v60 = vpack.c.bf16 %v696_v58, %v696_v58  ;;  %v705_v61 = vpack.c.bf16 %v699_v59, %v699_v59 }
 0x12d   : > { %709 = vst.msk [vmem:[%s404_s23 + $0x4] sm:$0xf] %vm707_vm14, %v704_v60 }
 0x12e   : > { %710 = vst.msk [vmem:[%s404_s23 + $0x8] sm:$0xf] %vm707_vm14, %v705_v61 }
 0x130   : > { %v700_v62 = vpop.f32.mrf.mxu1 }
 0x131   : > { %v701_v63 = vadd.f32 %v918_v52, %v700_v62 }
 0x133   : > { %v706_v0 = vpack.c.bf16 %v701_v63, %v701_v63 }
 0x135   : > { %711 = vst.msk [vmem:[%s404_s23 + $0xc] sm:$0xf] %vm707_vm14, %v706_v0 }
 0x136 PF: > { %s15_s20 = sadd.s32 1, %s941_s20   ;;  %s1111_s18 = smov %s937_s19 }
 0x137   : > { %p12_p5 = scmp.ge.s32.totalorder %s15_s20, 4   ;;  %s1112_s19 = smov %s1114_s21 }
 0x139   :  { %14 = sbr.rel (!%p12_p5) target bundleno = 2 (0x2), region = 76 }

// kernel: generator_forward.22
= control target key start
LH: loop header
LB: loop body
LE: loop exit
PB: predicated region body
PF: predicated region fallthrough
CT: control target
= control target key end

     0   :  { %s994_s18 = smov 0   ;;  %s996_s19 = smov 0   ;;  %s1117_s0 = inlined_call_operand.vmem [shape: bf16[2,32,16], index: 0, kind: input, shape index: {}, may-alias: {0,1,2}]   ;;  %s1118_s1 = inlined_call_operand.vmem [shape: bf16[2,32,16], index: 1, kind: input, shape index: {}, may-alias: {0,1,2}]   ;;  %s1119_s2 = inlined_call_operand.vmem [shape: bf16[2,32,16], index: 2, kind: input, shape index: {}, may-alias: {0,1,2}]   ;;  %s1120_s3 = inlined_call_operand.vmem [shape: bf16[48,16], index: 3, kind: input, shape index: {}]   ;;  %s1121_s4 = inlined_call_operand.vmem [shape: f32[1,16], index: 4, kind: input, shape index: {}]   ;;  %s1122_s5 = inlined_call_operand.vmem [shape: bf16[2,32,16], index: 5, kind: output, shape index: {}]  }
   0x1   :  { %s998_s20 = smov 0  }
   0x2 LB: > { %s27_s21 = sadd.s32 1, %s953_s19  ;;  %p854_p0 = scmp.ge.s32.totalorder %s957_s20, 1  ;;  %s957_s20 = sphi %s998_s20, %s15_s20   ;;  %s953_s19 = sphi %s996_s19, %s1138_s19   ;;  %s949_s18 = sphi %s994_s18, %s1137_s18  }
   0x3   : > { %p29_p1 = scmp.ge.s32.totalorder %s27_s21, 2  ;;  %p282_p2 = scmp.lt.s32.totalorder %s957_s20, 3 }
   0x5   : > { %s1140_s21 = smov (%p29_p1, %s27_s21), 0  ;;  %p283_p3 = pnand %p854_p0, %p282_p2 }
   0x6   : > { %p352_p4 = scmp.lt.s32.totalorder (!%p283_p3), %s949_s18, 1  ;;  %s962_s13 = smov (!%p283_p3), 32  }
   0x7   : > { %286 = sbr.rel (%p283_p3) target bundleno = 311 (0x137), region = 40  ;;  %s963_s14 = smov (!%p283_p3), 16  }
   0xc   : > { %v476_v0 = vlaneseq  ;;  %s1142_s18 = smov (!%p352_p4, %s949_s18), 1  ;;  %vm959_vm0 = vmmov 1   ;;  %v960_v2 = vmov 0   ;;  %vm961_vm2 = vmmov 0   ;;  %v901_v42 = vld [vmem:[%s1120_s3 + $0x10] sm:$0xff]  ;;  %v900_v50 = vld [vmem:[%s1120_s3 + $0x8] sm:$0xff] }
   0xd   : > { %vm521_vm1 = vmpackc.low %vm959_vm0, %vm959_vm0  ;;  %s1012_s22 = sshll.u32 %s1142_s18, 4  ;;  %vm437_vm4 = vsmask.f32 2304  ;;  %v1022_v8 = vunpack.c.l.b16 %v960_v2  ;;  %v1024_v9 = vunpack.c.h.b16 %v960_v2  ;;  %vm470_vm6 = vcmask 1042432   ;;  %704 = vmatpush.bf16.msra.mxu0 %v901_v42  ;;  %902 = vmatpush.bf16.msra.mxu1 %v901_v42  ;;  %v899_v61 = vld [vmem:[%s1120_s3] sm:$0xff] }
   0xe   : > { %v477_v1 = vshrl.u32 %v476_v0, 7  ;;  %v527_v3 = vsel %vm521_vm1, 65537, %v960_v2  ;;  %vm525_vm3 = vmpackc.low %vm961_vm2, %vm961_vm2  ;;  %s359_s25 = scalar_lea.vmem %s1117_s0, %s1012_s22  ;;  %s376_s28 = scalar_lea.vmem %s1118_s1, %s1012_s22 }
   0xf   : > { %v533_v5 = vunpack.c.l.b16 %v527_v3  ;;  %v531_v7 = vsel %vm525_vm3, 65537, %v960_v2  ;;  %v409_v10 = vld [vmem:[%s359_s25 + $0xc] sm:$0xf]  ;;  %v897_v11 = vld [vmem:[%s376_s28] sm:$0xff]  ;;  %s391_s6 = scalar_lea.vmem %s1119_s2, %s1012_s22  ;;  %vm1037_vm13 = vmand %vm470_vm6, %vm437_vm4  ;;  %s404_s23 = scalar_lea.vmem %s1122_s5, %s1012_s22 }
  0x10   : > { %v484_v4 = vadd.s32 4294967291, %v477_v1  ;;  %v481_v6 = vadd.s32 32, %v477_v1  ;;  %v898_v12 = vld [vmem:[%s376_s28 + $0x8] sm:$0xff]  ;;  %v416_v14 = vunpack.c.l.b16 %v409_v10  ;;  %v537_v16 = vunpack.c.l.b16 %v531_v7  ;;  %v414_v21 = vld [vmem:[%s391_s6] sm:$0xf] }
  0x11   : > { %v872_v13 = vunpack.i.l.s16 %v533_v5  ;;  %v439_v17 = vshrl.u32 %v897_v11, 16  ;;  %v442_v18 = vshll.u32 %v897_v11, 16  ;;  %v447_v19 = vshrl.u32 %v898_v12, 16  ;;  %705 = vmatpush.bf16.msra.mxu0 %v900_v50  ;;  %903 = vmatpush.bf16.msra.mxu1 %v900_v50 }
  0x12   : > { %vm490_vm5 = vcmp.ge.s32.totalorder %v484_v4, 0  ;;  %v488_v15 = vadd.s32 4294967291, %v481_v6  ;;  %v450_v20 = vshll.u32 %v898_v12, 16  ;;  %v417_v22 = vpack.c.b16 %v416_v14, %v416_v14 }
  0x13   : > { %vm520_vm7 = vmpackc.low %vm490_vm5, %vm490_vm5  ;;  %vm546_vm8 = vcmp.ne.s32.totalorder %v872_v13, %v1024_v9  ;;  %vm552_vm9 = vcmp.ne.s32.totalorder %v872_v13, %v1022_v8  ;;  %v441_v24 = vrot.slane %v439_v17, 5  ;;  %v444_v25 = vrot.slane %v442_v18, 6 }
  0x14   : > { %v526_v23 = vsel %vm520_vm7, 65537, %v960_v2  ;;  %v449_v26 = vrot.slane %v447_v19, 5  ;;  %v452_v27 = vrot.slane %v450_v20, 6  ;;  %v419_v28 = vshrl.u32 %v417_v22, 16  ;;  %vm554_vm10 = vmpackc.low %vm546_vm8, %vm552_vm9 }
  0x15   : > { %v422_v29 = vshll.u32 %v417_v22, 16  ;;  %v532_v30 = vunpack.c.l.b16 %v526_v23  ;;  %v459_v31 = vunpack.c.l.b16 %v414_v21  ;;  %v445_v32 = vor.u32 %v444_v25, %v441_v24  ;;  %706 = vmatpush.bf16.msra.mxu0 %v899_v61  ;;  %904 = vmatpush.bf16.msra.mxu1 %v899_v61 }
  0x16   : > { %v453_v33 = vor.u32 %v452_v27, %v449_v26  ;;  %vm500_vm11 = vcmp.lt.s32.totalorder %v488_v15, 32  ;;  %v421_v34 = vrot.slane %v419_v28, 1  ;;  %v876_v41 = vunpack.i.l.s16 %v537_v16 }
  0x17   : > { %v424_v35 = vrot.slane %v422_v29, 2  ;;  %v871_v36 = vunpack.i.l.s16 %v532_v30  ;;  %v460_v37 = vpack.c.b16 %v459_v31, %v459_v31  ;;  %vm524_vm12 = vmpackc.low %vm500_vm11, %vm500_vm11 }
  0x18   : > { %v454_v38 = vsel %vm437_vm4, %v445_v32, %v453_v33  ;;  %v530_v40 = vsel %vm524_vm12, 65537, %v960_v2  ;;  %vm560_vm0 = vcmp.ne.s32.totalorder %v876_v41, %v1024_v9  ;;  %vm613_vm12 = vsmask.f32 5376 }
  0x19   : > { %v425_v43 = vor.u32 %v424_v35, %v421_v34  ;;  %vm545_vm14 = vcmp.ne.s32.totalorder %v871_v36, %v1022_v8  ;;  %v563_v44 = vsel %vm554_vm10, %v454_v38, 0  ;;  %v462_v45 = vshrl.u32 %v460_v37, 16 }
  0x1a   : > { %vm547_vm15 = vmpackc.low %vm546_vm8, %vm545_vm14  ;;  %v567_v46 = vunpack.c.l.bf16 %v563_v44  ;;  %v568_v47 = vunpack.c.h.bf16 %v563_v44  ;;  %v465_v48 = vshll.u32 %v460_v37, 16  ;;  %v536_v49 = vunpack.c.l.b16 %v530_v40 }
  0x1b   : > { %v472_v51 = vsel %vm1037_vm13, %v425_v43, %v445_v32  ;;  %v464_v54 = vrot.slane %v462_v45, 5  ;;  %vm656_vm14 = vcmask 130048  }
  0x1c   : > { %v562_v52 = vsel %vm547_vm15, %v472_v51, 0  ;;  %v579_v53 = vmul.f32 0.100097656, %v567_v46  ;;  %v580_v57 = vmul.f32 0.100097656, %v568_v47  ;;  %v467_v58 = vrot.slane %v465_v48, 6 }
  0x1d   : > { %v565_v55 = vunpack.c.l.bf16 %v562_v52  ;;  %v566_v56 = vunpack.c.h.bf16 %v562_v52  ;;  %v875_v60 = vunpack.i.l.s16 %v536_v49  ;;  %vm1056_vm1 = vcmp.ge.f32.partialorder %v567_v46, 0.0 }
  0x1e   : > { %v585_v59 = vpack.c.bf16 %v579_v53, %v579_v53  ;;  %vm1060_vm2 = vcmp.ge.f32.partialorder %v568_v47, 0.0  ;;  %v586_v2 = vpack.c.bf16 %v580_v57, %v580_v57  ;;  %v468_v4 = vor.u32 %v467_v58, %v464_v54 }
  0x1f   : > { %v577_v0 = vmul.f32 0.100097656, %v565_v55  ;;  %v578_v1 = vmul.f32 0.100097656, %v566_v56  ;;  %vm559_vm3 = vcmp.ne.s32.totalorder %v875_v60, %v1022_v8  ;;  %vm1065_vm4 = vcmp.ge.f32.partialorder %v565_v55, 0.0  ;;  %vm590_vm8 = vmpackc.low %vm1060_vm2, %vm1056_vm1  ;;  %v934_v60 = vld [vmem:[%s1121_s4] ss:$0 sm:$0xff] }
  0x20   : > { %v600_v3 = vunpack.c.l.b16 %v585_v59  ;;  %vm1069_vm5 = vcmp.ge.f32.partialorder %v566_v56, 0.0  ;;  %vm561_vm7 = vmpackc.low %vm560_vm0, %vm559_vm3  ;;  %v601_v11 = vunpack.c.l.b16 %v586_v2  ;;  %v473_v12 = vsel %vm1037_vm13, %v453_v33, %v468_v4 }
  0x21   : > { %v583_v7 = vpack.c.bf16 %v577_v0, %v577_v0  ;;  %v584_v10 = vpack.c.bf16 %v578_v1, %v578_v1  ;;  %v564_v14 = vsel %vm561_vm7, %v473_v12, 0  ;;  %vm589_vm9 = vmpackc.low %vm1069_vm5, %vm1065_vm4  ;;  %vm661_vm15 = vcmask 261120  }
  0x22   : > { %v605_v9 = vpack.c.b16 %v601_v11, %v600_v3  ;;  %v569_v15 = vunpack.c.l.bf16 %v564_v14  ;;  %v570_v16 = vunpack.c.h.bf16 %v564_v14  ;;  %vm694_vm0 = vcmask 392192  }
  0x23   : > { %v598_v8 = vunpack.c.l.b16 %v583_v7  ;;  %v599_v13 = vunpack.c.l.b16 %v584_v10 }
  0x24   : > { %v611_v18 = vsel %vm590_vm8, %v563_v44, %v605_v9  ;;  %vm1085_vm10 = vcmp.ge.f32.partialorder %v569_v15, 0.0  ;;  %v581_v20 = vmul.f32 0.100097656, %v569_v15  ;;  %v582_v28 = vmul.f32 0.100097656, %v570_v16 }
  0x25   : > { %v604_v17 = vpack.c.b16 %v599_v13, %v598_v8  ;;  %v623_v22 = vshrl.u32 %v611_v18, 16  ;;  %v626_v23 = vshll.u32 %v611_v18, 16  ;;  %v648_v24 = vrot.slane %v611_v18, 5 }
  0x26   : > { %vm1089_vm11 = vcmp.ge.f32.partialorder %v570_v16, 0.0  ;;  %v587_v32 = vpack.c.bf16 %v581_v20, %v581_v20  ;;  %v588_v36 = vpack.c.bf16 %v582_v28, %v582_v28 }
  0x27   : > { %v610_v21 = vsel %vm589_vm9, %v562_v52, %v604_v17  ;;  %v625_v29 = vrot.slane %v623_v22, 2  ;;  %v628_v30 = vrot.slane %v626_v23, 3  ;;  %vm591_vm13 = vmpackc.low %vm1089_vm11, %vm1085_vm10 }
  0x28   : > { %v615_v25 = vshrl.u32 %v610_v21, 16  ;;  %v618_v26 = vshll.u32 %v610_v21, 16  ;;  %v647_v27 = vrot.slane %v610_v21, 5  ;;  %v602_v38 = vunpack.c.l.b16 %v587_v32 }
  0x29   : > { %v629_v37 = vor.u32 %v628_v30, %v625_v29  ;;  %v603_v40 = vunpack.c.l.b16 %v588_v36 }
  0x2a   : > { %v617_v33 = vrot.slane %v615_v25, 2  ;;  %v620_v34 = vrot.slane %v618_v26, 3  ;;  %v649_v35 = vsel %vm470_vm6, %v647_v27, %v648_v24 }
  0x2b   : > { %652 = vrot.lane.b32.xlu1 %v649_v35, %s962_s13  ;;  %v606_v42 = vpack.c.b16 %v603_v40, %v602_v38 }
  0x2c   : > { %v621_v39 = vor.u32 %v620_v34, %v617_v33 }
  0x2d   : > { %v612_v43 = vsel %vm591_vm13, %v564_v14, %v606_v42 }
  0x2e   : > { %v630_v41 = vsel %vm613_vm12, %v621_v39, %v629_v37  ;;  %v632_v44 = vshrl.u32 %v612_v43, 16  ;;  %v635_v45 = vshll.u32 %v612_v43, 16  ;;  %v650_v46 = vrot.slane %v612_v43, 5 }
  0x2f   : > { %640 = vrot.lane.b32.xlu0 %v630_v41, %s963_s14 }
  0x30   : > { %v634_v47 = vrot.slane %v632_v44, 2  ;;  %v637_v48 = vrot.slane %v635_v45, 3  ;;  %v651_v49 = vsel %vm470_vm6, %v648_v24, %v650_v46  ;;  %vm722_vm6 = vcmask 125952  }
  0x32   : > { %v638_v50 = vor.u32 %v637_v48, %v634_v47 }
  0x33   : > { %654 = vrot.lane.b32.xlu1 %v651_v49, %s962_s13 }
  0x34   : > { %v639_v51 = vsel %vm613_vm12, %v629_v37, %v638_v50 }
  0x37   : > { %642 = vrot.lane.b32.xlu0 %v639_v51, %s963_s14 }
  0x9d   : > { %v653_v52 = vpop.permute.xlu1 %652 }
  0xa1   : > { %v641_v53 = vpop.permute.xlu0 %640 }
  0xa2   : > { %v658_v54 = vsel %vm656_vm14, %v610_v21, %v641_v53 }
  0xa3   : > { %v663_v55 = vsel %vm661_vm15, %v658_v54, %v653_v52 }
  0xa4   : > { %889 = vmatmul.msk.bf16.vlgmr.msra.gmra.mxu0 %vm694_vm0, %v663_v55 }
  0xa5   : > { %v655_v56 = vpop.permute.xlu1 %654 }
  0xa9   : > { %v643_v57 = vpop.permute.xlu0 %642 }
  0xaa   : > { %v660_v58 = vsel %vm656_vm14, %v611_v18, %v643_v57 }
  0xab   : > { %v665_v59 = vsel %vm661_vm15, %v660_v58, %v655_v56 }
  0xac   : > { %890 = vmatmul.msk.bf16.vlgmr.msra.gmra.mxu1 %vm694_vm0, %v665_v59 }
 0x121   : > { %v708_v61 = vpop.f32.mrf.mxu0 }
 0x122   : > { %v709_v62 = vadd.f32 %v934_v60, %v708_v61 }
 0x124   : > { %v718_v63 = vpack.c.bf16 %v709_v62, %v709_v62 }
 0x126   : > { %723 = vst.msk [vmem:[%s404_s23] sm:$0xf] %vm722_vm6, %v718_v63 }
 0x129   : > { %v710_v0 = vpop.f32.mrf.mxu0  ;;  %v713_v2 = vpop.f32.mrf.mxu1 }
 0x12a   : > { %v711_v1 = vadd.f32 %v934_v60, %v710_v0  ;;  %v714_v3 = vadd.f32 %v934_v60, %v713_v2 }
 0x12c   : > { %v719_v4 = vpack.c.bf16 %v711_v1, %v711_v1  ;;  %v720_v5 = vpack.c.bf16 %v714_v3, %v714_v3 }
 0x12e   : > { %724 = vst.msk [vmem:[%s404_s23 + $0x4] sm:$0xf] %vm722_vm6, %v719_v4 }
 0x12f   : > { %725 = vst.msk [vmem:[%s404_s23 + $0x8] sm:$0xf] %vm722_vm6, %v720_v5 }
 0x131   : > { %v715_v6 = vpop.f32.mrf.mxu1 }
 0x132   : > { %v716_v7 = vadd.f32 %v934_v60, %v715_v6 }
 0x134   : > { %v721_v10 = vpack.c.bf16 %v716_v7, %v716_v7 }
 0x136   : > { %726 = vst.msk [vmem:[%s404_s23 + $0xc] sm:$0xf] %vm722_vm6, %v721_v10 }
 0x137 PF: > { %s15_s20 = sadd.s32 1, %s957_s20   ;;  %s1137_s18 = smov %s953_s19 }
 0x138   : > { %p12_p5 = scmp.ge.s32.totalorder %s15_s20, 4   ;;  %s1138_s19 = smov %s1140_s21 }
 0x13a   :  { %14 = sbr.rel (!%p12_p5) target bundleno = 2 (0x2), region = 76 }

// kernel: generator_forward.25
= control target key start
LH: loop header
LB: loop body
LE: loop exit
PB: predicated region body
PF: predicated region fallthrough
CT: control target
= control target key end

     0   :  { %s1143_s18 = smov 0   ;;  %s1145_s19 = smov 0   ;;  %s1371_s0 = inlined_call_operand.vmem [shape: bf16[2,64,8], index: 0, kind: input, shape index: {}, may-alias: {0,1,2}]   ;;  %s1372_s1 = inlined_call_operand.vmem [shape: bf16[2,64,8], index: 1, kind: input, shape index: {}, may-alias: {0,1,2}]   ;;  %s1373_s2 = inlined_call_operand.vmem [shape: bf16[2,64,8], index: 2, kind: input, shape index: {}, may-alias: {0,1,2}]   ;;  %s1374_s3 = inlined_call_operand.vmem [shape: bf16[24,8], index: 3, kind: input, shape index: {}]   ;;  %s1375_s4 = inlined_call_operand.vmem [shape: f32[1,8], index: 4, kind: input, shape index: {}]   ;;  %s1376_s5 = inlined_call_operand.vmem [shape: bf16[2,64,8], index: 5, kind: output, shape index: {}]  }
   0x1   :  { %s1147_s20 = smov 0  }
   0x2 LB: > { %s27_s21 = sadd.s32 1, %s1103_s19  ;;  %p996_p0 = scmp.ge.s32.totalorder %s1107_s20, 1  ;;  %s1107_s20 = sphi %s1147_s20, %s15_s20   ;;  %s1103_s19 = sphi %s1145_s19, %s1396_s19   ;;  %s1099_s18 = sphi %s1143_s18, %s1395_s18  }
   0x3   : > { %p29_p1 = scmp.ge.s32.totalorder %s27_s21, 2  ;;  %p282_p2 = scmp.lt.s32.totalorder %s1107_s20, 3 }
   0x5   : > { %s1398_s21 = smov (%p29_p1, %s27_s21), 0  ;;  %p283_p3 = pnand %p996_p0, %p282_p2 }
   0x6   : > { %p352_p4 = scmp.lt.s32.totalorder (!%p283_p3), %s1099_s18, 1  ;;  %s1111_s9 = smov (!%p283_p3), 16  }
   0x7   : > { %286 = sbr.rel (%p283_p3) target bundleno = 314 (0x13a), region = 40  ;;  %s1112_s10 = smov (!%p283_p3), 8  }
   0xc   : > { %vm1109_vm0 = vmmov 1   ;;  %s1400_s18 = smov (!%p352_p4, %s1099_s18), 1  ;;  %v1110_v0 = vmov 0   ;;  %v497_v2 = vlaneseq  ;;  %vm447_vm2 = vsmask.f32 256 }
   0xd   : > { %vm563_vm1 = vmpackc.low %vm1109_vm0, %vm1109_vm0  ;;  %v1163_v4 = vunpack.c.l.b16 %v1110_v0  ;;  %v1166_v5 = vunpack.c.h.b16 %v1110_v0  ;;  %s1168_s22 = sshll.u32 %s1400_s18, 5  ;;  %vm491_vm6 = vcmask 1040384  }
   0xe   : > { %v572_v1 = vsel %vm563_vm1, 65537, %v1110_v0  ;;  %v498_v6 = vshrl.u32 %v497_v2, 7  ;;  %s376_s25 = scalar_lea.vmem %s1372_s1, %s1168_s22  ;;  %s391_s28 = scalar_lea.vmem %s1373_s2, %s1168_s22  ;;  %vm1207_vm9 = vmand %vm491_vm6, %vm447_vm2  ;;  %vm758_vm6 = vcmask 1046528  }
   0xf   : > { %v581_v3 = vunpack.c.l.b16 %v572_v1  ;;  %v1046_v8 = vld [vmem:[%s376_s25 + $0x8] sm:$0xff]  ;;  %v1047_v9 = vld [vmem:[%s376_s25 + $0x10] sm:$0xff]  ;;  %v1048_v10 = vld [vmem:[%s376_s25 + $0x18] sm:$0xff]  ;;  %s359_s6 = scalar_lea.vmem %s1371_s0, %s1168_s22  ;;  %s1344_s17 = scalar_lea.vmem %s1376_s5, %s1168_s22 }
  0x10   : > { %v506_v11 = vadd.s32 64, %v498_v6  ;;  %v418_v12 = vld [vmem:[%s391_s28] sm:$0xf]  ;;  %v456_v14 = vshrl.u32 %v1046_v8, 16  ;;  %v464_v15 = vshrl.u32 %v1047_v9, 16  ;;  %v467_v16 = vshll.u32 %v1047_v9, 16 }
  0x11   : > { %v1174_v7 = vunpack.i.l.s16 %v581_v3  ;;  %v1184_v13 = vld [vmem:[%s376_s25] sm:$0xff]  ;;  %v472_v17 = vshrl.u32 %v1048_v10, 16  ;;  %v475_v18 = vshll.u32 %v1048_v10, 16  ;;  %v485_v19 = vunpack.c.l.b16 %v418_v12  ;;  %v409_v26 = vld [vmem:[%s359_s6 + $0x1c] sm:$0xf] }
  0x12   : > { %v516_v20 = vadd.s32 4294967295, %v506_v11  ;;  %v449_v21 = vshrl.u32 %v1184_v13, 16  ;;  %v458_v22 = vrot.slane %v456_v14, 7  ;;  %v466_v23 = vrot.slane %v464_v15, 7 }
  0x13   : > { %vm599_vm3 = vcmp.ne.s32.totalorder %v1174_v7, %v1166_v5  ;;  %vm605_vm4 = vcmp.ne.s32.totalorder %v1174_v7, %v1163_v4  ;;  %v474_v24 = vrot.slane %v472_v17, 7  ;;  %v459_v25 = vshll.u32 %v1046_v8, 16 }
  0x14   : > { %vm1197_vm5 = vmpackc.low %vm599_vm3, %vm605_vm4  ;;  %v486_v28 = vpack.c.b16 %v485_v19, %v485_v19  ;;  %vm534_vm7 = vcmp.lt.s32.totalorder %v516_v20, 64  ;;  %v1201_v29 = vrot.slane %v449_v21, 7  ;;  %v469_v30 = vor.u32 %v467_v16, %v466_v23 }
  0x15   : > { %v477_v31 = vor.u32 %v475_v18, %v474_v24  ;;  %vm570_vm8 = vmpackc.low %vm534_vm7, %vm534_vm7  ;;  %v461_v32 = vor.u32 %v459_v25, %v458_v22  ;;  %v420_v35 = vunpack.c.l.b16 %v409_v26  ;;  %v508_v36 = vadd.s32 4294967295, %v498_v6 }
  0x16   : > { %v488_v33 = vshll.u32 %v486_v28, 16  ;;  %v579_v34 = vsel %vm570_vm8, 65537, %v1110_v0  ;;  %v470_v37 = vsel %vm447_vm2, %v458_v22, %v469_v30  ;;  %v452_v45 = vshll.u32 %v1184_v13, 16  ;;  %v1049_v22 = vld [vmem:[%s1374_s3] sm:$0xff] }
  0x17   : > { %v478_v38 = vsel %vm447_vm2, %v466_v23, %v477_v31  ;;  %v588_v40 = vunpack.c.l.b16 %v579_v34  ;;  %v462_v41 = vsel %vm447_vm2, %v1201_v29, %v461_v32  ;;  %v631_v42 = vsel %vm1197_vm5, %v470_v37, 0 }
  0x18   : > { %v632_v43 = vsel %vm1197_vm5, %v478_v38, 0  ;;  %v1219_v44 = vsel %vm1197_vm5, %v462_v41, 0  ;;  %v638_v46 = vunpack.c.l.bf16 %v631_v42  ;;  %v639_v47 = vunpack.c.h.bf16 %v631_v42 }
  0x19   : > { %v640_v48 = vunpack.c.l.bf16 %v632_v43  ;;  %v641_v49 = vunpack.c.h.bf16 %v632_v43  ;;  %v494_v50 = vsel %vm1207_vm9, %v474_v24, %v488_v33  ;;  %v1029_v51 = vunpack.i.l.s16 %v588_v40 }
  0x1a   : > { %v421_v52 = vpack.c.b16 %v420_v35, %v420_v35  ;;  %vm517_vm10 = vcmp.ge.s32.totalorder %v508_v36, 0  ;;  %vm1224_vm11 = vcmp.ge.f32.partialorder %v638_v46, 0.0  ;;  %vm1228_vm12 = vcmp.ge.f32.partialorder %v639_v47, 0.0  ;;  %v796_v36 = vld [vmem:[%s1374_s3 + $0x8] sm:$0xf] }
  0x1b   : > { %v636_v55 = vunpack.c.l.bf16 %v1219_v44  ;;  %v637_v56 = vunpack.c.h.bf16 %v1219_v44  ;;  %v656_v57 = vmul.f32 0.100097656, %v638_v46  ;;  %v657_v58 = vmul.f32 0.100097656, %v639_v47  ;;  %vm562_vm2 = vmpackc.low %vm517_vm10, %vm517_vm10 }
  0x1c   : > { %v658_v59 = vmul.f32 0.100097656, %v640_v48  ;;  %v659_v60 = vmul.f32 0.100097656, %v641_v49  ;;  %vm1234_vm13 = vcmp.ge.f32.partialorder %v640_v48, 0.0  ;;  %vm1238_vm14 = vcmp.ge.f32.partialorder %v641_v49, 0.0  ;;  %vm672_vm4 = vmpackc.low %vm1228_vm12, %vm1224_vm11 }
  0x1d   : > { %vm626_vm15 = vcmp.ne.s32.totalorder %v1029_v51, %v1163_v4  ;;  %vm627_vm0 = vcmp.ne.s32.totalorder %v1029_v51, %v1166_v5  ;;  %v665_v63 = vpack.c.bf16 %v656_v57, %v656_v57  ;;  %v666_v1 = vpack.c.bf16 %v657_v58, %v657_v58  ;;  %vm673_vm5 = vmpackc.low %vm1238_vm14, %vm1234_vm13 }
  0x1e   : > { %v667_v2 = vpack.c.bf16 %v658_v59, %v658_v59  ;;  %v668_v3 = vpack.c.bf16 %v659_v60, %v659_v60  ;;  %vm628_vm1 = vmpackc.low %vm627_vm0, %vm626_vm15  ;;  %v654_v8 = vmul.f32 0.100097656, %v636_v55  ;;  %v655_v9 = vmul.f32 0.100097656, %v637_v56 }
  0x1f   : > { %v633_v6 = vsel %vm628_vm1, %v494_v50, 0  ;;  %v423_v10 = vshrl.u32 %v421_v52, 16  ;;  %v688_v11 = vunpack.c.l.b16 %v665_v63  ;;  %v689_v12 = vunpack.c.l.b16 %v666_v1 }
  0x20   : > { %v690_v13 = vunpack.c.l.b16 %v667_v2  ;;  %v691_v14 = vunpack.c.l.b16 %v668_v3  ;;  %vm708_vm7 = vsmask.f32 7424  ;;  %v642_v15 = vunpack.c.l.bf16 %v633_v6 }
  0x21   : > { %v663_v16 = vpack.c.bf16 %v654_v8, %v654_v8  ;;  %v695_v17 = vpack.c.b16 %v689_v12, %v688_v11  ;;  %v664_v19 = vpack.c.bf16 %v655_v9, %v655_v9  ;;  %v571_v20 = vsel %vm562_vm2, 65537, %v1110_v0 }
  0x22   : > { %v696_v18 = vpack.c.b16 %v691_v14, %v690_v13  ;;  %v660_v21 = vmul.f32 0.100097656, %v642_v15  ;;  %vm1255_vm8 = vcmp.ge.f32.partialorder %v636_v55, 0.0  ;;  %v425_v23 = vrot.slane %v423_v10, 3 }
  0x23   : > { %v454_v24 = vor.u32 %v452_v45, %v1201_v29  ;;  %v1265_v25 = vsel %vm672_vm4, %v631_v42, %v695_v17  ;;  %vm1269_vm10 = vcmp.ge.f32.partialorder %v642_v15, 0.0  ;;  %v580_v0 = vunpack.c.l.b16 %v571_v20 }
  0x24   : > { %v1267_v26 = vsel %vm673_vm5, %v632_v43, %v696_v18  ;;  %v762_v28 = vrot.slane %v1265_v25, 1  ;;  %v725_v29 = vshll.u32 %v1265_v25, 16  ;;  %v729_v31 = vshrl.u32 %v1265_v25, 16  ;;  %vm674_vm12 = vmpackc.low %vm1269_vm10, %vm1269_vm10 }
  0x25   : > { %v764_v30 = vrot.slane %v1267_v26, 1  ;;  %v733_v32 = vshll.u32 %v1267_v26, 16  ;;  %v669_v33 = vpack.c.bf16 %v660_v21, %v660_v21  ;;  %v686_v34 = vunpack.c.l.b16 %v663_v16 }
  0x26   : > { %v687_v35 = vunpack.c.l.b16 %v664_v19  ;;  %v1282_v38 = vrot.slane %v725_v29, 1  ;;  %v1021_v40 = vunpack.i.l.s16 %v580_v0  ;;  %v806_v41 = vunpack.c.l.b16 %v796_v36 }
  0x27   : > { %v765_v37 = vsel %vm758_vm6, %v762_v28, %v764_v30  ;;  %v735_v42 = vrot.slane %v733_v32, 1  ;;  %v692_v43 = vunpack.c.l.b16 %v669_v33  ;;  %vm1285_vm11 = vcmp.ge.f32.partialorder %v637_v56, 0.0 }
  0x28   : > { %772 = vrot.lane.b32.xlu1 %v765_v37, %s1111_s9  ;;  %v493_v46 = vsel %vm1207_vm9, %v425_v23, %v454_v24  ;;  %v731_v47 = vor.u32 %v729_v31, %v1282_v38  ;;  %v737_v48 = vshrl.u32 %v1267_v26, 16  ;;  %vm598_vm13 = vcmp.ne.s32.totalorder %v1021_v40, %v1163_v4  ;;  %vm671_vm9 = vmpackc.low %vm1285_vm11, %vm1255_vm8 }
  0x29   : > { %vm819_vm14 = vcmask 1043456   ;;  %v697_v49 = vpack.c.b16 %v692_v43, %v692_v43  ;;  %v694_v50 = vpack.c.b16 %v687_v35, %v686_v34  ;;  %vm600_vm15 = vmpackc.low %vm599_vm3, %vm598_vm13  ;;  %v808_v51 = vpack.c.b16 %v806_v41, %v806_v41 }
  0x2a   : > { %v736_v39 = vsel %vm708_vm7, %v731_v47, %v735_v42  ;;  %v629_v52 = vsel %vm600_vm15, %v493_v46, 0  ;;  %v739_v57 = vor.u32 %v737_v48, %v735_v42  ;;  %vm776_vm2 = vcmask 64512  }
  0x2b   : > { %749 = vrot.lane.b32.xlu0 %v736_v39, %s1112_s10  ;;  %v707_v4 = vsel %vm674_vm12, %v633_v6, %v697_v49  ;;  %v634_v53 = vunpack.c.l.bf16 %v629_v52  ;;  %v635_v54 = vunpack.c.h.bf16 %v629_v52  ;;  %v821_v55 = vsel %vm819_vm14, %v808_v51, 0 }
  0x2c   : > { %v766_v56 = vrot.slane %v707_v4, 1  ;;  %v741_v5 = vshll.u32 %v707_v4, 16  ;;  %1051 = vmatpush.bf16.msra.mxu2 %v821_v55  ;;  %1052 = vmatpush.bf16.msra.mxu3 %v821_v55  ;;  %v704_v7 = vsel %vm671_vm9, %v1219_v44, %v694_v50  ;;  %vm785_vm4 = vcmask 130048  }
  0x2d   : > { %v652_v58 = vmul.f32 0.100097656, %v634_v53  ;;  %v653_v59 = vmul.f32 0.100097656, %v635_v54  ;;  %1050 = vmatpush.bf16.msra.mxu1 %v821_v55  ;;  %829 = vmatpush.bf16.msra.mxu0 %v821_v55  ;;  %vm643_vm3 = vcmp.ge.f32.partialorder %v634_v53, 0.0  ;;  %vm644_vm0 = vcmp.ge.f32.partialorder %v635_v54, 0.0 }
  0x2e   : > { %v767_v60 = vsel %vm758_vm6, %v764_v30, %v766_v56  ;;  %v743_v61 = vrot.slane %v741_v5, 1  ;;  %v760_v2 = vrot.slane %v704_v7, 1  ;;  %vm670_vm1 = vmpackc.low %vm644_vm0, %vm643_vm3  ;;  %v717_v9 = vshll.u32 %v704_v7, 16 }
  0x2f   : > { %v661_v62 = vpack.c.bf16 %v652_v58, %v652_v58  ;;  %v662_v63 = vpack.c.bf16 %v653_v59, %v653_v59  ;;  %v721_v18 = vshrl.u32 %v704_v7, 16  ;;  %vm810_vm5 = vcmask 195584  }
  0x30   : > { %774 = vrot.lane.b32.xlu1 %v767_v60, %s1111_s9  ;;  %v744_v1 = vsel %vm708_vm7, %v739_v57, %v743_v61  ;;  %v763_v8 = vsel %vm758_vm6, %v760_v2, %v762_v28  ;;  %v719_v16 = vrot.slane %v717_v9, 1  ;;  %1054 = vmatpush.bf16.msra.mxu2 %v1049_v22 }
  0x31   : > { %v684_v3 = vunpack.c.l.b16 %v661_v62  ;;  %v685_v6 = vunpack.c.l.b16 %v662_v63  ;;  %1055 = vmatpush.bf16.msra.mxu3 %v1049_v22  ;;  %1053 = vmatpush.bf16.msra.mxu1 %v1049_v22 }
  0x32   : > { %v723_v20 = vor.u32 %v721_v18, %v719_v16  ;;  %830 = vmatpush.bf16.msra.mxu0 %v1049_v22 }
  0x33   : > { %751 = vrot.lane.b32.xlu0 %v744_v1, %s1112_s10  ;;  %v693_v44 = vpack.c.b16 %v685_v6, %v684_v3 }
  0x34   : > { %v728_v21 = vsel %vm708_vm7, %v723_v20, %v1282_v38 }
  0x35   : > { %v703_v10 = vsel %vm670_vm1, %v629_v52, %v693_v44 }
  0x36   : > { %v759_v11 = vrot.slane %v703_v10, 1  ;;  %v710_v12 = vshrl.u32 %v703_v10, 16  ;;  %v712_v13 = vshll.u32 %v703_v10, 16 }
  0x38   : > { %770 = vrot.lane.b32.xlu1 %v763_v8, %s1111_s9  ;;  %v761_v14 = vsel %vm758_vm6, %v759_v11, %v760_v2  ;;  %v714_v15 = vrot.slane %v712_v13, 1  ;;  %vm860_vm6 = vcmask 60416  }
  0x3a   : > { %v715_v17 = vor.u32 %v714_v15, %v710_v12 }
  0x3b   : > { %768 = vrot.lane.b32.xlu0 %v761_v14, %s1111_s9 }
  0x3c   : > { %v720_v19 = vsel %vm708_vm7, %v715_v17, %v719_v16 }
  0x3d   : > { %745 = vrot.lane.b32.xlu2 %v720_v19, %s1112_s10 }
  0x45   : > { %747 = vrot.lane.b32.xlu2 %v728_v21, %s1112_s10 }
  0x97   : > { %v746_v24 = vpop.permute.xlu2 %745 }
  0x98   : > { %v778_v36 = vsel %vm776_vm2, %v703_v10, %v746_v24 }
  0x9a   : > { %v773_v23 = vpop.permute.xlu1 %772 }
  0x9d   : > { %v750_v27 = vpop.permute.xlu0 %749 }
  0x9e   : > { %v782_v0 = vsel %vm776_vm2, %v1265_v25, %v750_v27 }
  0x9f   : > { %v791_v28 = vsel %vm785_vm4, %v782_v0, %v773_v23  ;;  %v748_v29 = vpop.permute.xlu2 %747 }
  0xa0   : > { %1037 = vmatmul.msk.bf16.vlgmr.msra.gmra.mxu2 %vm810_vm5, %v791_v28  ;;  %v780_v34 = vsel %vm776_vm2, %v704_v7, %v748_v29 }
  0xa2   : > { %v775_v30 = vpop.permute.xlu1 %774 }
  0xa5   : > { %v752_v31 = vpop.permute.xlu0 %751 }
  0xa6   : > { %v784_v32 = vsel %vm776_vm2, %v1267_v26, %v752_v31  ;;  %v1084_v26 = vld [vmem:[%s1375_s4] ss:$0 sm:$0xff] }
  0xa7   : > { %v793_v33 = vsel %vm785_vm4, %v784_v32, %v775_v30 }
  0xa8   : > { %1038 = vmatmul.msk.bf16.vlgmr.msra.gmra.mxu3 %vm810_vm5, %v793_v33 }
  0xaa   : > { %v771_v35 = vpop.permute.xlu1 %770 }
  0xab   : > { %v789_v25 = vsel %vm785_vm4, %v780_v34, %v771_v35 }
  0xac   : > { %1036 = vmatmul.msk.bf16.vlgmr.msra.gmra.mxu1 %vm810_vm5, %v789_v25 }
  0xad   : > { %v769_v37 = vpop.permute.xlu0 %768 }
  0xae   : > { %v787_v38 = vsel %vm785_vm4, %v778_v36, %v769_v37 }
  0xaf   : > { %1035 = vmatmul.msk.bf16.vlgmr.msra.gmra.mxu0 %vm810_vm5, %v787_v38 }
 0x123   : > { %v842_v40 = vpop.f32.mrf.mxu2 }
 0x124   : > { %v843_v41 = vadd.f32 %v1084_v26, %v842_v40 }
 0x126   : > { %v856_v42 = vpack.c.bf16 %v843_v41, %v843_v41 }
 0x128   : > { %865 = vst.msk [vmem:[%s1344_s17 + $0x10] sm:$0xf] %vm860_vm6, %v856_v42 }
 0x129   : > { %v837_v43 = vpop.f32.mrf.mxu1 }
 0x12a   : > { %v838_v45 = vadd.f32 %v1084_v26, %v837_v43 }
 0x12b   : > { %v844_v47 = vpop.f32.mrf.mxu2  ;;  %v847_v48 = vpop.f32.mrf.mxu3 }
 0x12c   : > { %v854_v46 = vpack.c.bf16 %v838_v45, %v838_v45  ;;  %v845_v49 = vadd.f32 %v1084_v26, %v844_v47  ;;  %v848_v50 = vadd.f32 %v1084_v26, %v847_v48  ;;  %v832_v51 = vpop.f32.mrf.mxu0 }
 0x12d   : > { %v833_v39 = vadd.f32 %v1084_v26, %v832_v51 }
 0x12e   : > { %863 = vst.msk [vmem:[%s1344_s17 + $0x8] sm:$0xf] %vm860_vm6, %v854_v46  ;;  %v857_v52 = vpack.c.bf16 %v845_v49, %v845_v49  ;;  %v858_v4 = vpack.c.bf16 %v848_v50, %v848_v50 }
 0x12f   : > { %v852_v53 = vpack.c.bf16 %v833_v39, %v833_v39 }
 0x130   : > { %866 = vst.msk [vmem:[%s1344_s17 + $0x14] sm:$0xf] %vm860_vm6, %v857_v52 }
 0x131   : > { %v839_v54 = vpop.f32.mrf.mxu1  ;;  %867 = vst.msk [vmem:[%s1344_s17 + $0x18] sm:$0xf] %vm860_vm6, %v858_v4 }
 0x132   : > { %v840_v55 = vadd.f32 %v1084_v26, %v839_v54  ;;  %861 = vst.msk [vmem:[%s1344_s17] sm:$0xf] %vm860_vm6, %v852_v53 }
 0x133   : > { %v849_v57 = vpop.f32.mrf.mxu3 }
 0x134   : > { %v855_v56 = vpack.c.bf16 %v840_v55, %v840_v55  ;;  %v850_v5 = vadd.f32 %v1084_v26, %v849_v57  ;;  %v834_v7 = vpop.f32.mrf.mxu0 }
 0x135   : > { %v835_v58 = vadd.f32 %v1084_v26, %v834_v7 }
 0x136   : > { %864 = vst.msk [vmem:[%s1344_s17 + $0xc] sm:$0xf] %vm860_vm6, %v855_v56  ;;  %v859_v59 = vpack.c.bf16 %v850_v5, %v850_v5 }
 0x137   : > { %v853_v60 = vpack.c.bf16 %v835_v58, %v835_v58 }
 0x138   : > { %868 = vst.msk [vmem:[%s1344_s17 + $0x1c] sm:$0xf] %vm860_vm6, %v859_v59 }
 0x139   : > { %862 = vst.msk [vmem:[%s1344_s17 + $0x4] sm:$0xf] %vm860_vm6, %v853_v60 }
 0x13a PF: > { %s15_s20 = sadd.s32 1, %s1107_s20   ;;  %s1395_s18 = smov %s1103_s19 }
 0x13b   : > { %p12_p5 = scmp.ge.s32.totalorder %s15_s20, 4   ;;  %s1396_s19 = smov %s1398_s21 }
 0x13d   :  { %14 = sbr.rel (!%p12_p5) target bundleno = 2 (0x2), region = 76 }

// kernel: generator_forward.24
= control target key start
LH: loop header
LB: loop body
LE: loop exit
PB: predicated region body
PF: predicated region fallthrough
CT: control target
= control target key end

     0   :  { %s1592_s18 = smov 0   ;;  %s1594_s19 = smov 0   ;;  %s1997_s0 = inlined_call_operand.vmem [shape: bf16[2,63,16], index: 0, kind: input, shape index: {}, may-alias: {0,1,2}]   ;;  %s1998_s1 = inlined_call_operand.vmem [shape: bf16[2,63,16], index: 1, kind: input, shape index: {}, may-alias: {0,1,2}]   ;;  %s1999_s2 = inlined_call_operand.vmem [shape: bf16[2,63,16], index: 2, kind: input, shape index: {}, may-alias: {0,1,2}]   ;;  %s2000_s3 = inlined_call_operand.vmem [shape: bf16[64,8], index: 3, kind: input, shape index: {}]   ;;  %s2001_s4 = inlined_call_operand.vmem [shape: f32[1,8], index: 4, kind: input, shape index: {}]   ;;  %s2002_s5 = inlined_call_operand.vmem [shape: bf16[2,64,8], index: 5, kind: output, shape index: {}]  }
   0x1   :  { %s1596_s20 = smov 0   ;;  %s1598_s21 = smov 0  }
   0x2   :  { %s1600_s22 = smov 0   ;;  %s1602_s23 = smov 0  }
   0x3   :  { %s1604_s24 = smov 0  }
   0x4 LB: > { %s24_s25 = sadd.s32 1, %s1516_s22  ;;  %s27_s26 = sadd.s32 1, %s1520_s23  ;;  %s1524_s24 = sphi %s1604_s24, %s15_s24   ;;  %s1520_s23 = sphi %s1602_s23, %s2040_s23   ;;  %s1516_s22 = sphi %s1600_s22, %s2039_s22   ;;  %s1512_s21 = sphi %s1598_s21, %s2038_s21   ;;  %s1508_s20 = sphi %s1596_s20, %s2037_s20   ;;  %s1504_s19 = sphi %s1594_s19, %s2036_s19   ;;  %s1500_s18 = sphi %s1592_s18, %s2035_s18  }
   0x5   : > { %p25_p0 = scmp.ge.s32.totalorder %s24_s25, 2  ;;  %s1197_s27 = sadd.s32 4294967295, %s1524_s24  }
   0x6   : > { %p192_p1 = scmp.ne.s32.totalorder %s1504_s19, %s1500_s18  ;;  %p193_p2 = scmp.eq.s32.totalorder %s1197_s27, 3 }
   0x7   : > { %s2042_s25 = smov (%p25_p0, %s24_s25), 0  ;;  %s2044_s26 = smov (!%p25_p0, %s27_s26), %s1520_s23 }
   0x8   : > { %s178_s28 = ssub.s32 %s1516_s22, %s2042_s25  ;;  %p29_p3 = scmp.ge.s32.totalorder %s2044_s26, 2 }
   0x9   : > { %p1213_p4 = scmp.ge.s32.totalorder %s1524_s24, 1  ;;  %p1638_p5 = por %p193_p2, %p192_p1 }
   0xa   : > { %p306_p6 = scmp.lt.s32.totalorder %s1524_s24, 5  ;;  %s2046_s26 = smov (%p29_p3, %s2044_s26), 0 }
   0xb   : > { %s177_s30 = ssub.s32 %s1520_s23, %s2046_s26  ;;  %s182_s7 = sadd.s32 1, %s1504_s19 }
   0xc   : > { %p307_p7 = pnand %p1213_p4, %p306_p6  ;;  %s179_s6 = sor.u32 %s178_s28, %s177_s30 }
   0xd   : > { %p180_p8 = scmp.eq.s32.totalorder %s179_s6, 0  ;;  %p387_p9 = scmp.lt.s32.totalorder (!%p307_p7), %s1512_s21, 1 }
   0xe   : > { %310 = sbr.rel (%p307_p7) target bundleno = 409 (0x199), region = 40  ;;  %p405_p10 = scmp.lt.s32.totalorder (!%p307_p7), %s1508_s20, 1 }
   0xf   : > { %s1649_s8 = scalar_select %p180_p8, %s1504_s19, %s182_s7  }
  0x10   : > { %s514_s9 = smul.u32 (!%p307_p7), 56, %s1508_s20  ;;  %s427_s14 = sadd.s32 (!%p307_p7), 1, %s1508_s20 }
  0x11   : > { %p428_p11 = scmp.lt.s32.totalorder (!%p307_p7), %s427_s14, 1  ;;  %s1660_s16 = sadd.s32 (!%p307_p7), 4294967295, %s1508_s20 }
  0x12   : > { %s1238_s12 = sadd.s32 (!%p307_p7), 4294967294, %s514_s9  ;;  %p378_p13 = scmp.gt.s32.totalorder (!%p307_p7), %s1660_s16, 0 }
  0x13   : > { %v516_v0 = vlaneseq  ;;  %s388_s10 = scalar_select %p387_p9, %s1512_s21, 1  ;;  %v525_v6 = vstv %s1238_s12  ;;  %vm490_vm12 = vcmask 1040384   ;;  %v1558_v24 = vmov 0  }
  0x14   : > { %s406_s11 = scalar_select %p405_p10, %s1508_s20, 1  ;;  %v1694_v25 = vunpack.c.l.b16 %v1558_v24  ;;  %v1702_v27 = vunpack.c.h.b16 %v1558_v24  ;;  %vm509_vm15 = vcmask 1044480  }
  0x15   : > { %v517_v1 = vshrl.u32 %v516_v0, 7  ;;  %s1657_s15 = sshll.u32 %s388_s10, 3  ;;  %s2048_s14 = smov (!%p428_p11, %s427_s14), 1 }
  0x16   : > { %s407_s13 = smul.u32 7, %s406_s11  ;;  %p1215_p1 = scmp.lt.s32.totalorder %s1660_s16, 1 }
  0x17   : > { %v519_v2 = vadd.s32 16, %v517_v1  ;;  %v520_v3 = vadd.s32 24, %v517_v1  ;;  %v521_v4 = vadd.s32 32, %v517_v1  ;;  %v522_v5 = vadd.s32 40, %v517_v1  ;;  %s430_s17 = smul.u32 7, %s2048_s14  ;;  %s1559_s6 = smov 32  }
  0x18   : > { %v523_v7 = vadd.s32 48, %v517_v1  ;;  %p414_p12 = scmp.lt.s32.totalorder %s407_s13, 7  ;;  %v524_v12 = vadd.s32 56, %v517_v1  ;;  %v518_v15 = vadd.s32 8, %v517_v1  ;;  %v1680_v19 = vadd.s32 %v525_v6, %v517_v1 }
  0x19   : > { %v528_v8 = vadd.s32 %v525_v6, %v519_v2  ;;  %v529_v9 = vadd.s32 %v525_v6, %v520_v3  ;;  %v530_v10 = vadd.s32 %v525_v6, %v521_v4  ;;  %v531_v11 = vadd.s32 %v525_v6, %v522_v5  ;;  %p437_p0 = scmp.lt.s32.totalorder %s430_s17, 7 }
  0x1a   : > { %s2050_s13 = smov (!%p414_p12, %s407_s13), 7  ;;  %v532_v14 = vadd.s32 %v525_v6, %v523_v7  ;;  %v533_v17 = vadd.s32 %v525_v6, %v524_v12  ;;  %v1696_v26 = vadd.s32 %v525_v6, %v518_v15 }
  0x1b   : > { %vm536_vm0 = vcmp.ge.s32.totalorder %v528_v8, 0  ;;  %vm537_vm1 = vcmp.ge.s32.totalorder %v529_v9, 0  ;;  %vm538_vm2 = vcmp.ge.s32.totalorder %v530_v10, 0  ;;  %vm544_vm3 = vcmp.lt.s32.totalorder %v528_v8, 63  ;;  %s417_s27 = sadd.s32 %s1657_s15, %s2050_s13  ;;  %s2052_s17 = smov (!%p437_p0, %s430_s17), 7 }
  0x1c   : > { %vm545_vm4 = vcmp.lt.s32.totalorder %v529_v9, 63  ;;  %vm546_vm5 = vcmp.lt.s32.totalorder %v530_v10, 63  ;;  %vm539_vm6 = vcmp.ge.s32.totalorder %v531_v11, 0  ;;  %vm547_vm7 = vcmp.lt.s32.totalorder %v531_v11, 63  ;;  %vm1664_vm8 = vmand %vm536_vm0, %vm544_vm3  ;;  %s1223_s28 = sshll.u32 %s417_s27, 2  ;;  %s440_s10 = sadd.s32 %s1657_s15, %s2052_s17 }
  0x1d   : > { %vm1670_vm9 = vmand %vm537_vm1, %vm545_vm4  ;;  %s419_s7 = scalar_lea.vmem %s1998_s1, %s1223_s28  ;;  %vm540_vm13 = vcmp.ge.s32.totalorder %v532_v14, 0  ;;  %vm541_vm0 = vcmp.ge.s32.totalorder %v533_v17, 0  ;;  %vm548_vm1 = vcmp.lt.s32.totalorder %v532_v14, 63  ;;  %vm534_vm4 = vcmp.ge.s32.totalorder %v1680_v19, 0  ;;  %s1225_s11 = sshll.u32 %s440_s10, 2 }
  0x1e   : > { %vm1676_vm10 = vmand %vm538_vm2, %vm546_vm5  ;;  %v1691_v21 = vld [vmem:[%s419_s7] sm:$0xff]  ;;  %v1287_v22 = vld [vmem:[%s419_s7 + $0x8] sm:$0xff]  ;;  %vm549_vm2 = vcmp.lt.s32.totalorder %v533_v17, 63  ;;  %s379_s9 = scalar_select %p378_p13, %s1660_s16, 0 }
  0x1f   : > { %vm1686_vm11 = vmand %vm539_vm6, %vm547_vm7  ;;  %v1288_v23 = vld [vmem:[%s419_s7 + $0x10] sm:$0xff]  ;;  %v466_v28 = vld [vmem:[%s419_s7 + $0x18] sm:$0xf]  ;;  %v491_v29 = vrot.slane %v1691_v21, 7  ;;  %v492_v30 = vrot.slane %v1287_v22, 7  ;;  %s442_s14 = scalar_lea.vmem %s1999_s2, %s1225_s11  ;;  %vm535_vm7 = vcmp.ge.s32.totalorder %v1696_v26, 0 }
  0x20   : > { %vm576_vm14 = vmpackc.low %vm1664_vm8, %vm1664_vm8  ;;  %v494_v32 = vrot.slane %v1288_v23, 7  ;;  %v485_v35 = vunpack.c.l.b16 %v466_v28  ;;  %vm542_vm8 = vcmp.lt.s32.totalorder %v1680_v19, 63  ;;  %v467_v41 = vld [vmem:[%s442_s14] sm:$0xf]  ;;  %s2054_s9 = smov (!%p1215_p1, %s379_s9), 1  ;;  %s1560_s7 = smov 16  }
  0x21   : > { %vm577_vm3 = vmpackc.low %vm1670_vm9, %vm1670_vm9  ;;  %v584_v31 = vsel %vm576_vm14, 65537, %v1558_v24  ;;  %v493_v44 = vsel %vm490_vm12, %v491_v29, %v492_v30  ;;  %v501_v47 = vunpack.c.l.b16 %v467_v41  ;;  %s382_s16 = smul.u32 7, %s2054_s9  ;;  %s1561_s9 = smov 48  }
  0x22   : > { %vm578_vm5 = vmpackc.low %vm1676_vm10, %vm1676_vm10  ;;  %v585_v33 = vsel %vm577_vm3, 65537, %v1558_v24  ;;  %v592_v34 = vunpack.c.l.b16 %v584_v31  ;;  %v489_v42 = vpack.c.b16 %v485_v35, %v485_v35  ;;  %v495_v49 = vsel %vm490_vm12, %v492_v30, %v494_v32 }
  0x23   : > { %vm579_vm6 = vmpackc.low %vm1686_vm11, %vm1686_vm11  ;;  %v586_v36 = vsel %vm578_vm5, 65537, %v1558_v24  ;;  %v593_v37 = vunpack.c.l.b16 %v585_v33  ;;  %v502_v53 = vpack.c.b16 %v501_v47, %v501_v47  ;;  %p389_p2 = scmp.lt.s32.totalorder %s382_s16, 7 }
  0x24   : > { %v587_v38 = vsel %vm579_vm6, 65537, %v1558_v24  ;;  %v594_v39 = vunpack.c.l.b16 %v586_v36  ;;  %v1241_v40 = vunpack.i.l.s16 %v592_v34  ;;  %vm1730_vm9 = vmand %vm540_vm13, %vm548_vm1  ;;  %v496_v51 = vrot.slane %v489_v42, 7 }
  0x25   : > { %v595_v45 = vunpack.c.l.b16 %v587_v38  ;;  %v1242_v46 = vunpack.i.l.s16 %v593_v37  ;;  %vm1743_vm10 = vmand %vm541_vm0, %vm549_vm2  ;;  %v503_v59 = vrot.slane %v502_v53, 3  ;;  %s2056_s16 = smov (!%p389_p2, %s382_s16), 7 }
  0x26   : > { %vm613_vm11 = vcmp.ne.s32.totalorder %v1241_v40, %v1694_v25  ;;  %v1243_v50 = vunpack.i.l.s16 %v594_v39  ;;  %vm580_vm13 = vmpackc.low %vm1730_vm9, %vm1730_vm9  ;;  %v497_v55 = vsel %vm490_vm12, %v494_v32, %v496_v51  ;;  %vm543_vm9 = vcmp.lt.s32.totalorder %v1696_v26, 63  ;;  %s392_s17 = sadd.s32 %s1657_s15, %s2056_s16  ;;  %s374_s15 = sand.u32 1, %s1500_s18  }
  0x27   : > { %vm614_vm14 = vcmp.ne.s32.totalorder %v1242_v46, %v1702_v27  ;;  %v1244_v52 = vunpack.i.l.s16 %v595_v45  ;;  %vm581_vm0 = vmpackc.low %vm1743_vm10, %vm1743_vm10  ;;  %v588_v54 = vsel %vm580_vm13, 65537, %v1558_v24  ;;  %v512_v2 = vsel %vm509_vm15, %v497_v55, %v503_v59  ;;  %s1221_s27 = sshll.u32 %s392_s17, 2  ;;  %s904_s18 = smul.u32 (%p1638_p5), 7, %s1508_s20 }
  0x28   : > { %vm615_vm1 = vmpackc.low %vm614_vm14, %vm613_vm11  ;;  %vm620_vm2 = vcmp.ne.s32.totalorder %v1243_v50, %v1694_v25  ;;  %v589_v56 = vsel %vm581_vm0, 65537, %v1558_v24  ;;  %v596_v57 = vunpack.c.l.b16 %v588_v54  ;;  %s394_s30 = scalar_lea.vmem %s1997_s0, %s1221_s27 }
  0x29   : > { %vm621_vm3 = vcmp.ne.s32.totalorder %v1244_v52, %v1702_v27  ;;  %v631_v58 = vsel %vm615_vm1, %v493_v44, 0  ;;  %v597_v60 = vunpack.c.l.b16 %v589_v56  ;;  %vm1766_vm5 = vmand %vm534_vm4, %vm542_vm8  ;;  %v459_v18 = vld [vmem:[%s394_s30 + $0x18] sm:$0xf]  ;;  %s905_s10 = ssub.s32 (%p1638_p5), 8, %s904_s18 }
  0x2a   : > { %vm622_vm6 = vmpackc.low %vm621_vm3, %vm620_vm2  ;;  %v636_v62 = vunpack.c.l.bf16 %v631_v58  ;;  %v637_v63 = vunpack.c.h.bf16 %v631_v58  ;;  %v1245_v0 = vunpack.i.l.s16 %v596_v57  ;;  %v469_v31 = vunpack.c.l.b16 %v459_v18  ;;  %p906_p3 = scmp.lt.s32.totalorder (%p1638_p5), %s905_s10, 7 }
  0x2b   : > { %v632_v1 = vsel %vm622_vm6, %v495_v49, 0  ;;  %v1246_v3 = vunpack.i.l.s16 %v597_v60  ;;  %vm574_vm8 = vmpackc.low %vm1766_vm5, %vm1766_vm5  ;;  %vm742_vm3 = vcmask 1046528  }
  0x2c   : > { %v638_v4 = vunpack.c.l.bf16 %v632_v1  ;;  %v639_v5 = vunpack.c.h.bf16 %v632_v1  ;;  %vm1772_vm10 = vcmp.ge.f32.partialorder %v636_v62, 0.0  ;;  %vm1776_vm4 = vcmp.ge.f32.partialorder %v637_v63, 0.0  ;;  %vm1790_vm13 = vmand %vm535_vm7, %vm543_vm9 }
  0x2d   : > { %v652_v8 = vmul.f32 0.100097656, %v636_v62  ;;  %v653_v9 = vmul.f32 0.100097656, %v637_v63  ;;  %vm627_vm15 = vcmp.ne.s32.totalorder %v1245_v0, %v1694_v25  ;;  %vm628_vm11 = vcmp.ne.s32.totalorder %v1246_v3, %v1702_v27  ;;  %vm575_vm7 = vmpackc.low %vm1790_vm13, %vm1790_vm13 }
  0x2e   : > { %vm1794_vm14 = vcmp.ge.f32.partialorder %v638_v4, 0.0  ;;  %vm1798_vm0 = vcmp.ge.f32.partialorder %v639_v5, 0.0  ;;  %v654_v13 = vmul.f32 0.100097656, %v638_v4  ;;  %v655_v14 = vmul.f32 0.100097656, %v639_v5  ;;  %vm629_vm1 = vmpackc.low %vm628_vm11, %vm627_vm15 }
  0x2f   : > { %v660_v15 = vpack.c.bf16 %v652_v8, %v652_v8  ;;  %v661_v16 = vpack.c.bf16 %v653_v9, %v653_v9  ;;  %v633_v17 = vsel %vm629_vm1, %v512_v2, 0  ;;  %v582_v19 = vsel %vm574_vm8, 65537, %v1558_v24  ;;  %vm667_vm2 = vmpackc.low %vm1776_vm4, %vm1772_vm10 }
  0x30   : > { %v662_v20 = vpack.c.bf16 %v654_v13, %v654_v13  ;;  %v663_v22 = vpack.c.bf16 %v655_v14, %v655_v14  ;;  %v640_v23 = vunpack.c.l.bf16 %v633_v17  ;;  %v641_v26 = vunpack.c.h.bf16 %v633_v17  ;;  %vm668_vm6 = vmpackc.low %vm1798_vm0, %vm1794_vm14 }
  0x31   : > { %v680_v28 = vunpack.c.l.b16 %v660_v15  ;;  %v681_v30 = vunpack.c.l.b16 %v661_v16  ;;  %v583_v32 = vsel %vm575_vm7, 65537, %v1558_v24  ;;  %v470_v38 = vpack.c.b16 %v469_v31, %v469_v31 }
  0x32   : > { %v682_v33 = vunpack.c.l.b16 %v662_v20  ;;  %v683_v34 = vunpack.c.l.b16 %v663_v22  ;;  %vm1819_vm5 = vcmp.ge.f32.partialorder %v640_v23, 0.0  ;;  %v656_v37 = vmul.f32 0.100097656, %v640_v23 }
  0x33   : > { %v687_v36 = vpack.c.b16 %v681_v30, %v680_v28  ;;  %v657_v24 = vmul.f32 0.100097656, %v641_v26  ;;  %vm1827_vm9 = vcmp.ge.f32.partialorder %v641_v26, 0.0  ;;  %v590_v41 = vunpack.c.l.b16 %v582_v19 }
  0x34   : > { %v688_v39 = vpack.c.b16 %v683_v34, %v682_v33  ;;  %v591_v42 = vunpack.c.l.b16 %v583_v32  ;;  %v664_v44 = vpack.c.bf16 %v656_v37, %v656_v37  ;;  %v471_v46 = vrot.slane %v470_v38, 3  ;;  %vm669_vm10 = vmpackc.low %vm1827_vm9, %vm1819_vm5 }
  0x35   : > { %v1831_v43 = vsel %vm667_vm2, %v631_v58, %v687_v36  ;;  %v665_v45 = vpack.c.bf16 %v657_v24, %v657_v24  ;;  %v1239_v49 = vunpack.i.l.s16 %v590_v41  ;;  %vm758_vm0 = vsmask.f32 6400 }
  0x36   : > { %v1833_v47 = vsel %vm668_vm6, %v632_v1, %v688_v39  ;;  %v744_v48 = vrot.slane %v1831_v43, 1  ;;  %v1240_v50 = vunpack.i.l.s16 %v591_v42  ;;  %v684_v52 = vunpack.c.l.b16 %v664_v44  ;;  %v1292_v44 = vld [vmem:[%s2000_s3 + $0x18] sm:$0xff] }
  0x37   : > { %v746_v51 = vrot.slane %v1833_v47, 1  ;;  %v685_v53 = vunpack.c.l.b16 %v665_v45  ;;  %v507_v54 = vsel %vm490_vm12, %v471_v46, %v491_v29  ;;  %vm606_vm4 = vcmp.ne.s32.totalorder %v1239_v49, %v1694_v25  ;;  %1293 = vmatpush.bf16.msra.mxu1 %v1292_v44  ;;  %v1291_v45 = vld [vmem:[%s2000_s3 + $0x10] sm:$0xff]  ;;  %1294 = vmatpush.bf16.msra.mxu2 %v1292_v44  ;;  %v1290_v46 = vld [vmem:[%s2000_s3 + $0x8] sm:$0xff] }
  0x38   : > { %vm607_vm8 = vcmp.ne.s32.totalorder %v1240_v50, %v1702_v27  ;;  %v707_v55 = vshll.u32 %v1831_v43, 16  ;;  %v711_v56 = vshrl.u32 %v1831_v43, 16  ;;  %v715_v21 = vshll.u32 %v1833_v47, 16  ;;  %1295 = vmatpush.bf16.msra.mxu3 %v1292_v44  ;;  %858 = vmatpush.bf16.msra.mxu0 %v1292_v44 }
  0x39   : > { %v747_v57 = vsel %vm742_vm3, %v744_v48, %v746_v51  ;;  %v689_v58 = vpack.c.b16 %v685_v53, %v684_v52  ;;  %vm608_vm15 = vmpackc.low %vm607_vm8, %vm606_vm4  ;;  %vm698_vm12 = vsmask.f32 7424  ;;  %v719_v9 = vshrl.u32 %v1833_v47, 16 }
  0x3a   : > { %752 = vrot.lane.b32.xlu2 %v747_v57, %s1559_s6  ;;  %v630_v29 = vsel %vm608_vm15, %v507_v54, 0  ;;  %v709_v59 = vrot.slane %v707_v55, 1  ;;  %v717_v27 = vrot.slane %v715_v21, 1  ;;  %v762_v22 = vrot.slane %v711_v56, 1 }
  0x3b   : > { %v1851_v60 = vsel %vm669_vm10, %v633_v17, %v689_v58  ;;  %v634_v25 = vunpack.c.l.bf16 %v630_v29  ;;  %v635_v61 = vunpack.c.h.bf16 %v630_v29  ;;  %v763_v23 = vrot.slane %v707_v55, 2  ;;  %1296 = vmatpush.bf16.msra.mxu1 %v1291_v45  ;;  %1297 = vmatpush.bf16.msra.mxu2 %v1291_v45 }
  0x3c   : > { %v748_v62 = vrot.slane %v1851_v60, 1  ;;  %v713_v63 = vor.u32 %v711_v56, %v709_v59  ;;  %v723_v11 = vshll.u32 %v1851_v60, 16  ;;  %v721_v15 = vor.u32 %v719_v9, %v717_v27  ;;  %1298 = vmatpush.bf16.msra.mxu3 %v1291_v45  ;;  %859 = vmatpush.bf16.msra.mxu0 %v1291_v45 }
  0x3d   : > { %v650_v0 = vmul.f32 0.100097656, %v634_v25  ;;  %v651_v1 = vmul.f32 0.100097656, %v635_v61  ;;  %vm642_vm11 = vcmp.ge.f32.partialorder %v634_v25, 0.0  ;;  %vm643_vm13 = vcmp.ge.f32.partialorder %v635_v61, 0.0 }
  0x3e   : > { %756 = vrot.lane.b32.xlu0 %v748_v62, %s1559_s6  ;;  %v718_v4 = vsel %vm698_vm12, %v713_v63, %v717_v27  ;;  %vm666_vm14 = vmpackc.low %vm643_vm13, %vm642_vm11  ;;  %v749_v8 = vsel %vm742_vm3, %v746_v51, %v748_v62  ;;  %v725_v18 = vrot.slane %v723_v11, 1  ;;  %v727_v19 = vshrl.u32 %v1851_v60, 16 }
  0x3f   : > { %v658_v2 = vpack.c.bf16 %v650_v0, %v650_v0  ;;  %v659_v3 = vpack.c.bf16 %v651_v1, %v651_v1  ;;  %v766_v30 = vrot.slane %v719_v9, 1  ;;  %v767_v31 = vrot.slane %v715_v21, 2  ;;  %1299 = vmatpush.bf16.msra.mxu1 %v1290_v46  ;;  %1300 = vmatpush.bf16.msra.mxu2 %v1290_v46 }
  0x40   : > { %v726_v26 = vsel %vm698_vm12, %v721_v15, %v725_v18  ;;  %v729_v32 = vor.u32 %v727_v19, %v725_v18  ;;  %v770_v33 = vrot.slane %v727_v19, 1  ;;  %v771_v34 = vrot.slane %v723_v11, 2  ;;  %1301 = vmatpush.bf16.msra.mxu3 %v1290_v46  ;;  %860 = vmatpush.bf16.msra.mxu0 %v1290_v46 }
  0x41   : > { %v678_v5 = vunpack.c.l.b16 %v658_v2  ;;  %v679_v6 = vunpack.c.l.b16 %v659_v3  ;;  %v764_v35 = vor.u32 %v763_v23, %v762_v22  ;;  %v768_v36 = vor.u32 %v767_v31, %v766_v30  ;;  %v1431_v3 = vld [vmem:[%s2001_s4] ss:$0 sm:$0xff] }
  0x42   : > { %732 = vrot.lane.b32.xlu2 %v718_v4, %s1560_s7  ;;  %v772_v37 = vor.u32 %v771_v34, %v770_v33  ;;  %vm782_vm1 = vcmask 130048   ;;  %vm791_vm7 = vcmask 261120   ;;  %vm800_vm2 = vcmask 392192  }
  0x43   : > { %v686_v7 = vpack.c.b16 %v679_v6, %v678_v5  ;;  %v769_v24 = vsel %vm758_vm0, %v764_v35, %v768_v36  ;;  %vm889_vm5 = vcmask 60416  }
  0x44   : > { %v773_v38 = vsel %vm758_vm0, %v768_v36, %v772_v37 }
  0x45   : > { %v1859_v10 = vsel %vm666_vm14, %v630_v29, %v686_v7 }
  0x46   : > { %v743_v12 = vrot.slane %v1859_v10, 1  ;;  %754 = vrot.lane.b32.xlu0 %v749_v8, %s1559_s6  ;;  %v700_v13 = vshrl.u32 %v1859_v10, 16  ;;  %v702_v14 = vshll.u32 %v1859_v10, 16 }
  0x48   : > { %v745_v16 = vsel %vm742_vm3, %v743_v12, %v744_v48  ;;  %v704_v17 = vrot.slane %v702_v14, 1  ;;  %v759_v39 = vrot.slane %v700_v13, 1  ;;  %v760_v40 = vrot.slane %v702_v14, 2  ;;  %v1289_v48 = vld [vmem:[%s2000_s3] sm:$0xff] }
  0x49   : > { %750 = vrot.lane.b32.xlu1 %v745_v16, %s1559_s6  ;;  %1302 = vmatpush.bf16.msra.mxu1 %v1289_v48  ;;  %vm845_vm3 = vcmask 523264   ;;  %s1305_s6 = smul.u32 28, %s374_s15 }
  0x4a   : > { %v705_v20 = vor.u32 %v704_v17, %v700_v13  ;;  %v761_v41 = vor.u32 %v760_v40, %v759_v39  ;;  %1303 = vmatpush.bf16.msra.mxu2 %v1289_v48  ;;  %1304 = vmatpush.bf16.msra.mxu3 %v1289_v48 }
  0x4b   : > { %861 = vmatpush.bf16.msra.mxu0 %v1289_v48 }
  0x4c   : > { %v710_v28 = vsel %vm698_vm12, %v705_v20, %v709_v59  ;;  %v765_v42 = vsel %vm758_vm0, %v761_v41, %v764_v35 }
  0x4d   : > { %730 = vrot.lane.b32.xlu2 %v710_v28, %s1560_s7 }
  0x4e   : > { %734 = vrot.lane.b32.xlu0 %v726_v26, %s1560_s7 }
  0x51   : > { %736 = vrot.lane.b32.xlu1 %v729_v32, %s1560_s7  ;;  %s1910_s7 = scalar_lea.vmem [#allocation2], %s1305_s6  }
  0x55   : > { %776 = vrot.lane.b32.xlu2 %v769_v24, %s1561_s9 }
  0x56   : > { %780 = vrot.lane.b32.xlu0 %v772_v37, %s1561_s9 }
  0x59   : > { %778 = vrot.lane.b32.xlu1 %v773_v38, %s1561_s9 }
  0x61   : > { %774 = vrot.lane.b32.xlu1 %v765_v42, %s1561_s9  ;;  %s1269_s9 = sshll.u32 (%p1638_p5), %s1512_s21, 3 }
  0x62   : > { %s911_s11 = sadd.s32 (%p1638_p5), %s1269_s9, %s904_s18 }
  0x63   : > { %s1270_s12 = sshll.u32 (%p1638_p5), %s911_s11, 2 }
  0x64   : > { %s1933_s16 = scalar_lea.vmem (%p1638_p5), %s2002_s5, %s1270_s12  }
  0x94   : > { %v753_v49 = vpop.permute.xlu2 %752 }
  0x9c   : > { %v733_v50 = vpop.permute.xlu2 %732 }
  0x9d   : > { %v786_v52 = vsel %vm782_vm1, %v1831_v43, %v733_v50 }
  0x9e   : > { %v795_v53 = vsel %vm791_vm7, %v786_v52, %v753_v49 }
  0xa7   : > { %v731_v51 = vpop.permute.xlu2 %730 }
  0xaf   : > { %v777_v54 = vpop.permute.xlu2 %776 }
  0xb0   : > { %v757_v55 = vpop.permute.xlu0 %756  ;;  %v804_v56 = vsel %vm800_vm2, %v795_v53, %v777_v54 }
  0xb1   : > { %1264 = vmatmul.msk.bf16.vlgmr.msra.gmra.mxu1 %vm845_vm3, %v804_v56 }
  0xb8   : > { %v755_v57 = vpop.permute.xlu0 %754 }
  0xbb   : > { %v751_v58 = vpop.permute.xlu1 %750 }
  0xc0   : > { %v735_v21 = vpop.permute.xlu0 %734 }
  0xc1   : > { %v788_v43 = vsel %vm782_vm1, %v1833_v47, %v735_v21 }
  0xc2   : > { %v797_v27 = vsel %vm791_vm7, %v788_v43, %v755_v57 }
  0xc3   : > { %v737_v29 = vpop.permute.xlu1 %736 }
  0xc4   : > { %v790_v59 = vsel %vm782_vm1, %v1851_v60, %v737_v29  ;;  %v784_v60 = vsel %vm782_vm1, %v1859_v10, %v731_v51 }
  0xc5   : > { %v799_v61 = vsel %vm791_vm7, %v790_v59, %v757_v55  ;;  %v793_v1 = vsel %vm791_vm7, %v784_v60, %v751_v58 }
  0xc8   : > { %v781_v25 = vpop.permute.xlu0 %780 }
  0xc9   : > { %v808_v62 = vsel %vm800_vm2, %v799_v61, %v781_v25 }
  0xca   : > { %1266 = vmatmul.msk.bf16.vlgmr.msra.gmra.mxu3 %vm845_vm3, %v808_v62 }
  0xcb   : > { %v779_v63 = vpop.permute.xlu1 %778 }
  0xcc   : > { %v806_v0 = vsel %vm800_vm2, %v797_v27, %v779_v63 }
  0xcd   : > { %1265 = vmatmul.msk.bf16.vlgmr.msra.gmra.mxu2 %vm845_vm3, %v806_v0 }
  0xd3   : > { %v775_v47 = vpop.permute.xlu1 %774 }
  0xd4   : > { %v802_v2 = vsel %vm800_vm2, %v793_v1, %v775_v47 }
  0xd5   : > { %1263 = vmatmul.msk.bf16.vlgmr.msra.gmra.mxu0 %vm845_vm3, %v802_v2 }
 0x12e   : > { %v868_v4 = vpop.f32.mrf.mxu1 }
 0x12f   : > { %v869_v5 = vadd.f32 %v1431_v3, %v868_v4 }
 0x131   : > { %v884_v6 = vpack.c.bf16 %v869_v5, %v869_v5 }
 0x133   : > { %892 = vst.msk [vmem:[%s1910_s7 + $0x8] sm:$0xf] %vm889_vm5, %v884_v6 }
 0x136   : > { %v870_v7 = vpop.f32.mrf.mxu1 }
 0x137   : > { %v871_v8 = vadd.f32 %v1431_v3, %v870_v7 }
 0x139   : > { %v885_v9 = vpack.c.bf16 %v871_v8, %v871_v8 }
 0x13b   : > { %893 = vst.msk [vmem:[%s1910_s7 + $0xc] sm:$0xf] %vm889_vm5, %v885_v9 }
 0x14d   : > { %v878_v10 = vpop.f32.mrf.mxu3 }
 0x14e   : > { %v879_v11 = vadd.f32 %v1431_v3, %v878_v10 }
 0x150   : > { %v873_v12 = vpop.f32.mrf.mxu2  ;;  %v888_v13 = vpack.c.bf16 %v879_v11, %v879_v11 }
 0x151   : > { %v874_v14 = vadd.f32 %v1431_v3, %v873_v12 }
 0x152   : > { %v863_v15 = vpop.f32.mrf.mxu0  ;;  %896 = vst.msk [vmem:[%s1910_s7 + $0x18] sm:$0xf] %vm889_vm5, %v888_v13 }
 0x153   : > { %v886_v16 = vpack.c.bf16 %v874_v14, %v874_v14  ;;  %v864_v17 = vadd.f32 %v1431_v3, %v863_v15 }
 0x155   : > { %894 = vst.msk [vmem:[%s1910_s7 + $0x10] sm:$0xf] %vm889_vm5, %v886_v16  ;;  %v882_v18 = vpack.c.bf16 %v864_v17, %v864_v17  ;;  %v880_v19 = vpop.f32.mrf.mxu3 }
 0x157   : > { %890 = vst.msk [vmem:[%s1910_s7] sm:$0xf] %vm889_vm5, %v882_v18 }
 0x158   : > { %v875_v20 = vpop.f32.mrf.mxu2 }
 0x159   : > { %v876_v22 = vadd.f32 %v1431_v3, %v875_v20 }
 0x15a   : > { %v865_v23 = vpop.f32.mrf.mxu0 }
 0x15b   : > { %v887_v26 = vpack.c.bf16 %v876_v22, %v876_v22  ;;  %v866_v28 = vadd.f32 %v1431_v3, %v865_v23  ;;  %903 = sbr.rel (!%p1638_p5) target bundleno = 409 (0x199), region = 44 }
 0x15d   : > { %895 = vst.msk [vmem:[%s1910_s7 + $0x14] sm:$0xf] %vm889_vm5, %v887_v26  ;;  %v883_v30 = vpack.c.bf16 %v866_v28, %v866_v28 }
 0x15f   : > { %891 = vst.msk [vmem:[%s1910_s7 + $0x4] sm:$0xf] %vm889_vm5, %v883_v30 }
 0x160   : > { %s2058_s10 = smov (!%p906_p3, %s905_s10), 7 }
 0x161   : > { %s1267_s17 = sshll.u32 %s2058_s10, 2 }
 0x162   : > { %p1271_p4 = scmp.eq.s32.totalorder %s1267_s17, 0 }
 0x163   : > { %1432 = sdivrem.u32 (!%p1271_p4), %s2058_s10, 7 }
 0x164   : > { %916 = sbr.rel (%p1271_p4) target bundleno = 409 (0x199), region = 48 }
 0x16c   : > { %s1939_s29 = spop.drf %1432 }
 0x16d   : > { %s1434_s20 = spop.drf %1432  ;;  %p1272_p5 = scmp.le.s32.totalorder %s1939_s29, 0 }
 0x16e   : > { %s2032_s21 = smov (!%p1272_p5), %s1933_s16  ;;  %s2033_s27 = smov (!%p1272_p5), %s1910_s7 }
 0x16f   : > { %1130 = sbr.rel (%p1272_p5) target bundleno = 383 (0x17f), region = 126  ;;  %s1948_s15 = smov (!%p1272_p5), 0  }
 0x170   : > { %s1950_s28 = smov (!%p1272_p5), 0  }
 0x174 LB: >> { %v934_v31 = vld [vmem:[%s1532_s27] sm:$0xf]  ;;  %v936_v32 = vld [vmem:[%s1532_s27 + $0x4] sm:$0xf]  ;;  %v938_v33 = vld [vmem:[%s1532_s27 + $0x8] sm:$0xf]  ;;  %s1540_s28 = sphi %s1950_s28, %s928_s28   ;;  %s1536_s15 = sphi %s1948_s15, %s2034_s15   ;;  %s1532_s27 = sphi %s2033_s27, %s953_s27   ;;  %s1528_s21 = sphi %s2032_s21, %s954_s21  }
 0x175   : >> { %935 = vst [vmem:[%s1528_s21] sm:$0xf] %v934_v31  ;;  %v940_v34 = vld [vmem:[%s1532_s27 + $0xc] sm:$0xf]  ;;  %s948_s30 = sadd.s32 1, %s1536_s15  ;;  %v942_v35 = vld [vmem:[%s1532_s27 + $0x10] sm:$0xf] }
 0x176   : >> { %937 = vst [vmem:[%s1528_s21 + $0x4] sm:$0xf] %v936_v32  ;;  %p949_p6 = scmp.ge.s32.totalorder %s948_s30, %s1939_s29  ;;  %v944_v36 = vld [vmem:[%s1532_s27 + $0x14] sm:$0xf]  ;;  %v946_v37 = vld [vmem:[%s1532_s27 + $0x18] sm:$0xf] }
 0x177   : >> { %939 = vst [vmem:[%s1528_s21 + $0x8] sm:$0xf] %v938_v33  ;;  %s928_s28 = sadd.s32 1, %s1540_s28  }
 0x178   : >> { %941 = vst [vmem:[%s1528_s21 + $0xc] sm:$0xf] %v940_v34  ;;  %s2060_s30 = smov (%p949_p6, %s948_s30), 0  ;;  %p927_p7 = scmp.ge.s32.totalorder %s928_s28, %s1939_s29 }
 0x179   : >> { %943 = vst [vmem:[%s1528_s21 + $0x10] sm:$0xf] %v942_v35  ;;  %s951_s6 = smul.u32 28, %s2060_s30  ;;  %s2034_s15 = smov %s2060_s30 }
 0x17a   : >> { %945 = vst [vmem:[%s1528_s21 + $0x14] sm:$0xf] %v944_v36  ;;  %930 = sbr.rel (!%p927_p7) target bundleno = 372 (0x174), region = 132 }
 0x17b   : >> { %947 = vst [vmem:[%s1528_s21 + $0x18] sm:$0xf] %v946_v37  ;;  %s953_s27 = scalar_lea.vmem %s1910_s7, %s951_s6 [#allocation2]   ;;  %s954_s21 = scalar_lea.vmem %s1933_s16, %s951_s6  }
 0x17f PF: > { %1435 = sdivrem.u32 %s2058_s10, 7 }
 0x180   : > { %s1273_s18 = smul.u32 28, %s1939_s29 }
 0x182   : > { %s1971_s9 = scalar_lea.vmem %s1910_s7, %s1273_s18 [#allocation2]   ;;  %s961_s11 = scalar_lea.vmem %s1933_s16, %s1273_s18  }
 0x188   : > { %s1436_s12 = spop.drf %1435 }
 0x189   : > { %s1437_s13 = spop.drf %1435 }
 0x18a   : > { %p1275_p8 = scmp.le.s32.totalorder %s1437_s13, 0 }
 0x18b   : > { %s1542_s14 = smov (!%p1275_p8), %s961_s11   ;;  %s1546_s17 = smov (!%p1275_p8), %s1971_s9  }
 0x18c   : > { %1144 = sbr.rel (%p1275_p8) target bundleno = 409 (0x199), region = 137  ;;  %s1550_s20 = smov (!%p1275_p8), 0  }
 0x18d   : > { %s1554_s28 = smov (!%p1275_p8), 0  }
 0x191 LB: >> { %v971_v24 = vld [vmem:[%s1548_s17] sm:$0xf]  ;;  %s973_s7 = sadd.s32 1, %s1552_s20  ;;  %s965_s28 = sadd.s32 1, %s1556_s28   ;;  %s1556_s28 = sphi %s1554_s28, %s965_s28   ;;  %s1552_s20 = sphi %s1550_s20, %s1551_s20   ;;  %s1548_s17 = sphi %s1546_s17, %s978_s17   ;;  %s1544_s14 = sphi %s1542_s14, %s979_s14  }
 0x192   : >> { %972 = vst [vmem:[%s1544_s14] sm:$0xf] %v971_v24  ;;  %p974_p9 = scmp.ge.s32.totalorder %s973_s7, %s1437_s13  ;;  %p964_p10 = scmp.ge.s32.totalorder %s965_s28, %s1437_s13 }
 0x194   : >> { %s2062_s7 = smov (%p974_p9, %s973_s7), 0  ;;  %967 = sbr.rel (!%p964_p10) target bundleno = 401 (0x191), region = 143 }
 0x195   : >> { %s1276_s10 = sshll.u32 %s2062_s7, 2  ;;  %s1551_s20 = smov %s2062_s7  }
 0x196   : >> { %s978_s17 = scalar_lea.vmem %s1971_s9, %s1276_s10 [#allocation2]   ;;  %s979_s14 = scalar_lea.vmem %s961_s11, %s1276_s10  }
 0x199 PF: > { %s15_s24 = sadd.s32 1, %s1524_s24   ;;  %s2035_s18 = smov %s1504_s19 }
 0x19a   : > { %p12_p11 = scmp.ge.s32.totalorder %s15_s24, 6   ;;  %s2036_s19 = smov %s1649_s8 }
 0x19b   : > { %s2037_s20 = smov %s1516_s22  ;;  %s2038_s21 = smov %s1520_s23 }
 0x19c   : > { %s2039_s22 = smov %s2042_s25  ;;  %s2040_s23 = smov %s2046_s26 }
 0x19d   :  { %14 = sbr.rel (!%p12_p11) target bundleno = 4 (0x4), region = 154 }

// kernel: generator_forward.26
= control target key start
LH: loop header
LB: loop body
LE: loop exit
PB: predicated region body
PF: predicated region fallthrough
CT: control target
= control target key end

     0   :  { %s1275_s21 = smov 0   ;;  %s1277_s22 = smov 0   ;;  %s1507_s0 = inlined_call_operand.vmem [shape: bf16[2,64,8], index: 0, kind: input, shape index: {}, may-alias: {0,1,2}]   ;;  %s1508_s1 = inlined_call_operand.vmem [shape: bf16[2,64,8], index: 1, kind: input, shape index: {}, may-alias: {0,1,2}]   ;;  %s1509_s2 = inlined_call_operand.vmem [shape: bf16[2,64,8], index: 2, kind: input, shape index: {}, may-alias: {0,1,2}]   ;;  %s1510_s3 = inlined_call_operand.vmem [shape: bf16[24,8], index: 3, kind: input, shape index: {}]   ;;  %s1511_s4 = inlined_call_operand.vmem [shape: f32[1,8], index: 4, kind: input, shape index: {}]   ;;  %s1512_s5 = inlined_call_operand.vmem [shape: bf16[2,64,8], index: 5, kind: input, shape index: {}]   ;;  %s1513_s6 = inlined_call_operand.vmem [shape: bf16[2,64,8], index: 6, kind: output, shape index: {}]  }
   0x1   :  { %s1279_s23 = smov 0  }
   0x2 LB: > { %s28_s24 = sadd.s32 1, %s1230_s22  ;;  %p1101_p0 = scmp.ge.s32.totalorder %s1234_s23, 1  ;;  %s1234_s23 = sphi %s1279_s23, %s16_s23   ;;  %s1230_s22 = sphi %s1277_s22, %s1533_s22   ;;  %s1226_s21 = sphi %s1275_s21, %s1532_s21  }
   0x3   : > { %p30_p1 = scmp.ge.s32.totalorder %s28_s24, 2  ;;  %p324_p2 = scmp.lt.s32.totalorder %s1234_s23, 3 }
   0x5   : > { %s1535_s24 = smov (%p30_p1, %s28_s24), 0  ;;  %p325_p3 = pnand %p1101_p0, %p324_p2 }
   0x6   : > { %p405_p4 = scmp.lt.s32.totalorder (!%p325_p3), %s1226_s21, 1  ;;  %s1238_s13 = smov (!%p325_p3), 16  }
   0x7   : > { %328 = sbr.rel (%p325_p3) target bundleno = 316 (0x13c), region = 44  ;;  %s1239_s14 = smov (!%p325_p3), 8  }
   0xc   : > { %vm1236_vm0 = vmmov 1   ;;  %s1537_s21 = smov (!%p405_p4, %s1226_s21), 1  ;;  %v1237_v0 = vmov 0   ;;  %v560_v2 = vlaneseq  ;;  %vm510_vm2 = vsmask.f32 256 }
   0xd   : > { %vm626_vm1 = vmpackc.low %vm1236_vm0, %vm1236_vm0  ;;  %v1295_v4 = vunpack.c.l.b16 %v1237_v0  ;;  %v1298_v5 = vunpack.c.h.b16 %v1237_v0  ;;  %s1300_s25 = sshll.u32 %s1537_s21, 5  ;;  %vm554_vm6 = vcmask 1040384  }
   0xe   : > { %v635_v1 = vsel %vm626_vm1, 65537, %v1237_v0  ;;  %v561_v6 = vshrl.u32 %v560_v2, 7  ;;  %s429_s28 = scalar_lea.vmem %s1508_s1, %s1300_s25  ;;  %s444_s7 = scalar_lea.vmem %s1509_s2, %s1300_s25  ;;  %vm1339_vm9 = vmand %vm554_vm6, %vm510_vm2  ;;  %vm821_vm6 = vcmask 1046528  }
   0xf   : > { %v644_v3 = vunpack.c.l.b16 %v635_v1  ;;  %v1154_v8 = vld [vmem:[%s429_s28 + $0x8] sm:$0xff]  ;;  %v1155_v9 = vld [vmem:[%s429_s28 + $0x10] sm:$0xff]  ;;  %v1156_v10 = vld [vmem:[%s429_s28 + $0x18] sm:$0xff]  ;;  %s412_s10 = scalar_lea.vmem %s1507_s0, %s1300_s25  ;;  %s457_s19 = scalar_lea.vmem %s1512_s5, %s1300_s25 }
  0x10   : > { %v569_v11 = vadd.s32 64, %v561_v6  ;;  %v481_v12 = vld [vmem:[%s444_s7] sm:$0xf]  ;;  %v519_v14 = vshrl.u32 %v1154_v8, 16  ;;  %v527_v15 = vshrl.u32 %v1155_v9, 16  ;;  %v530_v16 = vshll.u32 %v1155_v9, 16 }
  0x11   : > { %v1306_v7 = vunpack.i.l.s16 %v644_v3  ;;  %v1316_v13 = vld [vmem:[%s429_s28] sm:$0xff]  ;;  %v535_v17 = vshrl.u32 %v1156_v10, 16  ;;  %v538_v18 = vshll.u32 %v1156_v10, 16  ;;  %v548_v19 = vunpack.c.l.b16 %v481_v12  ;;  %v472_v26 = vld [vmem:[%s412_s10 + $0x1c] sm:$0xf]  ;;  %s1480_s28 = scalar_lea.vmem %s1513_s6, %s1300_s25 }
  0x12   : > { %v579_v20 = vadd.s32 4294967295, %v569_v11  ;;  %v512_v21 = vshrl.u32 %v1316_v13, 16  ;;  %v521_v22 = vrot.slane %v519_v14, 7  ;;  %v529_v23 = vrot.slane %v527_v15, 7 }
  0x13   : > { %vm662_vm3 = vcmp.ne.s32.totalorder %v1306_v7, %v1298_v5  ;;  %vm668_vm4 = vcmp.ne.s32.totalorder %v1306_v7, %v1295_v4  ;;  %v537_v24 = vrot.slane %v535_v17, 7  ;;  %v522_v25 = vshll.u32 %v1154_v8, 16 }
  0x14   : > { %vm1329_vm5 = vmpackc.low %vm662_vm3, %vm668_vm4  ;;  %v549_v28 = vpack.c.b16 %v548_v19, %v548_v19  ;;  %vm597_vm7 = vcmp.lt.s32.totalorder %v579_v20, 64  ;;  %v1333_v29 = vrot.slane %v512_v21, 7  ;;  %v532_v30 = vor.u32 %v530_v16, %v529_v23 }
  0x15   : > { %v540_v31 = vor.u32 %v538_v18, %v537_v24  ;;  %vm633_vm8 = vmpackc.low %vm597_vm7, %vm597_vm7  ;;  %v524_v32 = vor.u32 %v522_v25, %v521_v22  ;;  %v483_v35 = vunpack.c.l.b16 %v472_v26  ;;  %v571_v36 = vadd.s32 4294967295, %v561_v6 }
  0x16   : > { %v551_v33 = vshll.u32 %v549_v28, 16  ;;  %v642_v34 = vsel %vm633_vm8, 65537, %v1237_v0  ;;  %v533_v37 = vsel %vm510_vm2, %v521_v22, %v532_v30  ;;  %v515_v45 = vshll.u32 %v1316_v13, 16  ;;  %v1157_v22 = vld [vmem:[%s1510_s3] sm:$0xff] }
  0x17   : > { %v541_v38 = vsel %vm510_vm2, %v529_v23, %v540_v31  ;;  %v651_v40 = vunpack.c.l.b16 %v642_v34  ;;  %v525_v41 = vsel %vm510_vm2, %v1333_v29, %v524_v32  ;;  %v694_v42 = vsel %vm1329_vm5, %v533_v37, 0 }
  0x18   : > { %v695_v43 = vsel %vm1329_vm5, %v541_v38, 0  ;;  %v1351_v44 = vsel %vm1329_vm5, %v525_v41, 0  ;;  %v701_v46 = vunpack.c.l.bf16 %v694_v42  ;;  %v702_v47 = vunpack.c.h.bf16 %v694_v42 }
  0x19   : > { %v703_v48 = vunpack.c.l.bf16 %v695_v43  ;;  %v704_v49 = vunpack.c.h.bf16 %v695_v43  ;;  %v557_v50 = vsel %vm1339_vm9, %v537_v24, %v551_v33  ;;  %v1136_v51 = vunpack.i.l.s16 %v651_v40 }
  0x1a   : > { %v484_v52 = vpack.c.b16 %v483_v35, %v483_v35  ;;  %vm580_vm10 = vcmp.ge.s32.totalorder %v571_v36, 0  ;;  %vm1356_vm11 = vcmp.ge.f32.partialorder %v701_v46, 0.0  ;;  %vm1360_vm12 = vcmp.ge.f32.partialorder %v702_v47, 0.0  ;;  %v859_v36 = vld [vmem:[%s1510_s3 + $0x8] sm:$0xf] }
  0x1b   : > { %v699_v55 = vunpack.c.l.bf16 %v1351_v44  ;;  %v700_v56 = vunpack.c.h.bf16 %v1351_v44  ;;  %v719_v57 = vmul.f32 0.100097656, %v701_v46  ;;  %v720_v58 = vmul.f32 0.100097656, %v702_v47  ;;  %vm625_vm2 = vmpackc.low %vm580_vm10, %vm580_vm10 }
  0x1c   : > { %v721_v59 = vmul.f32 0.100097656, %v703_v48  ;;  %v722_v60 = vmul.f32 0.100097656, %v704_v49  ;;  %vm1366_vm13 = vcmp.ge.f32.partialorder %v703_v48, 0.0  ;;  %vm1370_vm14 = vcmp.ge.f32.partialorder %v704_v49, 0.0  ;;  %vm735_vm4 = vmpackc.low %vm1360_vm12, %vm1356_vm11 }
  0x1d   : > { %vm689_vm15 = vcmp.ne.s32.totalorder %v1136_v51, %v1295_v4  ;;  %vm690_vm0 = vcmp.ne.s32.totalorder %v1136_v51, %v1298_v5  ;;  %v728_v63 = vpack.c.bf16 %v719_v57, %v719_v57  ;;  %v729_v1 = vpack.c.bf16 %v720_v58, %v720_v58  ;;  %vm736_vm5 = vmpackc.low %vm1370_vm14, %vm1366_vm13 }
  0x1e   : > { %v730_v2 = vpack.c.bf16 %v721_v59, %v721_v59  ;;  %v731_v3 = vpack.c.bf16 %v722_v60, %v722_v60  ;;  %vm691_vm1 = vmpackc.low %vm690_vm0, %vm689_vm15  ;;  %v717_v8 = vmul.f32 0.100097656, %v699_v55  ;;  %v718_v9 = vmul.f32 0.100097656, %v700_v56 }
  0x1f   : > { %v696_v6 = vsel %vm691_vm1, %v557_v50, 0  ;;  %v486_v10 = vshrl.u32 %v484_v52, 16  ;;  %v751_v11 = vunpack.c.l.b16 %v728_v63  ;;  %v752_v12 = vunpack.c.l.b16 %v729_v1 }
  0x20   : > { %v753_v13 = vunpack.c.l.b16 %v730_v2  ;;  %v754_v14 = vunpack.c.l.b16 %v731_v3  ;;  %vm771_vm7 = vsmask.f32 7424  ;;  %v705_v15 = vunpack.c.l.bf16 %v696_v6 }
  0x21   : > { %v726_v16 = vpack.c.bf16 %v717_v8, %v717_v8  ;;  %v758_v17 = vpack.c.b16 %v752_v12, %v751_v11  ;;  %v727_v19 = vpack.c.bf16 %v718_v9, %v718_v9  ;;  %v634_v20 = vsel %vm625_vm2, 65537, %v1237_v0 }
  0x22   : > { %v759_v18 = vpack.c.b16 %v754_v14, %v753_v13  ;;  %v723_v21 = vmul.f32 0.100097656, %v705_v15  ;;  %vm1387_vm8 = vcmp.ge.f32.partialorder %v699_v55, 0.0  ;;  %v488_v23 = vrot.slane %v486_v10, 3 }
  0x23   : > { %v517_v24 = vor.u32 %v515_v45, %v1333_v29  ;;  %v1397_v25 = vsel %vm735_vm4, %v694_v42, %v758_v17  ;;  %vm1401_vm10 = vcmp.ge.f32.partialorder %v705_v15, 0.0  ;;  %v643_v0 = vunpack.c.l.b16 %v634_v20  ;;  %v1174_v45 = vld [vmem:[%s457_s19 + $0x8] sm:$0xff]  }
  0x24   : > { %v1399_v26 = vsel %vm736_vm5, %v695_v43, %v759_v18  ;;  %v825_v28 = vrot.slane %v1397_v25, 1  ;;  %v788_v29 = vshll.u32 %v1397_v25, 16  ;;  %v792_v31 = vshrl.u32 %v1397_v25, 16  ;;  %vm737_vm12 = vmpackc.low %vm1401_vm10, %vm1401_vm10 }
  0x25   : > { %v827_v30 = vrot.slane %v1399_v26, 1  ;;  %v796_v32 = vshll.u32 %v1399_v26, 16  ;;  %v732_v33 = vpack.c.bf16 %v723_v21, %v723_v21  ;;  %v749_v34 = vunpack.c.l.b16 %v726_v16 }
  0x26   : > { %v750_v35 = vunpack.c.l.b16 %v727_v19  ;;  %v1414_v38 = vrot.slane %v788_v29, 1  ;;  %v1128_v40 = vunpack.i.l.s16 %v643_v0  ;;  %v869_v41 = vunpack.c.l.b16 %v859_v36 }
  0x27   : > { %v828_v37 = vsel %vm821_vm6, %v825_v28, %v827_v30  ;;  %v798_v42 = vrot.slane %v796_v32, 1  ;;  %v755_v43 = vunpack.c.l.b16 %v732_v33  ;;  %vm1417_vm11 = vcmp.ge.f32.partialorder %v700_v56, 0.0 }
  0x28   : > { %835 = vrot.lane.b32.xlu1 %v828_v37, %s1238_s13  ;;  %v556_v46 = vsel %vm1339_vm9, %v488_v23, %v517_v24  ;;  %v794_v47 = vor.u32 %v792_v31, %v1414_v38  ;;  %v800_v48 = vshrl.u32 %v1399_v26, 16  ;;  %vm661_vm13 = vcmp.ne.s32.totalorder %v1128_v40, %v1295_v4  ;;  %vm734_vm9 = vmpackc.low %vm1417_vm11, %vm1387_vm8  ;;  %v1211_v40 = vld [vmem:[%s1511_s4] ss:$0 sm:$0xff] }
  0x29   : > { %vm882_vm14 = vcmask 1043456   ;;  %v760_v49 = vpack.c.b16 %v755_v43, %v755_v43  ;;  %v757_v50 = vpack.c.b16 %v750_v35, %v749_v34  ;;  %vm663_vm15 = vmpackc.low %vm662_vm3, %vm661_vm13  ;;  %v871_v51 = vpack.c.b16 %v869_v41, %v869_v41 }
  0x2a   : > { %v799_v39 = vsel %vm771_vm7, %v794_v47, %v798_v42  ;;  %v692_v52 = vsel %vm663_vm15, %v556_v46, 0  ;;  %v802_v57 = vor.u32 %v800_v48, %v798_v42  ;;  %vm839_vm2 = vcmask 64512   ;;  %v1176_v48 = vld [vmem:[%s457_s19 + $0x18] sm:$0xff]  }
  0x2b   : > { %812 = vrot.lane.b32.xlu0 %v799_v39, %s1239_s14  ;;  %v770_v4 = vsel %vm737_vm12, %v696_v6, %v760_v49  ;;  %v697_v53 = vunpack.c.l.bf16 %v692_v52  ;;  %v698_v54 = vunpack.c.h.bf16 %v692_v52  ;;  %v884_v55 = vsel %vm882_vm14, %v871_v51, 0  ;;  %v1159_v51 = vld [vmem:[%s457_s19] sm:$0xff]  }
  0x2c   : > { %v829_v56 = vrot.slane %v770_v4, 1  ;;  %v804_v5 = vshll.u32 %v770_v4, 16  ;;  %1178 = vmatpush.bf16.msra.mxu2 %v884_v55  ;;  %1179 = vmatpush.bf16.msra.mxu3 %v884_v55  ;;  %v767_v7 = vsel %vm734_vm9, %v1351_v44, %v757_v50  ;;  %vm848_vm4 = vcmask 130048  }
  0x2d   : > { %v715_v58 = vmul.f32 0.100097656, %v697_v53  ;;  %v716_v59 = vmul.f32 0.100097656, %v698_v54  ;;  %1177 = vmatpush.bf16.msra.mxu1 %v884_v55  ;;  %892 = vmatpush.bf16.msra.mxu0 %v884_v55  ;;  %vm706_vm3 = vcmp.ge.f32.partialorder %v697_v53, 0.0  ;;  %vm707_vm0 = vcmp.ge.f32.partialorder %v698_v54, 0.0 }
  0x2e   : > { %v830_v60 = vsel %vm821_vm6, %v827_v30, %v829_v56  ;;  %v806_v61 = vrot.slane %v804_v5, 1  ;;  %v823_v2 = vrot.slane %v767_v7, 1  ;;  %vm733_vm1 = vmpackc.low %vm707_vm0, %vm706_vm3  ;;  %v780_v9 = vshll.u32 %v767_v7, 16 }
  0x2f   : > { %v724_v62 = vpack.c.bf16 %v715_v58, %v715_v58  ;;  %v725_v63 = vpack.c.bf16 %v716_v59, %v716_v59  ;;  %v784_v18 = vshrl.u32 %v767_v7, 16  ;;  %vm873_vm5 = vcmask 195584  }
  0x30   : > { %837 = vrot.lane.b32.xlu1 %v830_v60, %s1238_s13  ;;  %v807_v1 = vsel %vm771_vm7, %v802_v57, %v806_v61  ;;  %v826_v8 = vsel %vm821_vm6, %v823_v2, %v825_v28  ;;  %v782_v16 = vrot.slane %v780_v9, 1  ;;  %1181 = vmatpush.bf16.msra.mxu2 %v1157_v22  ;;  %v1164_v47 = vunpack.c.l.bf16 %v1174_v45 }
  0x31   : > { %v747_v3 = vunpack.c.l.b16 %v724_v62  ;;  %v748_v6 = vunpack.c.l.b16 %v725_v63  ;;  %1182 = vmatpush.bf16.msra.mxu3 %v1157_v22  ;;  %1180 = vmatpush.bf16.msra.mxu1 %v1157_v22  ;;  %v1172_v4 = vunpack.c.l.bf16 %v1176_v48  ;;  %v1160_v56 = vunpack.c.l.bf16 %v1159_v51 }
  0x32   : > { %v786_v20 = vor.u32 %v784_v18, %v782_v16  ;;  %893 = vmatpush.bf16.msra.mxu0 %v1157_v22  ;;  %v1165_v63 = vunpack.c.h.bf16 %v1174_v45 }
  0x33   : > { %814 = vrot.lane.b32.xlu0 %v807_v1, %s1239_s14  ;;  %v756_v44 = vpack.c.b16 %v748_v6, %v747_v3 }
  0x34   : > { %v791_v21 = vsel %vm771_vm7, %v786_v20, %v1414_v38 }
  0x35   : > { %v766_v10 = vsel %vm733_vm1, %v692_v52, %v756_v44 }
  0x36   : > { %v822_v11 = vrot.slane %v766_v10, 1  ;;  %v773_v12 = vshrl.u32 %v766_v10, 16  ;;  %v775_v13 = vshll.u32 %v766_v10, 16 }
  0x38   : > { %833 = vrot.lane.b32.xlu1 %v826_v8, %s1238_s13  ;;  %v824_v14 = vsel %vm821_vm6, %v822_v11, %v823_v2  ;;  %v777_v15 = vrot.slane %v775_v13, 1  ;;  %vm947_vm6 = vcmask 60416   ;;  %v1173_v8 = vunpack.c.h.bf16 %v1176_v48 }
  0x39   : > { %v1161_v11 = vunpack.c.h.bf16 %v1159_v51 }
  0x3a   : > { %v778_v17 = vor.u32 %v777_v15, %v773_v12 }
  0x3b   : > { %831 = vrot.lane.b32.xlu0 %v824_v14, %s1238_s13 }
  0x3c   : > { %v783_v19 = vsel %vm771_vm7, %v778_v17, %v782_v16 }
  0x3d   : > { %808 = vrot.lane.b32.xlu2 %v783_v19, %s1239_s14 }
  0x45   : > { %810 = vrot.lane.b32.xlu2 %v791_v21, %s1239_s14 }
  0x97   : > { %v809_v24 = vpop.permute.xlu2 %808 }
  0x98   : > { %v841_v36 = vsel %vm839_vm2, %v766_v10, %v809_v24 }
  0x9a   : > { %v836_v23 = vpop.permute.xlu1 %835 }
  0x9d   : > { %v813_v27 = vpop.permute.xlu0 %812 }
  0x9e   : > { %v845_v0 = vsel %vm839_vm2, %v1397_v25, %v813_v27 }
  0x9f   : > { %v854_v28 = vsel %vm848_vm4, %v845_v0, %v836_v23  ;;  %v811_v29 = vpop.permute.xlu2 %810 }
  0xa0   : > { %1144 = vmatmul.msk.bf16.vlgmr.msra.gmra.mxu2 %vm873_vm5, %v854_v28  ;;  %v843_v34 = vsel %vm839_vm2, %v767_v7, %v811_v29 }
  0xa2   : > { %v838_v30 = vpop.permute.xlu1 %837 }
  0xa5   : > { %v815_v31 = vpop.permute.xlu0 %814 }
  0xa6   : > { %v847_v32 = vsel %vm839_vm2, %v1399_v26, %v815_v31  ;;  %v1175_v26 = vld [vmem:[%s457_s19 + $0x10] sm:$0xff]  }
  0xa7   : > { %v856_v33 = vsel %vm848_vm4, %v847_v32, %v838_v30  ;;  %v1168_v41 = vunpack.c.l.bf16 %v1175_v26  ;;  %v1169_v52 = vunpack.c.h.bf16 %v1175_v26 }
  0xa8   : > { %1145 = vmatmul.msk.bf16.vlgmr.msra.gmra.mxu3 %vm873_vm5, %v856_v33 }
  0xaa   : > { %v834_v35 = vpop.permute.xlu1 %833 }
  0xab   : > { %v852_v25 = vsel %vm848_vm4, %v843_v34, %v834_v35 }
  0xac   : > { %1143 = vmatmul.msk.bf16.vlgmr.msra.gmra.mxu1 %vm873_vm5, %v852_v25 }
  0xad   : > { %v832_v37 = vpop.permute.xlu0 %831 }
  0xae   : > { %v850_v38 = vsel %vm848_vm4, %v841_v36, %v832_v37 }
  0xaf   : > { %1142 = vmatmul.msk.bf16.vlgmr.msra.gmra.mxu0 %vm873_vm5, %v850_v38 }
 0x123   : > { %v905_v42 = vpop.f32.mrf.mxu2 }
 0x124   : > { %v906_v43 = vadd.f32 %v1211_v40, %v905_v42 }
 0x126   : > { %v935_v46 = vadd.f32 %v1168_v41, %v906_v43 }
 0x128   : > { %v943_v49 = vpack.c.bf16 %v935_v46, %v935_v46 }
 0x129   : > { %v900_v50 = vpop.f32.mrf.mxu1 }
 0x12a   : > { %v901_v39 = vadd.f32 %v1211_v40, %v900_v50  ;;  %952 = vst.msk [vmem:[%s1480_s28 + $0x10] sm:$0xf] %vm947_vm6, %v943_v49 }
 0x12b   : > { %v907_v54 = vpop.f32.mrf.mxu2  ;;  %v910_v55 = vpop.f32.mrf.mxu3 }
 0x12c   : > { %v933_v53 = vadd.f32 %v1164_v47, %v901_v39  ;;  %v908_v57 = vadd.f32 %v1211_v40, %v907_v54  ;;  %v911_v5 = vadd.f32 %v1211_v40, %v910_v55  ;;  %v895_v7 = vpop.f32.mrf.mxu0 }
 0x12d   : > { %v896_v59 = vadd.f32 %v1211_v40, %v895_v7 }
 0x12e   : > { %v941_v58 = vpack.c.bf16 %v933_v53, %v933_v53  ;;  %v936_v60 = vadd.f32 %v1169_v52, %v908_v57  ;;  %v937_v61 = vadd.f32 %v1172_v4, %v911_v5 }
 0x12f   : > { %v931_v62 = vadd.f32 %v1160_v56, %v896_v59 }
 0x130   : > { %950 = vst.msk [vmem:[%s1480_s28 + $0x8] sm:$0xf] %vm947_vm6, %v941_v58  ;;  %v944_v1 = vpack.c.bf16 %v936_v60, %v936_v60  ;;  %v945_v2 = vpack.c.bf16 %v937_v61, %v937_v61 }
 0x131   : > { %v902_v3 = vpop.f32.mrf.mxu1  ;;  %v939_v6 = vpack.c.bf16 %v931_v62, %v931_v62 }
 0x132   : > { %v903_v44 = vadd.f32 %v1211_v40, %v902_v3  ;;  %953 = vst.msk [vmem:[%s1480_s28 + $0x14] sm:$0xf] %vm947_vm6, %v944_v1 }
 0x133   : > { %954 = vst.msk [vmem:[%s1480_s28 + $0x18] sm:$0xf] %vm947_vm6, %v945_v2  ;;  %v912_v10 = vpop.f32.mrf.mxu3 }
 0x134   : > { %v934_v9 = vadd.f32 %v1165_v63, %v903_v44  ;;  %948 = vst.msk [vmem:[%s1480_s28] sm:$0xf] %vm947_vm6, %v939_v6  ;;  %v913_v12 = vadd.f32 %v1211_v40, %v912_v10  ;;  %v897_v13 = vpop.f32.mrf.mxu0 }
 0x135   : > { %v898_v15 = vadd.f32 %v1211_v40, %v897_v13 }
 0x136   : > { %v942_v14 = vpack.c.bf16 %v934_v9, %v934_v9  ;;  %v938_v16 = vadd.f32 %v1173_v8, %v913_v12 }
 0x137   : > { %v932_v17 = vadd.f32 %v1161_v11, %v898_v15 }
 0x138   : > { %951 = vst.msk [vmem:[%s1480_s28 + $0xc] sm:$0xf] %vm947_vm6, %v942_v14  ;;  %v946_v18 = vpack.c.bf16 %v938_v16, %v938_v16 }
 0x139   : > { %v940_v19 = vpack.c.bf16 %v932_v17, %v932_v17 }
 0x13a   : > { %955 = vst.msk [vmem:[%s1480_s28 + $0x1c] sm:$0xf] %vm947_vm6, %v946_v18 }
 0x13b   : > { %949 = vst.msk [vmem:[%s1480_s28 + $0x4] sm:$0xf] %vm947_vm6, %v940_v19 }
 0x13c PF: > { %s16_s23 = sadd.s32 1, %s1234_s23   ;;  %s1532_s21 = smov %s1230_s22 }
 0x13d   : > { %p13_p5 = scmp.ge.s32.totalorder %s16_s23, 4   ;;  %s1533_s22 = smov %s1535_s24 }
 0x13f   :  { %15 = sbr.rel (!%p13_p5) target bundleno = 2 (0x2), region = 83 }

// kernel: generator_forward.27
= control target key start
LH: loop header
LB: loop body
LE: loop exit
PB: predicated region body
PF: predicated region fallthrough
CT: control target
= control target key end

     0   :  { %s1164_s18 = smov 0   ;;  %s1166_s19 = smov 0   ;;  %s1398_s0 = inlined_call_operand.vmem [shape: bf16[2,64,8], index: 0, kind: input, shape index: {}, may-alias: {0,1,2}]   ;;  %s1399_s1 = inlined_call_operand.vmem [shape: bf16[2,64,8], index: 1, kind: input, shape index: {}, may-alias: {0,1,2}]   ;;  %s1400_s2 = inlined_call_operand.vmem [shape: bf16[2,64,8], index: 2, kind: input, shape index: {}, may-alias: {0,1,2}]   ;;  %s1401_s3 = inlined_call_operand.vmem [shape: bf16[24,8], index: 3, kind: input, shape index: {}]   ;;  %s1402_s4 = inlined_call_operand.vmem [shape: f32[1,8], index: 4, kind: input, shape index: {}]   ;;  %s1403_s5 = inlined_call_operand.vmem [shape: bf16[2,64,8], index: 5, kind: output, shape index: {}]  }
   0x1   :  { %s1168_s20 = smov 0  }
   0x2 LB: > { %s27_s21 = sadd.s32 1, %s1124_s19  ;;  %p1017_p0 = scmp.ge.s32.totalorder %s1128_s20, 1  ;;  %s1128_s20 = sphi %s1168_s20, %s15_s20   ;;  %s1124_s19 = sphi %s1166_s19, %s1423_s19   ;;  %s1120_s18 = sphi %s1164_s18, %s1422_s18  }
   0x3   : > { %p29_p1 = scmp.ge.s32.totalorder %s27_s21, 2  ;;  %p282_p2 = scmp.lt.s32.totalorder %s1128_s20, 3 }
   0x5   : > { %s1425_s21 = smov (%p29_p1, %s27_s21), 0  ;;  %p283_p3 = pnand %p1017_p0, %p282_p2 }
   0x6   : > { %p352_p4 = scmp.lt.s32.totalorder (!%p283_p3), %s1120_s18, 1  ;;  %s1132_s7 = smov (!%p283_p3), 16  }
   0x7   : > { %286 = sbr.rel (%p283_p3) target bundleno = 318 (0x13e), region = 40  ;;  %s1133_s8 = smov (!%p283_p3), 8  }
   0xc   : > { %vm1130_vm0 = vmmov 1   ;;  %s1427_s18 = smov (!%p352_p4, %s1120_s18), 1  ;;  %v1131_v0 = vmov 0   ;;  %v510_v2 = vlaneseq  ;;  %vm451_vm2 = vsmask.f32 1280 }
   0xd   : > { %vm576_vm1 = vmpackc.low %vm1130_vm0, %vm1130_vm0  ;;  %v1184_v4 = vunpack.c.l.b16 %v1131_v0  ;;  %v1187_v5 = vunpack.c.h.b16 %v1131_v0  ;;  %s1189_s22 = sshll.u32 %s1427_s18, 5  ;;  %vm504_vm5 = vcmask 1041408   ;;  %vm779_vm14 = vcmask 1044480  }
   0xe   : > { %v585_v1 = vsel %vm576_vm1, 65537, %v1131_v0  ;;  %v511_v6 = vshrl.u32 %v510_v2, 7  ;;  %s376_s25 = scalar_lea.vmem %s1399_s1, %s1189_s22  ;;  %s391_s28 = scalar_lea.vmem %s1400_s2, %s1189_s22  ;;  %vm1230_vm9 = vmand %vm504_vm5, %vm451_vm2  ;;  %vm721_vm5 = vsmask.f32 6400 }
   0xf   : > { %v594_v3 = vunpack.c.l.b16 %v585_v1  ;;  %v1067_v8 = vld [vmem:[%s376_s25 + $0x8] sm:$0xff]  ;;  %v1068_v9 = vld [vmem:[%s376_s25 + $0x10] sm:$0xff]  ;;  %v1069_v10 = vld [vmem:[%s376_s25 + $0x18] sm:$0xff]  ;;  %s359_s6 = scalar_lea.vmem %s1398_s0, %s1189_s22  ;;  %s1371_s17 = scalar_lea.vmem %s1403_s5, %s1189_s22 }
  0x10   : > { %v519_v11 = vadd.s32 64, %v511_v6  ;;  %v418_v12 = vld [vmem:[%s391_s28] sm:$0xf]  ;;  %v1205_v13 = vadd.s32 4294967293, %v511_v6  ;;  %v461_v14 = vshrl.u32 %v1067_v8, 16  ;;  %v464_v15 = vshll.u32 %v1067_v8, 16 }
  0x11   : > { %v1195_v7 = vunpack.i.l.s16 %v594_v3  ;;  %v470_v16 = vshrl.u32 %v1068_v9, 16  ;;  %v473_v17 = vshll.u32 %v1068_v9, 16  ;;  %v1066_v18 = vld [vmem:[%s376_s25] sm:$0xff]  ;;  %v479_v19 = vshrl.u32 %v1069_v10, 16  ;;  %v409_v1 = vld [vmem:[%s359_s6 + $0x1c] sm:$0xf] }
  0x12   : > { %v482_v20 = vshll.u32 %v1069_v10, 16  ;;  %v493_v21 = vunpack.c.l.b16 %v418_v12  ;;  %v529_v22 = vadd.s32 4294967293, %v519_v11  ;;  %v463_v23 = vrot.slane %v461_v14, 6 }
  0x13   : > { %vm612_vm3 = vcmp.ne.s32.totalorder %v1195_v7, %v1187_v5  ;;  %vm618_vm4 = vcmp.ne.s32.totalorder %v1195_v7, %v1184_v4  ;;  %v466_v24 = vrot.slane %v464_v15, 7  ;;  %v472_v25 = vrot.slane %v470_v16, 6 }
  0x14   : > { %v475_v26 = vrot.slane %v473_v17, 7  ;;  %v481_v27 = vrot.slane %v479_v19, 6  ;;  %v484_v28 = vrot.slane %v482_v20, 7  ;;  %vm1213_vm6 = vmpackc.low %vm612_vm3, %vm618_vm4  ;;  %v494_v30 = vpack.c.b16 %v493_v21, %v493_v21 }
  0x15   : > { %vm547_vm7 = vcmp.lt.s32.totalorder %v529_v22, 64  ;;  %v467_v31 = vor.u32 %v466_v24, %v463_v23  ;;  %v453_v33 = vshrl.u32 %v1066_v18, 16  ;;  %v456_v34 = vshll.u32 %v1066_v18, 16 }
  0x16   : > { %v476_v32 = vor.u32 %v475_v26, %v472_v25  ;;  %vm583_vm8 = vmpackc.low %vm547_vm7, %vm547_vm7  ;;  %v485_v35 = vor.u32 %v484_v28, %v481_v27  ;;  %v496_v36 = vshrl.u32 %v494_v30, 16  ;;  %v499_v37 = vshll.u32 %v494_v30, 16 }
  0x17   : > { %v592_v38 = vsel %vm583_vm8, 65537, %v1131_v0  ;;  %v455_v41 = vrot.slane %v453_v33, 6  ;;  %v458_v42 = vrot.slane %v456_v34, 7  ;;  %v420_v15 = vunpack.c.l.b16 %v409_v1 }
  0x18   : > { %v477_v39 = vsel %vm451_vm2, %v467_v31, %v476_v32  ;;  %v601_v40 = vunpack.c.l.b16 %v592_v38  ;;  %v486_v43 = vsel %vm451_vm2, %v476_v32, %v485_v35  ;;  %v498_v45 = vrot.slane %v496_v36, 6 }
  0x19   : > { %v644_v44 = vsel %vm1213_vm6, %v477_v39, 0  ;;  %v501_v46 = vrot.slane %v499_v37, 7  ;;  %v645_v47 = vsel %vm1213_vm6, %v486_v43, 0  ;;  %v1234_v55 = vor.u32 %v458_v42, %v455_v41 }
  0x1a   : > { %v651_v48 = vunpack.c.l.bf16 %v644_v44  ;;  %v652_v49 = vunpack.c.h.bf16 %v644_v44  ;;  %v1050_v50 = vunpack.i.l.s16 %v601_v40  ;;  %v653_v51 = vunpack.c.l.bf16 %v645_v47 }
  0x1b   : > { %v654_v52 = vunpack.c.h.bf16 %v645_v47  ;;  %v502_v53 = vor.u32 %v501_v46, %v498_v45  ;;  %v468_v10 = vsel %vm451_vm2, %v1234_v55, %v467_v31  ;;  %v421_v23 = vpack.c.b16 %v420_v15, %v420_v15 }
  0x1c   : > { %vm1236_vm10 = vcmp.ge.f32.partialorder %v651_v48, 0.0  ;;  %vm1240_vm11 = vcmp.ge.f32.partialorder %v652_v49, 0.0  ;;  %v669_v58 = vmul.f32 0.100097656, %v651_v48  ;;  %v670_v59 = vmul.f32 0.100097656, %v652_v49 }
  0x1d   : > { %vm1244_vm12 = vcmp.ge.f32.partialorder %v653_v51, 0.0  ;;  %vm1248_vm13 = vcmp.ge.f32.partialorder %v654_v52, 0.0  ;;  %v671_v62 = vmul.f32 0.100097656, %v653_v51  ;;  %v672_v63 = vmul.f32 0.100097656, %v654_v52  ;;  %vm685_vm4 = vmpackc.low %vm1240_vm11, %vm1236_vm10 }
  0x1e   : > { %v678_v2 = vpack.c.bf16 %v669_v58, %v669_v58  ;;  %v679_v3 = vpack.c.bf16 %v670_v59, %v670_v59  ;;  %v507_v6 = vsel %vm1230_vm9, %v485_v35, %v502_v53  ;;  %vm639_vm15 = vcmp.ne.s32.totalorder %v1050_v50, %v1184_v4  ;;  %vm686_vm2 = vmpackc.low %vm1248_vm13, %vm1244_vm12 }
  0x1f   : > { %v680_v8 = vpack.c.bf16 %v671_v62, %v671_v62  ;;  %v681_v9 = vpack.c.bf16 %v672_v63, %v672_v63  ;;  %vm640_vm0 = vcmp.ne.s32.totalorder %v1050_v50, %v1187_v5  ;;  %v1260_v14 = vsel %vm1213_vm6, %v468_v10, 0 }
  0x20   : > { %v701_v11 = vunpack.c.l.b16 %v678_v2  ;;  %v702_v12 = vunpack.c.l.b16 %v679_v3  ;;  %vm641_vm1 = vmpackc.low %vm640_vm0, %vm639_vm15  ;;  %v649_v19 = vunpack.c.l.bf16 %v1260_v14  ;;  %v650_v22 = vunpack.c.h.bf16 %v1260_v14  ;;  %v817_v2 = vld [vmem:[%s1401_s3 + $0x8] sm:$0xf] }
  0x21   : > { %v703_v16 = vunpack.c.l.b16 %v680_v8  ;;  %v704_v17 = vunpack.c.l.b16 %v681_v9  ;;  %v646_v18 = vsel %vm641_vm1, %v507_v6, 0  ;;  %vm530_vm7 = vcmp.ge.s32.totalorder %v1205_v13, 0 }
  0x22   : > { %v708_v20 = vpack.c.b16 %v702_v12, %v701_v11  ;;  %v655_v21 = vunpack.c.l.bf16 %v646_v18  ;;  %vm1272_vm6 = vcmp.ge.f32.partialorder %v649_v19, 0.0  ;;  %v667_v26 = vmul.f32 0.100097656, %v649_v19  ;;  %vm575_vm11 = vmpackc.low %vm530_vm7, %vm530_vm7 }
  0x23   : > { %v709_v24 = vpack.c.b16 %v704_v17, %v703_v16  ;;  %vm1283_vm10 = vcmp.ge.f32.partialorder %v650_v22, 0.0  ;;  %v668_v41 = vmul.f32 0.100097656, %v650_v22  ;;  %v423_v49 = vshrl.u32 %v421_v23, 16 }
  0x24   : > { %v1277_v27 = vsel %vm685_vm4, %v644_v44, %v708_v20  ;;  %vm1279_vm8 = vcmp.ge.f32.partialorder %v655_v21, 0.0  ;;  %v673_v29 = vmul.f32 0.100097656, %v655_v21  ;;  %v676_v42 = vpack.c.bf16 %v667_v26, %v667_v26  ;;  %vm684_vm13 = vmpackc.low %vm1283_vm10, %vm1272_vm6 }
  0x25   : > { %v1287_v31 = vsel %vm686_vm2, %v645_v47, %v709_v24  ;;  %v783_v32 = vrot.slane %v1277_v27, 3  ;;  %v740_v33 = vshrl.u32 %v1277_v27, 16  ;;  %v743_v34 = vshll.u32 %v1277_v27, 16  ;;  %vm687_vm12 = vmpackc.low %vm1279_vm8, %vm1279_vm8 }
  0x26   : > { %v785_v35 = vrot.slane %v1287_v31, 3  ;;  %v749_v36 = vshrl.u32 %v1287_v31, 16  ;;  %v752_v37 = vshll.u32 %v1287_v31, 16  ;;  %v682_v38 = vpack.c.bf16 %v673_v29, %v673_v29 }
  0x27   : > { %v742_v39 = vrot.slane %v740_v33, 1  ;;  %v745_v40 = vrot.slane %v743_v34, 2  ;;  %v677_v48 = vpack.c.bf16 %v668_v41, %v668_v41  ;;  %v699_v13 = vunpack.c.l.b16 %v676_v42 }
  0x28   : > { %v786_v43 = vsel %vm779_vm14, %v783_v32, %v785_v35  ;;  %v751_v44 = vrot.slane %v749_v36, 1  ;;  %v754_v45 = vrot.slane %v752_v37, 2  ;;  %v705_v46 = vunpack.c.l.b16 %v682_v38 }
  0x29   : > { %793 = vrot.lane.b32.xlu1 %v786_v43, %s1132_s7  ;;  %v1302_v47 = vor.u32 %v745_v40, %v742_v39  ;;  %v426_v52 = vshll.u32 %v421_v23, 16  ;;  %v584_v53 = vsel %vm575_vm11, 65537, %v1131_v0  ;;  %v700_v56 = vunpack.c.l.b16 %v677_v48  ;;  %v1070_v43 = vld [vmem:[%s1401_s3] sm:$0xff] }
  0x2a   : > { %v755_v50 = vor.u32 %v754_v45, %v751_v44  ;;  %v710_v51 = vpack.c.b16 %v705_v46, %v705_v46  ;;  %v425_v57 = vrot.slane %v423_v49, 2  ;;  %v593_v58 = vunpack.c.l.b16 %v584_v53 }
  0x2b   : > { %v428_v61 = vrot.slane %v426_v52, 3  ;;  %v707_v0 = vpack.c.b16 %v700_v56, %v699_v13  ;;  %v827_v8 = vunpack.c.l.b16 %v817_v2  ;;  %vm840_vm1 = vcmask 1043456  }
  0x2c   : > { %v756_v59 = vsel %vm721_vm5, %v1302_v47, %v755_v50  ;;  %v720_v60 = vsel %vm687_vm12, %v646_v18, %v710_v51  ;;  %v1042_v6 = vunpack.i.l.s16 %v593_v58  ;;  %vm806_vm2 = vcmask 130048  }
  0x2d   : > { %770 = vrot.lane.b32.xlu0 %v756_v59, %s1133_s8  ;;  %v787_v62 = vrot.slane %v720_v60, 3  ;;  %v758_v63 = vshrl.u32 %v720_v60, 16  ;;  %v761_v1 = vshll.u32 %v720_v60, 16  ;;  %v429_v3 = vor.u32 %v428_v61, %v425_v57 }
  0x2e   : > { %v1320_v12 = vsel %vm684_vm13, %v1260_v14, %v707_v0  ;;  %vm611_vm15 = vcmp.ne.s32.totalorder %v1042_v6, %v1184_v4  ;;  %v829_v17 = vpack.c.b16 %v827_v8, %v827_v8  ;;  %vm831_vm6 = vcmask 195584  }
  0x2f   : > { %v788_v9 = vsel %vm779_vm14, %v785_v35, %v787_v62  ;;  %v760_v10 = vrot.slane %v758_v63, 1  ;;  %v763_v11 = vrot.slane %v761_v1, 2  ;;  %v506_v15 = vsel %vm1230_vm9, %v429_v3, %v1234_v55  ;;  %vm613_vm0 = vmpackc.low %vm612_vm3, %vm611_vm15 }
  0x30   : > { %v781_v18 = vrot.slane %v1320_v12, 3  ;;  %v642_v19 = vsel %vm613_vm0, %v506_v15, 0  ;;  %v842_v54 = vsel %vm840_vm1, %v829_v17, 0  ;;  %v731_v23 = vshrl.u32 %v1320_v12, 16 }
  0x31   : > { %795 = vrot.lane.b32.xlu1 %v788_v9, %s1132_s7  ;;  %v764_v16 = vor.u32 %v763_v11, %v760_v10  ;;  %v647_v20 = vunpack.c.l.bf16 %v642_v19  ;;  %v648_v21 = vunpack.c.h.bf16 %v642_v19  ;;  %1072 = vmatpush.bf16.msra.mxu2 %v842_v54  ;;  %v734_v24 = vshll.u32 %v1320_v12, 16 }
  0x32   : > { %v784_v5 = vsel %vm779_vm14, %v781_v18, %v783_v32  ;;  %1073 = vmatpush.bf16.msra.mxu3 %v842_v54  ;;  %1071 = vmatpush.bf16.msra.mxu1 %v842_v54  ;;  %v733_v29 = vrot.slane %v731_v23, 1 }
  0x33   : > { %v765_v14 = vsel %vm721_vm5, %v755_v50, %v764_v16  ;;  %v665_v4 = vmul.f32 0.100097656, %v647_v20  ;;  %v666_v55 = vmul.f32 0.100097656, %v648_v21  ;;  %vm656_vm3 = vcmp.ge.f32.partialorder %v647_v20, 0.0  ;;  %850 = vmatpush.bf16.msra.mxu0 %v842_v54 }
  0x34   : > { %vm657_vm9 = vcmp.ge.f32.partialorder %v648_v21, 0.0  ;;  %v736_v30 = vrot.slane %v734_v24, 2 }
  0x35   : > { %772 = vrot.lane.b32.xlu0 %v765_v14, %s1133_s8  ;;  %v674_v7 = vpack.c.bf16 %v665_v4, %v665_v4  ;;  %v675_v22 = vpack.c.bf16 %v666_v55, %v666_v55  ;;  %vm683_vm4 = vmpackc.low %vm657_vm9, %vm656_vm3  ;;  %1075 = vmatpush.bf16.msra.mxu2 %v1070_v43 }
  0x36   : > { %v737_v39 = vor.u32 %v736_v30, %v733_v29  ;;  %1076 = vmatpush.bf16.msra.mxu3 %v1070_v43  ;;  %1074 = vmatpush.bf16.msra.mxu1 %v1070_v43 }
  0x37   : > { %v697_v25 = vunpack.c.l.b16 %v674_v7  ;;  %v698_v26 = vunpack.c.l.b16 %v675_v22  ;;  %851 = vmatpush.bf16.msra.mxu0 %v1070_v43 }
  0x38   : > { %v747_v42 = vsel %vm721_vm5, %v737_v39, %v1302_v47 }
  0x39   : > { %791 = vrot.lane.b32.xlu1 %v784_v5, %s1132_s7  ;;  %v706_v28 = vpack.c.b16 %v698_v26, %v697_v25 }
  0x3b   : > { %v716_v32 = vsel %vm683_vm4, %v642_v19, %v706_v28 }
  0x3c   : > { %v780_v33 = vrot.slane %v716_v32, 3  ;;  %v723_v34 = vshrl.u32 %v716_v32, 16  ;;  %v726_v35 = vshll.u32 %v716_v32, 16 }
  0x3e   : > { %v782_v36 = vsel %vm779_vm14, %v780_v33, %v781_v18  ;;  %v725_v37 = vrot.slane %v723_v34, 1  ;;  %v728_v38 = vrot.slane %v726_v35, 2  ;;  %vm797_vm14 = vcmask 64512  }
  0x3f   : > { %789 = vrot.lane.b32.xlu0 %v782_v36, %s1132_s7 }
  0x40   : > { %v729_v40 = vor.u32 %v728_v38, %v725_v37 }
  0x42   : > { %v738_v41 = vsel %vm721_vm5, %v729_v40, %v737_v39  ;;  %vm881_vm5 = vcmask 60416  }
  0x43   : > { %766 = vrot.lane.b32.xlu2 %v738_v41, %s1133_s8 }
  0x4b   : > { %768 = vrot.lane.b32.xlu2 %v747_v42, %s1133_s8 }
  0x9b   : > { %v794_v44 = vpop.permute.xlu1 %793 }
  0x9d   : > { %v767_v46 = vpop.permute.xlu2 %766 }
  0x9e   : > { %v799_v57 = vsel %vm797_vm14, %v716_v32, %v767_v46 }
  0x9f   : > { %v771_v45 = vpop.permute.xlu0 %770 }
  0xa0   : > { %v803_v48 = vsel %vm797_vm14, %v1277_v27, %v771_v45 }
  0xa1   : > { %v812_v47 = vsel %vm806_vm2, %v803_v48, %v794_v44 }
  0xa2   : > { %1058 = vmatmul.msk.bf16.vlgmr.msra.gmra.mxu2 %vm831_vm6, %v812_v47 }
  0xa3   : > { %v796_v13 = vpop.permute.xlu1 %795 }
  0xa5   : > { %v769_v50 = vpop.permute.xlu2 %768 }
  0xa6   : > { %v801_v53 = vsel %vm797_vm14, %v1320_v12, %v769_v50 }
  0xa7   : > { %v773_v49 = vpop.permute.xlu0 %772 }
  0xa8   : > { %v805_v51 = vsel %vm797_vm14, %v1287_v31, %v773_v49  ;;  %v1105_v31 = vld [vmem:[%s1402_s4] ss:$0 sm:$0xff] }
  0xa9   : > { %v814_v52 = vsel %vm806_vm2, %v805_v51, %v796_v13 }
  0xaa   : > { %1059 = vmatmul.msk.bf16.vlgmr.msra.gmra.mxu3 %vm831_vm6, %v814_v52 }
  0xab   : > { %v792_v56 = vpop.permute.xlu1 %791 }
  0xac   : > { %v810_v27 = vsel %vm806_vm2, %v801_v53, %v792_v56 }
  0xad   : > { %1057 = vmatmul.msk.bf16.vlgmr.msra.gmra.mxu1 %vm831_vm6, %v810_v27 }
  0xb1   : > { %v790_v58 = vpop.permute.xlu0 %789 }
  0xb2   : > { %v808_v59 = vsel %vm806_vm2, %v799_v57, %v790_v58 }
  0xb3   : > { %1056 = vmatmul.msk.bf16.vlgmr.msra.gmra.mxu0 %vm831_vm6, %v808_v59 }
 0x125   : > { %v863_v60 = vpop.f32.mrf.mxu2 }
 0x126   : > { %v864_v61 = vadd.f32 %v1105_v31, %v863_v60 }
 0x128   : > { %v877_v62 = vpack.c.bf16 %v864_v61, %v864_v61 }
 0x12a   : > { %886 = vst.msk [vmem:[%s1371_s17 + $0x10] sm:$0xf] %vm881_vm5, %v877_v62  ;;  %v858_v63 = vpop.f32.mrf.mxu1 }
 0x12b   : > { %v859_v1 = vadd.f32 %v1105_v31, %v858_v63 }
 0x12d   : > { %v875_v0 = vpack.c.bf16 %v859_v1, %v859_v1  ;;  %v865_v2 = vpop.f32.mrf.mxu2  ;;  %v868_v3 = vpop.f32.mrf.mxu3 }
 0x12e   : > { %v866_v6 = vadd.f32 %v1105_v31, %v865_v2  ;;  %v869_v8 = vadd.f32 %v1105_v31, %v868_v3 }
 0x12f   : > { %884 = vst.msk [vmem:[%s1371_s17 + $0x8] sm:$0xf] %vm881_vm5, %v875_v0 }
 0x130   : > { %v878_v9 = vpack.c.bf16 %v866_v6, %v866_v6  ;;  %v879_v10 = vpack.c.bf16 %v869_v8, %v869_v8  ;;  %v853_v11 = vpop.f32.mrf.mxu0 }
 0x131   : > { %v854_v15 = vadd.f32 %v1105_v31, %v853_v11 }
 0x132   : > { %887 = vst.msk [vmem:[%s1371_s17 + $0x14] sm:$0xf] %vm881_vm5, %v878_v9  ;;  %v860_v12 = vpop.f32.mrf.mxu1 }
 0x133   : > { %888 = vst.msk [vmem:[%s1371_s17 + $0x18] sm:$0xf] %vm881_vm5, %v879_v10  ;;  %v861_v16 = vadd.f32 %v1105_v31, %v860_v12  ;;  %v873_v17 = vpack.c.bf16 %v854_v15, %v854_v15 }
 0x135   : > { %v876_v18 = vpack.c.bf16 %v861_v16, %v861_v16  ;;  %v870_v19 = vpop.f32.mrf.mxu3  ;;  %882 = vst.msk [vmem:[%s1371_s17] sm:$0xf] %vm881_vm5, %v873_v17 }
 0x136   : > { %v871_v14 = vadd.f32 %v1105_v31, %v870_v19 }
 0x137   : > { %885 = vst.msk [vmem:[%s1371_s17 + $0xc] sm:$0xf] %vm881_vm5, %v876_v18 }
 0x138   : > { %v880_v20 = vpack.c.bf16 %v871_v14, %v871_v14  ;;  %v855_v21 = vpop.f32.mrf.mxu0 }
 0x139   : > { %v856_v54 = vadd.f32 %v1105_v31, %v855_v21 }
 0x13a   : > { %889 = vst.msk [vmem:[%s1371_s17 + $0x1c] sm:$0xf] %vm881_vm5, %v880_v20 }
 0x13b   : > { %v874_v4 = vpack.c.bf16 %v856_v54, %v856_v54 }
 0x13d   : > { %883 = vst.msk [vmem:[%s1371_s17 + $0x4] sm:$0xf] %vm881_vm5, %v874_v4 }
 0x13e PF: > { %s15_s20 = sadd.s32 1, %s1128_s20   ;;  %s1422_s18 = smov %s1124_s19 }
 0x13f   : > { %p12_p5 = scmp.ge.s32.totalorder %s15_s20, 4   ;;  %s1423_s19 = smov %s1425_s21 }
 0x141   :  { %14 = sbr.rel (!%p12_p5) target bundleno = 2 (0x2), region = 76 }

// kernel: generator_forward.29
= control target key start
LH: loop header
LB: loop body
LE: loop exit
PB: predicated region body
PF: predicated region fallthrough
CT: control target
= control target key end

     0   :  { %s1181_s18 = smov 0   ;;  %s1183_s19 = smov 0   ;;  %s1416_s0 = inlined_call_operand.vmem [shape: bf16[2,64,8], index: 0, kind: input, shape index: {}, may-alias: {0,1,2}]   ;;  %s1417_s1 = inlined_call_operand.vmem [shape: bf16[2,64,8], index: 1, kind: input, shape index: {}, may-alias: {0,1,2}]   ;;  %s1418_s2 = inlined_call_operand.vmem [shape: bf16[2,64,8], index: 2, kind: input, shape index: {}, may-alias: {0,1,2}]   ;;  %s1419_s3 = inlined_call_operand.vmem [shape: bf16[24,8], index: 3, kind: input, shape index: {}]   ;;  %s1420_s4 = inlined_call_operand.vmem [shape: f32[1,8], index: 4, kind: input, shape index: {}]   ;;  %s1421_s5 = inlined_call_operand.vmem [shape: bf16[2,64,8], index: 5, kind: output, shape index: {}]  }
   0x1   :  { %s1185_s20 = smov 0  }
   0x2 LB: > { %s27_s21 = sadd.s32 1, %s1140_s19  ;;  %p1032_p0 = scmp.ge.s32.totalorder %s1144_s20, 1  ;;  %s1144_s20 = sphi %s1185_s20, %s15_s20   ;;  %s1140_s19 = sphi %s1183_s19, %s1443_s19   ;;  %s1136_s18 = sphi %s1181_s18, %s1442_s18  }
   0x3   : > { %p29_p1 = scmp.ge.s32.totalorder %s27_s21, 2  ;;  %p282_p2 = scmp.lt.s32.totalorder %s1144_s20, 3 }
   0x5   : > { %s1445_s21 = smov (%p29_p1, %s27_s21), 0  ;;  %p283_p3 = pnand %p1032_p0, %p282_p2 }
   0x6   : > { %p352_p4 = scmp.lt.s32.totalorder (!%p283_p3), %s1136_s18, 1  ;;  %s1149_s7 = smov (!%p283_p3), 16  }
   0x7   : > { %286 = sbr.rel (%p283_p3) target bundleno = 320 (0x140), region = 40  ;;  %s1150_s8 = smov (!%p283_p3), 8  }
   0xc   : > { %v510_v0 = vlaneseq  ;;  %s1447_s18 = smov (!%p352_p4, %s1136_s18), 1  ;;  %vm1146_vm0 = vmmov 1   ;;  %v1147_v1 = vmov 0   ;;  %vm1148_vm2 = vmmov 0  }
   0xd   : > { %vm583_vm1 = vmpackc.low %vm1146_vm0, %vm1146_vm0  ;;  %s1200_s22 = sshll.u32 %s1447_s18, 5  ;;  %v1208_v6 = vunpack.c.l.b16 %v1147_v1  ;;  %v1211_v7 = vunpack.c.h.b16 %v1147_v1  ;;  %vm451_vm4 = vsmask.f32 2304  ;;  %vm504_vm5 = vcmask 1042432  }
   0xe   : > { %v593_v2 = vsel %vm583_vm1, 65537, %v1147_v1  ;;  %v511_v3 = vshrl.u32 %v510_v0, 7  ;;  %vm591_vm3 = vmpackc.low %vm1148_vm2, %vm1148_vm2  ;;  %s376_s25 = scalar_lea.vmem %s1417_s1, %s1200_s22  ;;  %s391_s28 = scalar_lea.vmem %s1418_s2, %s1200_s22 }
   0xf   : > { %v603_v4 = vunpack.c.l.b16 %v593_v2  ;;  %v601_v5 = vsel %vm591_vm3, 65537, %v1147_v1  ;;  %v1082_v10 = vld [vmem:[%s376_s25 + $0x8] sm:$0xff]  ;;  %v1083_v11 = vld [vmem:[%s376_s25 + $0x10] sm:$0xff]  ;;  %v1084_v12 = vld [vmem:[%s376_s25 + $0x18] sm:$0xff]  ;;  %s359_s6 = scalar_lea.vmem %s1416_s0, %s1200_s22  ;;  %s1389_s17 = scalar_lea.vmem %s1421_s5, %s1200_s22 }
  0x10   : > { %v519_v8 = vadd.s32 64, %v511_v3  ;;  %v611_v9 = vunpack.c.l.b16 %v601_v5  ;;  %v418_v14 = vld [vmem:[%s391_s28] sm:$0xf]  ;;  %v1221_v17 = vadd.s32 4294967291, %v511_v3  ;;  %v461_v18 = vshrl.u32 %v1082_v10, 16  ;;  %vm1257_vm14 = vmand %vm504_vm5, %vm451_vm4 }
  0x11   : > { %v1217_v13 = vunpack.i.l.s16 %v603_v4  ;;  %v464_v19 = vshll.u32 %v1082_v10, 16  ;;  %v470_v20 = vshrl.u32 %v1083_v11, 16  ;;  %v473_v21 = vshll.u32 %v1083_v11, 16  ;;  %v1081_v22 = vld [vmem:[%s376_s25] sm:$0xff]  ;;  %v409_v33 = vld [vmem:[%s359_s6 + $0x1c] sm:$0xf] }
  0x12   : > { %v530_v15 = vadd.s32 4294967291, %v519_v8  ;;  %v1219_v16 = vunpack.i.l.s16 %v611_v9  ;;  %v479_v23 = vshrl.u32 %v1084_v12, 16  ;;  %v482_v24 = vshll.u32 %v1084_v12, 16 }
  0x13   : > { %vm622_vm6 = vcmp.ne.s32.totalorder %v1217_v13, %v1211_v7  ;;  %vm628_vm7 = vcmp.ne.s32.totalorder %v1217_v13, %v1208_v6  ;;  %v463_v25 = vrot.slane %v461_v18, 5  ;;  %v466_v26 = vrot.slane %v464_v19, 6 }
  0x14   : > { %v472_v27 = vrot.slane %v470_v20, 5  ;;  %v475_v28 = vrot.slane %v473_v21, 6  ;;  %v481_v29 = vrot.slane %v479_v23, 5  ;;  %v484_v30 = vrot.slane %v482_v24, 6  ;;  %vm1234_vm8 = vmpackc.low %vm622_vm6, %vm628_vm7 }
  0x15   : > { %v493_v32 = vunpack.c.l.b16 %v418_v14  ;;  %vm550_vm9 = vcmp.lt.s32.totalorder %v530_v15, 64  ;;  %v467_v34 = vor.u32 %v466_v26, %v463_v25  ;;  %vm650_vm11 = vcmp.ne.s32.totalorder %v1219_v16, %v1211_v7 }
  0x16   : > { %v476_v35 = vor.u32 %v475_v28, %v472_v27  ;;  %vm590_vm10 = vmpackc.low %vm550_vm9, %vm550_vm9  ;;  %v453_v36 = vshrl.u32 %v1081_v22, 16  ;;  %v485_v37 = vor.u32 %v484_v30, %v481_v29  ;;  %v456_v40 = vshll.u32 %v1081_v22, 16 }
  0x17   : > { %v494_v38 = vpack.c.b16 %v493_v32, %v493_v32  ;;  %v600_v39 = vsel %vm590_vm10, 65537, %v1147_v1  ;;  %v420_v44 = vunpack.c.l.b16 %v409_v33  ;;  %vm532_vm7 = vcmp.ge.s32.totalorder %v1221_v17, 0 }
  0x18   : > { %v477_v41 = vsel %vm451_vm4, %v467_v34, %v476_v35  ;;  %v610_v42 = vunpack.c.l.b16 %v600_v39  ;;  %v455_v43 = vrot.slane %v453_v36, 5  ;;  %v486_v45 = vsel %vm451_vm4, %v476_v35, %v485_v37  ;;  %vm582_vm10 = vmpackc.low %vm532_vm7, %vm532_vm7 }
  0x19   : > { %v654_v46 = vsel %vm1234_vm8, %v477_v41, 0  ;;  %v496_v47 = vshrl.u32 %v494_v38, 16  ;;  %v499_v48 = vshll.u32 %v494_v38, 16  ;;  %v655_v49 = vsel %vm1234_vm8, %v486_v45, 0 }
  0x1a   : > { %v661_v50 = vunpack.c.l.bf16 %v654_v46  ;;  %v662_v51 = vunpack.c.h.bf16 %v654_v46  ;;  %v1065_v52 = vunpack.i.l.s16 %v610_v42  ;;  %v663_v53 = vunpack.c.l.bf16 %v655_v49 }
  0x1b   : > { %v664_v54 = vunpack.c.h.bf16 %v655_v49  ;;  %v498_v55 = vrot.slane %v496_v47, 5  ;;  %v501_v56 = vrot.slane %v499_v48, 6  ;;  %v458_v10 = vrot.slane %v456_v40, 6 }
  0x1c   : > { %vm1247_vm12 = vcmp.ge.f32.partialorder %v661_v50, 0.0  ;;  %vm1251_vm13 = vcmp.ge.f32.partialorder %v662_v51, 0.0  ;;  %v681_v59 = vmul.f32 0.100097656, %v661_v50  ;;  %v682_v60 = vmul.f32 0.100097656, %v662_v51 }
  0x1d   : > { %vm1261_vm15 = vcmp.ge.f32.partialorder %v663_v53, 0.0  ;;  %vm1265_vm0 = vcmp.ge.f32.partialorder %v664_v54, 0.0  ;;  %v683_v0 = vmul.f32 0.100097656, %v663_v53  ;;  %v684_v2 = vmul.f32 0.100097656, %v664_v54  ;;  %vm699_vm3 = vmpackc.low %vm1251_vm13, %vm1247_vm12 }
  0x1e   : > { %v691_v3 = vpack.c.bf16 %v681_v59, %v681_v59  ;;  %v692_v4 = vpack.c.bf16 %v682_v60, %v682_v60  ;;  %v502_v5 = vor.u32 %v501_v56, %v498_v55  ;;  %vm649_vm1 = vcmp.ne.s32.totalorder %v1065_v52, %v1208_v6 }
  0x1f   : > { %v693_v8 = vpack.c.bf16 %v683_v0, %v683_v0  ;;  %v694_v9 = vpack.c.bf16 %v684_v2, %v684_v2  ;;  %vm651_vm2 = vmpackc.low %vm650_vm11, %vm649_vm1  ;;  %v421_v11 = vpack.c.b16 %v420_v44, %v420_v44  ;;  %vm737_vm9 = vsmask.f32 5376 }
  0x20   : > { %v716_v12 = vunpack.c.l.b16 %v691_v3  ;;  %v717_v14 = vunpack.c.l.b16 %v692_v4  ;;  %v507_v15 = vsel %vm1257_vm14, %v485_v37, %v502_v5  ;;  %v459_v16 = vor.u32 %v458_v10, %v455_v43  ;;  %vm700_vm11 = vmpackc.low %vm1265_vm0, %vm1261_vm15 }
  0x21   : > { %v718_v18 = vunpack.c.l.b16 %v693_v8  ;;  %v719_v19 = vunpack.c.l.b16 %v694_v9  ;;  %v656_v20 = vsel %vm651_vm2, %v507_v15, 0  ;;  %v423_v24 = vshrl.u32 %v421_v11, 16  ;;  %v832_v8 = vld [vmem:[%s1419_s3 + $0x8] sm:$0xf] }
  0x22   : > { %v724_v21 = vpack.c.b16 %v717_v14, %v716_v12  ;;  %v665_v22 = vunpack.c.l.bf16 %v656_v20  ;;  %v666_v23 = vunpack.c.h.bf16 %v656_v20  ;;  %v468_v26 = vsel %vm451_vm4, %v459_v16, %v467_v34 }
  0x23   : > { %v725_v25 = vpack.c.b16 %v719_v19, %v718_v18  ;;  %v426_v27 = vshll.u32 %v421_v11, 16  ;;  %v592_v17 = vsel %vm582_vm10, 65537, %v1147_v1  ;;  %v653_v43 = vsel %vm1234_vm8, %v468_v26, 0 }
  0x24   : > { %v1291_v28 = vsel %vm699_vm3, %v654_v46, %v724_v21  ;;  %vm1293_vm1 = vcmp.ge.f32.partialorder %v665_v22, 0.0  ;;  %vm1297_vm15 = vcmp.ge.f32.partialorder %v666_v23, 0.0  ;;  %v685_v32 = vmul.f32 0.100097656, %v665_v22 }
  0x25   : > { %v1301_v33 = vsel %vm700_vm11, %v655_v49, %v725_v25  ;;  %v798_v1 = vrot.slane %v1291_v28, 5  ;;  %v756_v34 = vshrl.u32 %v1291_v28, 16  ;;  %v759_v35 = vshll.u32 %v1291_v28, 16  ;;  %vm701_vm4 = vmpackc.low %vm1297_vm15, %vm1293_vm1 }
  0x26   : > { %v800_v36 = vrot.slane %v1301_v33, 5  ;;  %v765_v37 = vshrl.u32 %v1301_v33, 16  ;;  %v768_v38 = vshll.u32 %v1301_v33, 16  ;;  %v686_v39 = vmul.f32 0.100097656, %v666_v23 }
  0x27   : > { %v758_v40 = vrot.slane %v756_v34, 2  ;;  %v761_v41 = vrot.slane %v759_v35, 3  ;;  %v695_v42 = vpack.c.bf16 %v685_v32, %v685_v32  ;;  %v659_v50 = vunpack.c.l.bf16 %v653_v43 }
  0x28   : > { %v801_v44 = vsel %vm504_vm5, %v798_v1, %v800_v36  ;;  %v767_v45 = vrot.slane %v765_v37, 2  ;;  %v770_v46 = vrot.slane %v768_v38, 3  ;;  %v696_v47 = vpack.c.bf16 %v686_v39, %v686_v39 }
  0x29   : > { %808 = vrot.lane.b32.xlu1 %v801_v44, %s1149_s7  ;;  %v1315_v48 = vor.u32 %v761_v41, %v758_v40  ;;  %v720_v49 = vunpack.c.l.b16 %v695_v42  ;;  %v660_v51 = vunpack.c.h.bf16 %v653_v43  ;;  %v425_v54 = vrot.slane %v423_v24, 1 }
  0x2a   : > { %v771_v52 = vor.u32 %v770_v46, %v767_v45  ;;  %v721_v53 = vunpack.c.l.b16 %v696_v47  ;;  %v428_v31 = vrot.slane %v426_v27, 2  ;;  %v679_v55 = vmul.f32 0.100097656, %v659_v50 }
  0x2b   : > { %v680_v56 = vmul.f32 0.100097656, %v660_v51  ;;  %v602_v60 = vunpack.c.l.b16 %v592_v17  ;;  %vm1324_vm8 = vcmp.ge.f32.partialorder %v659_v50, 0.0  ;;  %vm1328_vm12 = vcmp.ge.f32.partialorder %v660_v51, 0.0  ;;  %v1085_v51 = vld [vmem:[%s1419_s3] sm:$0xff] }
  0x2c   : > { %v772_v57 = vsel %vm737_vm9, %v1315_v48, %v771_v52  ;;  %v726_v58 = vpack.c.b16 %v721_v53, %v720_v49  ;;  %v429_v59 = vor.u32 %v428_v31, %v425_v54  ;;  %v689_v0 = vpack.c.bf16 %v679_v55, %v679_v55  ;;  %vm698_vm13 = vmpackc.low %vm1328_vm12, %vm1324_vm8 }
  0x2d   : > { %786 = vrot.lane.b32.xlu0 %v772_v57, %s1150_s8  ;;  %v690_v2 = vpack.c.bf16 %v680_v56, %v680_v56  ;;  %v1057_v5 = vunpack.i.l.s16 %v602_v60  ;;  %v842_v15 = vunpack.c.l.b16 %v832_v8  ;;  %vm855_vm2 = vcmask 1043456  }
  0x2e   : > { %v736_v3 = vsel %vm701_vm4, %v656_v20, %v726_v58  ;;  %v506_v4 = vsel %vm1257_vm14, %v429_v59, %v459_v16  ;;  %v714_v12 = vunpack.c.l.b16 %v689_v0  ;;  %vm821_vm10 = vcmask 130048  }
  0x2f   : > { %v802_v9 = vrot.slane %v736_v3, 5  ;;  %v774_v10 = vshrl.u32 %v736_v3, 16  ;;  %v777_v11 = vshll.u32 %v736_v3, 16  ;;  %v715_v14 = vunpack.c.l.b16 %v690_v2 }
  0x30   : > { %vm621_vm0 = vcmp.ne.s32.totalorder %v1057_v5, %v1208_v6  ;;  %v844_v21 = vpack.c.b16 %v842_v15, %v842_v15  ;;  %vm846_vm11 = vcmask 195584  }
  0x31   : > { %v803_v61 = vsel %vm504_vm5, %v800_v36, %v802_v9  ;;  %v776_v18 = vrot.slane %v774_v10, 2  ;;  %v779_v19 = vrot.slane %v777_v11, 3  ;;  %vm623_vm14 = vmpackc.low %vm622_vm6, %vm621_vm0  ;;  %v723_v20 = vpack.c.b16 %v715_v14, %v714_v12 }
  0x32   : > { %810 = vrot.lane.b32.xlu1 %v803_v61, %s1149_s7  ;;  %v652_v16 = vsel %vm623_vm14, %v506_v4, 0  ;;  %v857_v25 = vsel %vm855_vm2, %v844_v21, 0 }
  0x33   : > { %v780_v22 = vor.u32 %v779_v19, %v776_v18  ;;  %v657_v23 = vunpack.c.l.bf16 %v652_v16  ;;  %v658_v24 = vunpack.c.h.bf16 %v652_v16  ;;  %v733_v6 = vsel %vm698_vm13, %v653_v43, %v723_v20  ;;  %1087 = vmatpush.bf16.msra.mxu2 %v857_v25  ;;  %1088 = vmatpush.bf16.msra.mxu3 %v857_v25 }
  0x34   : > { %v796_v7 = vrot.slane %v733_v6, 5  ;;  %1086 = vmatpush.bf16.msra.mxu1 %v857_v25  ;;  %865 = vmatpush.bf16.msra.mxu0 %v857_v25  ;;  %v747_v32 = vshrl.u32 %v733_v6, 16  ;;  %v750_v34 = vshll.u32 %v733_v6, 16 }
  0x35   : > { %v781_v26 = vsel %vm737_vm9, %v771_v52, %v780_v22  ;;  %v677_v13 = vmul.f32 0.100097656, %v657_v23  ;;  %v678_v27 = vmul.f32 0.100097656, %v658_v24  ;;  %vm667_vm6 = vcmp.ge.f32.partialorder %v657_v23, 0.0 }
  0x36   : > { %788 = vrot.lane.b32.xlu0 %v781_v26, %s1150_s8  ;;  %v799_v17 = vsel %vm504_vm5, %v796_v7, %v798_v1  ;;  %vm668_vm3 = vcmp.ge.f32.partialorder %v658_v24, 0.0  ;;  %v749_v38 = vrot.slane %v747_v32, 2  ;;  %v752_v39 = vrot.slane %v750_v34, 3 }
  0x37   : > { %v687_v29 = vpack.c.bf16 %v677_v13, %v677_v13  ;;  %v688_v30 = vpack.c.bf16 %v678_v27, %v678_v27  ;;  %vm697_vm7 = vmpackc.low %vm668_vm3, %vm667_vm6  ;;  %1090 = vmatpush.bf16.msra.mxu2 %v1085_v51  ;;  %1091 = vmatpush.bf16.msra.mxu3 %v1085_v51 }
  0x38   : > { %v753_v46 = vor.u32 %v752_v39, %v749_v38  ;;  %1089 = vmatpush.bf16.msra.mxu1 %v1085_v51  ;;  %866 = vmatpush.bf16.msra.mxu0 %v1085_v51 }
  0x39   : > { %v712_v35 = vunpack.c.l.b16 %v687_v29  ;;  %v713_v36 = vunpack.c.l.b16 %v688_v30 }
  0x3a   : > { %806 = vrot.lane.b32.xlu1 %v799_v17, %s1149_s7  ;;  %v763_v50 = vsel %vm737_vm9, %v753_v46, %v1315_v48 }
  0x3b   : > { %v722_v37 = vpack.c.b16 %v713_v36, %v712_v35 }
  0x3d   : > { %v732_v40 = vsel %vm697_vm7, %v652_v16, %v722_v37 }
  0x3e   : > { %v795_v41 = vrot.slane %v732_v40, 5  ;;  %v739_v42 = vshrl.u32 %v732_v40, 16  ;;  %v742_v43 = vshll.u32 %v732_v40, 16 }
  0x40   : > { %v797_v1 = vsel %vm504_vm5, %v795_v41, %v796_v7  ;;  %v741_v44 = vrot.slane %v739_v42, 2  ;;  %v744_v45 = vrot.slane %v742_v43, 3  ;;  %vm812_vm5 = vcmask 64512  }
  0x41   : > { %804 = vrot.lane.b32.xlu0 %v797_v1, %s1149_s7 }
  0x42   : > { %v745_v47 = vor.u32 %v744_v45, %v741_v44 }
  0x44   : > { %v754_v49 = vsel %vm737_vm9, %v745_v47, %v753_v46  ;;  %vm896_vm9 = vcmask 60416  }
  0x45   : > { %782 = vrot.lane.b32.xlu2 %v754_v49, %s1150_s8 }
  0x4d   : > { %784 = vrot.lane.b32.xlu2 %v763_v50, %s1150_s8 }
  0x9b   : > { %v809_v52 = vpop.permute.xlu1 %808 }
  0x9f   : > { %v787_v53 = vpop.permute.xlu0 %786  ;;  %v783_v31 = vpop.permute.xlu2 %782 }
  0xa0   : > { %v818_v54 = vsel %vm812_vm5, %v1291_v28, %v787_v53  ;;  %v814_v63 = vsel %vm812_vm5, %v732_v40, %v783_v31 }
  0xa1   : > { %v827_v48 = vsel %vm821_vm10, %v818_v54, %v809_v52 }
  0xa2   : > { %1073 = vmatmul.msk.bf16.vlgmr.msra.gmra.mxu2 %vm846_vm11, %v827_v48 }
  0xa4   : > { %v811_v55 = vpop.permute.xlu1 %810 }
  0xa7   : > { %v785_v57 = vpop.permute.xlu2 %784 }
  0xa8   : > { %v789_v56 = vpop.permute.xlu0 %788  ;;  %v816_v60 = vsel %vm812_vm5, %v733_v6, %v785_v57 }
  0xa9   : > { %v820_v58 = vsel %vm812_vm5, %v1301_v33, %v789_v56  ;;  %v1121_v33 = vld [vmem:[%s1420_s4] ss:$0 sm:$0xff] }
  0xaa   : > { %v829_v59 = vsel %vm821_vm10, %v820_v58, %v811_v55 }
  0xab   : > { %1074 = vmatmul.msk.bf16.vlgmr.msra.gmra.mxu3 %vm846_vm11, %v829_v59 }
  0xac   : > { %v807_v62 = vpop.permute.xlu1 %806 }
  0xad   : > { %v825_v28 = vsel %vm821_vm10, %v816_v60, %v807_v62 }
  0xae   : > { %1072 = vmatmul.msk.bf16.vlgmr.msra.gmra.mxu1 %vm846_vm11, %v825_v28 }
  0xb3   : > { %v805_v0 = vpop.permute.xlu0 %804 }
  0xb4   : > { %v823_v2 = vsel %vm821_vm10, %v814_v63, %v805_v0 }
  0xb5   : > { %1071 = vmatmul.msk.bf16.vlgmr.msra.gmra.mxu0 %vm846_vm11, %v823_v2 }
 0x125   : > { %v878_v3 = vpop.f32.mrf.mxu2 }
 0x126   : > { %v879_v4 = vadd.f32 %v1121_v33, %v878_v3 }
 0x128   : > { %v892_v5 = vpack.c.bf16 %v879_v4, %v879_v4 }
 0x12a   : > { %901 = vst.msk [vmem:[%s1389_s17 + $0x10] sm:$0xf] %vm896_vm9, %v892_v5 }
 0x12b   : > { %v873_v8 = vpop.f32.mrf.mxu1 }
 0x12c   : > { %v874_v9 = vadd.f32 %v1121_v33, %v873_v8 }
 0x12d   : > { %v880_v10 = vpop.f32.mrf.mxu2 }
 0x12e   : > { %v890_v11 = vpack.c.bf16 %v874_v9, %v874_v9  ;;  %v881_v12 = vadd.f32 %v1121_v33, %v880_v10  ;;  %v883_v14 = vpop.f32.mrf.mxu3 }
 0x12f   : > { %v884_v15 = vadd.f32 %v1121_v33, %v883_v14 }
 0x130   : > { %899 = vst.msk [vmem:[%s1389_s17 + $0x8] sm:$0xf] %vm896_vm9, %v890_v11  ;;  %v893_v61 = vpack.c.bf16 %v881_v12, %v881_v12 }
 0x131   : > { %v894_v18 = vpack.c.bf16 %v884_v15, %v884_v15 }
 0x132   : > { %902 = vst.msk [vmem:[%s1389_s17 + $0x14] sm:$0xf] %vm896_vm9, %v893_v61  ;;  %v868_v19 = vpop.f32.mrf.mxu0 }
 0x133   : > { %903 = vst.msk [vmem:[%s1389_s17 + $0x18] sm:$0xf] %vm896_vm9, %v894_v18  ;;  %v875_v20 = vpop.f32.mrf.mxu1  ;;  %v869_v16 = vadd.f32 %v1121_v33, %v868_v19 }
 0x134   : > { %v876_v21 = vadd.f32 %v1121_v33, %v875_v20 }
 0x135   : > { %v888_v22 = vpack.c.bf16 %v869_v16, %v869_v16 }
 0x136   : > { %v891_v23 = vpack.c.bf16 %v876_v21, %v876_v21  ;;  %v885_v24 = vpop.f32.mrf.mxu3 }
 0x137   : > { %v886_v6 = vadd.f32 %v1121_v33, %v885_v24  ;;  %897 = vst.msk [vmem:[%s1389_s17] sm:$0xf] %vm896_vm9, %v888_v22 }
 0x138   : > { %900 = vst.msk [vmem:[%s1389_s17 + $0xc] sm:$0xf] %vm896_vm9, %v891_v23 }
 0x139   : > { %v895_v25 = vpack.c.bf16 %v886_v6, %v886_v6 }
 0x13a   : > { %v870_v26 = vpop.f32.mrf.mxu0 }
 0x13b   : > { %904 = vst.msk [vmem:[%s1389_s17 + $0x1c] sm:$0xf] %vm896_vm9, %v895_v25  ;;  %v871_v7 = vadd.f32 %v1121_v33, %v870_v26 }
 0x13d   : > { %v889_v13 = vpack.c.bf16 %v871_v7, %v871_v7 }
 0x13f   : > { %898 = vst.msk [vmem:[%s1389_s17 + $0x4] sm:$0xf] %vm896_vm9, %v889_v13 }
 0x140 PF: > { %s15_s20 = sadd.s32 1, %s1144_s20   ;;  %s1442_s18 = smov %s1140_s19 }
 0x141   : > { %p12_p5 = scmp.ge.s32.totalorder %s15_s20, 4   ;;  %s1443_s19 = smov %s1445_s21 }
 0x143   :  { %14 = sbr.rel (!%p12_p5) target bundleno = 2 (0x2), region = 76 }

// kernel: generator_forward.31
= control target key start
LH: loop header
LB: loop body
LE: loop exit
PB: predicated region body
PF: predicated region fallthrough
CT: control target
= control target key end

     0   :  { %s1355_s20 = smov 0   ;;  %s1357_s21 = smov 0   ;;  %s1721_s0 = inlined_call_operand.vmem [shape: bf16[2,64,8], index: 0, kind: input, shape index: {}, may-alias: {0,1,2}]   ;;  %s1722_s1 = inlined_call_operand.vmem [shape: bf16[2,64,8], index: 1, kind: input, shape index: {}, may-alias: {0,1,2}]   ;;  %s1723_s2 = inlined_call_operand.vmem [shape: bf16[2,64,8], index: 2, kind: input, shape index: {}, may-alias: {0,1,2}]   ;;  %s1724_s3 = inlined_call_operand.vmem [shape: bf16[56,1], index: 3, kind: input, shape index: {}]   ;;  %s1725_s4 = inlined_call_operand.<no memory space> [shape: f32[1,1], index: 4, kind: input, shape index: {}]   ;;  %s1726_s5 = inlined_call_operand.vmem [shape: bf16[2,64,1], index: 5, kind: output, shape index: {}]  }
   0x1   :  { %v10_v0 = vstv %s1725_s4  ;;  %s1359_s22 = smov 0  }
   0x2   :  { %11 = vst [vmem:[#allocation2] sm:$0x1] %v10_v0 }
   0x3 LB: > { %s29_s4 = sadd.s32 1, %s1308_s21  ;;  %p1165_p0 = scmp.ge.s32.totalorder %s1312_s22, 1  ;;  %s1312_s22 = sphi %s1359_s22, %s17_s22   ;;  %s1308_s21 = sphi %s1357_s21, %s1754_s21   ;;  %s1304_s20 = sphi %s1355_s20, %s1753_s20  }
   0x4   : > { %p31_p1 = scmp.ge.s32.totalorder %s29_s4, 2  ;;  %p284_p2 = scmp.lt.s32.totalorder %s1312_s22, 3 }
   0x6   : > { %s1756_s4 = smov (%p31_p1, %s29_s4), 0  ;;  %p285_p3 = pnand %p1165_p0, %p284_p2 }
   0x7   : > { %p354_p4 = scmp.lt.s32.totalorder (!%p285_p3), %s1304_s20, 1  ;;  %s1316_s8 = smov (!%p285_p3), 32  }
   0x8   : > { %288 = sbr.rel (%p285_p3) target bundleno = 360 (0x168), region = 40  ;;  %s1317_s9 = smov (!%p285_p3), 16  }
   0x9   : > { %s1318_s10 = smov (!%p285_p3), 48   ;;  %s1319_s11 = smov (!%p285_p3), 8  }
   0xa   : > { %s1320_s12 = smov (!%p285_p3), 40   ;;  %s1321_s13 = smov (!%p285_p3), 24  }
   0xd   : > { %vm1314_vm0 = vmmov 1   ;;  %s1758_s20 = smov (!%p354_p4, %s1304_s20), 1  ;;  %v1315_v1 = vmov 0   ;;  %v512_v3 = vlaneseq  ;;  %vm1728_vm2 = vsmask.f32 1280 }
   0xe   : > { %vm578_vm1 = vmpackc.low %vm1314_vm0, %vm1314_vm0  ;;  %v1375_v5 = vunpack.c.l.b16 %v1315_v1  ;;  %v1378_v6 = vunpack.c.h.b16 %v1315_v1  ;;  %s1380_s23 = sshll.u32 %s1758_s20, 5  ;;  %vm506_vm7 = vcmask 1041408  }
   0xf   : > { %v587_v2 = vsel %vm578_vm1, 65537, %v1315_v1  ;;  %v513_v7 = vshrl.u32 %v512_v3, 7  ;;  %s378_s26 = scalar_lea.vmem %s1722_s1, %s1380_s23  ;;  %s393_s29 = scalar_lea.vmem %s1723_s2, %s1380_s23  ;;  %vm1425_vm9 = vmand %vm506_vm7, %vm1728_vm2  ;;  %vm821_vm7 = vcmask 1045504  }
  0x10   : > { %v596_v4 = vunpack.c.l.b16 %v587_v2  ;;  %v1223_v9 = vld [vmem:[%s378_s26 + $0x8] sm:$0xff]  ;;  %v1224_v10 = vld [vmem:[%s378_s26 + $0x10] sm:$0xff]  ;;  %v1225_v11 = vld [vmem:[%s378_s26 + $0x18] sm:$0xff]  ;;  %s361_s7 = scalar_lea.vmem %s1721_s0, %s1380_s23  ;;  %s1694_s27 = scalar_lea.vmem %s1726_s5, %s1380_s23 }
  0x11   : > { %v521_v12 = vadd.s32 64, %v513_v7  ;;  %v420_v13 = vld [vmem:[%s393_s29] sm:$0xf]  ;;  %v463_v14 = vshrl.u32 %v1223_v9, 16  ;;  %v466_v15 = vshll.u32 %v1223_v9, 16  ;;  %v472_v16 = vshrl.u32 %v1224_v10, 16 }
  0x12   : > { %v1386_v8 = vunpack.i.l.s16 %v596_v4  ;;  %v475_v17 = vshll.u32 %v1224_v10, 16  ;;  %v481_v18 = vshrl.u32 %v1225_v11, 16  ;;  %v484_v19 = vshll.u32 %v1225_v11, 16  ;;  %v411_v22 = vld [vmem:[%s361_s7 + $0x1c] sm:$0xf]  ;;  %v1400_v27 = vld [vmem:[%s378_s26] sm:$0xff] }
  0x13   : > { %v495_v20 = vunpack.c.l.b16 %v420_v13  ;;  %v531_v21 = vadd.s32 4294967293, %v521_v12  ;;  %v465_v23 = vrot.slane %v463_v14, 6  ;;  %v468_v24 = vrot.slane %v466_v15, 7 }
  0x14   : > { %vm1727_vm3 = vcmp.ne.s32.totalorder %v1386_v8, %v1378_v6  ;;  %vm620_vm4 = vcmp.ne.s32.totalorder %v1386_v8, %v1375_v5  ;;  %v474_v25 = vrot.slane %v472_v16, 6  ;;  %v477_v26 = vrot.slane %v475_v17, 7 }
  0x15   : > { %v483_v28 = vrot.slane %v481_v18, 6  ;;  %v486_v29 = vrot.slane %v484_v19, 7  ;;  %vm1408_vm5 = vmpackc.low %vm1727_vm3, %vm620_vm4  ;;  %v496_v31 = vpack.c.b16 %v495_v20, %v495_v20  ;;  %vm549_vm6 = vcmp.lt.s32.totalorder %v531_v21, 64 }
  0x16   : > { %v1412_v32 = vor.u32 %v468_v24, %v465_v23  ;;  %v478_v33 = vor.u32 %v477_v26, %v474_v25  ;;  %vm585_vm8 = vmpackc.low %vm549_vm6, %vm549_vm6  ;;  %v422_v34 = vunpack.c.l.b16 %v411_v22  ;;  %v455_v41 = vshrl.u32 %v1400_v27, 16 }
  0x17   : > { %v487_v35 = vor.u32 %v486_v29, %v483_v28  ;;  %v498_v36 = vshrl.u32 %v496_v31, 16  ;;  %v501_v37 = vshll.u32 %v496_v31, 16  ;;  %v594_v38 = vsel %vm585_vm8, 65537, %v1315_v1 }
  0x18   : > { %v479_v39 = vsel %vm1728_vm2, %v1412_v32, %v478_v33  ;;  %v603_v40 = vunpack.c.l.b16 %v594_v38  ;;  %v523_v42 = vadd.s32 4294967293, %v513_v7  ;;  %v423_v55 = vpack.c.b16 %v422_v34, %v422_v34 }
  0x19   : > { %v488_v43 = vsel %vm1728_vm2, %v478_v33, %v487_v35  ;;  %v646_v44 = vsel %vm1408_vm5, %v479_v39, 0  ;;  %v500_v45 = vrot.slane %v498_v36, 6  ;;  %v503_v46 = vrot.slane %v501_v37, 7 }
  0x1a   : > { %v647_v47 = vsel %vm1408_vm5, %v488_v43, 0  ;;  %v653_v48 = vunpack.c.l.bf16 %v646_v44  ;;  %v654_v49 = vunpack.c.h.bf16 %v646_v44  ;;  %v1198_v50 = vunpack.i.l.s16 %v603_v40 }
  0x1b   : > { %v655_v51 = vunpack.c.l.bf16 %v647_v47  ;;  %v656_v52 = vunpack.c.h.bf16 %v647_v47  ;;  %v504_v53 = vor.u32 %v503_v46, %v500_v45  ;;  %v425_v9 = vshrl.u32 %v423_v55, 16 }
  0x1c   : > { %vm1429_vm10 = vcmp.ge.f32.partialorder %v653_v48, 0.0  ;;  %vm1433_vm11 = vcmp.ge.f32.partialorder %v654_v49, 0.0  ;;  %v671_v58 = vmul.f32 0.010009766, %v653_v48  ;;  %v672_v59 = vmul.f32 0.010009766, %v654_v49 }
  0x1d   : > { %vm1437_vm12 = vcmp.ge.f32.partialorder %v655_v51, 0.0  ;;  %vm1441_vm13 = vcmp.ge.f32.partialorder %v656_v52, 0.0  ;;  %v673_v62 = vmul.f32 0.010009766, %v655_v51  ;;  %v674_v63 = vmul.f32 0.010009766, %v656_v52  ;;  %vm687_vm15 = vmpackc.low %vm1433_vm11, %vm1429_vm10 }
  0x1e   : > { %v680_v0 = vpack.c.bf16 %v671_v58, %v671_v58  ;;  %v681_v2 = vpack.c.bf16 %v672_v59, %v672_v59  ;;  %v509_v3 = vsel %vm1425_vm9, %v487_v35, %v504_v53  ;;  %vm641_vm14 = vcmp.ne.s32.totalorder %v1198_v50, %v1375_v5  ;;  %vm688_vm4 = vmpackc.low %vm1441_vm13, %vm1437_vm12 }
  0x1f   : > { %v682_v4 = vpack.c.bf16 %v673_v62, %v673_v62  ;;  %v683_v7 = vpack.c.bf16 %v674_v63, %v674_v63  ;;  %vm642_vm0 = vcmp.ne.s32.totalorder %v1198_v50, %v1378_v6  ;;  %v428_v12 = vshll.u32 %v423_v55, 16 }
  0x20   : > { %v703_v10 = vunpack.c.l.b16 %v680_v0  ;;  %v704_v11 = vunpack.c.l.b16 %v681_v2  ;;  %vm643_vm1 = vmpackc.low %vm642_vm0, %vm641_vm14  ;;  %v458_v13 = vshll.u32 %v1400_v27, 16  ;;  %vm532_vm6 = vcmp.ge.s32.totalorder %v523_v42, 0 }
  0x21   : > { %v705_v14 = vunpack.c.l.b16 %v682_v4  ;;  %v706_v15 = vunpack.c.l.b16 %v683_v7  ;;  %v648_v16 = vsel %vm643_vm1, %v509_v3, 0  ;;  %vm773_vm8 = vcmask 1046528   ;;  %vm577_vm3 = vmpackc.low %vm532_vm6, %vm532_vm6 }
  0x22   : > { %v710_v17 = vpack.c.b16 %v704_v11, %v703_v10  ;;  %v657_v18 = vunpack.c.l.bf16 %v648_v16  ;;  %vm867_vm2 = vcmask 1044480   ;;  %v427_v20 = vrot.slane %v425_v9, 2 }
  0x23   : > { %v711_v19 = vpack.c.b16 %v706_v15, %v705_v14  ;;  %v457_v21 = vrot.slane %v455_v41, 6  ;;  %v430_v24 = vrot.slane %v428_v12, 3  ;;  %v460_v25 = vrot.slane %v458_v13, 7 }
  0x24   : > { %v1463_v22 = vsel %vm687_vm15, %v646_v44, %v710_v17  ;;  %v675_v23 = vmul.f32 0.010009766, %v657_v18  ;;  %v586_v29 = vsel %vm577_vm3, 65537, %v1315_v1  ;;  %vm1480_vm10 = vcmp.ge.f32.partialorder %v657_v18, 0.0 }
  0x25   : > { %v1470_v26 = vsel %vm688_vm4, %v647_v47, %v711_v19  ;;  %v825_v27 = vrot.slane %v1463_v22, 2  ;;  %v777_v28 = vrot.slane %v1463_v22, 1  ;;  %v1478_v34 = vshll.u32 %v1463_v22, 16  ;;  %vm689_vm3 = vmpackc.low %vm1480_vm10, %vm1480_vm10 }
  0x26   : > { %v827_v31 = vrot.slane %v1470_v26, 2  ;;  %v779_v33 = vrot.slane %v1470_v26, 1  ;;  %v871_v36 = vrot.slane %v1463_v22, 3  ;;  %v1486_v37 = vshrl.u32 %v1463_v22, 16 }
  0x27   : > { %v1489_v38 = vshll.u32 %v1470_v26, 16  ;;  %v684_v1 = vpack.c.bf16 %v675_v23, %v675_v23  ;;  %v873_v41 = vrot.slane %v1470_v26, 3  ;;  %v742_v42 = vrot.slane %v1478_v34, 1 }
  0x28   : > { %v828_v39 = vsel %vm821_vm7, %v825_v27, %v827_v31  ;;  %v780_v40 = vsel %vm773_vm8, %v777_v28, %v779_v33  ;;  %v431_v44 = vor.u32 %v430_v24, %v427_v20  ;;  %v461_v45 = vor.u32 %v460_v25, %v457_v21 }
  0x29   : > { %835 = vrot.lane.b32.xlu0 %v828_v39, %s1316_s8  ;;  %787 = vrot.lane.b32.xlu1 %v780_v40, %s1317_s9  ;;  %v707_v43 = vunpack.c.l.b16 %v684_v1  ;;  %v595_v46 = vunpack.c.l.b16 %v586_v29  ;;  %v746_v47 = vor.u32 %v1486_v37, %v742_v42  ;;  %v750_v48 = vrot.slane %v1489_v38, 1 }
  0x2a   : > { %vm723_vm11 = vsmask.f32 7424  ;;  %vm1743_vm12 = vsmask.f32 1280  ;;  %v874_v51 = vsel %vm867_vm2, %v871_v36, %v873_v41  ;;  %v1518_v52 = vshrl.u32 %v1470_v26, 16 }
  0x2b   : > { %v712_v49 = vpack.c.b16 %v707_v43, %v707_v43  ;;  %v470_v50 = vsel %vm1743_vm12, %v461_v45, %v1412_v32  ;;  %v1190_v53 = vunpack.i.l.s16 %v595_v46  ;;  %v508_v57 = vsel %vm1425_vm9, %v431_v44, %v461_v45 }
  0x2c   : > { %v645_v55 = vsel %vm1408_vm5, %v470_v50, 0  ;;  %v751_v32 = vsel %vm723_vm11, %v746_v47, %v750_v48  ;;  %vm1744_vm14 = vcmp.ne.s32.totalorder %v1386_v8, %v1378_v6  ;;  %v754_v0 = vor.u32 %v1518_v52, %v750_v48 }
  0x2d   : > { %v1522_v56 = vsel %vm689_vm3, %v648_v16, %v712_v49  ;;  %v651_v58 = vunpack.c.l.bf16 %v645_v55  ;;  %v652_v59 = vunpack.c.h.bf16 %v645_v55  ;;  %vm613_vm13 = vcmp.ne.s32.totalorder %v1190_v53, %v1375_v5 }
  0x2e   : > { %v875_v60 = vrot.slane %v1522_v56, 3  ;;  %v1529_v61 = vshll.u32 %v1522_v56, 16  ;;  %vm615_vm5 = vmpackc.low %vm1744_vm14, %vm613_vm13  ;;  %v781_v63 = vrot.slane %v1522_v56, 1  ;;  %v807_v10 = vshrl.u32 %v1522_v56, 16 }
  0x2f   : > { %v669_v30 = vmul.f32 0.010009766, %v651_v58  ;;  %v670_v62 = vmul.f32 0.010009766, %v652_v59  ;;  %v644_v2 = vsel %vm615_vm5, %v508_v57, 0  ;;  %vm1542_vm9 = vcmp.ge.f32.partialorder %v651_v58, 0.0 }
  0x30   : > { %v876_v54 = vsel %vm867_vm2, %v873_v41, %v875_v60  ;;  %v649_v5 = vunpack.c.l.bf16 %v644_v2  ;;  %v650_v3 = vunpack.c.h.bf16 %v644_v2  ;;  %v758_v8 = vrot.slane %v1529_v61, 1 }
  0x31   : > { %881 = vrot.lane.b32.xlu1 %v874_v51, %s1318_s10  ;;  %764 = vrot.lane.b32.xlu0 %v751_v32, %s1319_s11  ;;  %v678_v4 = vpack.c.bf16 %v669_v30, %v669_v30  ;;  %v679_v6 = vpack.c.bf16 %v670_v62, %v670_v62  ;;  %vm1546_vm15 = vcmp.ge.f32.partialorder %v652_v59, 0.0  ;;  %v851_v13 = vrot.slane %v1518_v52, 2 }
  0x32   : > { %883 = vrot.lane.b32.xlu2 %v876_v54, %s1318_s10  ;;  %v667_v11 = vmul.f32 0.010009766, %v649_v5  ;;  %v668_v12 = vmul.f32 0.010009766, %v650_v3  ;;  %v852_v14 = vrot.slane %v1489_v38, 3  ;;  %vm1553_vm0 = vcmp.ge.f32.partialorder %v649_v5, 0.0  ;;  %vm686_vm4 = vmpackc.low %vm1546_vm15, %vm1542_vm9 }
  0x33   : > { %v701_v16 = vunpack.c.l.b16 %v678_v4  ;;  %v702_v17 = vunpack.c.l.b16 %v679_v6  ;;  %v856_v18 = vrot.slane %v1529_v61, 3  ;;  %vm1558_vm1 = vcmp.ge.f32.partialorder %v650_v3, 0.0 }
  0x34   : > { %v676_v20 = vpack.c.bf16 %v667_v11, %v667_v11  ;;  %v677_v21 = vpack.c.bf16 %v668_v12, %v668_v12  ;;  %v855_v23 = vrot.slane %v807_v10, 2  ;;  %v782_v24 = vsel %vm773_vm8, %v779_v33, %v781_v63  ;;  %vm685_vm6 = vmpackc.low %vm1558_vm1, %vm1553_vm0 }
  0x35   : > { %v759_v25 = vsel %vm723_vm11, %v754_v0, %v758_v8  ;;  %v709_v29 = vpack.c.b16 %v702_v17, %v701_v16  ;;  %v829_v41 = vrot.slane %v1522_v56, 2  ;;  %v853_v33 = vor.u32 %v852_v14, %v851_v13 }
  0x36   : > { %v699_v35 = vunpack.c.l.b16 %v676_v20  ;;  %v700_v1 = vunpack.c.l.b16 %v677_v21  ;;  %v857_v43 = vor.u32 %v856_v18, %v855_v23  ;;  %vm839_vm10 = vsmask.f32 5376 }
  0x37   : > { %v1576_v39 = vsel %vm686_vm4, %v645_v55, %v709_v29  ;;  %v799_v47 = vrot.slane %v1486_v37, 1  ;;  %v800_v48 = vrot.slane %v1478_v34, 2  ;;  %v803_v50 = vrot.slane %v1518_v52, 1 }
  0x38   : > { %v708_v40 = vpack.c.b16 %v700_v1, %v699_v35  ;;  %v775_v44 = vrot.slane %v1576_v39, 1  ;;  %v732_v45 = vshll.u32 %v1576_v39, 16  ;;  %v804_v51 = vrot.slane %v1489_v38, 2 }
  0x39   : > { %789 = vrot.lane.b32.xlu1 %v782_v24, %s1317_s9  ;;  %766 = vrot.lane.b32.xlu0 %v759_v25, %s1319_s11  ;;  %v830_v55 = vsel %vm821_vm7, %v827_v31, %v829_v41  ;;  %v858_v57 = vsel %vm839_vm10, %v853_v33, %v857_v43  ;;  %v736_v58 = vshrl.u32 %v1576_v39, 16  ;;  %v801_v52 = vor.u32 %v800_v48, %v799_v47 }
  0x3a   : > { %v1583_v46 = vsel %vm685_vm6, %v644_v2, %v708_v40  ;;  %v734_v32 = vrot.slane %v732_v45, 1  ;;  %v805_v38 = vor.u32 %v804_v51, %v803_v50  ;;  %vm791_vm3 = vsmask.f32 6400  ;;  %v945_v40 = vld [vmem:[%s1724_s3 + $0x18] sm:$0xf] }
  0x3b   : > { %v774_v49 = vrot.slane %v1583_v46, 1  ;;  %v727_v53 = vshll.u32 %v1583_v46, 16  ;;  %v725_v60 = vshrl.u32 %v1583_v46, 16  ;;  %v847_v63 = vrot.slane %v1486_v37, 2 }
  0x3c   : > { %v738_v31 = vor.u32 %v736_v58, %v734_v32  ;;  %v806_v54 = vsel %vm791_vm3, %v801_v52, %v805_v38  ;;  %v848_v0 = vrot.slane %v1478_v34, 3  ;;  %v795_v2 = vrot.slane %v736_v58, 1 }
  0x3d   : > { %v776_v59 = vsel %vm773_vm8, %v774_v49, %v775_v44  ;;  %v729_v30 = vrot.slane %v727_v53, 1  ;;  %v796_v5 = vrot.slane %v732_v45, 2  ;;  %v792_v6 = vrot.slane %v725_v60, 1 }
  0x3e   : > { %783 = vrot.lane.b32.xlu2 %v776_v59, %s1317_s9  ;;  %v743_v3 = vsel %vm723_vm11, %v738_v31, %v742_v42  ;;  %v793_v8 = vrot.slane %v727_v53, 2  ;;  %v849_v7 = vor.u32 %v848_v0, %v847_v63  ;;  %v809_v34 = vrot.slane %v807_v10, 1 }
  0x3f   : > { %v730_v62 = vor.u32 %v729_v30, %v725_v60  ;;  %v797_v9 = vor.u32 %v796_v5, %v795_v2  ;;  %v810_v42 = vrot.slane %v1529_v61, 2  ;;  %v778_v13 = vsel %vm773_vm8, %v775_v44, %v777_v28  ;;  %v1228_v44 = vld [vmem:[%s1724_s3 + $0x10] sm:$0xff] }
  0x40   : > { %v794_v37 = vor.u32 %v793_v8, %v792_v6  ;;  %v854_v11 = vsel %vm839_vm10, %v849_v7, %v853_v33  ;;  %v823_v15 = vrot.slane %v1576_v39, 2  ;;  %v822_v56 = vrot.slane %v1583_v46, 2 }
  0x41   : > { %837 = vrot.lane.b32.xlu1 %v830_v55, %s1316_s8  ;;  %865 = vrot.lane.b32.xlu0 %v858_v57, %s1320_s12  ;;  %v735_v4 = vsel %vm723_vm11, %v730_v62, %v734_v32  ;;  %v811_v14 = vor.u32 %v810_v42, %v809_v34  ;;  %v843_v28 = vrot.slane %v736_v58, 2  ;;  %v844_v17 = vrot.slane %v732_v45, 3  ;;  %v1226_v45 = vld [vmem:[%s1724_s3] sm:$0xff] }
  0x42   : > { %v798_v12 = vsel %vm791_vm3, %v794_v37, %v797_v9  ;;  %v826_v61 = vsel %vm821_vm7, %v823_v15, %v825_v27  ;;  %v824_v16 = vsel %vm821_vm7, %v822_v56, %v823_v15  ;;  %v868_v18 = vrot.slane %v1583_v46, 3 }
  0x43   : > { %v812_v10 = vsel %vm791_vm3, %v805_v38, %v811_v14  ;;  %v869_v19 = vrot.slane %v1576_v39, 3  ;;  %v845_v20 = vor.u32 %v844_v17, %v843_v28  ;;  %v802_v21 = vsel %vm791_vm3, %v797_v9, %v801_v52 }
  0x44   : > { %v840_v23 = vrot.slane %v725_v60, 2  ;;  %v841_v24 = vrot.slane %v727_v53, 3  ;;  %v963_v41 = vunpack.c.l.b16 %v945_v40  ;;  %vm980_vm7 = vcmask 1043456  }
  0x45   : > { %v870_v27 = vsel %vm867_vm2, %v868_v18, %v869_v19  ;;  %v850_v25 = vsel %vm839_vm10, %v845_v20, %v849_v7  ;;  %v872_v1 = vsel %vm867_vm2, %v869_v19, %v871_v36  ;;  %v1227_v36 = vld [vmem:[%s1724_s3 + $0x8] sm:$0xff]  ;;  %vm885_vm2 = vcmask 64512  }
  0x46   : > { %817 = vrot.lane.b32.xlu2 %v806_v54, %s1321_s13  ;;  %v842_v29 = vor.u32 %v841_v24, %v840_v23  ;;  %v967_v33 = vpack.c.b16 %v963_v41, %v963_v41  ;;  %vm894_vm8 = vcmask 130048   ;;  %vm903_vm11 = vcmask 195584  }
  0x47   : > { %vm912_vm12 = vcmask 261120   ;;  %vm921_vm13 = vcmask 326656   ;;  %vm930_vm14 = vcmask 392192   ;;  %vm971_vm5 = vcmask 457728  }
  0x48   : > { %v846_v35 = vsel %vm839_vm10, %v842_v29, %v845_v20  ;;  %v982_v43 = vsel %vm980_vm7, %v967_v33, 0  ;;  %v1273_v20 = vld [vmem:[#allocation2] ss:$0 sm:$0xff]  ;;  %vm1029_vm9 = vcmask 3072  }
  0x49   : > { %762 = vrot.lane.b32.xlu1 %v743_v3, %s1319_s11  ;;  %760 = vrot.lane.b32.xlu0 %v735_v4, %s1319_s11 }
  0x4a   : > { %1230 = vmatpush.bf16.msra.mxu2 %v982_v43  ;;  %1231 = vmatpush.bf16.msra.mxu3 %v982_v43 }
  0x4b   : > { %988 = vmatpush.bf16.msra.mxu0 %v982_v43  ;;  %1229 = vmatpush.bf16.msra.mxu1 %v982_v43 }
  0x4e   : > { %863 = vrot.lane.b32.xlu2 %v854_v11, %s1320_s12  ;;  %1233 = vmatpush.bf16.msra.mxu2 %v1228_v44 }
  0x4f   : > { %1234 = vmatpush.bf16.msra.mxu3 %v1228_v44  ;;  %989 = vmatpush.bf16.msra.mxu0 %v1228_v44 }
  0x50   : > { %1232 = vmatpush.bf16.msra.mxu1 %v1228_v44 }
  0x51   : > { %813 = vrot.lane.b32.xlu1 %v798_v12, %s1321_s13  ;;  %785 = vrot.lane.b32.xlu0 %v778_v13, %s1317_s9 }
  0x52   : > { %1236 = vmatpush.bf16.msra.mxu2 %v1227_v36 }
  0x53   : > { %1237 = vmatpush.bf16.msra.mxu3 %v1227_v36  ;;  %990 = vmatpush.bf16.msra.mxu0 %v1227_v36 }
  0x54   : > { %1235 = vmatpush.bf16.msra.mxu1 %v1227_v36 }
  0x56   : > { %819 = vrot.lane.b32.xlu2 %v812_v10, %s1321_s13  ;;  %1239 = vmatpush.bf16.msra.mxu2 %v1226_v45 }
  0x57   : > { %1240 = vmatpush.bf16.msra.mxu3 %v1226_v45  ;;  %991 = vmatpush.bf16.msra.mxu0 %v1226_v45 }
  0x58   : > { %1238 = vmatpush.bf16.msra.mxu1 %v1226_v45 }
  0x59   : > { %833 = vrot.lane.b32.xlu1 %v826_v61, %s1316_s8  ;;  %831 = vrot.lane.b32.xlu0 %v824_v16, %s1316_s8 }
  0x5e   : > { %815 = vrot.lane.b32.xlu2 %v802_v21, %s1321_s13 }
  0x61   : > { %877 = vrot.lane.b32.xlu1 %v870_v27, %s1318_s10  ;;  %861 = vrot.lane.b32.xlu0 %v850_v25, %s1320_s12 }
  0x66   : > { %859 = vrot.lane.b32.xlu2 %v846_v35, %s1320_s12 }
  0x6e   : > { %879 = vrot.lane.b32.xlu2 %v872_v1, %s1318_s10 }
  0x8c   : > { %v884_v47 = vpop.permute.xlu2 %883 }
  0x98   : > { %v784_v48 = vpop.permute.xlu2 %783 }
  0x9b   : > { %v836_v49 = vpop.permute.xlu0 %835  ;;  %v788_v50 = vpop.permute.xlu1 %787 }
  0xa0   : > { %v818_v51 = vpop.permute.xlu2 %817 }
  0xa3   : > { %v882_v53 = vpop.permute.xlu1 %881  ;;  %v765_v55 = vpop.permute.xlu0 %764 }
  0xa4   : > { %v891_v57 = vsel %vm885_vm2, %v1463_v22, %v765_v55 }
  0xa5   : > { %v900_v58 = vsel %vm894_vm8, %v891_v57, %v788_v50 }
  0xa6   : > { %v909_v59 = vsel %vm903_vm11, %v900_v58, %v818_v51 }
  0xa7   : > { %v918_v32 = vsel %vm912_vm12, %v909_v59, %v836_v49 }
  0xa8   : > { %v864_v60 = vpop.permute.xlu2 %863 }
  0xa9   : > { %v927_v30 = vsel %vm921_vm13, %v918_v32, %v864_v60 }
  0xaa   : > { %v936_v52 = vsel %vm930_vm14, %v927_v30, %v882_v53 }
  0xab   : > { %v790_v38 = vpop.permute.xlu1 %789  ;;  %v767_v31 = vpop.permute.xlu0 %766  ;;  %1214 = vmatmul.msk.bf16.vlgmr.msra.gmra.mxu2 %vm971_vm5, %v936_v52 }
  0xac   : > { %v893_v22 = vsel %vm885_vm2, %v1470_v26, %v767_v31 }
  0xad   : > { %v902_v62 = vsel %vm894_vm8, %v893_v22, %v790_v38 }
  0xb0   : > { %v820_v54 = vpop.permute.xlu2 %819 }
  0xb1   : > { %v911_v63 = vsel %vm903_vm11, %v902_v62, %v820_v54 }
  0xb3   : > { %v838_v0 = vpop.permute.xlu1 %837  ;;  %v866_v2 = vpop.permute.xlu0 %865 }
  0xb4   : > { %v920_v5 = vsel %vm912_vm12, %v911_v63, %v838_v0 }
  0xb5   : > { %v929_v3 = vsel %vm921_vm13, %v920_v5, %v866_v2 }
  0xb6   : > { %v938_v4 = vsel %vm930_vm14, %v929_v3, %v884_v47 }
  0xb7   : > { %1215 = vmatmul.msk.bf16.vlgmr.msra.gmra.mxu3 %vm971_vm5, %v938_v4 }
  0xb8   : > { %v816_v7 = vpop.permute.xlu2 %815 }
  0xbb   : > { %v763_v6 = vpop.permute.xlu1 %762  ;;  %v761_v8 = vpop.permute.xlu0 %760 }
  0xbc   : > { %v887_v11 = vsel %vm885_vm2, %v1583_v46, %v761_v8  ;;  %v889_v12 = vsel %vm885_vm2, %v1576_v39, %v763_v6 }
  0xbd   : > { %v896_v13 = vsel %vm894_vm8, %v887_v11, %v784_v48 }
  0xc0   : > { %v860_v9 = vpop.permute.xlu2 %859 }
  0xc3   : > { %v814_v37 = vpop.permute.xlu1 %813  ;;  %v786_v26 = vpop.permute.xlu0 %785 }
  0xc4   : > { %v905_v14 = vsel %vm903_vm11, %v896_v13, %v814_v37  ;;  %v898_v15 = vsel %vm894_vm8, %v889_v12, %v786_v26 }
  0xc5   : > { %v907_v10 = vsel %vm903_vm11, %v898_v15, %v816_v7 }
  0xc8   : > { %v880_v61 = vpop.permute.xlu2 %879 }
  0xcb   : > { %v834_v34 = vpop.permute.xlu1 %833  ;;  %v832_v42 = vpop.permute.xlu0 %831 }
  0xcc   : > { %v914_v56 = vsel %vm912_vm12, %v905_v14, %v832_v42  ;;  %v916_v16 = vsel %vm912_vm12, %v907_v10, %v834_v34 }
  0xcd   : > { %v923_v46 = vsel %vm921_vm13, %v914_v56, %v860_v9 }
  0xd3   : > { %v878_v28 = vpop.permute.xlu1 %877  ;;  %v862_v17 = vpop.permute.xlu0 %861 }
  0xd4   : > { %v925_v39 = vsel %vm921_vm13, %v916_v16, %v862_v17  ;;  %v932_v18 = vsel %vm930_vm14, %v923_v46, %v878_v28 }
  0xd5   : > { %1212 = vmatmul.msk.bf16.vlgmr.msra.gmra.mxu0 %vm971_vm5, %v932_v18  ;;  %v934_v19 = vsel %vm930_vm14, %v925_v39, %v880_v61 }
  0xd6   : > { %1213 = vmatmul.msk.bf16.vlgmr.msra.gmra.mxu1 %vm971_vm5, %v934_v19 }
 0x12e   : > { %v1003_v21 = vpop.f32.mrf.mxu2 }
 0x12f   : > { %v1004_v23 = vadd.f32 %v1273_v20, %v1003_v21 }
 0x131   : > { %1274 = vtanh.f32 %v1004_v23 }
 0x136   : > { %v1005_v24 = vpop.f32.mrf.mxu2 }
 0x137   : > { %v1275_v27 = vpop.eup %1274  ;;  %v1006_v25 = vadd.f32 %v1273_v20, %v1005_v24 }
 0x138   : > { %v1025_v29 = vpack.c.bf16 %v1275_v27, %v1275_v27 }
 0x139   : > { %1276 = vtanh.f32 %v1006_v25 }
 0x13a   : > { %v1008_v35 = vpop.f32.mrf.mxu3  ;;  %1034 = vst.msk [vmem:[%s1694_s27 + $0x10] sm:$0xf] %vm1029_vm9, %v1025_v29 }
 0x13b   : > { %v1009_v1 = vadd.f32 %v1273_v20, %v1008_v35 }
 0x13d   : > { %1278 = vtanh.f32 %v1009_v1 }
 0x13f   : > { %v1277_v40 = vpop.eup %1276 }
 0x140   : > { %v1026_v41 = vpack.c.bf16 %v1277_v40, %v1277_v40 }
 0x142   : > { %v1010_v33 = vpop.f32.mrf.mxu3  ;;  %1035 = vst.msk [vmem:[%s1694_s27 + $0x14] sm:$0xf] %vm1029_vm9, %v1026_v41 }
 0x143   : > { %v1279_v43 = vpop.eup %1278  ;;  %v1011_v44 = vadd.f32 %v1273_v20, %v1010_v33 }
 0x144   : > { %v1027_v36 = vpack.c.bf16 %v1279_v43, %v1279_v43 }
 0x145   : > { %1280 = vtanh.f32 %v1011_v44 }
 0x146   : > { %1036 = vst.msk [vmem:[%s1694_s27 + $0x18] sm:$0xf] %vm1029_vm9, %v1027_v36 }
 0x14b   : > { %v1281_v45 = vpop.eup %1280 }
 0x14c   : > { %v1028_v47 = vpack.c.bf16 %v1281_v45, %v1281_v45 }
 0x14e   : > { %1037 = vst.msk [vmem:[%s1694_s27 + $0x1c] sm:$0xf] %vm1029_vm9, %v1028_v47 }
 0x152   : > { %v993_v48 = vpop.f32.mrf.mxu0 }
 0x153   : > { %v994_v49 = vadd.f32 %v1273_v20, %v993_v48  ;;  %v998_v50 = vpop.f32.mrf.mxu1 }
 0x154   : > { %v999_v51 = vadd.f32 %v1273_v20, %v998_v50 }
 0x155   : > { %1282 = vtanh.f32 %v994_v49 }
 0x156   : > { %1284 = vtanh.f32 %v999_v51 }
 0x15a   : > { %v995_v53 = vpop.f32.mrf.mxu0 }
 0x15b   : > { %v1283_v55 = vpop.eup %1282  ;;  %v996_v57 = vadd.f32 %v1273_v20, %v995_v53  ;;  %v1000_v58 = vpop.f32.mrf.mxu1 }
 0x15c   : > { %v1285_v59 = vpop.eup %1284  ;;  %v1021_v32 = vpack.c.bf16 %v1283_v55, %v1283_v55  ;;  %v1001_v60 = vadd.f32 %v1273_v20, %v1000_v58 }
 0x15d   : > { %v1023_v30 = vpack.c.bf16 %v1285_v59, %v1285_v59  ;;  %1286 = vtanh.f32 %v996_v57 }
 0x15e   : > { %1030 = vst.msk [vmem:[%s1694_s27] sm:$0xf] %vm1029_vm9, %v1021_v32  ;;  %1288 = vtanh.f32 %v1001_v60 }
 0x15f   : > { %1032 = vst.msk [vmem:[%s1694_s27 + $0x8] sm:$0xf] %vm1029_vm9, %v1023_v30 }
 0x163   : > { %v1287_v52 = vpop.eup %1286 }
 0x164   : > { %v1289_v38 = vpop.eup %1288  ;;  %v1022_v31 = vpack.c.bf16 %v1287_v52, %v1287_v52 }
 0x165   : > { %v1024_v22 = vpack.c.bf16 %v1289_v38, %v1289_v38 }
 0x166   : > { %1031 = vst.msk [vmem:[%s1694_s27 + $0x4] sm:$0xf] %vm1029_vm9, %v1022_v31 }
 0x167   : > { %1033 = vst.msk [vmem:[%s1694_s27 + $0xc] sm:$0xf] %vm1029_vm9, %v1024_v22 }
 0x168 PF: > { %s17_s22 = sadd.s32 1, %s1312_s22   ;;  %s1753_s20 = smov %s1308_s21 }
 0x169   : > { %p14_p5 = scmp.ge.s32.totalorder %s17_s22, 4   ;;  %s1754_s21 = smov %s1756_s4 }
 0x16b   :  { %16 = sbr.rel (!%p14_p5) target bundleno = 3 (0x3), region = 76 }

</bundles_post_ra>
